<compile_context>
chip_gen: v6e
topology: v6e:2x2x1
jax: 0.10.0
libtpu: 0.0.40
codegen_flags: <defaults>
</compile_context>

<pallas_src>
import jax
import jax.numpy as jnp
from jax.experimental import pallas as pl
from jax.experimental.pallas import tpu as pltpu


LAYER_DIMS = [28 * 28, 512, 256, 128, 64, 32, 10]   # fixed by the PyTorch module
OUT_PAD = 128                                       # lane-dense logits slab (10 -> 128)
TILE_B = 512                                        # batch tile (multiple of 128); sweep 1024


def mnist_mlp_kernel(x_ref,
                     w1_ref, b1_ref, w2_ref, b2_ref, w3_ref, b3_ref,
                     w4_ref, b4_ref, w5_ref, b5_ref, w6_ref, b6_ref,
                     out_ref):
    """Fused 6-layer MLP forward for one (TILE_B, 784) batch tile.

    Weights are bf16 (MXU inputs); accumulation, bias add and ReLU are fp32.
    """

    def layer(h_bf16, w_ref, b_ref, relu):
        acc = jnp.dot(h_bf16, w_ref[...], preferred_element_type=jnp.float32)
        acc = acc + b_ref[...]              # (1, out) fp32 bias broadcasts over batch
        if relu:
            acc = jnp.maximum(acc, 0.0)     # fp32 VPU math (v5e-safe)
        return acc

    h = x_ref[...].astype(jnp.bfloat16)                         # fp32 -> bf16 in-kernel
    h = layer(h, w1_ref, b1_ref, True).astype(jnp.bfloat16)     # layer01 + ReLU
    h = layer(h, w2_ref, b2_ref, True).astype(jnp.bfloat16)     # layer02 + ReLU
    h = layer(h, w3_ref, b3_ref, True).astype(jnp.bfloat16)     # layer03 + ReLU
    h = layer(h, w4_ref, b4_ref, True).astype(jnp.bfloat16)     # layer04 + ReLU
    h = layer(h, w5_ref, b5_ref, True).astype(jnp.bfloat16)     # layer05 + ReLU
    out_ref[...] = layer(h, w6_ref, b6_ref, False)              # layer06 -> fp32 (TILE_B, 128)


def mnist_net_forward(x, params, *, tile_b=TILE_B):
    """x: (B, 784).  params: list of (W, b) with W (in, out), b (1, out), fp32."""
    assert x.ndim == 2 and x.shape[1] == LAYER_DIMS[0], x.shape
    batch = x.shape[0]

    # Cast / pad parameters once in the wrapper (not per grid step).
    flat_params = []
    for i, (w, b) in enumerate(params):
        fan_in, fan_out = LAYER_DIMS[i], LAYER_DIMS[i + 1]
        assert w.shape == (fan_in, fan_out), (i, w.shape)
        assert b.shape == (1, fan_out), (i, b.shape)
        if i == len(params) - 1:                      # lane-dense logits: pad 10 -> 128
            w = jnp.pad(w, ((0, 0), (0, OUT_PAD - fan_out)))
            b = jnp.pad(b, ((0, 0), (0, OUT_PAD - fan_out)))
        flat_params.append(w.astype(jnp.bfloat16))
        flat_params.append(b.astype(jnp.float32))

    grid = (pl.cdiv(batch, tile_b),)                  # ragged last tile is over-covered
    const_map = lambda i: (0, 0)                      # params: same block every step

    # x streams; full 784 last dim (legal: equals the array dim).
    # TODO(synk): on v6e, if xprof shows exposed x DMA, use pipeline_mode=pl.Buffered(3) here.
    in_specs = [pl.BlockSpec((tile_b, LAYER_DIMS[0]), lambda i: (i, 0))]
    # Params are VMEM-resident: single-buffered to avoid wasted second buffers.
    for p in flat_params:
        in_specs.append(pl.BlockSpec(p.shape, const_map, pipeline_mode=pl.Buffered(1)))

    out = pl.pallas_call(
        mnist_mlp_kernel,
        out_shape=jax.ShapeDtypeStruct((batch, OUT_PAD), jnp.float32),
        grid=grid,
        in_specs=in_specs,
        out_specs=pl.BlockSpec((tile_b, OUT_PAD), lambda i: (i, 0)),
        compiler_params=pltpu.CompilerParams(
            dimension_semantics=("parallel",),          # batch tiles independent (v7x 2 TCs)
            vmem_limit_bytes=32 * 1024 * 1024),         # explicit budget, v5e/v7x-safe
    )(x, *flat_params)

    return out[:, :LAYER_DIMS[-1]]                      # drop the zero-padded logit lanes


def init_params(key):
    """Deterministic init mimicking PyTorch's default Linear init
    (uniform in [-1/sqrt(fan_in), 1/sqrt(fan_in)]); W stored as (in, out)."""
    params = []
    for fan_in, fan_out in zip(LAYER_DIMS[:-1], LAYER_DIMS[1:]):
        key, kw, kb = jax.random.split(key, 3)
        bound = 1.0 / jnp.sqrt(float(fan_in))
        w = jax.random.uniform(kw, (fan_in, fan_out), jnp.float32, -bound, bound)
        b = jax.random.uniform(kb, (1, fan_out), jnp.float32, -bound, bound)
        params.append((w, b))
    return params


def reference_forward_f32(x, params):
    """Pure fp32 reference of the module semantics."""
    h = x
    for i, (w, b) in enumerate(params):
        h = h @ w + b
        if i < len(params) - 1:
            h = jnp.maximum(h, 0.0)
    return h


def reference_forward_bf16(x, params):
    """Pure-JAX reference of the kernel's exact precision path
    (bf16 matmul inputs, fp32 accumulation, fp32 bias/ReLU)."""
    h = x.astype(jnp.bfloat16)
    acc = None
    for i, (w, b) in enumerate(params):
        acc = jnp.dot(h, w.astype(jnp.bfloat16),
                      preferred_element_type=jnp.float32) + b
        if i < len(params) - 1:
            h = jnp.maximum(acc, 0.0).astype(jnp.bfloat16)
    return acc


if __name__ == "__main__":
    key = jax.random.PRNGKey(0)
    key, kx = jax.random.split(key)

    # Small smoke-test batch, deliberately > TILE_B and not a multiple of it:
    # 2 grid tiles (both v7x TensorCores get work) and a ragged last tile
    # (exercises over-covering + wrapper slice-back).
    batch = 600
    x = jax.random.normal(kx, (batch, LAYER_DIMS[0]), dtype=jnp.float32)
    params = init_params(key)

    out = jax.block_until_ready(mnist_net_forward(x, params))
    assert out.shape == (batch, LAYER_DIMS[-1]), out.shape

    ref_bf16 = reference_forward_bf16(x, params)   # same precision path as the kernel
    ref_f32 = reference_forward_f32(x, params)     # module semantics, fp32
    assert jnp.allclose(out, ref_bf16, atol=2e-3, rtol=2e-3), "mismatch vs bf16 reference"
    assert jnp.allclose(out, ref_f32, atol=5e-2, rtol=5e-2), "mismatch vs fp32 reference"

    print("KERNEL_OK")
</pallas_src>

<mosaic_0001>
module attributes {stable_mosaic.version = 11 : i64} {
  func.func @mnist_mlp_kernel(%arg0: i32, %arg1: memref<512x784xf32, #tpu.memory_space<vmem>>, %arg2: memref<784x512xbf16, #tpu.memory_space<vmem>>, %arg3: memref<1x512xf32, #tpu.memory_space<vmem>>, %arg4: memref<512x256xbf16, #tpu.memory_space<vmem>>, %arg5: memref<1x256xf32, #tpu.memory_space<vmem>>, %arg6: memref<256x128xbf16, #tpu.memory_space<vmem>>, %arg7: memref<1x128xf32, #tpu.memory_space<vmem>>, %arg8: memref<128x64xbf16, #tpu.memory_space<vmem>>, %arg9: memref<1x64xf32, #tpu.memory_space<vmem>>, %arg10: memref<64x32xbf16, #tpu.memory_space<vmem>>, %arg11: memref<1x32xf32, #tpu.memory_space<vmem>>, %arg12: memref<32x128xbf16, #tpu.memory_space<vmem>>, %arg13: memref<1x128xf32, #tpu.memory_space<vmem>>, %arg14: memref<512x128xf32, #tpu.memory_space<vmem>>) attributes {dimension_semantics = [#tpu.dimension_semantics<parallel>], iteration_bounds = array<i64: 2>, scalar_prefetch = 0 : i64, scratch_operands = 0 : i64, tpu.core_type = #tpu.core_type<tc>, window_params = [{transform_indices = @transform_0, window_bounds = array<i64: 512, 784>}, {pipeline_mode = #tpu.pipeline_mode<synchronous>, transform_indices = @transform_1, window_bounds = array<i64: 784, 512>}, {pipeline_mode = #tpu.pipeline_mode<synchronous>, transform_indices = @transform_2, window_bounds = array<i64: 1, 512>}, {pipeline_mode = #tpu.pipeline_mode<synchronous>, transform_indices = @transform_3, window_bounds = array<i64: 512, 256>}, {pipeline_mode = #tpu.pipeline_mode<synchronous>, transform_indices = @transform_4, window_bounds = array<i64: 1, 256>}, {pipeline_mode = #tpu.pipeline_mode<synchronous>, transform_indices = @transform_5, window_bounds = array<i64: 256, 128>}, {pipeline_mode = #tpu.pipeline_mode<synchronous>, transform_indices = @transform_6, window_bounds = array<i64: 1, 128>}, {pipeline_mode = #tpu.pipeline_mode<synchronous>, transform_indices = @transform_7, window_bounds = array<i64: 128, 64>}, {pipeline_mode = #tpu.pipeline_mode<synchronous>, transform_indices = @transform_8, window_bounds = array<i64: 1, 64>}, {pipeline_mode = #tpu.pipeline_mode<synchronous>, transform_indices = @transform_9, window_bounds = array<i64: 64, 32>}, {pipeline_mode = #tpu.pipeline_mode<synchronous>, transform_indices = @transform_10, window_bounds = array<i64: 1, 32>}, {pipeline_mode = #tpu.pipeline_mode<synchronous>, transform_indices = @transform_11, window_bounds = array<i64: 32, 128>}, {pipeline_mode = #tpu.pipeline_mode<synchronous>, transform_indices = @transform_12, window_bounds = array<i64: 1, 128>}, {transform_indices = @transform_13, window_bounds = array<i64: 512, 128>}]} {
    %c0 = arith.constant 0 : index
    %c0_0 = arith.constant 0 : index
    %0 = vector.load %arg1[%c0, %c0_0] : memref<512x784xf32, #tpu.memory_space<vmem>>, vector<512x784xf32>
    %1 = arith.truncf %0 : vector<512x784xf32> to vector<512x784xbf16>
    %c0_1 = arith.constant 0 : index
    %c0_2 = arith.constant 0 : index
    %2 = vector.load %arg2[%c0_1, %c0_2] : memref<784x512xbf16, #tpu.memory_space<vmem>>, vector<784x512xbf16>
    %cst = arith.constant dense<0.000000e+00> : vector<512x512xf32>
    %3 = tpu.matmul %1, %2, %cst {dimension_numbers = #tpu.dot_dimension_numbers<[1], [0], [0], [1], [0, 0, 1, 1], [], []>} : vector<512x784xbf16>, vector<784x512xbf16>, vector<512x512xf32> -> vector<512x512xf32>
    %c0_3 = arith.constant 0 : index
    %c0_4 = arith.constant 0 : index
    %4 = vector.load %arg3[%c0_3, %c0_4] : memref<1x512xf32, #tpu.memory_space<vmem>>, vector<1x512xf32>
    %5 = vector.broadcast %4 : vector<1x512xf32> to vector<512x512xf32>
    %6 = arith.addf %3, %5 : vector<512x512xf32>
    %cst_5 = arith.constant 0.000000e+00 : f32
    %7 = vector.broadcast %cst_5 : f32 to vector<512x512xf32>
    %8 = arith.maximumf %6, %7 : vector<512x512xf32>
    %9 = arith.truncf %8 : vector<512x512xf32> to vector<512x512xbf16>
    %c0_6 = arith.constant 0 : index
    %c0_7 = arith.constant 0 : index
    %10 = vector.load %arg4[%c0_6, %c0_7] : memref<512x256xbf16, #tpu.memory_space<vmem>>, vector<512x256xbf16>
    %cst_8 = arith.constant dense<0.000000e+00> : vector<512x256xf32>
    %11 = tpu.matmul %9, %10, %cst_8 {dimension_numbers = #tpu.dot_dimension_numbers<[1], [0], [0], [1], [0, 0, 1, 1], [], []>} : vector<512x512xbf16>, vector<512x256xbf16>, vector<512x256xf32> -> vector<512x256xf32>
    %c0_9 = arith.constant 0 : index
    %c0_10 = arith.constant 0 : index
    %12 = vector.load %arg5[%c0_9, %c0_10] : memref<1x256xf32, #tpu.memory_space<vmem>>, vector<1x256xf32>
    %13 = vector.broadcast %12 : vector<1x256xf32> to vector<512x256xf32>
    %14 = arith.addf %11, %13 : vector<512x256xf32>
    %cst_11 = arith.constant 0.000000e+00 : f32
    %15 = vector.broadcast %cst_11 : f32 to vector<512x256xf32>
    %16 = arith.maximumf %14, %15 : vector<512x256xf32>
    %17 = arith.truncf %16 : vector<512x256xf32> to vector<512x256xbf16>
    %c0_12 = arith.constant 0 : index
    %c0_13 = arith.constant 0 : index
    %18 = vector.load %arg6[%c0_12, %c0_13] : memref<256x128xbf16, #tpu.memory_space<vmem>>, vector<256x128xbf16>
    %cst_14 = arith.constant dense<0.000000e+00> : vector<512x128xf32>
    %19 = tpu.matmul %17, %18, %cst_14 {dimension_numbers = #tpu.dot_dimension_numbers<[1], [0], [0], [1], [0, 0, 1, 1], [], []>} : vector<512x256xbf16>, vector<256x128xbf16>, vector<512x128xf32> -> vector<512x128xf32>
    %c0_15 = arith.constant 0 : index
    %c0_16 = arith.constant 0 : index
    %20 = vector.load %arg7[%c0_15, %c0_16] : memref<1x128xf32, #tpu.memory_space<vmem>>, vector<1x128xf32>
    %21 = vector.broadcast %20 : vector<1x128xf32> to vector<512x128xf32>
    %22 = arith.addf %19, %21 : vector<512x128xf32>
    %cst_17 = arith.constant 0.000000e+00 : f32
    %23 = vector.broadcast %cst_17 : f32 to vector<512x128xf32>
    %24 = arith.maximumf %22, %23 : vector<512x128xf32>
    %25 = arith.truncf %24 : vector<512x128xf32> to vector<512x128xbf16>
    %c0_18 = arith.constant 0 : index
    %c0_19 = arith.constant 0 : index
    %26 = vector.load %arg8[%c0_18, %c0_19] : memref<128x64xbf16, #tpu.memory_space<vmem>>, vector<128x64xbf16>
    %cst_20 = arith.constant dense<0.000000e+00> : vector<512x64xf32>
    %27 = tpu.matmul %25, %26, %cst_20 {dimension_numbers = #tpu.dot_dimension_numbers<[1], [0], [0], [1], [0, 0, 1, 1], [], []>} : vector<512x128xbf16>, vector<128x64xbf16>, vector<512x64xf32> -> vector<512x64xf32>
    %c0_21 = arith.constant 0 : index
    %c0_22 = arith.constant 0 : index
    %28 = vector.load %arg9[%c0_21, %c0_22] : memref<1x64xf32, #tpu.memory_space<vmem>>, vector<1x64xf32>
    %29 = vector.broadcast %28 : vector<1x64xf32> to vector<512x64xf32>
    %30 = arith.addf %27, %29 : vector<512x64xf32>
    %cst_23 = arith.constant 0.000000e+00 : f32
    %31 = vector.broadcast %cst_23 : f32 to vector<512x64xf32>
    %32 = arith.maximumf %30, %31 : vector<512x64xf32>
    %33 = arith.truncf %32 : vector<512x64xf32> to vector<512x64xbf16>
    %c0_24 = arith.constant 0 : index
    %c0_25 = arith.constant 0 : index
    %34 = vector.load %arg10[%c0_24, %c0_25] : memref<64x32xbf16, #tpu.memory_space<vmem>>, vector<64x32xbf16>
    %cst_26 = arith.constant dense<0.000000e+00> : vector<512x32xf32>
    %35 = tpu.matmul %33, %34, %cst_26 {dimension_numbers = #tpu.dot_dimension_numbers<[1], [0], [0], [1], [0, 0, 1, 1], [], []>} : vector<512x64xbf16>, vector<64x32xbf16>, vector<512x32xf32> -> vector<512x32xf32>
    %c0_27 = arith.constant 0 : index
    %c0_28 = arith.constant 0 : index
    %36 = vector.load %arg11[%c0_27, %c0_28] : memref<1x32xf32, #tpu.memory_space<vmem>>, vector<1x32xf32>
    %37 = vector.broadcast %36 : vector<1x32xf32> to vector<512x32xf32>
    %38 = arith.addf %35, %37 : vector<512x32xf32>
    %cst_29 = arith.constant 0.000000e+00 : f32
    %39 = vector.broadcast %cst_29 : f32 to vector<512x32xf32>
    %40 = arith.maximumf %38, %39 : vector<512x32xf32>
    %41 = arith.truncf %40 : vector<512x32xf32> to vector<512x32xbf16>
    %c0_30 = arith.constant 0 : index
    %c0_31 = arith.constant 0 : index
    %42 = vector.load %arg12[%c0_30, %c0_31] : memref<32x128xbf16, #tpu.memory_space<vmem>>, vector<32x128xbf16>
    %cst_32 = arith.constant dense<0.000000e+00> : vector<512x128xf32>
    %43 = tpu.matmul %41, %42, %cst_32 {dimension_numbers = #tpu.dot_dimension_numbers<[1], [0], [0], [1], [0, 0, 1, 1], [], []>} : vector<512x32xbf16>, vector<32x128xbf16>, vector<512x128xf32> -> vector<512x128xf32>
    %c0_33 = arith.constant 0 : index
    %c0_34 = arith.constant 0 : index
    %44 = vector.load %arg13[%c0_33, %c0_34] : memref<1x128xf32, #tpu.memory_space<vmem>>, vector<1x128xf32>
    %45 = vector.broadcast %44 : vector<1x128xf32> to vector<512x128xf32>
    %46 = arith.addf %43, %45 : vector<512x128xf32>
    %c0_35 = arith.constant 0 : index
    %c0_36 = arith.constant 0 : index
    %47 = vector.load %arg14[%c0_35, %c0_36] : memref<512x128xf32, #tpu.memory_space<vmem>>, vector<512x128xf32>
    tpu.vector_store %arg14[%c0_35, %c0_36], %46 {strides = array<i32>} : memref<512x128xf32, #tpu.memory_space<vmem>>, vector<512x128xf32>,
    return
  }
  func.func @transform_0(%arg0: i32) -> (i32, i32) {
    %c0_i32 = arith.constant 0 : i32
    %c0_i32_0 = arith.constant 0 : i32
    return %arg0, %c0_i32 : i32, i32
  }
  func.func @transform_1(%arg0: i32) -> (i32, i32) {
    %c0_i32 = arith.constant 0 : i32
    %c0_i32_0 = arith.constant 0 : i32
    %c0_i32_1 = arith.constant 0 : i32
    return %c0_i32, %c0_i32_0 : i32, i32
  }
  func.func @transform_2(%arg0: i32) -> (i32, i32) {
    %c0_i32 = arith.constant 0 : i32
    %c0_i32_0 = arith.constant 0 : i32
    %c0_i32_1 = arith.constant 0 : i32
    return %c0_i32, %c0_i32_0 : i32, i32
  }
  func.func @transform_3(%arg0: i32) -> (i32, i32) {
    %c0_i32 = arith.constant 0 : i32
    %c0_i32_0 = arith.constant 0 : i32
    %c0_i32_1 = arith.constant 0 : i32
    return %c0_i32, %c0_i32_0 : i32, i32
  }
  func.func @transform_4(%arg0: i32) -> (i32, i32) {
    %c0_i32 = arith.constant 0 : i32
    %c0_i32_0 = arith.constant 0 : i32
    %c0_i32_1 = arith.constant 0 : i32
    return %c0_i32, %c0_i32_0 : i32, i32
  }
  func.func @transform_5(%arg0: i32) -> (i32, i32) {
    %c0_i32 = arith.constant 0 : i32
    %c0_i32_0 = arith.constant 0 : i32
    %c0_i32_1 = arith.constant 0 : i32
    return %c0_i32, %c0_i32_0 : i32, i32
  }
  func.func @transform_6(%arg0: i32) -> (i32, i32) {
    %c0_i32 = arith.constant 0 : i32
    %c0_i32_0 = arith.constant 0 : i32
    %c0_i32_1 = arith.constant 0 : i32
    return %c0_i32, %c0_i32_0 : i32, i32
  }
  func.func @transform_7(%arg0: i32) -> (i32, i32) {
    %c0_i32 = arith.constant 0 : i32
    %c0_i32_0 = arith.constant 0 : i32
    %c0_i32_1 = arith.constant 0 : i32
    return %c0_i32, %c0_i32_0 : i32, i32
  }
  func.func @transform_8(%arg0: i32) -> (i32, i32) {
    %c0_i32 = arith.constant 0 : i32
    %c0_i32_0 = arith.constant 0 : i32
    %c0_i32_1 = arith.constant 0 : i32
    return %c0_i32, %c0_i32_0 : i32, i32
  }
  func.func @transform_9(%arg0: i32) -> (i32, i32) {
    %c0_i32 = arith.constant 0 : i32
    %c0_i32_0 = arith.constant 0 : i32
    %c0_i32_1 = arith.constant 0 : i32
    return %c0_i32, %c0_i32_0 : i32, i32
  }
  func.func @transform_10(%arg0: i32) -> (i32, i32) {
    %c0_i32 = arith.constant 0 : i32
    %c0_i32_0 = arith.constant 0 : i32
    %c0_i32_1 = arith.constant 0 : i32
    return %c0_i32, %c0_i32_0 : i32, i32
  }
  func.func @transform_11(%arg0: i32) -> (i32, i32) {
    %c0_i32 = arith.constant 0 : i32
    %c0_i32_0 = arith.constant 0 : i32
    %c0_i32_1 = arith.constant 0 : i32
    return %c0_i32, %c0_i32_0 : i32, i32
  }
  func.func @transform_12(%arg0: i32) -> (i32, i32) {
    %c0_i32 = arith.constant 0 : i32
    %c0_i32_0 = arith.constant 0 : i32
    %c0_i32_1 = arith.constant 0 : i32
    return %c0_i32, %c0_i32_0 : i32, i32
  }
  func.func @transform_13(%arg0: i32) -> (i32, i32) {
    %c0_i32 = arith.constant 0 : i32
    %c0_i32_0 = arith.constant 0 : i32
    return %arg0, %c0_i32 : i32, i32
  }
}

</mosaic_0001>

<bundles_post_ra>
// kernel: tpu_custom_call.1
= control target key start
LH: loop header
LB: loop body
LE: loop exit
PB: predicated region body
PF: predicated region fallthrough
CT: control target
= control target key end

     0   :  { %18 = vsyncpa [#allocation3], 0  ;;  %s16780_s0 = inlined_call_operand.vmem [shape: f32[600,784], index: 0, kind: input, shape index: {}]   ;;  %s16781_s1 = inlined_call_operand.vmem [shape: bf16[784,512], index: 1, kind: input, shape index: {}]   ;;  %s16782_s2 = inlined_call_operand.vmem [shape: f32[1,512], index: 2, kind: input, shape index: {}]   ;;  %s16783_s3 = inlined_call_operand.vmem [shape: bf16[512,256], index: 3, kind: input, shape index: {}]   ;;  %s16784_s4 = inlined_call_operand.vmem [shape: f32[1,256], index: 4, kind: input, shape index: {}]   ;;  %s16785_s5 = inlined_call_operand.vmem [shape: bf16[256,128], index: 5, kind: input, shape index: {}]   ;;  %s16786_s6 = inlined_call_operand.vmem [shape: f32[1,128], index: 6, kind: input, shape index: {}]   ;;  %s16787_s7 = inlined_call_operand.vmem [shape: bf16[128,64], index: 7, kind: input, shape index: {}]   ;;  %s16788_s8 = inlined_call_operand.vmem [shape: f32[1,64], index: 8, kind: input, shape index: {}]   ;;  %s16789_s9 = inlined_call_operand.vmem [shape: bf16[64,32], index: 9, kind: input, shape index: {}]   ;;  %s16790_s10 = inlined_call_operand.vmem [shape: f32[1,32], index: 10, kind: input, shape index: {}]   ;;  %s16791_s11 = inlined_call_operand.vmem [shape: bf16[32,128], index: 11, kind: input, shape index: {}]   ;;  %s16792_s12 = inlined_call_operand.vmem [shape: f32[1,128], index: 12, kind: input, shape index: {}]   ;;  %s16793_s13 = inlined_call_operand.hbm [shape: f32[600,128], index: 13, kind: output, shape index: {}]  }
   0x1   :  { %20 = vsyncpa [#allocation3 + $0x1], 0  ;;  %s10396_s25 = smov 0   ;;  %s10398_s26 = smov 0  }
   0x2   :  { %s10400_s27 = smov 0   ;;  %s10402_s28 = smov 0  }
   0x3 LB: > { %17028 = sst [smem:[#allocation5_spill]] %s10316_s27  ;;  %s10417_s29 = sadd.s32 4294967295, %s10320_s28   ;;  %s10320_s28 = sphi %s10402_s28, %s18502_s28   ;;  %s10316_s27 = sphi %s10400_s27, %s18504_s27   ;;  %s10312_s26 = sphi %s10398_s26, %s18506_s26   ;;  %s10308_s25 = sphi %s10396_s25, %s18505_s25  }
   0x4   : > { %s8996_s30 = sadd.s32 4294967294, %s10320_s28   ;;  %s10421_s14 = sadd.s32 1, %s10320_s28  }
   0x5   : > { %17029 = sst [smem:[#allocation6_spill]] %s10421_s14  ;;  %s311_s15 = sadd.s32 1, %s10316_s27 }
   0x6   : > { %s308_s16 = ssub.s32 %s10320_s28, %s10421_s14  ;;  %p321_p0 = scmp.ne.s32.totalorder %s10316_s27, %s10312_s26 }
   0x7   : > { %p309_p1 = scmp.eq.s32.totalorder %s308_s16, 0  ;;  %p322_p2 = scmp.eq.s32.totalorder %s10417_s29, 1 }
   0x8   : > { %p327_p3 = scmp.ne.s32.totalorder %s10312_s26, %s10308_s25  ;;  %p328_p4 = scmp.eq.s32.totalorder %s8996_s30, 1 }
   0x9   : > { %s10432_s17 = scalar_select %p309_p1, %s10316_s27, %s311_s15  }
   0xa   : > { %p10434_p5 = por %p322_p2, %p321_p0  ;;  %p10438_p6 = por %p328_p4, %p327_p3 }
   0xb   : > { %17030 = sst [smem:[#allocation7_spill]] %s10432_s17  ;;  %p8999_p7 = scmp.ge.s32.totalorder %s10320_s28, 1 }
   0xc   : > { %s17032_s19 = scalar_select %p10438_p6, 1, 0 }
   0xd   : > { %p402_p8 = scmp.lt.s32.totalorder %s10320_s28, 3 }
   0xe   : > { %17033 = sst [smem:[#allocation8_spill]] %s17032_s19 }
   0xf   : > { %p403_p9 = pnand %p8999_p7, %p402_p8 }
  0x11   : > { %406 = sbr.rel (%p403_p9) target bundleno = 2473 (0x9a9), region = 72 }
  0x16   : > { %v9839_v0 = vld [vmem:[%s16781_s1 + $0xe4] ss:$16 sps:$4 sm:$0xff]   ;;  %v9841_v1 = vld [vmem:[%s16781_s1 + $0xe0] ss:$16 sps:$4 sm:$0xff]   ;;  %s10457_s17 = sshll.u32 %s10417_s29, 6  ;;  %vm2345_vm0 = vcmask 130048  }
  0x17   : > { %2442 = vmatprep.subr.bf16.mxu0 %v9839_v0  ;;  %9765 = vmatprep.subr.bf16.mxu1 %v9839_v0  ;;  %v9842_v2 = vld [vmem:[%s16781_s1 + $0xc4] ss:$16 sps:$4 sm:$0xff]   ;;  %v9844_v3 = vld [vmem:[%s16781_s1 + $0xc0] ss:$16 sps:$4 sm:$0xff]   ;;  %p458_p10 = scmp.lt.s32.totalorder %s10457_s17, 74  ;;  %vm7959_vm1 = vcmask 523264  }
  0x18   : > { %2443 = vmatpush1.bf16.msra.mxu0 %v9841_v1  ;;  %9781 = vmatpush1.bf16.msra.mxu1 %v9841_v1  ;;  %v9845_v4 = vld [vmem:[%s16781_s1 + $0xa4] ss:$16 sps:$4 sm:$0xff]   ;;  %v9847_v5 = vld [vmem:[%s16781_s1 + $0xa0] ss:$16 sps:$4 sm:$0xff]   ;;  %vm8464_vm2 = vcmask 261120   ;;  %s449_s14 = sand.u32 1, %s10312_s26  }
  0x19   : > { %2444 = vmatprep.subr.bf16.mxu0 %v9842_v2  ;;  %9766 = vmatprep.subr.bf16.mxu1 %v9842_v2  ;;  %v9848_v6 = vld [vmem:[%s16781_s1 + $0x84] ss:$16 sps:$4 sm:$0xff]   ;;  %s459_s15 = scalar_select %p458_p10, %s10457_s17, 74  ;;  %v9850_v7 = vld [vmem:[%s16781_s1 + $0x80] ss:$16 sps:$4 sm:$0xff]  }
  0x1a   : > { %v9851_v8 = vld [vmem:[%s16781_s1 + $0x64] ss:$16 sps:$4 sm:$0xff]   ;;  %v9853_v9 = vld [vmem:[%s16781_s1 + $0x60] ss:$16 sps:$4 sm:$0xff]   ;;  %s16720_s23 = scalar_lea.sflag [#allocation3], %s449_s14  ;;  %s8923_s24 = ssub.s32 (%p10434_p5), 75, %s10457_s17 }
  0x1b   : > { %s9797_s22 = smul.u32 56, %s459_s15  ;;  %v9854_v10 = vld [vmem:[%s16781_s1 + $0x44] ss:$16 sps:$4 sm:$0xff]   ;;  %v9856_v11 = vld [vmem:[%s16781_s1 + $0x40] ss:$16 sps:$4 sm:$0xff]   ;;  %p8924_p11 = scmp.lt.s32.totalorder (%p10434_p5), %s8923_s24, 64 }
  0x1c   : > { %2445 = vmatpush1.bf16.msra.mxu0 %v9844_v3  ;;  %9782 = vmatpush1.bf16.msra.mxu1 %v9844_v3  ;;  %v9857_v12 = vld [vmem:[%s16781_s1 + $0x24] ss:$16 sps:$4 sm:$0xff]   ;;  %v9859_v18 = vld [vmem:[%s16781_s1 + $0x20] ss:$16 sps:$4 sm:$0xff]  }
  0x1d   : > { %2446 = vmatprep.subr.bf16.mxu0 %v9845_v4  ;;  %9767 = vmatprep.subr.bf16.mxu1 %v9845_v4  ;;  %s10485_s19 = scalar_lea.vmem %s16780_s0, %s9797_s22  ;;  %v9860_v20 = vld [vmem:[%s16781_s1 + $0x4] ss:$16 sps:$4 sm:$0xff]   ;;  %v9862_v21 = vld [vmem:[%s16781_s1] ss:$16 sps:$4 sm:$0xff]  }
  0x1e   : > { %v476_v13 = vld [vmem:[%s10485_s19 + $0x8] sm:$0xff]  ;;  %v483_v14 = vld [vmem:[%s10485_s19 + $0x40] sm:$0xff]  ;;  %v482_v39 = vld [vmem:[%s10485_s19 + $0x38] sm:$0xff] }
  0x1f   : > { %v10495_v15 = vpack.c.bf16 %v483_v14, %v476_v13  ;;  %v812_v16 = vld [vmem:[%s10485_s19 + $0xa88] sm:$0xff]  ;;  %v819_v17 = vld [vmem:[%s10485_s19 + $0xac0] sm:$0xff]  ;;  %v818_v41 = vld [vmem:[%s10485_s19 + $0xab8] sm:$0xff] }
  0x20   : > { %2447 = vmatpush1.bf16.msra.mxu0 %v9847_v5  ;;  %9783 = vmatpush1.bf16.msra.mxu1 %v9847_v5  ;;  %v10502_v19 = vpack.c.bf16 %v819_v17, %v812_v16  ;;  %v9863_v22 = vld [vmem:[%s16781_s1 + $0x1e4] ss:$16 sps:$4 sm:$0xff]   ;;  %v9865_v23 = vld [vmem:[%s16781_s1 + $0x1e0] ss:$16 sps:$4 sm:$0xff]   ;;  %v490_v43 = vld [vmem:[%s10485_s19 + $0x78] sm:$0xff] }
  0x21   : > { %2448 = vmatprep.subr.bf16.mxu0 %v9848_v6  ;;  %9768 = vmatprep.subr.bf16.mxu1 %v9848_v6  ;;  %17034 = vst [vmem:[#allocation9_spill] sm:$0xff] %v10495_v15  ;;  %v9866_v24 = vld [vmem:[%s16781_s1 + $0x1c4] ss:$16 sps:$4 sm:$0xff]   ;;  %v9868_v25 = vld [vmem:[%s16781_s1 + $0x1c0] ss:$16 sps:$4 sm:$0xff]   ;;  %v826_v45 = vld [vmem:[%s10485_s19 + $0xaf8] sm:$0xff] }
  0x22   : > { %17035 = vst [vmem:[#allocation10_spill] sm:$0xff] %v10502_v19  ;;  %2474 = vmatprep.mubr.bf16.mxu0 %v10495_v15  ;;  %2714 = vmatprep.mubr.bf16.mxu1 %v10502_v19  ;;  %v9869_v26 = vld [vmem:[%s16781_s1 + $0x1a4] ss:$16 sps:$4 sm:$0xff]   ;;  %v9871_v27 = vld [vmem:[%s16781_s1 + $0x1a0] ss:$16 sps:$4 sm:$0xff]   ;;  %v496_v55 = vld [vmem:[%s10485_s19 + $0xa8] sm:$0xff] }
  0x23   : > { %v9872_v28 = vld [vmem:[%s16781_s1 + $0x184] ss:$16 sps:$4 sm:$0xff]   ;;  %v9874_v29 = vld [vmem:[%s16781_s1 + $0x180] ss:$16 sps:$4 sm:$0xff]   ;;  %v832_v57 = vld [vmem:[%s10485_s19 + $0xb28] sm:$0xff] }
  0x24   : > { %2449 = vmatpush1.bf16.msra.mxu0 %v9850_v7  ;;  %9784 = vmatpush1.bf16.msra.mxu1 %v9850_v7  ;;  %v9875_v30 = vld [vmem:[%s16781_s1 + $0x164] ss:$16 sps:$4 sm:$0xff]   ;;  %v9877_v31 = vld [vmem:[%s16781_s1 + $0x160] ss:$16 sps:$4 sm:$0xff]   ;;  %v504_v59 = vld [vmem:[%s10485_s19 + $0xe8] sm:$0xff] }
  0x25   : > { %2450 = vmatprep.subr.bf16.mxu0 %v9851_v8  ;;  %9769 = vmatprep.subr.bf16.mxu1 %v9851_v8  ;;  %v9878_v32 = vld [vmem:[%s16781_s1 + $0x144] ss:$16 sps:$4 sm:$0xff]   ;;  %v9880_v33 = vld [vmem:[%s16781_s1 + $0x140] ss:$16 sps:$4 sm:$0xff]   ;;  %v840_v61 = vld [vmem:[%s10485_s19 + $0xb68] sm:$0xff] }
  0x26   : > { %v9881_v34 = vld [vmem:[%s16781_s1 + $0x124] ss:$16 sps:$4 sm:$0xff]   ;;  %v9883_v35 = vld [vmem:[%s16781_s1 + $0x120] ss:$16 sps:$4 sm:$0xff]   ;;  %v518_v13 = vld [vmem:[%s10485_s19 + $0x158] sm:$0xff] }
  0x27   : > { %v9884_v36 = vld [vmem:[%s16781_s1 + $0x104] ss:$16 sps:$4 sm:$0xff]   ;;  %v9886_v37 = vld [vmem:[%s16781_s1 + $0x100] ss:$16 sps:$4 sm:$0xff]   ;;  %v854_v16 = vld [vmem:[%s10485_s19 + $0xbd8] sm:$0xff] }
  0x28   : > { %2451 = vmatpush1.bf16.msra.mxu0 %v9853_v9  ;;  %9785 = vmatpush1.bf16.msra.mxu1 %v9853_v9  ;;  %v475_v38 = vld [vmem:[%s10485_s19] sm:$0xff]  ;;  %v497_v44 = vld [vmem:[%s10485_s19 + $0xb0] sm:$0xff]  ;;  %v510_v9 = vld [vmem:[%s10485_s19 + $0x118] sm:$0xff] }
  0x29   : > { %2452 = vmatprep.subr.bf16.mxu0 %v9854_v10  ;;  %9770 = vmatprep.subr.bf16.mxu1 %v9854_v10  ;;  %v811_v40 = vld [vmem:[%s10485_s19 + $0xa80] sm:$0xff]  ;;  %v833_v46 = vld [vmem:[%s10485_s19 + $0xb30] sm:$0xff]  ;;  %v10571_v47 = vpack.c.bf16 %v482_v39, %v475_v38  ;;  %v10578_v50 = vpack.c.bf16 %v497_v44, %v490_v43  ;;  %v720_v19 = vld [vmem:[%s10485_s19 + $0x7a8] sm:$0xff] }
  0x2a   : > { %v9889_v42 = vld [vmem:[%s16781_s1 + $0x2e4] ss:$16 sps:$4 sm:$0xff]   ;;  %v10573_v48 = vpack.c.bf16 %v818_v41, %v811_v40  ;;  %v9887_v49 = vld [vmem:[%s16781_s1 + $0x2e0] ss:$16 sps:$4 sm:$0xff]   ;;  %v10583_v52 = vpack.c.bf16 %v833_v46, %v826_v45 }
  0x2b   : > { %17036 = vst [vmem:[#allocation11_spill] sm:$0xff] %v10571_v47  ;;  %17038 = vst [vmem:[#allocation13_spill] sm:$0xff] %v10578_v50  ;;  %v9892_v51 = vld [vmem:[%s16781_s1 + $0x2c4] ss:$16 sps:$4 sm:$0xff]   ;;  %v9890_v53 = vld [vmem:[%s16781_s1 + $0x2c0] ss:$16 sps:$4 sm:$0xff]  }
  0x2c   : > { %2453 = vmatpush1.bf16.msra.mxu0 %v9856_v11  ;;  %9786 = vmatpush1.bf16.msra.mxu1 %v9856_v11  ;;  %17037 = vst [vmem:[#allocation12_spill] sm:$0xff] %v10573_v48  ;;  %17039 = vst [vmem:[#allocation14_spill] sm:$0xff] %v10583_v52  ;;  %v489_v54 = vld [vmem:[%s10485_s19 + $0x70] sm:$0xff]  ;;  %v511_v60 = vld [vmem:[%s10485_s19 + $0x120] sm:$0xff] }
  0x2d   : > { %2454 = vmatprep.subr.bf16.mxu0 %v9857_v12  ;;  %9771 = vmatprep.subr.bf16.mxu1 %v9857_v12  ;;  %v825_v56 = vld [vmem:[%s10485_s19 + $0xaf0] sm:$0xff]  ;;  %v847_v62 = vld [vmem:[%s10485_s19 + $0xba0] sm:$0xff]  ;;  %v10603_v63 = vpack.c.bf16 %v496_v55, %v489_v54  ;;  %v10610_v2 = vpack.c.bf16 %v511_v60, %v504_v59  ;;  %v846_v11 = vld [vmem:[%s10485_s19 + $0xb98] sm:$0xff] }
  0x2e   : > { %v9895_v58 = vld [vmem:[%s16781_s1 + $0x2a4] ss:$16 sps:$4 sm:$0xff]   ;;  %v10605_v0 = vpack.c.bf16 %v832_v57, %v825_v56  ;;  %v9893_v1 = vld [vmem:[%s16781_s1 + $0x2a0] ss:$16 sps:$4 sm:$0xff]   ;;  %v10618_v5 = vpack.c.bf16 %v847_v62, %v840_v61  ;;  %v874_v55 = vld [vmem:[%s10485_s19 + $0xc78] sm:$0xff] }
  0x2f   : > { %17040 = vst [vmem:[#allocation15_spill] sm:$0xff] %v10603_v63  ;;  %17042 = vst [vmem:[#allocation17_spill] sm:$0xff] %v10610_v2  ;;  %v9940_v3 = vld [vmem:[%s16781_s1 + $0x4e4] ss:$16 sps:$4 sm:$0xff]   ;;  %v9938_v6 = vld [vmem:[%s16781_s1 + $0x4e0] ss:$16 sps:$4 sm:$0xff]  }
  0x30   : > { %2455 = vmatpush1.bf16.msra.mxu0 %v9859_v18  ;;  %9787 = vmatpush1.bf16.msra.mxu1 %v9859_v18  ;;  %17041 = vst [vmem:[#allocation16_spill] sm:$0xff] %v10605_v0  ;;  %v9898_v4 = vld [vmem:[%s16781_s1 + $0x284] ss:$16 sps:$4 sm:$0xff]   ;;  %17043 = vst [vmem:[#allocation18_spill] sm:$0xff] %v10618_v5  ;;  %v9896_v7 = vld [vmem:[%s16781_s1 + $0x280] ss:$16 sps:$4 sm:$0xff]  }
  0x31   : > { %2456 = vmatprep.subr.bf16.mxu0 %v9860_v20  ;;  %9772 = vmatprep.subr.bf16.mxu1 %v9860_v20  ;;  %v503_v8 = vld [vmem:[%s10485_s19 + $0xe0] sm:$0xff]  ;;  %v525_v14 = vld [vmem:[%s10485_s19 + $0x190] sm:$0xff]  ;;  %v546_v57 = vld [vmem:[%s10485_s19 + $0x238] sm:$0xff] }
  0x32   : > { %v839_v10 = vld [vmem:[%s10485_s19 + $0xb60] sm:$0xff]  ;;  %v861_v17 = vld [vmem:[%s10485_s19 + $0xc10] sm:$0xff]  ;;  %v10641_v18 = vpack.c.bf16 %v510_v9, %v503_v8  ;;  %v882_v59 = vld [vmem:[%s10485_s19 + $0xcb8] sm:$0xff] }
  0x33   : > { %v9901_v12 = vld [vmem:[%s16781_s1 + $0x264] ss:$16 sps:$4 sm:$0xff]   ;;  %v10643_v20 = vpack.c.bf16 %v846_v11, %v839_v10  ;;  %v9905_v41 = vld [vmem:[%s16781_s1 + $0x220] ss:$16 sps:$4 sm:$0xff]   ;;  %v552_v11 = vld [vmem:[%s10485_s19 + $0x268] sm:$0xff] }
  0x34   : > { %2457 = vmatpush1.bf16.msra.mxu0 %v9862_v21  ;;  %9788 = vmatpush1.bf16.msra.mxu1 %v9862_v21  ;;  %17044 = vst [vmem:[#allocation19_spill] sm:$0xff] %v10641_v18  ;;  %v9941_v21 = vld [vmem:[%s16781_s1 + $0x4c0] ss:$16 sps:$4 sm:$0xff]   ;;  %v9910_v43 = vld [vmem:[%s16781_s1 + $0x204] ss:$16 sps:$4 sm:$0xff]  }
  0x35   : > { %2458 = vmatprep.subr.bf16.mxu0 %v9863_v22  ;;  %9773 = vmatprep.subr.bf16.mxu1 %v9863_v22  ;;  %17045 = vst [vmem:[#allocation20_spill] sm:$0xff] %v10643_v20  ;;  %v9943_v22 = vld [vmem:[%s16781_s1 + $0x4c4] ss:$16 sps:$4 sm:$0xff]   ;;  %v9908_v45 = vld [vmem:[%s16781_s1 + $0x200] ss:$16 sps:$4 sm:$0xff]  }
  0x36   : > { %v875_v38 = vld [vmem:[%s10485_s19 + $0xc80] sm:$0xff]  ;;  %v889_v60 = vld [vmem:[%s10485_s19 + $0xcf0] sm:$0xff] }
  0x37   : > { %v531_v46 = vld [vmem:[%s10485_s19 + $0x1c0] sm:$0xff]  ;;  %v545_v9 = vld [vmem:[%s10485_s19 + $0x230] sm:$0xff] }
  0x38   : > { %2459 = vmatpush2.bf16.msra.mxu0 %v9865_v23  ;;  %9789 = vmatpush2.bf16.msra.mxu1 %v9865_v23  ;;  %v9899_v23 = vld [vmem:[%s16781_s1 + $0x260] ss:$16 sps:$4 sm:$0xff]   ;;  %v9913_v56 = vld [vmem:[%s16781_s1 + $0x3e4] ss:$16 sps:$4 sm:$0xff]  }
  0x39   : > { %2460 = vmatprep.subr.bf16.mxu0 %v9866_v24  ;;  %9774 = vmatprep.subr.bf16.mxu1 %v9866_v24  ;;  %v10654_v24 = vpack.c.bf16 %v525_v14, %v518_v13  ;;  %v9947_v54 = vld [vmem:[%s16781_s1 + $0x480] ss:$16 sps:$4 sm:$0xff]   ;;  %v9952_v61 = vld [vmem:[%s16781_s1 + $0x464] ss:$16 sps:$4 sm:$0xff]   ;;  %v888_v13 = vld [vmem:[%s10485_s19 + $0xce8] sm:$0xff] }
  0x3a   : > { %v9914_v8 = vld [vmem:[%s16781_s1 + $0x3c0] ss:$16 sps:$4 sm:$0xff]   ;;  %v9955_v14 = vld [vmem:[%s16781_s1 + $0x444] ss:$16 sps:$4 sm:$0xff]  }
  0x3b   : > { %17046 = vst [vmem:[#allocation21_spill] sm:$0xff] %v10654_v24  ;;  %v9950_v10 = vld [vmem:[%s16781_s1 + $0x460] ss:$16 sps:$4 sm:$0xff]  }
  0x3c   : > { %2461 = vmatpush2.bf16.msra.mxu0 %v9868_v25  ;;  %9790 = vmatpush2.bf16.msra.mxu1 %v9868_v25  ;;  %v9904_v25 = vld [vmem:[%s16781_s1 + $0x244] ss:$16 sps:$4 sm:$0xff]  }
  0x3d   : > { %2462 = vmatprep.subr.bf16.mxu0 %v9869_v26  ;;  %9775 = vmatprep.subr.bf16.mxu1 %v9869_v26  ;;  %v10659_v26 = vpack.c.bf16 %v861_v17, %v854_v16  ;;  %v9919_v16 = vld [vmem:[%s16781_s1 + $0x3a4] ss:$16 sps:$4 sm:$0xff]   ;;  %v560_v17 = vld [vmem:[%s10485_s19 + $0x2a8] sm:$0xff] }
  0x3f   : > { %17047 = vst [vmem:[#allocation22_spill] sm:$0xff] %v10659_v26 }
  0x40   : > { %2463 = vmatpush2.bf16.msra.mxu0 %v9871_v27  ;;  %9791 = vmatpush2.bf16.msra.mxu1 %v9871_v27  ;;  %v9902_v27 = vld [vmem:[%s16781_s1 + $0x240] ss:$16 sps:$4 sm:$0xff]  }
  0x41   : > { %2464 = vmatprep.subr.bf16.mxu0 %v9872_v28  ;;  %9776 = vmatprep.subr.bf16.mxu1 %v9872_v28  ;;  %v517_v28 = vld [vmem:[%s10485_s19 + $0x150] sm:$0xff] }
  0x44   : > { %2465 = vmatpush2.bf16.msra.mxu0 %v9874_v29  ;;  %9792 = vmatpush2.bf16.msra.mxu1 %v9874_v29  ;;  %v9944_v29 = vld [vmem:[%s16781_s1 + $0x4a0] ss:$16 sps:$4 sm:$0xff]  }
  0x45   : > { %2466 = vmatprep.subr.bf16.mxu0 %v9875_v30  ;;  %9777 = vmatprep.subr.bf16.mxu1 %v9875_v30  ;;  %v9946_v30 = vld [vmem:[%s16781_s1 + $0x4a4] ss:$16 sps:$4 sm:$0xff]  }
  0x48   : > { %2467 = vmatpush2.bf16.msra.mxu0 %v9877_v31  ;;  %9793 = vmatpush2.bf16.msra.mxu1 %v9877_v31  ;;  %v524_v31 = vld [vmem:[%s10485_s19 + $0x188] sm:$0xff] }
  0x49   : > { %2468 = vmatprep.subr.bf16.mxu0 %v9878_v32  ;;  %9778 = vmatprep.subr.bf16.mxu1 %v9878_v32  ;;  %v853_v32 = vld [vmem:[%s10485_s19 + $0xbd0] sm:$0xff]  ;;  %v10685_v39 = vpack.c.bf16 %v524_v31, %v517_v28 }
  0x4a   : > { %v9922_v31 = vld [vmem:[%s16781_s1 + $0x384] ss:$16 sps:$4 sm:$0xff]  }
  0x4b   : > { %17048 = vst [vmem:[#allocation23_spill] sm:$0xff] %v10685_v39 }
  0x4c   : > { %2469 = vmatpush2.bf16.msra.mxu0 %v9880_v33  ;;  %9794 = vmatpush2.bf16.msra.mxu1 %v9880_v33  ;;  %v860_v33 = vld [vmem:[%s10485_s19 + $0xc08] sm:$0xff] }
  0x4d   : > { %2470 = vmatprep.subr.bf16.mxu0 %v9881_v34  ;;  %9779 = vmatprep.subr.bf16.mxu1 %v9881_v34  ;;  %v9907_v34 = vld [vmem:[%s16781_s1 + $0x224] ss:$16 sps:$4 sm:$0xff]   ;;  %v10687_v40 = vpack.c.bf16 %v860_v33, %v853_v32  ;;  %v9920_v33 = vld [vmem:[%s16781_s1 + $0x380] ss:$16 sps:$4 sm:$0xff]  }
  0x4f   : > { %17049 = vst [vmem:[#allocation24_spill] sm:$0xff] %v10687_v40 }
  0x50   : > { %2471 = vmatpush2.bf16.msra.mxu0 %v9883_v35  ;;  %9795 = vmatpush2.bf16.msra.mxu1 %v9883_v35  ;;  %v532_v35 = vld [vmem:[%s10485_s19 + $0x1c8] sm:$0xff] }
  0x51   : > { %2472 = vmatprep.subr.bf16.mxu0 %v9884_v36  ;;  %9780 = vmatprep.subr.bf16.mxu1 %v9884_v36  ;;  %v539_v36 = vld [vmem:[%s10485_s19 + $0x200] sm:$0xff] }
  0x54   : > { %2473 = vmatpush2.bf16.msra.mxu0 %v9886_v37  ;;  %9796 = vmatpush2.bf16.msra.mxu1 %v9886_v37  ;;  %v868_v37 = vld [vmem:[%s10485_s19 + $0xc48] sm:$0xff] }
  0x55   : > { %2795 = vmatprep.subr.bf16.mxu1 %v9889_v42  ;;  %3148 = vmatprep.subr.bf16.mxu0 %v9940_v3  ;;  %v10692_v42 = vpack.c.bf16 %v539_v36, %v532_v35  ;;  %v10697_v44 = vpack.c.bf16 %v875_v38, %v868_v37  ;;  %v9911_v3 = vld [vmem:[%s16781_s1 + $0x3e0] ss:$16 sps:$4 sm:$0xff]   ;;  %v566_v35 = vld [vmem:[%s10485_s19 + $0x2d8] sm:$0xff]  ;;  %v9958_v36 = vld [vmem:[%s16781_s1 + $0x424] ss:$16 sps:$4 sm:$0xff]  }
  0x56   : > { %v895_v37 = vld [vmem:[%s10485_s19 + $0xd20] sm:$0xff] }
  0x57   : > { %2475 = vmatmul.mubr.bf16.vlgmr.msra.gmra.mxu0 %v10571_v47  ;;  %2715 = vmatmul.mubr.bf16.vlgmr.msra.gmra.mxu1 %v10573_v48  ;;  %17050 = vst [vmem:[#allocation25_spill] sm:$0xff] %v10692_v42  ;;  %17051 = vst [vmem:[#allocation26_spill] sm:$0xff] %v10697_v44  ;;  %v9956_v38 = vld [vmem:[%s16781_s1 + $0x420] ss:$16 sps:$4 sm:$0xff]  }
  0x58   : > { %2796 = vmatpush1.bf16.msra.mxu1 %v9887_v49  ;;  %2484 = vmatprep.mubr.bf16.mxu0 %v10578_v50  ;;  %v9949_v49 = vld [vmem:[%s16781_s1 + $0x484] ss:$16 sps:$4 sm:$0xff]   ;;  %v648_v50 = vld [vmem:[%s10485_s19 + $0x568] sm:$0xff] }
  0x59   : > { %2797 = vmatprep.subr.bf16.mxu1 %v9892_v51  ;;  %2724 = vmatprep.mubr.bf16.mxu1 %v10583_v52  ;;  %v538_v51 = vld [vmem:[%s10485_s19 + $0x1f8] sm:$0xff]  ;;  %v596_v52 = vld [vmem:[%s10485_s19 + $0x3c8] sm:$0xff]  ;;  %v713_v48 = vld [vmem:[%s10485_s19 + $0x770] sm:$0xff] }
  0x5a   : > { %3149 = vmatpush1.bf16.msra.mxu0 %v9938_v6  ;;  %v10726_v62 = vpack.c.bf16 %v538_v51, %v531_v46  ;;  %v9916_v6 = vld [vmem:[%s16781_s1 + $0x3c4] ss:$16 sps:$4 sm:$0xff]   ;;  %v574_v46 = vld [vmem:[%s10485_s19 + $0x318] sm:$0xff] }
  0x5b   : > { %3150 = vmatprep.subr.bf16.mxu0 %v9943_v22  ;;  %v896_v22 = vld [vmem:[%s10485_s19 + $0xd28] sm:$0xff]  ;;  %v910_v51 = vld [vmem:[%s10485_s19 + $0xd98] sm:$0xff] }
  0x5c   : > { %2798 = vmatpush1.bf16.msra.mxu1 %v9890_v53  ;;  %v867_v53 = vld [vmem:[%s10485_s19 + $0xc40] sm:$0xff]  ;;  %17052 = vst [vmem:[#allocation27_spill] sm:$0xff] %v10726_v62 }
  0x5d   : > { %2799 = vmatprep.subr.bf16.mxu1 %v9895_v58  ;;  %v553_v58 = vld [vmem:[%s10485_s19 + $0x270] sm:$0xff] }
  0x5e   : > { %3151 = vmatpush1.bf16.msra.mxu0 %v9941_v21  ;;  %v567_v21 = vld [vmem:[%s10485_s19 + $0x2e0] sm:$0xff] }
  0x5f   : > { %2485 = vmatmul.mubr.bf16.gmra.mxu0 %v10603_v63  ;;  %2725 = vmatmul.mubr.bf16.gmra.mxu1 %v10605_v0  ;;  %v589_v0 = vld [vmem:[%s10485_s19 + $0x390] sm:$0xff] }
  0x60   : > { %2800 = vmatpush1.bf16.msra.mxu1 %v9893_v1  ;;  %2494 = vmatprep.mubr.bf16.mxu0 %v10610_v2  ;;  %v10728_v1 = vpack.c.bf16 %v874_v55, %v867_v53  ;;  %v917_v53 = vld [vmem:[%s10485_s19 + $0xdd0] sm:$0xff] }
  0x61   : > { %2801 = vmatprep.subr.bf16.mxu1 %v9898_v4  ;;  %2734 = vmatprep.mubr.bf16.mxu1 %v10618_v5  ;;  %v10733_v4 = vpack.c.bf16 %v553_v58, %v546_v57  ;;  %v9928_v58 = vld [vmem:[%s16781_s1 + $0x344] ss:$16 sps:$4 sm:$0xff]   ;;  %v706_v5 = vld [vmem:[%s10485_s19 + $0x738] sm:$0xff] }
  0x62   : > { %3152 = vmatprep.subr.bf16.mxu0 %v9946_v30  ;;  %17053 = vst [vmem:[#allocation28_spill] sm:$0xff] %v10728_v1  ;;  %v10774_v30 = vpack.c.bf16 %v567_v21, %v560_v17  ;;  %v9962_v17 = vld [vmem:[%s16781_s1 + $0x5e0] ss:$16 sps:$4 sm:$0xff]  }
  0x63   : > { %3153 = vmatpush1.bf16.msra.mxu0 %v9944_v29  ;;  %17054 = vst [vmem:[#allocation29_spill] sm:$0xff] %v10733_v4  ;;  %v9917_v29 = vld [vmem:[%s16781_s1 + $0x3a0] ss:$16 sps:$4 sm:$0xff]  }
  0x64   : > { %2802 = vmatpush1.bf16.msra.mxu1 %v9896_v7  ;;  %3154 = vmatprep.subr.bf16.mxu0 %v9949_v49  ;;  %v10738_v7 = vpack.c.bf16 %v889_v60, %v882_v59  ;;  %17058 = vst [vmem:[#allocation33_spill] sm:$0xff] %v10774_v30  ;;  %v581_v49 = vld [vmem:[%s10485_s19 + $0x350] sm:$0xff]  ;;  %v10820_v59 = vpack.c.bf16 %v917_v53, %v910_v51  ;;  %v492_v51 = vld [vmem:[%s10485_s19 + $0x88] sm:$0xff]  ;;  %v499_v53 = vld [vmem:[%s10485_s19 + $0xc0] sm:$0xff] }
  0x65   : > { %2803 = vmatprep.subr.bf16.mxu1 %v9901_v12  ;;  %v881_v12 = vld [vmem:[%s10485_s19 + $0xcb0] sm:$0xff]  ;;  %v10815_v57 = vpack.c.bf16 %v581_v49, %v574_v46  ;;  %v602_v46 = vld [vmem:[%s10485_s19 + $0x3f8] sm:$0xff] }
  0x66   : > { %17055 = vst [vmem:[#allocation30_spill] sm:$0xff] %v10738_v7  ;;  %v10769_v28 = vpack.c.bf16 %v888_v13, %v881_v12  ;;  %17063 = vst [vmem:[#allocation38_spill] sm:$0xff] %v10820_v59  ;;  %v9926_v60 = vld [vmem:[%s16781_s1 + $0x340] ss:$16 sps:$4 sm:$0xff]   ;;  %v588_v12 = vld [vmem:[%s10485_s19 + $0x388] sm:$0xff] }
  0x67   : > { %2495 = vmatmul.mubr.bf16.gmra.mxu0 %v10641_v18  ;;  %2735 = vmatmul.mubr.bf16.gmra.mxu1 %v10643_v20  ;;  %17062 = vst [vmem:[#allocation37_spill] sm:$0xff] %v10815_v57  ;;  %v595_v13 = vld [vmem:[%s10485_s19 + $0x3c0] sm:$0xff]  ;;  %v609_v49 = vld [vmem:[%s10485_s19 + $0x430] sm:$0xff] }
  0x68   : > { %2804 = vmatpush1.bf16.msra.mxu1 %v9899_v23  ;;  %2504 = vmatprep.mubr.bf16.mxu0 %v10654_v24  ;;  %v903_v23 = vld [vmem:[%s10485_s19 + $0xd60] sm:$0xff]  ;;  %17057 = vst [vmem:[#allocation32_spill] sm:$0xff] %v10769_v28 }
  0x69   : > { %2805 = vmatprep.subr.bf16.mxu1 %v9904_v25  ;;  %2744 = vmatprep.mubr.bf16.mxu1 %v10659_v26  ;;  %v9953_v25 = vld [vmem:[%s16781_s1 + $0x440] ss:$16 sps:$4 sm:$0xff]   ;;  %v10779_v32 = vpack.c.bf16 %v903_v23, %v896_v22  ;;  %v582_v26 = vld [vmem:[%s10485_s19 + $0x358] sm:$0xff] }
  0x6a   : > { %3155 = vmatpush1.bf16.msra.mxu0 %v9947_v54  ;;  %v9929_v23 = vld [vmem:[%s16781_s1 + $0x320] ss:$16 sps:$4 sm:$0xff]  }
  0x6b   : > { %3156 = vmatprep.subr.bf16.mxu0 %v9952_v61  ;;  %17059 = vst [vmem:[#allocation34_spill] sm:$0xff] %v10779_v32  ;;  %v573_v61 = vld [vmem:[%s10485_s19 + $0x310] sm:$0xff]  ;;  %v699_v20 = vld [vmem:[%s10485_s19 + $0x700] sm:$0xff] }
  0x6c   : > { %2806 = vmatpush1.bf16.msra.mxu1 %v9902_v27  ;;  %v10767_v27 = vpack.c.bf16 %v552_v11, %v545_v9  ;;  %v916_v9 = vld [vmem:[%s10485_s19 + $0xdc8] sm:$0xff]  ;;  %v9964_v11 = vld [vmem:[%s16781_s1 + $0x5e4] ss:$16 sps:$4 sm:$0xff]  }
  0x6d   : > { %2807 = vmatprep.subr.bf16.mxu1 %v9907_v34  ;;  %v559_v34 = vld [vmem:[%s10485_s19 + $0x2a0] sm:$0xff] }
  0x6e   : > { %3157 = vmatpush1.bf16.msra.mxu0 %v9950_v10  ;;  %17056 = vst [vmem:[#allocation31_spill] sm:$0xff] %v10767_v27  ;;  %v10808_v54 = vpack.c.bf16 %v566_v35, %v559_v34  ;;  %v9931_v10 = vld [vmem:[%s16781_s1 + $0x324] ss:$16 sps:$4 sm:$0xff]   ;;  %v594_v35 = vld [vmem:[%s10485_s19 + $0x3b8] sm:$0xff] }
  0x6f   : > { %2505 = vmatmul.mubr.bf16.gmra.mxu0 %v10685_v39  ;;  %2745 = vmatmul.mubr.bf16.gmra.mxu1 %v10687_v40  ;;  %v587_v34 = vld [vmem:[%s10485_s19 + $0x380] sm:$0xff] }
  0x70   : > { %2808 = vmatpush1.bf16.msra.mxu1 %v9905_v41  ;;  %2514 = vmatprep.mubr.bf16.mxu0 %v10692_v42  ;;  %v902_v41 = vld [vmem:[%s10485_s19 + $0xd58] sm:$0xff]  ;;  %17060 = vst [vmem:[#allocation35_spill] sm:$0xff] %v10808_v54  ;;  %v575_v40 = vld [vmem:[%s10485_s19 + $0x320] sm:$0xff]  ;;  %v592_v42 = vld [vmem:[%s10485_s19 + $0x3a8] sm:$0xff] }
  0x71   : > { %2809 = vmatprep.subr.bf16.mxu1 %v9910_v43  ;;  %2754 = vmatprep.mubr.bf16.mxu1 %v10697_v44  ;;  %v9961_v43 = vld [vmem:[%s16781_s1 + $0x404] ss:$16 sps:$4 sm:$0xff]   ;;  %v10810_v55 = vpack.c.bf16 %v902_v41, %v895_v37  ;;  %v484_v41 = vld [vmem:[%s10485_s19 + $0x48] sm:$0xff] }
  0x72   : > { %3158 = vmatprep.subr.bf16.mxu0 %v9955_v14  ;;  %v478_v14 = vld [vmem:[%s10485_s19 + $0x18] sm:$0xff]  ;;  %v477_v37 = vld [vmem:[%s10485_s19 + $0x10] sm:$0xff]  ;;  %v692_v44 = vld [vmem:[%s10485_s19 + $0x6c8] sm:$0xff] }
  0x73   : > { %3159 = vmatpush1.bf16.msra.mxu0 %v9953_v25  ;;  %17061 = vst [vmem:[#allocation36_spill] sm:$0xff] %v10810_v55  ;;  %v10856_v25 = vpack.c.bf16 %v595_v13, %v588_v12  ;;  %v498_v12 = vld [vmem:[%s10485_s19 + $0xb8] sm:$0xff]  ;;  %v616_v13 = vld [vmem:[%s10485_s19 + $0x468] sm:$0xff] }
  0x74   : > { %2810 = vmatpush1.bf16.msra.mxu1 %v9908_v45  ;;  %v9925_v45 = vld [vmem:[%s16781_s1 + $0x364] ss:$16 sps:$4 sm:$0xff]   ;;  %3160 = vmatprep.subr.bf16.mxu0 %v9958_v36 }
  0x75   : > { %2811 = vmatprep.subr.bf16.mxu1 %v9913_v56  ;;  %v9923_v56 = vld [vmem:[%s16781_s1 + $0x360] ss:$16 sps:$4 sm:$0xff]   ;;  %17066 = vst [vmem:[#allocation41_spill] sm:$0xff] %v10856_v25  ;;  %v9967_v36 = vld [vmem:[%s16781_s1 + $0x5c4] ss:$16 sps:$4 sm:$0xff]  }
  0x77   : > { %2515 = vmatmul.mubr.bf16.gmra.mxu0 %v10726_v62  ;;  %2755 = vmatmul.mubr.bf16.gmra.mxu1 %v10728_v1  ;;  %v685_v1 = vld [vmem:[%s10485_s19 + $0x690] sm:$0xff] }
  0x78   : > { %2812 = vmatpush2.bf16.msra.mxu1 %v9911_v3  ;;  %2524 = vmatprep.mubr.bf16.mxu0 %v10733_v4  ;;  %v580_v3 = vld [vmem:[%s10485_s19 + $0x348] sm:$0xff] }
  0x79   : > { %2813 = vmatprep.subr.bf16.mxu1 %v9916_v6  ;;  %2764 = vmatprep.mubr.bf16.mxu1 %v10738_v7  ;;  %v909_v6 = vld [vmem:[%s10485_s19 + $0xd90] sm:$0xff]  ;;  %v10849_v21 = vpack.c.bf16 %v580_v3, %v573_v61  ;;  %v10897_v61 = vpack.c.bf16 %v609_v49, %v602_v46  ;;  %v10899_v3 = vpack.c.bf16 %v499_v53, %v492_v51  ;;  %v512_v46 = vld [vmem:[%s10485_s19 + $0x128] sm:$0xff]  ;;  %v630_v49 = vld [vmem:[%s10485_s19 + $0x4d8] sm:$0xff] }
  0x7a   : > { %3161 = vmatpush1.bf16.msra.mxu0 %v9956_v38  ;;  %v10851_v22 = vpack.c.bf16 %v916_v9, %v909_v6  ;;  %v9965_v38 = vld [vmem:[%s16781_s1 + $0x5c0] ss:$16 sps:$4 sm:$0xff]   ;;  %v608_v9 = vld [vmem:[%s10485_s19 + $0x428] sm:$0xff] }
  0x7b   : > { %3162 = vmatprep.subr.bf16.mxu0 %v9961_v43  ;;  %17064 = vst [vmem:[#allocation39_spill] sm:$0xff] %v10849_v21  ;;  %v9970_v43 = vld [vmem:[%s16781_s1 + $0x5a4] ss:$16 sps:$4 sm:$0xff]   ;;  %17070 = vst [vmem:[#allocation45_spill] sm:$0xff] %v10897_v61  ;;  %v9968_v6 = vld [vmem:[%s16781_s1 + $0x5a0] ss:$16 sps:$4 sm:$0xff]  }
  0x7c   : > { %2814 = vmatpush2.bf16.msra.mxu1 %v9914_v8  ;;  %v9959_v8 = vld [vmem:[%s16781_s1 + $0x400] ss:$16 sps:$4 sm:$0xff]   ;;  %17065 = vst [vmem:[#allocation40_spill] sm:$0xff] %v10851_v22  ;;  %17071 = vst [vmem:[#allocation46_spill] sm:$0xff] %v10899_v3  ;;  %v520_v53 = vld [vmem:[%s10485_s19 + $0x168] sm:$0xff] }
  0x7d   : > { %2815 = vmatprep.subr.bf16.mxu1 %v9919_v16  ;;  %v485_v16 = vld [vmem:[%s10485_s19 + $0x50] sm:$0xff]  ;;  %v568_v7 = vld [vmem:[%s10485_s19 + $0x2e8] sm:$0xff] }
  0x7e   : > { %3163 = vmatpush1.bf16.msra.mxu0 %v9959_v8  ;;  %v601_v8 = vld [vmem:[%s10485_s19 + $0x3f0] sm:$0xff] }
  0x7f   : > { %2525 = vmatmul.mubr.bf16.gmra.mxu0 %v10767_v27  ;;  %2765 = vmatmul.mubr.bf16.gmra.mxu1 %v10769_v28  ;;  %v637_v51 = vld [vmem:[%s10485_s19 + $0x510] sm:$0xff] }
  0x80   : > { %2816 = vmatpush2.bf16.msra.mxu1 %v9917_v29  ;;  %2534 = vmatprep.mubr.bf16.mxu0 %v10774_v30  ;;  %v9934_v29 = vld [vmem:[%s16781_s1 + $0x304] ss:$16 sps:$4 sm:$0xff]  }
  0x81   : > { %2817 = vmatprep.subr.bf16.mxu1 %v9922_v31  ;;  %2774 = vmatprep.mubr.bf16.mxu1 %v10779_v32  ;;  %v10861_v31 = vpack.c.bf16 %v485_v16, %v478_v14  ;;  %v623_v14 = vld [vmem:[%s10485_s19 + $0x4a0] sm:$0xff]  ;;  %v506_v16 = vld [vmem:[%s10485_s19 + $0xf8] sm:$0xff]  ;;  %v561_v28 = vld [vmem:[%s10485_s19 + $0x2b0] sm:$0xff] }
  0x82   : > { %3164 = vmatprep.subr.bf16.mxu0 %v9964_v11  ;;  %v9973_v11 = vld [vmem:[%s16781_s1 + $0x584] ss:$16 sps:$4 sm:$0xff]   ;;  %v678_v32 = vld [vmem:[%s10485_s19 + $0x658] sm:$0xff] }
  0x83   : > { %17067 = vst [vmem:[#allocation42_spill] sm:$0xff] %v10861_v31  ;;  %3165 = vmatpush2.bf16.msra.mxu0 %v9962_v17  ;;  %v513_v17 = vld [vmem:[%s10485_s19 + $0x130] sm:$0xff] }
  0x84   : > { %2818 = vmatpush2.bf16.msra.mxu1 %v9920_v33  ;;  %v9932_v33 = vld [vmem:[%s16781_s1 + $0x300] ss:$16 sps:$4 sm:$0xff]   ;;  %3166 = vmatprep.subr.bf16.mxu0 %v9967_v36  ;;  %v10931_v36 = vpack.c.bf16 %v513_v17, %v506_v16  ;;  %v636_v17 = vld [vmem:[%s10485_s19 + $0x508] sm:$0xff] }
  0x85   : > { %2819 = vmatprep.subr.bf16.mxu1 %v9925_v45  ;;  %v9937_v45 = vld [vmem:[%s16781_s1 + $0x604] ss:$16 sps:$4 sm:$0xff]  }
  0x86   : > { %17075 = vst [vmem:[#allocation50_spill] sm:$0xff] %v10931_v36  ;;  %v629_v16 = vld [vmem:[%s10485_s19 + $0x4d0] sm:$0xff] }
  0x87   : > { %2535 = vmatmul.mubr.bf16.gmra.mxu0 %v10808_v54  ;;  %2775 = vmatmul.mubr.bf16.gmra.mxu1 %v10810_v55  ;;  %v671_v55 = vld [vmem:[%s10485_s19 + $0x620] sm:$0xff] }
  0x88   : > { %2820 = vmatpush2.bf16.msra.mxu1 %v9923_v56  ;;  %2544 = vmatprep.mubr.bf16.mxu0 %v10815_v57  ;;  %v10890_v56 = vpack.c.bf16 %v594_v35, %v587_v34  ;;  %v10929_v35 = vpack.c.bf16 %v623_v14, %v616_v13  ;;  %v9980_v13 = vld [vmem:[%s16781_s1 + $0x520] ss:$16 sps:$4 sm:$0xff]   ;;  %v9985_v14 = vld [vmem:[%s16781_s1 + $0x504] ss:$16 sps:$4 sm:$0xff]  }
  0x89   : > { %2821 = vmatprep.subr.bf16.mxu1 %v9928_v58  ;;  %2784 = vmatprep.mubr.bf16.mxu1 %v10820_v59  ;;  %v10892_v58 = vpack.c.bf16 %v484_v41, %v477_v37  ;;  %v9974_v37 = vld [vmem:[%s16781_s1 + $0x560] ss:$16 sps:$4 sm:$0xff]   ;;  %v554_v59 = vld [vmem:[%s10485_s19 + $0x278] sm:$0xff] }
  0x8a   : > { %17068 = vst [vmem:[#allocation43_spill] sm:$0xff] %v10890_v56  ;;  %3167 = vmatpush2.bf16.msra.mxu0 %v9965_v38  ;;  %17074 = vst [vmem:[#allocation49_spill] sm:$0xff] %v10929_v35  ;;  %v9979_v38 = vld [vmem:[%s16781_s1 + $0x544] ss:$16 sps:$4 sm:$0xff]  }
  0x8b   : > { %17069 = vst [vmem:[#allocation44_spill] sm:$0xff] %v10892_v58  ;;  %3168 = vmatprep.subr.bf16.mxu0 %v9970_v43  ;;  %v615_v41 = vld [vmem:[%s10485_s19 + $0x460] sm:$0xff]  ;;  %v622_v43 = vld [vmem:[%s10485_s19 + $0x498] sm:$0xff] }
  0x8c   : > { %2822 = vmatpush2.bf16.msra.mxu1 %v9926_v60  ;;  %v9935_v60 = vld [vmem:[%s16781_s1 + $0x600] ss:$16 sps:$4 sm:$0xff]  }
  0x8d   : > { %2823 = vmatprep.subr.bf16.mxu1 %v9931_v10  ;;  %v491_v10 = vld [vmem:[%s10485_s19 + $0x80] sm:$0xff] }
  0x8e   : > { %3169 = vmatpush2.bf16.msra.mxu0 %v9968_v6  ;;  %v10927_v34 = vpack.c.bf16 %v498_v12, %v491_v10  ;;  %v9977_v6 = vld [vmem:[%s16781_s1 + $0x540] ss:$16 sps:$4 sm:$0xff]  }
  0x8f   : > { %2545 = vmatmul.mubr.bf16.gmra.mxu0 %v10849_v21  ;;  %2785 = vmatmul.mubr.bf16.gmra.mxu1 %v10851_v22  ;;  %v540_v22 = vld [vmem:[%s10485_s19 + $0x208] sm:$0xff]  ;;  %v571_v57 = vld [vmem:[%s10485_s19 + $0x300] sm:$0xff] }
  0x90   : > { %2824 = vmatpush2.bf16.msra.mxu1 %v9929_v23  ;;  %2554 = vmatprep.mubr.bf16.mxu0 %v10856_v25  ;;  %v9971_v23 = vld [vmem:[%s16781_s1 + $0x580] ss:$16 sps:$4 sm:$0xff]   ;;  %17073 = vst [vmem:[#allocation48_spill] sm:$0xff] %v10927_v34  ;;  %v564_v21 = vld [vmem:[%s10485_s19 + $0x2c8] sm:$0xff] }
  0x91   : > { %2825 = vmatprep.subr.bf16.mxu1 %v9934_v29  ;;  %2827 = vmatprep.mubr.bf16.mxu1 %v10861_v31  ;;  %v9976_v29 = vld [vmem:[%s16781_s1 + $0x564] ss:$16 sps:$4 sm:$0xff]   ;;  %v11467_v30 = vpack.c.bf16 %v571_v57, %v564_v21  ;;  %v570_v21 = vld [vmem:[%s10485_s19 + $0x2f8] sm:$0xff] }
  0x92   : > { %3170 = vmatprep.subr.bf16.mxu0 %v9973_v11  ;;  %v10961_v11 = vpack.c.bf16 %v637_v51, %v630_v49  ;;  %v793_v25 = vld [vmem:[%s10485_s19 + $0x9f0] sm:$0xff]  ;;  %v563_v57 = vld [vmem:[%s10485_s19 + $0x2c0] sm:$0xff] }
  0x93   : > { %3171 = vmatpush2.bf16.msra.mxu0 %v9971_v23  ;;  %v519_v23 = vld [vmem:[%s10485_s19 + $0x160] sm:$0xff]  ;;  %17174 = vst [vmem:[#allocation149_spill] sm:$0xff] %v11467_v30 }
  0x94   : > { %2826 = vmatpush2.bf16.msra.mxu1 %v9932_v33  ;;  %v10925_v33 = vpack.c.bf16 %v608_v9, %v601_v8  ;;  %3172 = vmatprep.subr.bf16.mxu0 %v9976_v29  ;;  %v9982_v8 = vld [vmem:[%s16781_s1 + $0x524] ss:$16 sps:$4 sm:$0xff]   ;;  %v10957_v9 = vpack.c.bf16 %v622_v43, %v615_v41  ;;  %17078 = vst [vmem:[#allocation53_spill] sm:$0xff] %v10961_v11  ;;  %v526_v29 = vld [vmem:[%s10485_s19 + $0x198] sm:$0xff] }
  0x95   : > { %3515 = vmatprep.subr.bf16.mxu1 %v9937_v45  ;;  %v505_v45 = vld [vmem:[%s10485_s19 + $0xf0] sm:$0xff]  ;;  %v534_v41 = vld [vmem:[%s10485_s19 + $0x1d8] sm:$0xff]  ;;  %v10988_v49 = vpack.c.bf16 %v526_v29, %v519_v23 }
  0x96   : > { %17072 = vst [vmem:[#allocation47_spill] sm:$0xff] %v10925_v33  ;;  %17076 = vst [vmem:[#allocation51_spill] sm:$0xff] %v10957_v9  ;;  %v10959_v10 = vpack.c.bf16 %v512_v46, %v505_v45  ;;  %v541_v43 = vld [vmem:[%s10485_s19 + $0x210] sm:$0xff]  ;;  %v10986_v46 = vpack.c.bf16 %v636_v17, %v629_v16  ;;  %v548_v16 = vld [vmem:[%s10485_s19 + $0x248] sm:$0xff] }
  0x97   : > { %2555 = vmatmul.mubr.bf16.gmra.mxu0 %v10890_v56  ;;  %2828 = vmatmul.mubr.bf16.vlgmr.msra.gmra.mxu1 %v10892_v58  ;;  %v9983_v45 = vld [vmem:[%s16781_s1 + $0x500] ss:$16 sps:$4 sm:$0xff]   ;;  %17081 = vst [vmem:[#allocation56_spill] sm:$0xff] %v10988_v49 }
  0x98   : > { %3516 = vmatpush1.bf16.msra.mxu1 %v9935_v60  ;;  %2564 = vmatprep.mubr.bf16.mxu0 %v10897_v61  ;;  %v527_v60 = vld [vmem:[%s10485_s19 + $0x1a0] sm:$0xff]  ;;  %17077 = vst [vmem:[#allocation52_spill] sm:$0xff] %v10959_v10  ;;  %17080 = vst [vmem:[#allocation55_spill] sm:$0xff] %v10986_v46 }
  0x99   : > { %2837 = vmatprep.mubr.bf16.mxu1 %v10899_v3  ;;  %3173 = vmatpush2.bf16.msra.mxu0 %v9974_v37  ;;  %v10963_v12 = vpack.c.bf16 %v527_v60, %v520_v53  ;;  %v644_v37 = vld [vmem:[%s10485_s19 + $0x548] sm:$0xff]  ;;  %v10992_v53 = vpack.c.bf16 %v541_v43, %v534_v41  ;;  %v643_v60 = vld [vmem:[%s10485_s19 + $0x540] sm:$0xff]  ;;  %v657_v41 = vld [vmem:[%s10485_s19 + $0x5b0] sm:$0xff] }
  0x9a   : > { %3174 = vmatprep.subr.bf16.mxu0 %v9979_v38  ;;  %v651_v38 = vld [vmem:[%s10485_s19 + $0x580] sm:$0xff]  ;;  %v664_v43 = vld [vmem:[%s10485_s19 + $0x5e8] sm:$0xff] }
  0x9b   : > { %17079 = vst [vmem:[#allocation54_spill] sm:$0xff] %v10963_v12  ;;  %v10990_v51 = vpack.c.bf16 %v651_v38, %v644_v37  ;;  %17083 = vst [vmem:[#allocation58_spill] sm:$0xff] %v10992_v53  ;;  %v555_v17 = vld [vmem:[%s10485_s19 + $0x280] sm:$0xff] }
  0x9c   : > { %v11012_v38 = vpack.c.bf16 %v555_v17, %v548_v16 }
  0x9d   : > { %3175 = vmatpush2.bf16.msra.mxu0 %v9977_v6  ;;  %17082 = vst [vmem:[#allocation57_spill] sm:$0xff] %v10990_v51  ;;  %v650_v6 = vld [vmem:[%s10485_s19 + $0x578] sm:$0xff] }
  0x9e   : > { %3176 = vmatprep.subr.bf16.mxu0 %v9982_v8  ;;  %v533_v8 = vld [vmem:[%s10485_s19 + $0x1d0] sm:$0xff]  ;;  %v11006_v23 = vpack.c.bf16 %v650_v6, %v643_v60  ;;  %17087 = vst [vmem:[#allocation62_spill] sm:$0xff] %v11012_v38  ;;  %v672_v60 = vld [vmem:[%s10485_s19 + $0x628] sm:$0xff]  ;;  %v562_v6 = vld [vmem:[%s10485_s19 + $0x2b8] sm:$0xff] }
  0x9f   : > { %2565 = vmatmul.mubr.bf16.gmra.mxu0 %v10925_v33  ;;  %2838 = vmatmul.mubr.bf16.gmra.mxu1 %v10927_v34  ;;  %v11008_v29 = vpack.c.bf16 %v540_v22, %v533_v8  ;;  %v679_v22 = vld [vmem:[%s10485_s19 + $0x660] sm:$0xff]  ;;  %v569_v8 = vld [vmem:[%s10485_s19 + $0x2f0] sm:$0xff]  ;;  %v522_v34 = vld [vmem:[%s10485_s19 + $0x178] sm:$0xff] }
  0xa0   : > { %2574 = vmatprep.mubr.bf16.mxu0 %v10929_v35  ;;  %2847 = vmatprep.mubr.bf16.mxu1 %v10931_v36  ;;  %17084 = vst [vmem:[#allocation59_spill] sm:$0xff] %v11006_v23  ;;  %v11030_v16 = vpack.c.bf16 %v679_v22, %v672_v60  ;;  %v11032_v17 = vpack.c.bf16 %v569_v8, %v562_v6  ;;  %v10007_v33 = vld [vmem:[%s16781_s1 + $0x48] ss:$16 sps:$4 sm:$0xff]  }
  0xa1   : > { %3177 = vmatpush2.bf16.msra.mxu0 %v9980_v13  ;;  %v658_v13 = vld [vmem:[%s10485_s19 + $0x5b8] sm:$0xff]  ;;  %17085 = vst [vmem:[#allocation60_spill] sm:$0xff] %v11008_v29  ;;  %v11046_v60 = vpack.c.bf16 %v678_v32, %v671_v55  ;;  %v11048_v22 = vpack.c.bf16 %v568_v7, %v561_v28  ;;  %v700_v32 = vld [vmem:[%s10485_s19 + $0x708] sm:$0xff]  ;;  %v707_v7 = vld [vmem:[%s10485_s19 + $0x740] sm:$0xff] }
  0xa2   : > { %3178 = vmatprep.subr.bf16.mxu0 %v9985_v14  ;;  %v665_v14 = vld [vmem:[%s10485_s19 + $0x5f0] sm:$0xff]  ;;  %17090 = vst [vmem:[#allocation65_spill] sm:$0xff] %v11030_v16  ;;  %17091 = vst [vmem:[#allocation66_spill] sm:$0xff] %v11032_v17  ;;  %v590_v28 = vld [vmem:[%s10485_s19 + $0x398] sm:$0xff] }
  0xa3   : > { %v11010_v37 = vpack.c.bf16 %v665_v14, %v658_v13  ;;  %v11026_v13 = vpack.c.bf16 %v664_v43, %v657_v41  ;;  %v686_v41 = vld [vmem:[%s10485_s19 + $0x698] sm:$0xff]  ;;  %v576_v43 = vld [vmem:[%s10485_s19 + $0x328] sm:$0xff]  ;;  %17092 = vst [vmem:[#allocation67_spill] sm:$0xff] %v11046_v60  ;;  %17093 = vst [vmem:[#allocation68_spill] sm:$0xff] %v11048_v22 }
  0xa4   : > { %v597_v55 = vld [vmem:[%s10485_s19 + $0x3d0] sm:$0xff] }
  0xa5   : > { %3179 = vmatpush2.bf16.msra.mxu0 %v9983_v45  ;;  %17086 = vst [vmem:[#allocation61_spill] sm:$0xff] %v11010_v37  ;;  %v547_v45 = vld [vmem:[%s10485_s19 + $0x240] sm:$0xff]  ;;  %17088 = vst [vmem:[#allocation63_spill] sm:$0xff] %v11026_v13 }
  0xa6   : > { %v11028_v14 = vpack.c.bf16 %v554_v59, %v547_v45  ;;  %v693_v59 = vld [vmem:[%s10485_s19 + $0x6d0] sm:$0xff]  ;;  %v583_v45 = vld [vmem:[%s10485_s19 + $0x360] sm:$0xff] }
  0xa7   : > { %2575 = vmatmul.mubr.bf16.gmra.mxu0 %v10957_v9  ;;  %2848 = vmatmul.mubr.bf16.gmra.mxu1 %v10959_v10  ;;  %v11050_v6 = vpack.c.bf16 %v693_v59, %v686_v41  ;;  %v11052_v8 = vpack.c.bf16 %v583_v45, %v576_v43  ;;  %v11066_v41 = vpack.c.bf16 %v692_v44, %v685_v1  ;;  %v714_v44 = vld [vmem:[%s10485_s19 + $0x778] sm:$0xff]  ;;  %v611_v1 = vld [vmem:[%s10485_s19 + $0x440] sm:$0xff] }
  0xa8   : > { %2584 = vmatprep.mubr.bf16.mxu0 %v10961_v11  ;;  %2857 = vmatprep.mubr.bf16.mxu1 %v10963_v12  ;;  %17089 = vst [vmem:[#allocation64_spill] sm:$0xff] %v11028_v14  ;;  %v11068_v59 = vpack.c.bf16 %v582_v26, %v575_v40  ;;  %v11070_v43 = vpack.c.bf16 %v707_v7, %v700_v32  ;;  %v721_v26 = vld [vmem:[%s10485_s19 + $0x7b0] sm:$0xff]  ;;  %v604_v40 = vld [vmem:[%s10485_s19 + $0x408] sm:$0xff] }
  0xa9   : > { %17094 = vst [vmem:[#allocation69_spill] sm:$0xff] %v11050_v6  ;;  %17095 = vst [vmem:[#allocation70_spill] sm:$0xff] %v11052_v8  ;;  %v11072_v45 = vpack.c.bf16 %v597_v55, %v590_v28  ;;  %v11086_v32 = vpack.c.bf16 %v706_v5, %v699_v20  ;;  %v11088_v7 = vpack.c.bf16 %v596_v52, %v589_v0  ;;  %v728_v5 = vld [vmem:[%s10485_s19 + $0x7e8] sm:$0xff]  ;;  %v735_v52 = vld [vmem:[%s10485_s19 + $0x820] sm:$0xff] }
  0xaa   : > { %17096 = vst [vmem:[#allocation71_spill] sm:$0xff] %v11066_v41  ;;  %17097 = vst [vmem:[#allocation72_spill] sm:$0xff] %v11068_v59  ;;  %v11090_v28 = vpack.c.bf16 %v721_v26, %v714_v44  ;;  %v11092_v55 = vpack.c.bf16 %v611_v1, %v604_v40  ;;  %v618_v0 = vld [vmem:[%s10485_s19 + $0x478] sm:$0xff]  ;;  %v625_v20 = vld [vmem:[%s10485_s19 + $0x4b0] sm:$0xff]  ;;  %v11106_v44 = vpack.c.bf16 %v720_v19, %v713_v48 }
  0xab   : > { %17098 = vst [vmem:[#allocation73_spill] sm:$0xff] %v11070_v43  ;;  %17099 = vst [vmem:[#allocation74_spill] sm:$0xff] %v11072_v45  ;;  %v11110_v40 = vpack.c.bf16 %v735_v52, %v728_v5  ;;  %v11112_v1 = vpack.c.bf16 %v625_v20, %v618_v0  ;;  %v742_v19 = vld [vmem:[%s10485_s19 + $0x858] sm:$0xff]  ;;  %v749_v48 = vld [vmem:[%s10485_s19 + $0x890] sm:$0xff] }
  0xac   : > { %17100 = vst [vmem:[#allocation75_spill] sm:$0xff] %v11086_v32  ;;  %17101 = vst [vmem:[#allocation76_spill] sm:$0xff] %v11088_v7  ;;  %v11130_v0 = vpack.c.bf16 %v749_v48, %v742_v19 }
  0xad   : > { %17102 = vst [vmem:[#allocation77_spill] sm:$0xff] %v11090_v28  ;;  %17103 = vst [vmem:[#allocation78_spill] sm:$0xff] %v11092_v55 }
  0xae   : > { %17104 = vst [vmem:[#allocation79_spill] sm:$0xff] %v11106_v44  ;;  %17106 = vst [vmem:[#allocation81_spill] sm:$0xff] %v11110_v40 }
  0xaf   : > { %2585 = vmatmul.mubr.bf16.gmra.mxu0 %v10986_v46  ;;  %2858 = vmatmul.mubr.bf16.gmra.mxu1 %v10988_v49  ;;  %17107 = vst [vmem:[#allocation82_spill] sm:$0xff] %v11112_v1  ;;  %17110 = vst [vmem:[#allocation85_spill] sm:$0xff] %v11130_v0  ;;  %v652_v49 = vld [vmem:[%s10485_s19 + $0x588] sm:$0xff] }
  0xb0   : > { %2594 = vmatprep.mubr.bf16.mxu0 %v10990_v51  ;;  %2867 = vmatprep.mubr.bf16.mxu1 %v10992_v53  ;;  %v645_v53 = vld [vmem:[%s10485_s19 + $0x550] sm:$0xff] }
  0xb1   : > { %v557_v51 = vld [vmem:[%s10485_s19 + $0x290] sm:$0xff] }
  0xb7   : > { %2595 = vmatmul.mubr.bf16.gmra.mxu0 %v11006_v23  ;;  %2868 = vmatmul.mubr.bf16.gmra.mxu1 %v11008_v29  ;;  %v9988_v29 = vld [vmem:[%s16781_s1 + $0xec] ss:$16 sps:$4 sm:$0xff]  }
  0xb8   : > { %2604 = vmatprep.mubr.bf16.mxu0 %v11010_v37  ;;  %2877 = vmatprep.mubr.bf16.mxu1 %v11012_v38  ;;  %v638_v38 = vld [vmem:[%s10485_s19 + $0x518] sm:$0xff] }
  0xb9   : > { %3854 = vmatprep.subr.bf16.mxu0 %v9988_v29  ;;  %v770_v29 = vld [vmem:[%s10485_s19 + $0x938] sm:$0xff] }
  0xba   : > { %v550_v23 = vld [vmem:[%s10485_s19 + $0x258] sm:$0xff] }
  0xbb   : > { %v11425_v11 = vpack.c.bf16 %v557_v51, %v550_v23  ;;  %v771_v51 = vld [vmem:[%s10485_s19 + $0x940] sm:$0xff]  ;;  %v778_v23 = vld [vmem:[%s10485_s19 + $0x978] sm:$0xff] }
  0xbd   : > { %17166 = vst [vmem:[#allocation141_spill] sm:$0xff] %v11425_v11 }
  0xbf   : > { %2605 = vmatmul.mubr.bf16.gmra.mxu0 %v11026_v13  ;;  %2878 = vmatmul.mubr.bf16.gmra.mxu1 %v11028_v14  ;;  %v631_v14 = vld [vmem:[%s10485_s19 + $0x4e0] sm:$0xff] }
  0xc0   : > { %2614 = vmatprep.mubr.bf16.mxu0 %v11030_v16  ;;  %2887 = vmatprep.mubr.bf16.mxu1 %v11032_v17  ;;  %v624_v17 = vld [vmem:[%s10485_s19 + $0x4a8] sm:$0xff]  ;;  %v11151_v48 = vpack.c.bf16 %v638_v38, %v631_v14  ;;  %v777_v38 = vld [vmem:[%s10485_s19 + $0x970] sm:$0xff] }
  0xc1   : > { %v660_v14 = vld [vmem:[%s10485_s19 + $0x5c8] sm:$0xff] }
  0xc2   : > { %17113 = vst [vmem:[#allocation88_spill] sm:$0xff] %v11151_v48 }
  0xc7   : > { %2615 = vmatmul.mubr.bf16.gmra.mxu0 %v11046_v60  ;;  %2888 = vmatmul.mubr.bf16.gmra.mxu1 %v11048_v22  ;;  %v617_v22 = vld [vmem:[%s10485_s19 + $0x470] sm:$0xff] }
  0xc8   : > { %2624 = vmatprep.mubr.bf16.mxu0 %v11050_v6  ;;  %2897 = vmatprep.mubr.bf16.mxu1 %v11052_v8  ;;  %v610_v8 = vld [vmem:[%s10485_s19 + $0x438] sm:$0xff]  ;;  %v11128_v52 = vpack.c.bf16 %v624_v17, %v617_v22  ;;  %v756_v17 = vld [vmem:[%s10485_s19 + $0x8c8] sm:$0xff]  ;;  %v763_v22 = vld [vmem:[%s10485_s19 + $0x900] sm:$0xff] }
  0xc9   : > { %v543_v6 = vld [vmem:[%s10485_s19 + $0x220] sm:$0xff] }
  0xca   : > { %17109 = vst [vmem:[#allocation84_spill] sm:$0xff] %v11128_v52 }
  0xcf   : > { %2625 = vmatmul.mubr.bf16.gmra.mxu0 %v11066_v41  ;;  %2898 = vmatmul.mubr.bf16.gmra.mxu1 %v11068_v59  ;;  %v603_v59 = vld [vmem:[%s10485_s19 + $0x400] sm:$0xff]  ;;  %v536_v41 = vld [vmem:[%s10485_s19 + $0x1e8] sm:$0xff] }
  0xd0   : > { %2634 = vmatprep.mubr.bf16.mxu0 %v11070_v43  ;;  %2907 = vmatprep.mubr.bf16.mxu1 %v11072_v45  ;;  %v11108_v26 = vpack.c.bf16 %v610_v8, %v603_v59  ;;  %v734_v45 = vld [vmem:[%s10485_s19 + $0x818] sm:$0xff]  ;;  %v632_v8 = vld [vmem:[%s10485_s19 + $0x4e8] sm:$0xff]  ;;  %v639_v59 = vld [vmem:[%s10485_s19 + $0x520] sm:$0xff]  ;;  %v11389_v16 = vpack.c.bf16 %v543_v6, %v536_v41 }
  0xd1   : > { %v11132_v20 = vpack.c.bf16 %v639_v59, %v632_v8  ;;  %v11153_v8 = vpack.c.bf16 %v763_v22, %v756_v17  ;;  %v11171_v17 = vpack.c.bf16 %v652_v49, %v645_v53  ;;  %v11173_v22 = vpack.c.bf16 %v777_v38, %v770_v29  ;;  %v791_v49 = vld [vmem:[%s10485_s19 + $0x9e0] sm:$0xff]  ;;  %v674_v53 = vld [vmem:[%s10485_s19 + $0x638] sm:$0xff]  ;;  %v765_v43 = vld [vmem:[%s10485_s19 + $0x910] sm:$0xff] }
  0xd2   : > { %17105 = vst [vmem:[#allocation80_spill] sm:$0xff] %v11108_v26  ;;  %17158 = vst [vmem:[#allocation133_spill] sm:$0xff] %v11389_v16  ;;  %v535_v6 = vld [vmem:[%s10485_s19 + $0x1e0] sm:$0xff]  ;;  %v542_v41 = vld [vmem:[%s10485_s19 + $0x218] sm:$0xff] }
  0xd3   : > { %17111 = vst [vmem:[#allocation86_spill] sm:$0xff] %v11132_v20  ;;  %17114 = vst [vmem:[#allocation89_spill] sm:$0xff] %v11153_v8 }
  0xd4   : > { %17117 = vst [vmem:[#allocation92_spill] sm:$0xff] %v11171_v17  ;;  %17118 = vst [vmem:[#allocation93_spill] sm:$0xff] %v11173_v22 }
  0xd7   : > { %2635 = vmatmul.mubr.bf16.gmra.mxu0 %v11086_v32  ;;  %2908 = vmatmul.mubr.bf16.gmra.mxu1 %v11088_v7  ;;  %v727_v7 = vld [vmem:[%s10485_s19 + $0x7e0] sm:$0xff] }
  0xd8   : > { %2644 = vmatprep.mubr.bf16.mxu0 %v11090_v28  ;;  %2917 = vmatprep.mubr.bf16.mxu1 %v11092_v55  ;;  %v11126_v5 = vpack.c.bf16 %v734_v45, %v727_v7  ;;  %v748_v55 = vld [vmem:[%s10485_s19 + $0x888] sm:$0xff]  ;;  %v646_v45 = vld [vmem:[%s10485_s19 + $0x558] sm:$0xff]  ;;  %v653_v7 = vld [vmem:[%s10485_s19 + $0x590] sm:$0xff] }
  0xd9   : > { %v11155_v59 = vpack.c.bf16 %v653_v7, %v646_v45  ;;  %v769_v7 = vld [vmem:[%s10485_s19 + $0x930] sm:$0xff] }
  0xda   : > { %17108 = vst [vmem:[#allocation83_spill] sm:$0xff] %v11126_v5 }
  0xdb   : > { %17115 = vst [vmem:[#allocation90_spill] sm:$0xff] %v11155_v59 }
  0xdf   : > { %2645 = vmatmul.mubr.bf16.gmra.mxu0 %v11106_v44  ;;  %2918 = vmatmul.mubr.bf16.gmra.mxu1 %v11108_v26  ;;  %v741_v26 = vld [vmem:[%s10485_s19 + $0x850] sm:$0xff] }
  0xe0   : > { %2654 = vmatprep.mubr.bf16.mxu0 %v11110_v40  ;;  %2927 = vmatprep.mubr.bf16.mxu1 %v11112_v1  ;;  %v11149_v19 = vpack.c.bf16 %v748_v55, %v741_v26  ;;  %v762_v1 = vld [vmem:[%s10485_s19 + $0x8f8] sm:$0xff]  ;;  %v667_v55 = vld [vmem:[%s10485_s19 + $0x600] sm:$0xff]  ;;  %v529_v44 = vld [vmem:[%s10485_s19 + $0x1b0] sm:$0xff] }
  0xe1   : > { %v11175_v45 = vpack.c.bf16 %v667_v55, %v660_v14 }
  0xe2   : > { %17112 = vst [vmem:[#allocation87_spill] sm:$0xff] %v11149_v19 }
  0xe3   : > { %17119 = vst [vmem:[#allocation94_spill] sm:$0xff] %v11175_v45 }
  0xe7   : > { %2655 = vmatmul.mubr.bf16.gmra.mxu0 %v11126_v5  ;;  %2928 = vmatmul.mubr.bf16.gmra.mxu1 %v11128_v52  ;;  %v755_v52 = vld [vmem:[%s10485_s19 + $0x8c0] sm:$0xff] }
  0xe8   : > { %2664 = vmatprep.mubr.bf16.mxu0 %v11130_v0  ;;  %2937 = vmatprep.mubr.bf16.mxu1 %v11132_v20  ;;  %v11169_v26 = vpack.c.bf16 %v762_v1, %v755_v52  ;;  %v659_v20 = vld [vmem:[%s10485_s19 + $0x5c0] sm:$0xff]  ;;  %v784_v1 = vld [vmem:[%s10485_s19 + $0x9a8] sm:$0xff]  ;;  %v681_v52 = vld [vmem:[%s10485_s19 + $0x670] sm:$0xff] }
  0xe9   : > { %v11193_v14 = vpack.c.bf16 %v791_v49, %v784_v1  ;;  %v11195_v55 = vpack.c.bf16 %v681_v52, %v674_v53 }
  0xea   : > { %17116 = vst [vmem:[#allocation91_spill] sm:$0xff] %v11169_v26 }
  0xeb   : > { %17122 = vst [vmem:[#allocation97_spill] sm:$0xff] %v11193_v14  ;;  %17123 = vst [vmem:[#allocation98_spill] sm:$0xff] %v11195_v55 }
  0xef   : > { %2665 = vmatmul.mubr.bf16.gmra.mxu0 %v11149_v19  ;;  %2938 = vmatmul.mubr.bf16.gmra.mxu1 %v11151_v48  ;;  %v776_v48 = vld [vmem:[%s10485_s19 + $0x968] sm:$0xff]  ;;  %v666_v19 = vld [vmem:[%s10485_s19 + $0x5f8] sm:$0xff] }
  0xf0   : > { %2674 = vmatprep.mubr.bf16.mxu0 %v11153_v8  ;;  %2947 = vmatprep.mubr.bf16.mxu1 %v11155_v59  ;;  %v11189_v29 = vpack.c.bf16 %v776_v48, %v769_v7  ;;  %v11191_v38 = vpack.c.bf16 %v666_v19, %v659_v20  ;;  %v790_v59 = vld [vmem:[%s10485_s19 + $0x9d8] sm:$0xff]  ;;  %v680_v8 = vld [vmem:[%s10485_s19 + $0x668] sm:$0xff]  ;;  %v805_v20 = vld [vmem:[%s10485_s19 + $0xa50] sm:$0xff] }
  0xf1   : > { %v798_v48 = vld [vmem:[%s10485_s19 + $0xa18] sm:$0xff]  ;;  %v688_v19 = vld [vmem:[%s10485_s19 + $0x6a8] sm:$0xff]  ;;  %v695_v7 = vld [vmem:[%s10485_s19 + $0x6e0] sm:$0xff] }
  0xf2   : > { %17120 = vst [vmem:[#allocation95_spill] sm:$0xff] %v11189_v29  ;;  %17121 = vst [vmem:[#allocation96_spill] sm:$0xff] %v11191_v38  ;;  %v11213_v53 = vpack.c.bf16 %v805_v20, %v798_v48  ;;  %v11215_v52 = vpack.c.bf16 %v695_v7, %v688_v19  ;;  %v701_v7 = vld [vmem:[%s10485_s19 + $0x710] sm:$0xff] }
  0xf4   : > { %17126 = vst [vmem:[#allocation101_spill] sm:$0xff] %v11213_v53  ;;  %17127 = vst [vmem:[#allocation102_spill] sm:$0xff] %v11215_v52 }
  0xf7   : > { %2675 = vmatmul.mubr.bf16.gmra.mxu0 %v11169_v26  ;;  %2948 = vmatmul.mubr.bf16.gmra.mxu1 %v11171_v17  ;;  %v783_v17 = vld [vmem:[%s10485_s19 + $0x9a0] sm:$0xff]  ;;  %v673_v26 = vld [vmem:[%s10485_s19 + $0x630] sm:$0xff] }
  0xf8   : > { %2684 = vmatprep.mubr.bf16.mxu0 %v11173_v22  ;;  %2957 = vmatprep.mubr.bf16.mxu1 %v11175_v45  ;;  %v11209_v1 = vpack.c.bf16 %v790_v59, %v783_v17  ;;  %v11211_v49 = vpack.c.bf16 %v680_v8, %v673_v26  ;;  %v804_v45 = vld [vmem:[%s10485_s19 + $0xa48] sm:$0xff]  ;;  %v694_v22 = vld [vmem:[%s10485_s19 + $0x6d8] sm:$0xff]  ;;  %v709_v59 = vld [vmem:[%s10485_s19 + $0x750] sm:$0xff] }
  0xf9   : > { %v480_v8 = vld [vmem:[%s10485_s19 + $0x28] sm:$0xff]  ;;  %v487_v26 = vld [vmem:[%s10485_s19 + $0x60] sm:$0xff] }
  0xfa   : > { %17124 = vst [vmem:[#allocation99_spill] sm:$0xff] %v11209_v1  ;;  %17125 = vst [vmem:[#allocation100_spill] sm:$0xff] %v11211_v49  ;;  %v11235_v19 = vpack.c.bf16 %v487_v26, %v480_v8 }
  0xfc   : > { %17131 = vst [vmem:[#allocation106_spill] sm:$0xff] %v11235_v19 }
  0xff   : > { %2685 = vmatmul.mubr.bf16.gmra.mxu0 %v11189_v29  ;;  %2958 = vmatmul.mubr.bf16.gmra.mxu1 %v11191_v38  ;;  %v797_v38 = vld [vmem:[%s10485_s19 + $0xa10] sm:$0xff]  ;;  %v687_v29 = vld [vmem:[%s10485_s19 + $0x6a0] sm:$0xff] }
 0x100   : > { %2694 = vmatprep.mubr.bf16.mxu0 %v11193_v14  ;;  %2967 = vmatprep.mubr.bf16.mxu1 %v11195_v55  ;;  %v702_v14 = vld [vmem:[%s10485_s19 + $0x718] sm:$0xff]  ;;  %v11229_v17 = vpack.c.bf16 %v804_v45, %v797_v38  ;;  %v11231_v48 = vpack.c.bf16 %v694_v22, %v687_v29  ;;  %v716_v22 = vld [vmem:[%s10485_s19 + $0x788] sm:$0xff]  ;;  %v723_v29 = vld [vmem:[%s10485_s19 + $0x7c0] sm:$0xff] }
 0x101   : > { %v11233_v20 = vpack.c.bf16 %v709_v59, %v702_v14  ;;  %v486_v45 = vld [vmem:[%s10485_s19 + $0x58] sm:$0xff]  ;;  %v501_v14 = vld [vmem:[%s10485_s19 + $0xd0] sm:$0xff]  ;;  %v11253_v26 = vpack.c.bf16 %v723_v29, %v716_v22  ;;  %v500_v22 = vld [vmem:[%s10485_s19 + $0xc8] sm:$0xff] }
 0x102   : > { %17128 = vst [vmem:[#allocation103_spill] sm:$0xff] %v11229_v17  ;;  %17129 = vst [vmem:[#allocation104_spill] sm:$0xff] %v11231_v48  ;;  %v494_v38 = vld [vmem:[%s10485_s19 + $0x98] sm:$0xff] }
 0x103   : > { %17130 = vst [vmem:[#allocation105_spill] sm:$0xff] %v11233_v20  ;;  %17134 = vst [vmem:[#allocation109_spill] sm:$0xff] %v11253_v26  ;;  %v9991_v55 = vld [vmem:[%s16781_s1 + $0xcc] ss:$16 sps:$4 sm:$0xff]  }
 0x104   : > { %v730_v29 = vld [vmem:[%s10485_s19 + $0x7f8] sm:$0xff] }
 0x107   : > { %2695 = vmatmul.mubr.bf16.gmra.mxu0 %v11209_v1  ;;  %2968 = vmatmul.mubr.bf16.gmra.mxu1 %v11211_v49  ;;  %v708_v49 = vld [vmem:[%s10485_s19 + $0x748] sm:$0xff]  ;;  %v515_v1 = vld [vmem:[%s10485_s19 + $0x140] sm:$0xff] }
 0x108   : > { %2704 = vmatprep.mubr.bf16.mxu0 %v11213_v53  ;;  %2977 = vmatprep.mubr.bf16.mxu1 %v11215_v52  ;;  %v479_v52 = vld [vmem:[%s10485_s19 + $0x20] sm:$0xff]  ;;  %v11249_v59 = vpack.c.bf16 %v708_v49, %v701_v7  ;;  %v722_v7 = vld [vmem:[%s10485_s19 + $0x7b8] sm:$0xff] }
 0x109   : > { %v11251_v8 = vpack.c.bf16 %v486_v45, %v479_v52  ;;  %v493_v45 = vld [vmem:[%s10485_s19 + $0x90] sm:$0xff] }
 0x10a   : > { %17132 = vst [vmem:[#allocation107_spill] sm:$0xff] %v11249_v59 }
 0x10b   : > { %17133 = vst [vmem:[#allocation108_spill] sm:$0xff] %v11251_v8 }
 0x10f   : > { %2705 = vmatmul.mubr.bf16.gmra.mxu0 %v11229_v17  ;;  %2978 = vmatmul.mubr.bf16.gmra.mxu1 %v11231_v48  ;;  %v715_v48 = vld [vmem:[%s10485_s19 + $0x780] sm:$0xff] }
 0x110   : > { %2987 = vmatprep.mubr.bf16.mxu1 %v11233_v20  ;;  %3180 = vmatprep.mubr.bf16.mxu0 %v11235_v19  ;;  %v11255_v20 = vpack.c.bf16 %v501_v14, %v494_v38  ;;  %v9986_v19 = vld [vmem:[%s16781_s1 + $0xe8] ss:$16 sps:$4 sm:$0xff]   ;;  %v737_v38 = vld [vmem:[%s10485_s19 + $0x830] sm:$0xff]  ;;  %v10000_v14 = vld [vmem:[%s16781_s1 + $0x2ec] ss:$16 sps:$4 sm:$0xff]   ;;  %v11296_v0 = vpack.c.bf16 %v722_v7, %v715_v48 }
 0x111   : > { %4207 = vmatprep.subr.bf16.mxu1 %v10000_v14  ;;  %v11300_v10 = vpack.c.bf16 %v737_v38, %v730_v29  ;;  %v9992_v48 = vld [vmem:[%s16781_s1 + $0xa8] ss:$16 sps:$4 sm:$0xff]   ;;  %v9997_v7 = vld [vmem:[%s16781_s1 + $0x8c] ss:$16 sps:$4 sm:$0xff]   ;;  %v751_v38 = vld [vmem:[%s10485_s19 + $0x8a0] sm:$0xff] }
 0x112   : > { %17135 = vst [vmem:[#allocation110_spill] sm:$0xff] %v11255_v20  ;;  %17139 = vst [vmem:[#allocation114_spill] sm:$0xff] %v11296_v0  ;;  %v744_v29 = vld [vmem:[%s10485_s19 + $0x868] sm:$0xff] }
 0x113   : > { %17141 = vst [vmem:[#allocation116_spill] sm:$0xff] %v11300_v10  ;;  %v11345_v28 = vpack.c.bf16 %v751_v38, %v744_v29  ;;  %v528_v29 = vld [vmem:[%s10485_s19 + $0x1a8] sm:$0xff]  ;;  %v758_v38 = vld [vmem:[%s10485_s19 + $0x8d8] sm:$0xff] }
 0x114   : > { %v11387_v60 = vpack.c.bf16 %v765_v43, %v758_v38  ;;  %v764_v43 = vld [vmem:[%s10485_s19 + $0x908] sm:$0xff]  ;;  %v779_v38 = vld [vmem:[%s10485_s19 + $0x980] sm:$0xff] }
 0x115   : > { %17149 = vst [vmem:[#allocation124_spill] sm:$0xff] %v11345_v28 }
 0x116   : > { %17157 = vst [vmem:[#allocation132_spill] sm:$0xff] %v11387_v60 }
 0x117   : > { %v11264_v49 = vpop.f32.mrf.mxu0  ;;  %v11266_v52 = vpop.f32.mrf.mxu1  ;;  %2988 = vmatmul.mubr.bf16.gmra.mxu1 %v11249_v59  ;;  %3181 = vmatmul.mubr.bf16.vlgmr.msra.gmra.mxu0 %v11251_v8  ;;  %v508_v59 = vld [vmem:[%s10485_s19 + $0x108] sm:$0xff] }
 0x118   : > { %17136 = vst [vmem:[#allocation111_spill] sm:$0xff] %v11266_v52  ;;  %2997 = vmatprep.mubr.bf16.mxu1 %v11253_v26  ;;  %3190 = vmatprep.mubr.bf16.mxu0 %v11255_v20  ;;  %v9989_v8 = vld [vmem:[%s16781_s1 + $0xc8] ss:$16 sps:$4 sm:$0xff]   ;;  %v9994_v20 = vld [vmem:[%s16781_s1 + $0xac] ss:$16 sps:$4 sm:$0xff]   ;;  %v11302_v5 = vpack.c.bf16 %v515_v1, %v508_v59 }
 0x119   : > { %v11280_v17 = vpop.f32.mrf.mxu0  ;;  %v11282_v53 = vpop.f32.mrf.mxu1  ;;  %3855 = vmatpush1.bf16.msra.mxu0 %v9986_v19  ;;  %v11298_v19 = vpack.c.bf16 %v500_v22, %v493_v45  ;;  %v736_v45 = vld [vmem:[%s10485_s19 + $0x828] sm:$0xff]  ;;  %v507_v22 = vld [vmem:[%s10485_s19 + $0x100] sm:$0xff] }
 0x11a   : > { %17137 = vst [vmem:[#allocation112_spill] sm:$0xff] %v11282_v53  ;;  %3856 = vmatprep.subr.bf16.mxu0 %v9991_v55  ;;  %17142 = vst [vmem:[#allocation117_spill] sm:$0xff] %v11302_v5 }
 0x11b   : > { %v11292_v26 = vpop.f32.mrf.mxu0  ;;  %v11294_v12 = vpop.f32.mrf.mxu1  ;;  %17140 = vst [vmem:[#allocation115_spill] sm:$0xff] %v11298_v19 }
 0x11c   : > { %17138 = vst [vmem:[#allocation113_spill] sm:$0xff] %v11294_v12 }
 0x11d   : > { %v11304_v55 = vpop.f32.mrf.mxu0  ;;  %v11306_v14 = vpop.f32.mrf.mxu1  ;;  %3857 = vmatpush1.bf16.msra.mxu0 %v9989_v8  ;;  %v729_v8 = vld [vmem:[%s10485_s19 + $0x7f0] sm:$0xff] }
 0x11e   : > { %17143 = vst [vmem:[#allocation118_spill] sm:$0xff] %v11306_v14  ;;  %3858 = vmatprep.subr.bf16.mxu0 %v9994_v20  ;;  %v514_v20 = vld [vmem:[%s10485_s19 + $0x138] sm:$0xff] }
 0x11f   : > { %v11314_v1 = vpop.f32.mrf.mxu0  ;;  %v11316_v59 = vpop.f32.mrf.mxu1  ;;  %2998 = vmatmul.mubr.bf16.gmra.mxu1 %v11296_v0  ;;  %3191 = vmatmul.mubr.bf16.gmra.mxu0 %v11298_v19  ;;  %v9995_v19 = vld [vmem:[%s16781_s1 + $0x88] ss:$16 sps:$4 sm:$0xff]   ;;  %v11343_v3 = vpack.c.bf16 %v514_v20, %v507_v22  ;;  %v521_v20 = vld [vmem:[%s10485_s19 + $0x170] sm:$0xff] }
 0x120   : > { %17144 = vst [vmem:[#allocation119_spill] sm:$0xff] %v11316_v59  ;;  %3007 = vmatprep.mubr.bf16.mxu1 %v11300_v10  ;;  %3200 = vmatprep.mubr.bf16.mxu0 %v11302_v5  ;;  %v11341_v10 = vpack.c.bf16 %v736_v45, %v729_v8  ;;  %v10001_v8 = vld [vmem:[%s16781_s1 + $0x68] ss:$16 sps:$4 sm:$0xff]   ;;  %v10003_v45 = vld [vmem:[%s16781_s1 + $0x6c] ss:$16 sps:$4 sm:$0xff]  }
 0x121   : > { %v11328_v36 = vpop.f32.mrf.mxu0  ;;  %v11330_v40 = vpop.f32.mrf.mxu1  ;;  %3859 = vmatpush1.bf16.msra.mxu0 %v9992_v48  ;;  %17148 = vst [vmem:[#allocation123_spill] sm:$0xff] %v11343_v3  ;;  %v11347_v48 = vpack.c.bf16 %v529_v44, %v522_v34  ;;  %v743_v44 = vld [vmem:[%s10485_s19 + $0x860] sm:$0xff] }
 0x122   : > { %17145 = vst [vmem:[#allocation120_spill] sm:$0xff] %v11330_v40  ;;  %3860 = vmatprep.subr.bf16.mxu0 %v9997_v7  ;;  %17147 = vst [vmem:[#allocation122_spill] sm:$0xff] %v11341_v10 }
 0x123   : > { %v11337_v0 = vpop.f32.mrf.mxu0  ;;  %v11339_v5 = vpop.f32.mrf.mxu1  ;;  %17150 = vst [vmem:[#allocation125_spill] sm:$0xff] %v11347_v48 }
 0x124   : > { %17146 = vst [vmem:[#allocation121_spill] sm:$0xff] %v11339_v5 }
 0x125   : > { %v11349_v58 = vpop.f32.mrf.mxu0  ;;  %v11351_v7 = vpop.f32.mrf.mxu1  ;;  %3861 = vmatpush1.bf16.msra.mxu0 %v9995_v19  ;;  %v750_v19 = vld [vmem:[%s10485_s19 + $0x898] sm:$0xff] }
 0x126   : > { %17151 = vst [vmem:[#allocation126_spill] sm:$0xff] %v11351_v7  ;;  %3862 = vmatprep.subr.bf16.mxu0 %v10003_v45  ;;  %v620_v7 = vld [vmem:[%s10485_s19 + $0x488] sm:$0xff] }
 0x127   : > { %v11359_v22 = vpop.f32.mrf.mxu0  ;;  %v11361_v34 = vpop.f32.mrf.mxu1  ;;  %3008 = vmatmul.mubr.bf16.gmra.mxu1 %v11341_v10  ;;  %3201 = vmatmul.mubr.bf16.gmra.mxu0 %v11343_v3  ;;  %v11385_v10 = vpack.c.bf16 %v528_v29, %v521_v20 }
 0x128   : > { %17152 = vst [vmem:[#allocation127_spill] sm:$0xff] %v11361_v34  ;;  %3017 = vmatprep.mubr.bf16.mxu1 %v11345_v28  ;;  %3210 = vmatprep.mubr.bf16.mxu0 %v11347_v48  ;;  %v11383_v48 = vpack.c.bf16 %v750_v19, %v743_v44  ;;  %v757_v44 = vld [vmem:[%s10485_s19 + $0x8d0] sm:$0xff]  ;;  %v772_v19 = vld [vmem:[%s10485_s19 + $0x948] sm:$0xff] }
 0x129   : > { %v11372_v32 = vpop.f32.mrf.mxu0  ;;  %v11374_v31 = vpop.f32.mrf.mxu1  ;;  %3863 = vmatpush1.bf16.msra.mxu0 %v10001_v8  ;;  %17156 = vst [vmem:[#allocation131_spill] sm:$0xff] %v11385_v10  ;;  %v11419_v46 = vpack.c.bf16 %v764_v43, %v757_v44  ;;  %v10009_v44 = vld [vmem:[%s16781_s1 + $0x4c] ss:$16 sps:$4 sm:$0xff]  }
 0x12a   : > { %17153 = vst [vmem:[#allocation128_spill] sm:$0xff] %v11374_v31  ;;  %17155 = vst [vmem:[#allocation130_spill] sm:$0xff] %v11383_v48  ;;  %3864 = vmatprep.subr.bf16.mxu0 %v10009_v44 }
 0x12b   : > { %v11379_v3 = vpop.f32.mrf.mxu0  ;;  %v11381_v28 = vpop.f32.mrf.mxu1  ;;  %17163 = vst [vmem:[#allocation138_spill] sm:$0xff] %v11419_v46 }
 0x12c   : > { %17154 = vst [vmem:[#allocation129_spill] sm:$0xff] %v11381_v28 }
 0x12d   : > { %v11391_v13 = vpop.f32.mrf.mxu0  ;;  %v11393_v8 = vpop.f32.mrf.mxu1  ;;  %3865 = vmatpush1.bf16.msra.mxu0 %v10007_v33 }
 0x12e   : > { %17159 = vst [vmem:[#allocation134_spill] sm:$0xff] %v11393_v8 }
 0x12f   : > { %v11395_v45 = vpop.f32.mrf.mxu0  ;;  %v11397_v37 = vpop.f32.mrf.mxu1  ;;  %3018 = vmatmul.mubr.bf16.gmra.mxu1 %v11383_v48  ;;  %3211 = vmatmul.mubr.bf16.gmra.mxu0 %v11385_v10 }
 0x130   : > { %17160 = vst [vmem:[#allocation135_spill] sm:$0xff] %v11397_v37  ;;  %3027 = vmatprep.mubr.bf16.mxu1 %v11387_v60  ;;  %3220 = vmatprep.mubr.bf16.mxu0 %v11389_v16  ;;  %v11421_v16 = vpack.c.bf16 %v542_v41, %v535_v6  ;;  %v11423_v60 = vpack.c.bf16 %v779_v38, %v772_v19  ;;  %v549_v41 = vld [vmem:[%s10485_s19 + $0x250] sm:$0xff]  ;;  %v556_v19 = vld [vmem:[%s10485_s19 + $0x288] sm:$0xff]  ;;  %v786_v38 = vld [vmem:[%s10485_s19 + $0x9b8] sm:$0xff] }
 0x131   : > { %v11408_v20 = vpop.f32.mrf.mxu0  ;;  %v11410_v29 = vpop.f32.mrf.mxu1  ;;  %v11465_v54 = vpack.c.bf16 %v793_v25, %v786_v38  ;;  %v792_v25 = vld [vmem:[%s10485_s19 + $0x9e8] sm:$0xff]  ;;  %v807_v38 = vld [vmem:[%s10485_s19 + $0xa60] sm:$0xff]  ;;  %v606_v37 = vld [vmem:[%s10485_s19 + $0x418] sm:$0xff] }
 0x132   : > { %17161 = vst [vmem:[#allocation136_spill] sm:$0xff] %v11410_v29  ;;  %17164 = vst [vmem:[#allocation139_spill] sm:$0xff] %v11421_v16 }
 0x133   : > { %v11415_v48 = vpop.f32.mrf.mxu0  ;;  %v11417_v10 = vpop.f32.mrf.mxu1  ;;  %17165 = vst [vmem:[#allocation140_spill] sm:$0xff] %v11423_v60  ;;  %17173 = vst [vmem:[#allocation148_spill] sm:$0xff] %v11465_v54 }
 0x134   : > { %17162 = vst [vmem:[#allocation137_spill] sm:$0xff] %v11417_v10  ;;  %v821_v10 = vld [vmem:[%s10485_s19 + $0xad0] sm:$0xff] }
 0x135   : > { %v11427_v9 = vpop.f32.mrf.mxu0  ;;  %v11429_v35 = vpop.f32.mrf.mxu1 }
 0x136   : > { %17167 = vst [vmem:[#allocation142_spill] sm:$0xff] %v11429_v35 }
 0x137   : > { %v11437_v43 = vpop.f32.mrf.mxu0  ;;  %v11439_v6 = vpop.f32.mrf.mxu1  ;;  %3028 = vmatmul.mubr.bf16.gmra.mxu1 %v11419_v46  ;;  %3221 = vmatmul.mubr.bf16.gmra.mxu0 %v11421_v16  ;;  %v11463_v46 = vpack.c.bf16 %v556_v19, %v549_v41 }
 0x138   : > { %17168 = vst [vmem:[#allocation143_spill] sm:$0xff] %v11439_v6  ;;  %3037 = vmatprep.mubr.bf16.mxu1 %v11423_v60  ;;  %3230 = vmatprep.mubr.bf16.mxu0 %v11425_v11  ;;  %v11461_v11 = vpack.c.bf16 %v778_v23, %v771_v51  ;;  %v785_v51 = vld [vmem:[%s10485_s19 + $0x9b0] sm:$0xff]  ;;  %v800_v23 = vld [vmem:[%s10485_s19 + $0xa28] sm:$0xff]  ;;  %v1345_v6 = vlaneseq }
 0x139   : > { %v11450_v61 = vpop.f32.mrf.mxu0  ;;  %v11452_v56 = vpop.f32.mrf.mxu1  ;;  %17172 = vst [vmem:[#allocation147_spill] sm:$0xff] %v11463_v46  ;;  %v11497_v4 = vpack.c.bf16 %v792_v25, %v785_v51  ;;  %v10013_v51 = vld [vmem:[%s16781_s1 + $0x28] ss:$16 sps:$4 sm:$0xff]   ;;  %v10015_v25 = vld [vmem:[%s16781_s1 + $0x2c] ss:$16 sps:$4 sm:$0xff]  }
 0x13a   : > { %17169 = vst [vmem:[#allocation144_spill] sm:$0xff] %v11452_v56  ;;  %17171 = vst [vmem:[#allocation146_spill] sm:$0xff] %v11461_v11  ;;  %3866 = vmatprep.subr.bf16.mxu0 %v10015_v25 }
 0x13b   : > { %v11457_v16 = vpop.f32.mrf.mxu0  ;;  %v11459_v60 = vpop.f32.mrf.mxu1  ;;  %17179 = vst [vmem:[#allocation154_spill] sm:$0xff] %v11497_v4  ;;  %3867 = vmatpush1.bf16.msra.mxu0 %v10013_v51  ;;  %v828_v51 = vld [vmem:[%s10485_s19 + $0xb08] sm:$0xff] }
 0x13c   : > { %17170 = vst [vmem:[#allocation145_spill] sm:$0xff] %v11459_v60 }
 0x13d   : > { %v11469_v27 = vpop.f32.mrf.mxu0  ;;  %v11471_v33 = vpop.f32.mrf.mxu1 }
 0x13e   : > { %17175 = vst [vmem:[#allocation150_spill] sm:$0xff] %v11471_v33  ;;  %v578_v33 = vld [vmem:[%s10485_s19 + $0x338] sm:$0xff] }
 0x13f   : > { %v11473_v44 = vpop.f32.mrf.mxu0  ;;  %v11475_v60 = vpop.f32.mrf.mxu1  ;;  %3038 = vmatmul.mubr.bf16.gmra.mxu1 %v11461_v11  ;;  %3231 = vmatmul.mubr.bf16.gmra.mxu0 %v11463_v46 }
 0x140   : > { %17176 = vst [vmem:[#allocation151_spill] sm:$0xff] %v11475_v60  ;;  %3047 = vmatprep.mubr.bf16.mxu1 %v11465_v54  ;;  %3240 = vmatprep.mubr.bf16.mxu0 %v11467_v30  ;;  %v585_v60 = vld [vmem:[%s10485_s19 + $0x370] sm:$0xff]  ;;  %v11499_v54 = vpack.c.bf16 %v570_v21, %v563_v57  ;;  %v11501_v30 = vpack.c.bf16 %v807_v38, %v800_v23  ;;  %v806_v21 = vld [vmem:[%s10485_s19 + $0xa58] sm:$0xff]  ;;  %v584_v38 = vld [vmem:[%s10485_s19 + $0x368] sm:$0xff] }
 0x141   : > { %v11486_v41 = vpop.f32.mrf.mxu0  ;;  %v11488_v19 = vpop.f32.mrf.mxu1  ;;  %v11503_v56 = vpack.c.bf16 %v585_v60, %v578_v33  ;;  %v799_v33 = vld [vmem:[%s10485_s19 + $0xa20] sm:$0xff]  ;;  %v577_v23 = vld [vmem:[%s10485_s19 + $0x330] sm:$0xff] }
 0x142   : > { %17177 = vst [vmem:[#allocation152_spill] sm:$0xff] %v11488_v19  ;;  %17180 = vst [vmem:[#allocation155_spill] sm:$0xff] %v11499_v54  ;;  %v11543_v29 = vpack.c.bf16 %v584_v38, %v577_v23  ;;  %v591_v23 = vld [vmem:[%s10485_s19 + $0x3a0] sm:$0xff]  ;;  %v598_v38 = vld [vmem:[%s10485_s19 + $0x3d8] sm:$0xff] }
 0x143   : > { %v11493_v11 = vpop.f32.mrf.mxu0  ;;  %v11495_v46 = vpop.f32.mrf.mxu1  ;;  %17181 = vst [vmem:[#allocation156_spill] sm:$0xff] %v11501_v30  ;;  %17182 = vst [vmem:[#allocation157_spill] sm:$0xff] %v11503_v56 }
 0x144   : > { %17178 = vst [vmem:[#allocation153_spill] sm:$0xff] %v11495_v46  ;;  %17189 = vst [vmem:[#allocation164_spill] sm:$0xff] %v11543_v29 }
 0x145   : > { %v11505_v19 = vpop.f32.mrf.mxu0  ;;  %v11507_v62 = vpop.f32.mrf.mxu1 }
 0x146   : > { %17183 = vst [vmem:[#allocation158_spill] sm:$0xff] %v11507_v62  ;;  %v814_v62 = vld [vmem:[%s10485_s19 + $0xa98] sm:$0xff] }
 0x147   : > { %v11515_v57 = vpop.f32.mrf.mxu0  ;;  %v11517_v60 = vpop.f32.mrf.mxu1  ;;  %3048 = vmatmul.mubr.bf16.gmra.mxu1 %v11497_v4  ;;  %3241 = vmatmul.mubr.bf16.gmra.mxu0 %v11499_v54  ;;  %v11535_v4 = vshrl.u32 %v1345_v6, 7  ;;  %v11545_v39 = vpack.c.bf16 %v821_v10, %v814_v62  ;;  %v820_v10 = vld [vmem:[%s10485_s19 + $0xac8] sm:$0xff] }
 0x148   : > { %17184 = vst [vmem:[#allocation159_spill] sm:$0xff] %v11517_v60  ;;  %3057 = vmatprep.mubr.bf16.mxu1 %v11501_v30  ;;  %3250 = vmatprep.mubr.bf16.mxu0 %v11503_v56  ;;  %v599_v60 = vld [vmem:[%s10485_s19 + $0x3e0] sm:$0xff]  ;;  %v11541_v56 = vpack.c.bf16 %v806_v21, %v799_v33 }
 0x149   : > { %v11528_v46 = vpop.f32.mrf.mxu0  ;;  %v11530_v35 = vpop.f32.mrf.mxu1  ;;  %17186 = vst [vmem:[#allocation161_spill] sm:$0xff] %v11535_v4  ;;  %17190 = vst [vmem:[#allocation165_spill] sm:$0xff] %v11545_v39  ;;  %v1343_v33 = vld [vmem:[%s16782_s2] sm:$0xf]  ;;  %v17199_v24 = vsub.s32 1, %v11535_v4 }
 0x14a   : > { %17185 = vst [vmem:[#allocation160_spill] sm:$0xff] %v11530_v35  ;;  %17188 = vst [vmem:[#allocation163_spill] sm:$0xff] %v11541_v56  ;;  %v11547_v35 = vpack.c.bf16 %v599_v60, %v592_v42  ;;  %v813_v42 = vld [vmem:[%s10485_s19 + $0xa90] sm:$0xff] }
 0x14b   : > { %v11537_v54 = vpop.f32.mrf.mxu0  ;;  %v11539_v30 = vpop.f32.mrf.mxu1  ;;  %v11594_v31 = vrot.slane %v1343_v33, %v17199_v24  ;;  %v10021_v24 = vld [vmem:[%s16781_s1 + $0xc] ss:$16 sps:$4 sm:$0xff]  }
 0x14c   : > { %17187 = vst [vmem:[#allocation162_spill] sm:$0xff] %v11539_v30  ;;  %17191 = vst [vmem:[#allocation166_spill] sm:$0xff] %v11547_v35  ;;  %3868 = vmatprep.subr.bf16.mxu0 %v10021_v24 }
 0x14d   : > { %v11549_v6 = vpop.f32.mrf.mxu0  ;;  %v11551_v25 = vpop.f32.mrf.mxu1  ;;  %v2483_v5 = vadd.f32 %v11304_v55, %v11594_v31  ;;  %v2503_v53 = vadd.f32 %v11391_v13, %v11594_v31 }
 0x14e   : > { %17192 = vst [vmem:[#allocation167_spill] sm:$0xff] %v11551_v25 }
 0x14f   : > { %v11557_v21 = vpop.f32.mrf.mxu0  ;;  %v11559_v62 = vpop.f32.mrf.mxu1  ;;  %3058 = vmatmul.mubr.bf16.gmra.mxu1 %v11541_v56  ;;  %3251 = vmatmul.mubr.bf16.gmra.mxu0 %v11543_v29  ;;  %v613_v56 = vld [vmem:[%s10485_s19 + $0x450] sm:$0xff]  ;;  %v17195_v29 = vsub.s32 0, %v11535_v4  ;;  %v842_v4 = vld [vmem:[%s10485_s19 + $0xb78] sm:$0xff] }
 0x150   : > { %17193 = vst [vmem:[#allocation168_spill] sm:$0xff] %v11559_v62  ;;  %3067 = vmatprep.mubr.bf16.mxu1 %v11545_v39  ;;  %3260 = vmatprep.mubr.bf16.mxu0 %v11547_v35  ;;  %v835_v62 = vld [vmem:[%s10485_s19 + $0xb40] sm:$0xff]  ;;  %v11586_v35 = vpack.c.bf16 %v820_v10, %v813_v42  ;;  %v11588_v39 = vpack.c.bf16 %v598_v38, %v591_v23  ;;  %v605_v23 = vld [vmem:[%s10485_s19 + $0x410] sm:$0xff]  ;;  %v612_v38 = vld [vmem:[%s10485_s19 + $0x448] sm:$0xff] }
 0x151   : > { %v11571_v25 = vpop.f32.mrf.mxu0  ;;  %v11573_v30 = vpop.f32.mrf.mxu1  ;;  %v11580_v8 = vrot.slane %v1343_v33, %v17195_v29  ;;  %v11596_v18 = vpack.c.bf16 %v835_v62, %v828_v51  ;;  %v11598_v29 = vpack.c.bf16 %v613_v56, %v606_v37  ;;  %v2479_v10 = vadd.f32 %v11280_v17, %v11594_v31  ;;  %v827_v51 = vld [vmem:[%s10485_s19 + $0xb00] sm:$0xff]  ;;  %v834_v17 = vld [vmem:[%s10485_s19 + $0xb38] sm:$0xff] }
 0x152   : > { %17194 = vst [vmem:[#allocation169_spill] sm:$0xff] %v11573_v30  ;;  %17197 = vst [vmem:[#allocation171_spill] sm:$0xff] %v11586_v35 }
 0x153   : > { %v11582_v28 = vpop.f32.mrf.mxu0  ;;  %v11584_v60 = vpop.f32.mrf.mxu1  ;;  %17198 = vst [vmem:[#allocation172_spill] sm:$0xff] %v11588_v39  ;;  %v2477_v30 = vadd.f32 %v11264_v49, %v11580_v8  ;;  %17200 = vst [vmem:[#allocation173_spill] sm:$0xff] %v11596_v18  ;;  %v10019_v49 = vld [vmem:[%s16781_s1 + $0x8] ss:$16 sps:$4 sm:$0xff]   ;;  %v2481_v33 = vadd.f32 %v11292_v26, %v11580_v8  ;;  %v2487_v2 = vadd.f32 %v11314_v1, %v11580_v8 }
 0x154   : > { %17196 = vst [vmem:[#allocation170_spill] sm:$0xff] %v11584_v60  ;;  %17201 = vst [vmem:[#allocation174_spill] sm:$0xff] %v11598_v29  ;;  %3869 = vmatpush1.bf16.msra.mxu0 %v10019_v49  ;;  %v2489_v49 = vadd.f32 %v11328_v36, %v11594_v31  ;;  %v619_v36 = vld [vmem:[%s10485_s19 + $0x480] sm:$0xff]  ;;  %v2507_v47 = vadd.f32 %v11395_v45, %v11580_v8 }
 0x155   : > { %v11600_v34 = vpop.f32.mrf.mxu0  ;;  %v11602_v42 = vpop.f32.mrf.mxu1 }
 0x156   : > { %17202 = vst [vmem:[#allocation175_spill] sm:$0xff] %v11602_v42 }
 0x157   : > { %v11612_v56 = vpop.f32.mrf.mxu0  ;;  %v2829_v37 = vpop.f32.mrf.mxu1  ;;  %3068 = vmatmul.mubr.bf16.gmra.mxu1 %v11586_v35  ;;  %3261 = vmatmul.mubr.bf16.gmra.mxu0 %v11588_v39  ;;  %v849_v35 = vld [vmem:[%s10485_s19 + $0xbb0] sm:$0xff]  ;;  %v627_v39 = vld [vmem:[%s10485_s19 + $0x4c0] sm:$0xff] }
 0x158   : > { %v11620_v62 = vadd.f32 %v2829_v37, %v2477_v30  ;;  %3077 = vmatprep.mubr.bf16.mxu1 %v11596_v18  ;;  %3270 = vmatprep.mubr.bf16.mxu0 %v11598_v29  ;;  %v11638_v29 = vpack.c.bf16 %v834_v17, %v827_v51  ;;  %v11640_v18 = vpack.c.bf16 %v612_v38, %v605_v23 }
 0x159   : > { %v11627_v42 = vpop.f32.mrf.mxu0  ;;  %v2831_v60 = vpop.f32.mrf.mxu1  ;;  %v11646_v24 = vpack.c.bf16 %v849_v35, %v842_v4  ;;  %v11648_v55 = vpack.c.bf16 %v627_v39, %v620_v7  ;;  %v841_v39 = vld [vmem:[%s10485_s19 + $0xb70] sm:$0xff]  ;;  %v848_v4 = vld [vmem:[%s10485_s19 + $0xba8] sm:$0xff]  ;;  %v2491_v35 = vadd.f32 %v11337_v0, %v11580_v8 }
 0x15a   : > { %v11634_v26 = vadd.f32 %v2831_v60, %v2479_v10  ;;  %17203 = vst [vmem:[#allocation176_spill] sm:$0xff] %v11638_v29  ;;  %17204 = vst [vmem:[#allocation177_spill] sm:$0xff] %v11640_v18 }
 0x15b   : > { %v11636_v30 = vpop.f32.mrf.mxu0  ;;  %v2833_v37 = vpop.f32.mrf.mxu1  ;;  %17205 = vst [vmem:[#allocation178_spill] sm:$0xff] %v11646_v24  ;;  %17206 = vst [vmem:[#allocation179_spill] sm:$0xff] %v11648_v55 }
 0x15c   : > { %v11644_v40 = vadd.f32 %v2833_v37, %v2481_v33  ;;  %v856_v33 = vld [vmem:[%s10485_s19 + $0xbe8] sm:$0xff]  ;;  %v863_v37 = vld [vmem:[%s10485_s19 + $0xc20] sm:$0xff] }
 0x15d   : > { %v11650_v60 = vpop.f32.mrf.mxu0  ;;  %v2835_v10 = vpop.f32.mrf.mxu1  ;;  %v11690_v14 = vpack.c.bf16 %v863_v37, %v856_v33  ;;  %v640_v37 = vld [vmem:[%s10485_s19 + $0x528] sm:$0xff] }
 0x15e   : > { %v11654_v51 = vadd.f32 %v2835_v10, %v2483_v5  ;;  %v626_v5 = vld [vmem:[%s10485_s19 + $0x4b8] sm:$0xff] }
 0x15f   : > { %v11656_v17 = vpop.f32.mrf.mxu0  ;;  %v2839_v1 = vpop.f32.mrf.mxu1  ;;  %3078 = vmatmul.mubr.bf16.gmra.mxu1 %v11638_v29  ;;  %3271 = vmatmul.mubr.bf16.gmra.mxu0 %v11640_v18  ;;  %v634_v10 = vld [vmem:[%s10485_s19 + $0x4f8] sm:$0xff]  ;;  %v641_v18 = vld [vmem:[%s10485_s19 + $0x530] sm:$0xff]  ;;  %v2493_v29 = vadd.f32 %v11349_v58, %v11594_v31  ;;  %17209 = vst [vmem:[#allocation182_spill] sm:$0xff] %v11690_v14 }
 0x160   : > { %v11664_v7 = vadd.f32 %v2839_v1, %v2487_v2  ;;  %3087 = vmatprep.mubr.bf16.mxu1 %v11646_v24  ;;  %3280 = vmatprep.mubr.bf16.mxu0 %v11648_v55  ;;  %v11682_v1 = vpack.c.bf16 %v848_v4, %v841_v39  ;;  %v11684_v55 = vpack.c.bf16 %v626_v5, %v619_v36 }
 0x161   : > { %v11671_v23 = vpop.f32.mrf.mxu0  ;;  %v2841_v38 = vpop.f32.mrf.mxu1  ;;  %v2497_v24 = vadd.f32 %v11359_v22, %v11580_v8  ;;  %v11692_v12 = vpack.c.bf16 %v641_v18, %v634_v10  ;;  %v2499_v39 = vadd.f32 %v11372_v32, %v11594_v31  ;;  %v10025_v22 = vld [vmem:[%s16781_s1 + $0x1e8] ss:$16 sps:$4 sm:$0xff]   ;;  %v10027_v18 = vld [vmem:[%s16781_s1 + $0x1ec] ss:$16 sps:$4 sm:$0xff]   ;;  %v855_v32 = vld [vmem:[%s10485_s19 + $0xbe0] sm:$0xff]  ;;  %v2501_v5 = vadd.f32 %v11379_v3, %v11580_v8 }
 0x162   : > { %v11678_v63 = vadd.f32 %v2841_v38, %v2489_v49  ;;  %17207 = vst [vmem:[#allocation180_spill] sm:$0xff] %v11682_v1  ;;  %17208 = vst [vmem:[#allocation181_spill] sm:$0xff] %v11684_v55  ;;  %v633_v38 = vld [vmem:[%s10485_s19 + $0x4f0] sm:$0xff]  ;;  %v870_v10 = vld [vmem:[%s10485_s19 + $0xc58] sm:$0xff]  ;;  %3870 = vmatprep.subr.bf16.mxu0 %v10027_v18 }
 0x163   : > { %v11680_v2 = vpop.f32.mrf.mxu0  ;;  %v2843_v0 = vpop.f32.mrf.mxu1  ;;  %17210 = vst [vmem:[#allocation183_spill] sm:$0xff] %v11692_v12  ;;  %3871 = vmatpush2.bf16.msra.mxu0 %v10025_v22 }
 0x164   : > { %v11688_v59 = vadd.f32 %v2843_v0, %v2491_v35 }
 0x165   : > { %v11694_v58 = vpop.f32.mrf.mxu0  ;;  %v2845_v49 = vpop.f32.mrf.mxu1 }
 0x166   : > { %v11698_v4 = vadd.f32 %v2845_v49, %v2493_v29  ;;  %v862_v29 = vld [vmem:[%s10485_s19 + $0xc18] sm:$0xff] }
 0x167   : > { %v11706_v35 = vpop.f32.mrf.mxu0  ;;  %v2849_v36 = vpop.f32.mrf.mxu1  ;;  %3088 = vmatmul.mubr.bf16.gmra.mxu1 %v11682_v1  ;;  %3281 = vmatmul.mubr.bf16.gmra.mxu0 %v11684_v55  ;;  %v877_v1 = vld [vmem:[%s10485_s19 + $0xc90] sm:$0xff]  ;;  %v655_v55 = vld [vmem:[%s10485_s19 + $0x5a0] sm:$0xff] }
 0x168   : > { %v11714_v33 = vadd.f32 %v2849_v36, %v2497_v24  ;;  %3097 = vmatprep.mubr.bf16.mxu1 %v11690_v14  ;;  %3290 = vmatprep.mubr.bf16.mxu0 %v11692_v12  ;;  %v11732_v12 = vpack.c.bf16 %v862_v29, %v855_v32  ;;  %v11734_v14 = vpack.c.bf16 %v640_v37, %v633_v38  ;;  %v884_v37 = vld [vmem:[%s10485_s19 + $0xcc8] sm:$0xff] }
 0x169   : > { %v11721_v0 = vpop.f32.mrf.mxu0  ;;  %v2851_v49 = vpop.f32.mrf.mxu1  ;;  %v11740_v18 = vpack.c.bf16 %v877_v1, %v870_v10  ;;  %v11742_v13 = vpack.c.bf16 %v655_v55, %v648_v50  ;;  %v2509_v32 = vadd.f32 %v11408_v20, %v11594_v31  ;;  %v869_v50 = vld [vmem:[%s10485_s19 + $0xc50] sm:$0xff]  ;;  %v876_v55 = vld [vmem:[%s10485_s19 + $0xc88] sm:$0xff]  ;;  %v2511_v1 = vadd.f32 %v11415_v48, %v11580_v8  ;;  %v654_v20 = vld [vmem:[%s10485_s19 + $0x598] sm:$0xff] }
 0x16a   : > { %v11728_v3 = vadd.f32 %v2851_v49, %v2499_v39  ;;  %17212 = vst [vmem:[#allocation185_spill] sm:$0xff] %v11732_v12  ;;  %17213 = vst [vmem:[#allocation186_spill] sm:$0xff] %v11734_v14 }
 0x16b   : > { %v11730_v24 = vpop.f32.mrf.mxu0  ;;  %v2853_v36 = vpop.f32.mrf.mxu1  ;;  %17215 = vst [vmem:[#allocation188_spill] sm:$0xff] %v11740_v18  ;;  %17216 = vst [vmem:[#allocation189_spill] sm:$0xff] %v11742_v13 }
 0x16c   : > { %17211 = vst [vmem:[#allocation184_spill] sm:$0xff] %v11728_v3  ;;  %v11738_v52 = vadd.f32 %v2853_v36, %v2501_v5  ;;  %v891_v36 = vld [vmem:[%s10485_s19 + $0xd00] sm:$0xff] }
 0x16d   : > { %v11744_v39 = vpop.f32.mrf.mxu0  ;;  %v2855_v22 = vpop.f32.mrf.mxu1 }
 0x16e   : > { %17214 = vst [vmem:[#allocation187_spill] sm:$0xff] %v11738_v52  ;;  %v11748_v29 = vadd.f32 %v2855_v22, %v2503_v53  ;;  %v647_v53 = vld [vmem:[%s10485_s19 + $0x560] sm:$0xff]  ;;  %v662_v22 = vld [vmem:[%s10485_s19 + $0x5d8] sm:$0xff] }
 0x16f   : > { %v11750_v38 = vpop.f32.mrf.mxu0  ;;  %v2859_v45 = vpop.f32.mrf.mxu1  ;;  %3098 = vmatmul.mubr.bf16.gmra.mxu1 %v11732_v12  ;;  %3291 = vmatmul.mubr.bf16.gmra.mxu0 %v11734_v14  ;;  %v669_v14 = vld [vmem:[%s10485_s19 + $0x610] sm:$0xff]  ;;  %v2513_v12 = vadd.f32 %v11427_v9, %v11594_v31 }
 0x170   : > { %17217 = vst [vmem:[#allocation190_spill] sm:$0xff] %v11748_v29  ;;  %v11758_v5 = vadd.f32 %v2859_v45, %v2507_v47  ;;  %3107 = vmatprep.mubr.bf16.mxu1 %v11740_v18  ;;  %3300 = vmatprep.mubr.bf16.mxu0 %v11742_v13  ;;  %v11776_v45 = vpack.c.bf16 %v876_v55, %v869_v50 }
 0x171   : > { %v11765_v10 = vpop.f32.mrf.mxu0  ;;  %v2861_v49 = vpop.f32.mrf.mxu1  ;;  %v11778_v13 = vpack.c.bf16 %v654_v20, %v647_v53  ;;  %v2517_v18 = vadd.f32 %v11437_v43, %v11580_v8  ;;  %v11784_v29 = vpack.c.bf16 %v891_v36, %v884_v37  ;;  %v11786_v52 = vpack.c.bf16 %v669_v14, %v662_v22  ;;  %v10031_v43 = vld [vmem:[%s16781_s1 + $0x1c8] ss:$16 sps:$4 sm:$0xff]   ;;  %v10033_v14 = vld [vmem:[%s16781_s1 + $0x1cc] ss:$16 sps:$4 sm:$0xff]  }
 0x172   : > { %17218 = vst [vmem:[#allocation191_spill] sm:$0xff] %v11758_v5  ;;  %v11772_v15 = vadd.f32 %v2861_v49, %v2509_v32  ;;  %17220 = vst [vmem:[#allocation193_spill] sm:$0xff] %v11776_v45  ;;  %v2519_v50 = vadd.f32 %v11450_v61, %v11594_v31  ;;  %v883_v61 = vld [vmem:[%s10485_s19 + $0xcc0] sm:$0xff]  ;;  %v2521_v20 = vadd.f32 %v11457_v16, %v11580_v8  ;;  %v661_v49 = vld [vmem:[%s10485_s19 + $0x5d0] sm:$0xff]  ;;  %3872 = vmatprep.subr.bf16.mxu0 %v10033_v14 }
 0x173   : > { %v11774_v47 = vpop.f32.mrf.mxu0  ;;  %v2863_v48 = vpop.f32.mrf.mxu1  ;;  %17221 = vst [vmem:[#allocation194_spill] sm:$0xff] %v11778_v13  ;;  %17223 = vst [vmem:[#allocation196_spill] sm:$0xff] %v11784_v29  ;;  %v668_v36 = vld [vmem:[%s10485_s19 + $0x608] sm:$0xff]  ;;  %v898_v22 = vld [vmem:[%s10485_s19 + $0xd38] sm:$0xff]  ;;  %3873 = vmatpush2.bf16.msra.mxu0 %v10031_v43 }
 0x174   : > { %17219 = vst [vmem:[#allocation192_spill] sm:$0xff] %v11772_v15  ;;  %v11782_v5 = vadd.f32 %v2863_v48, %v2511_v1  ;;  %17224 = vst [vmem:[#allocation197_spill] sm:$0xff] %v11786_v52 }
 0x175   : > { %v11788_v9 = vpop.f32.mrf.mxu0  ;;  %v2865_v32 = vpop.f32.mrf.mxu1 }
 0x176   : > { %17222 = vst [vmem:[#allocation195_spill] sm:$0xff] %v11782_v5  ;;  %v11792_v55 = vadd.f32 %v2865_v32, %v2513_v12  ;;  %v890_v12 = vld [vmem:[%s10485_s19 + $0xcf8] sm:$0xff]  ;;  %v2523_v5 = vadd.f32 %v11469_v27, %v11594_v31 }
 0x177   : > { %v11800_v1 = vpop.f32.mrf.mxu0  ;;  %v2869_v53 = vpop.f32.mrf.mxu1  ;;  %3108 = vmatmul.mubr.bf16.gmra.mxu1 %v11776_v45  ;;  %3301 = vmatmul.mubr.bf16.gmra.mxu0 %v11778_v13  ;;  %v905_v45 = vld [vmem:[%s10485_s19 + $0xd70] sm:$0xff]  ;;  %v683_v13 = vld [vmem:[%s10485_s19 + $0x680] sm:$0xff] }
 0x178   : > { %17225 = vst [vmem:[#allocation198_spill] sm:$0xff] %v11792_v55  ;;  %v11808_v37 = vadd.f32 %v2869_v53, %v2517_v18  ;;  %3117 = vmatprep.mubr.bf16.mxu1 %v11784_v29  ;;  %3310 = vmatprep.mubr.bf16.mxu0 %v11786_v52  ;;  %v676_v55 = vld [vmem:[%s10485_s19 + $0x648] sm:$0xff]  ;;  %v11826_v52 = vpack.c.bf16 %v890_v12, %v883_v61 }
 0x179   : > { %v11815_v48 = vpop.f32.mrf.mxu0  ;;  %v2871_v32 = vpop.f32.mrf.mxu1  ;;  %v11828_v29 = vpack.c.bf16 %v668_v36, %v661_v49  ;;  %v11834_v15 = vpack.c.bf16 %v905_v45, %v898_v22  ;;  %v11836_v27 = vpack.c.bf16 %v683_v13, %v676_v55  ;;  %v10039_v61 = vld [vmem:[%s16781_s1 + $0x1ac] ss:$16 sps:$4 sm:$0xff]   ;;  %v2529_v12 = vadd.f32 %v11486_v41, %v11594_v31  ;;  %v10037_v13 = vld [vmem:[%s16781_s1 + $0x1a8] ss:$16 sps:$4 sm:$0xff]   ;;  %v675_v36 = vld [vmem:[%s10485_s19 + $0x640] sm:$0xff] }
 0x17a   : > { %17226 = vst [vmem:[#allocation199_spill] sm:$0xff] %v11808_v37  ;;  %v11822_v16 = vadd.f32 %v2871_v32, %v2519_v50  ;;  %17228 = vst [vmem:[#allocation201_spill] sm:$0xff] %v11826_v52  ;;  %v2527_v37 = vadd.f32 %v11473_v44, %v11580_v8  ;;  %v904_v49 = vld [vmem:[%s10485_s19 + $0xd68] sm:$0xff]  ;;  %v2531_v41 = vadd.f32 %v11493_v11, %v11580_v8  ;;  %v682_v22 = vld [vmem:[%s10485_s19 + $0x678] sm:$0xff]  ;;  %3874 = vmatprep.subr.bf16.mxu0 %v10039_v61 }
 0x17b   : > { %v11824_v18 = vpop.f32.mrf.mxu0  ;;  %v2873_v53 = vpop.f32.mrf.mxu1  ;;  %17229 = vst [vmem:[#allocation202_spill] sm:$0xff] %v11828_v29  ;;  %17231 = vst [vmem:[#allocation204_spill] sm:$0xff] %v11834_v15  ;;  %v912_v32 = vld [vmem:[%s10485_s19 + $0xda8] sm:$0xff]  ;;  %v2533_v11 = vadd.f32 %v11505_v19, %v11594_v31  ;;  %3875 = vmatpush2.bf16.msra.mxu0 %v10037_v13  ;;  %v11884_v61 = vpack.c.bf16 %v682_v22, %v675_v36  ;;  %v689_v22 = vld [vmem:[%s10485_s19 + $0x6b0] sm:$0xff] }
 0x17c   : > { %17227 = vst [vmem:[#allocation200_spill] sm:$0xff] %v11822_v16  ;;  %v11832_v14 = vadd.f32 %v2873_v53, %v2521_v20  ;;  %17232 = vst [vmem:[#allocation205_spill] sm:$0xff] %v11836_v27  ;;  %v897_v20 = vld [vmem:[%s10485_s19 + $0xd30] sm:$0xff]  ;;  %v919_v53 = vld [vmem:[%s10485_s19 + $0xde0] sm:$0xff]  ;;  %v2537_v16 = vadd.f32 %v11515_v57, %v11580_v8 }
 0x17d   : > { %v11838_v50 = vpop.f32.mrf.mxu0  ;;  %v2875_v43 = vpop.f32.mrf.mxu1  ;;  %17237 = vst [vmem:[#allocation210_spill] sm:$0xff] %v11884_v61 }
 0x17e   : > { %17230 = vst [vmem:[#allocation203_spill] sm:$0xff] %v11832_v14  ;;  %v11845_v44 = vadd.f32 %v2875_v43, %v2523_v5  ;;  %v10042_v14 = vld [vmem:[%s16781_s1 + $0x18c] ss:$16 sps:$4 sm:$0xff]  }
 0x17f   : > { %v11850_v45 = vpop.f32.mrf.mxu0  ;;  %v2879_v55 = vpop.f32.mrf.mxu1  ;;  %3118 = vmatmul.mubr.bf16.gmra.mxu1 %v11826_v52  ;;  %3311 = vmatmul.mubr.bf16.gmra.mxu0 %v11828_v29  ;;  %v697_v29 = vld [vmem:[%s10485_s19 + $0x6f0] sm:$0xff] }
 0x180   : > { %17233 = vst [vmem:[#allocation206_spill] sm:$0xff] %v11845_v44  ;;  %v11859_v5 = vadd.f32 %v2879_v55, %v2527_v37  ;;  %3127 = vmatprep.mubr.bf16.mxu1 %v11834_v15  ;;  %3320 = vmatprep.mubr.bf16.mxu0 %v11836_v27  ;;  %v690_v44 = vld [vmem:[%s10485_s19 + $0x6b8] sm:$0xff] }
 0x181   : > { %v11866_v43 = vpop.f32.mrf.mxu0  ;;  %v2881_v52 = vpop.f32.mrf.mxu1  ;;  %v10040_v55 = vld [vmem:[%s16781_s1 + $0x188] ss:$16 sps:$4 sm:$0xff]   ;;  %3876 = vmatprep.subr.bf16.mxu0 %v10042_v14  ;;  %v2539_v14 = vadd.f32 %v11528_v46, %v11594_v31  ;;  %v2541_v46 = vadd.f32 %v11537_v54, %v11580_v8  ;;  %v2543_v54 = vadd.f32 %v11549_v6, %v11594_v31 }
 0x182   : > { %17234 = vst [vmem:[#allocation207_spill] sm:$0xff] %v11859_v5  ;;  %v11875_v37 = vadd.f32 %v2881_v52, %v2529_v12  ;;  %v11882_v5 = vpack.c.bf16 %v904_v49, %v897_v20  ;;  %v11890_v52 = vpack.c.bf16 %v919_v53, %v912_v32  ;;  %v11892_v12 = vpack.c.bf16 %v697_v29, %v690_v44  ;;  %v10045_v20 = vld [vmem:[%s16781_s1 + $0x16c] ss:$16 sps:$4 sm:$0xff]   ;;  %v911_v49 = vld [vmem:[%s10485_s19 + $0xda0] sm:$0xff] }
 0x183   : > { %v11880_v27 = vpop.f32.mrf.mxu0  ;;  %v2883_v15 = vpop.f32.mrf.mxu1  ;;  %3877 = vmatpush2.bf16.msra.mxu0 %v10040_v55  ;;  %v696_v32 = vld [vmem:[%s10485_s19 + $0x6e8] sm:$0xff]  ;;  %v711_v55 = vld [vmem:[%s10485_s19 + $0x760] sm:$0xff] }
 0x184   : > { %17235 = vst [vmem:[#allocation208_spill] sm:$0xff] %v11875_v37  ;;  %17236 = vst [vmem:[#allocation209_spill] sm:$0xff] %v11882_v5  ;;  %v11888_v19 = vadd.f32 %v2883_v15, %v2531_v41  ;;  %v10043_v15 = vld [vmem:[%s16781_s1 + $0x168] ss:$16 sps:$4 sm:$0xff]   ;;  %3878 = vmatprep.subr.bf16.mxu0 %v10045_v20  ;;  %v11938_v20 = vpack.c.bf16 %v696_v32, %v689_v22  ;;  %v703_v22 = vld [vmem:[%s10485_s19 + $0x720] sm:$0xff] }
 0x185   : > { %17239 = vst [vmem:[#allocation212_spill] sm:$0xff] %v11890_v52  ;;  %17240 = vst [vmem:[#allocation213_spill] sm:$0xff] %v11892_v12  ;;  %v11894_v13 = vpop.f32.mrf.mxu0  ;;  %v2885_v37 = vpop.f32.mrf.mxu1  ;;  %v918_v41 = vld [vmem:[%s10485_s19 + $0xdd8] sm:$0xff] }
 0x186   : > { %17238 = vst [vmem:[#allocation211_spill] sm:$0xff] %v11888_v19  ;;  %v11901_v57 = vadd.f32 %v2885_v37, %v2533_v11  ;;  %v704_v37 = vld [vmem:[%s10485_s19 + $0x728] sm:$0xff]  ;;  %17245 = vst [vmem:[#allocation218_spill] sm:$0xff] %v11938_v20 }
 0x187   : > { %v11906_v29 = vpop.f32.mrf.mxu0  ;;  %v2889_v44 = vpop.f32.mrf.mxu1  ;;  %3128 = vmatmul.mubr.bf16.gmra.mxu1 %v11882_v5  ;;  %3321 = vmatmul.mubr.bf16.gmra.mxu0 %v11884_v61  ;;  %v10051_v61 = vld [vmem:[%s16781_s1 + $0x14c] ss:$16 sps:$4 sm:$0xff]   ;;  %v11936_v5 = vpack.c.bf16 %v918_v41, %v911_v49  ;;  %v2549_v41 = vadd.f32 %v11571_v25, %v11594_v31  ;;  %v2551_v25 = vadd.f32 %v11582_v28, %v11580_v8 }
 0x188   : > { %17241 = vst [vmem:[#allocation214_spill] sm:$0xff] %v11901_v57  ;;  %v11913_v36 = vadd.f32 %v2889_v44, %v2537_v16  ;;  %3137 = vmatprep.mubr.bf16.mxu1 %v11890_v52  ;;  %3330 = vmatprep.mubr.bf16.mxu0 %v11892_v12  ;;  %v10049_v44 = vld [vmem:[%s16781_s1 + $0x148] ss:$16 sps:$4 sm:$0xff]   ;;  %v10054_v49 = vld [vmem:[%s16781_s1 + $0x12c] ss:$16 sps:$4 sm:$0xff]  }
 0x189   : > { %v11920_v53 = vpop.f32.mrf.mxu0  ;;  %v2891_v11 = vpop.f32.mrf.mxu1  ;;  %3879 = vmatpush2.bf16.msra.mxu0 %v10043_v15  ;;  %17244 = vst [vmem:[#allocation217_spill] sm:$0xff] %v11936_v5  ;;  %v10057_v28 = vld [vmem:[%s16781_s1 + $0x10c] ss:$16 sps:$4 sm:$0xff]  }
 0x18a   : > { %17242 = vst [vmem:[#allocation215_spill] sm:$0xff] %v11913_v36  ;;  %v11929_v16 = vadd.f32 %v2891_v11, %v2539_v14  ;;  %3880 = vmatprep.subr.bf16.mxu0 %v10051_v61  ;;  %v2547_v36 = vadd.f32 %v11557_v21, %v11580_v8  ;;  %v11944_v14 = vpack.c.bf16 %v711_v55, %v704_v37  ;;  %v10052_v21 = vld [vmem:[%s16781_s1 + $0x128] ss:$16 sps:$4 sm:$0xff]   ;;  %v16959_v37 = vmov 0  }
 0x18b   : > { %v11934_v12 = vpop.f32.mrf.mxu0  ;;  %v2893_v52 = vpop.f32.mrf.mxu1  ;;  %v710_v55 = vld [vmem:[%s10485_s19 + $0x758] sm:$0xff] }
 0x18c   : > { %17243 = vst [vmem:[#allocation216_spill] sm:$0xff] %v11929_v16  ;;  %v11942_v6 = vadd.f32 %v2893_v52, %v2541_v46  ;;  %17247 = vst [vmem:[#allocation220_spill] sm:$0xff] %v11944_v14  ;;  %v2557_v16 = vadd.f32 %v11612_v56, %v11580_v8  ;;  %v2559_v56 = vadd.f32 %v11627_v42, %v11594_v31  ;;  %v495_v42 = vld [vmem:[%s10485_s19 + $0xa0] sm:$0xff] }
 0x18d   : > { %v11946_v15 = vpop.f32.mrf.mxu0  ;;  %v2895_v11 = vpop.f32.mrf.mxu1  ;;  %3881 = vmatpush2.bf16.msra.mxu0 %v10049_v44  ;;  %v488_v44 = vld [vmem:[%s10485_s19 + $0x68] sm:$0xff] }
 0x18e   : > { %17246 = vst [vmem:[#allocation219_spill] sm:$0xff] %v11942_v6  ;;  %v11953_v61 = vadd.f32 %v2895_v11, %v2543_v54  ;;  %v481_v54 = vld [vmem:[%s10485_s19 + $0x30] sm:$0xff]  ;;  %3882 = vmatprep.subr.bf16.mxu0 %v10054_v49 }
 0x18f   : > { %v11958_v52 = vpop.f32.mrf.mxu0  ;;  %v2899_v46 = vpop.f32.mrf.mxu1  ;;  %3138 = vmatmul.mubr.bf16.gmra.mxu1 %v11936_v5  ;;  %3331 = vmatmul.mubr.bf16.gmra.mxu0 %v11938_v20  ;;  %v718_v5 = vld [vmem:[%s10485_s19 + $0x798] sm:$0xff]  ;;  %v725_v6 = vld [vmem:[%s10485_s19 + $0x7d0] sm:$0xff]  ;;  %v11990_v49 = vpack.c.bf16 %v488_v44, %v481_v54  ;;  %v724_v54 = vld [vmem:[%s10485_s19 + $0x7c8] sm:$0xff]  ;;  %v2561_v44 = vadd.f32 %v11636_v30, %v11580_v8 }
 0x190   : > { %17248 = vst [vmem:[#allocation221_spill] sm:$0xff] %v11953_v61  ;;  %v11965_v32 = vadd.f32 %v2899_v46, %v2547_v36  ;;  %3340 = vmatprep.mubr.bf16.mxu0 %v11944_v14  ;;  %3533 = vmatprep.mubr.bf16.mxu1 %v16959_v37  ;;  %v2553_v36 = vadd.f32 %v11600_v34, %v11594_v31  ;;  %v10055_v37 = vld [vmem:[%s16781_s1 + $0x108] ss:$16 sps:$4 sm:$0xff]   ;;  %v10012_v30 = vld [vmem:[%s16781_s1 + $0x2ac] ss:$16 sps:$4 sm:$0xff]  }
 0x191   : > { %v11972_v11 = vpop.f32.mrf.mxu0  ;;  %v2901_v61 = vpop.f32.mrf.mxu1  ;;  %3883 = vmatpush2.bf16.msra.mxu0 %v10052_v21  ;;  %17252 = vst [vmem:[#allocation225_spill] sm:$0xff] %v11990_v49 }
 0x192   : > { %17249 = vst [vmem:[#allocation222_spill] sm:$0xff] %v11965_v32  ;;  %v11981_v46 = vadd.f32 %v2901_v61, %v2549_v41  ;;  %v11988_v32 = vpack.c.bf16 %v710_v55, %v703_v22  ;;  %3884 = vmatprep.subr.bf16.mxu0 %v10057_v28  ;;  %v9998_v41 = vld [vmem:[%s16781_s1 + $0x2e8] ss:$16 sps:$4 sm:$0xff]   ;;  %v11999_v61 = vpack.c.bf16 %v725_v6, %v718_v5  ;;  %v10006_v55 = vld [vmem:[%s16781_s1 + $0x2cc] ss:$16 sps:$4 sm:$0xff]   ;;  %v717_v6 = vld [vmem:[%s10485_s19 + $0x790] sm:$0xff] }
 0x193   : > { %v11986_v14 = vpop.f32.mrf.mxu0  ;;  %v2903_v20 = vpop.f32.mrf.mxu1 }
 0x194   : > { %17250 = vst [vmem:[#allocation223_spill] sm:$0xff] %v11981_v46  ;;  %17251 = vst [vmem:[#allocation224_spill] sm:$0xff] %v11988_v32  ;;  %v11994_v34 = vadd.f32 %v2903_v20, %v2551_v25 }
 0x195   : > { %17254 = vst [vmem:[#allocation227_spill] sm:$0xff] %v11999_v61  ;;  %v12001_v21 = vpop.f32.mrf.mxu0  ;;  %v2905_v22 = vpop.f32.mrf.mxu1  ;;  %3885 = vmatpush2.bf16.msra.mxu0 %v10055_v37  ;;  %v502_v37 = vld [vmem:[%s10485_s19 + $0xd8] sm:$0xff] }
 0x196   : > { %17253 = vst [vmem:[#allocation226_spill] sm:$0xff] %v11994_v34  ;;  %v12008_v20 = vadd.f32 %v2905_v22, %v2553_v36  ;;  %v10004_v36 = vld [vmem:[%s16781_s1 + $0x2c8] ss:$16 sps:$4 sm:$0xff]   ;;  %v739_v34 = vld [vmem:[%s10485_s19 + $0x840] sm:$0xff]  ;;  %v12043_v46 = vpack.c.bf16 %v502_v37, %v495_v42  ;;  %v509_v42 = vld [vmem:[%s10485_s19 + $0x110] sm:$0xff] }
 0x197   : > { %v12010_v25 = vpop.f32.mrf.mxu0  ;;  %v2909_v5 = vpop.f32.mrf.mxu1  ;;  %3341 = vmatmul.mubr.bf16.gmra.mxu0 %v11988_v32  ;;  %9199 = vmatmul.mubr.msk.bf16.vlgmr.msra.gmra.mxu1 %vm2345_vm0, %v11990_v49  ;;  %v17257_v49 = vmov 0   ;;  %v516_v37 = vld [vmem:[%s10485_s19 + $0x148] sm:$0xff] }
 0x198   : > { %17255 = vst [vmem:[#allocation228_spill] sm:$0xff] %v12008_v20  ;;  %v12019_v28 = vadd.f32 %v2909_v5, %v2557_v16  ;;  %4208 = vmatpush1.bf16.msra.mxu1 %v9998_v41  ;;  %3350 = vmatprep.mubr.bf16.mxu0 %v11999_v61  ;;  %v732_v20 = vld [vmem:[%s10485_s19 + $0x808] sm:$0xff]  ;;  %v2563_v16 = vadd.f32 %v11650_v60, %v11594_v31  ;;  %17259 = vst [vmem:[#allocation231_spill] sm:$0xff] %v12043_v46 }
 0x199   : > { %v12027_v22 = vpop.f32.mrf.mxu0  ;;  %v2911_v32 = vpop.f32.mrf.mxu1  ;;  %3543 = vmatprep.mubr.bf16.mxu1 %v17257_v49  ;;  %4209 = vmatprep.subr.bf16.mxu1 %v10006_v55  ;;  %v2567_v55 = vadd.f32 %v11656_v17, %v11580_v8  ;;  %v12049_v19 = vpack.c.bf16 %v739_v34, %v732_v20  ;;  %v10018_v34 = vld [vmem:[%s16781_s1 + $0x28c] ss:$16 sps:$4 sm:$0xff]  }
 0x19a   : > { %17256 = vst [vmem:[#allocation229_spill] sm:$0xff] %v12019_v28  ;;  %v12037_v41 = vadd.f32 %v2911_v32, %v2559_v56  ;;  %v12041_v28 = vpack.c.bf16 %v724_v54, %v717_v6  ;;  %v10010_v32 = vld [vmem:[%s16781_s1 + $0x2a8] ss:$16 sps:$4 sm:$0xff]   ;;  %v2569_v56 = vadd.f32 %v11671_v23, %v11594_v31  ;;  %v731_v6 = vld [vmem:[%s10485_s19 + $0x800] sm:$0xff]  ;;  %v2571_v23 = vadd.f32 %v11680_v2, %v11580_v8 }
 0x19b   : > { %v12039_v5 = vpop.f32.mrf.mxu0  ;;  %v2913_v61 = vpop.f32.mrf.mxu1  ;;  %17261 = vst [vmem:[#allocation233_spill] sm:$0xff] %v12049_v19  ;;  %v2573_v2 = vadd.f32 %v11694_v58, %v11594_v31 }
 0x19c   : > { %17258 = vst [vmem:[#allocation230_spill] sm:$0xff] %v12041_v28  ;;  %v12047_v57 = vadd.f32 %v2913_v61, %v2561_v44  ;;  %4210 = vmatpush1.bf16.msra.mxu1 %v10004_v36  ;;  %v738_v44 = vld [vmem:[%s10485_s19 + $0x838] sm:$0xff] }
 0x19d   : > { %v12051_v3 = vpop.f32.mrf.mxu0  ;;  %v2915_v60 = vpop.f32.mrf.mxu1  ;;  %4211 = vmatprep.subr.bf16.mxu1 %v10012_v30 }
 0x19e   : > { %17260 = vst [vmem:[#allocation232_spill] sm:$0xff] %v12047_v57  ;;  %v12058_v17 = vadd.f32 %v2915_v60, %v2563_v16  ;;  %v746_v16 = vld [vmem:[%s10485_s19 + $0x878] sm:$0xff]  ;;  %v753_v60 = vld [vmem:[%s10485_s19 + $0x8b0] sm:$0xff] }
 0x19f   : > { %v12063_v61 = vpop.f32.mrf.mxu0  ;;  %v2919_v20 = vpop.f32.mrf.mxu1  ;;  %3351 = vmatmul.mubr.bf16.gmra.mxu0 %v12041_v28  ;;  %9200 = vmatmul.mubr.msk.bf16.gmra.mxu1 %vm2345_vm0, %v12043_v46  ;;  %v10016_v46 = vld [vmem:[%s16781_s1 + $0x288] ss:$16 sps:$4 sm:$0xff]   ;;  %v12102_v58 = vpack.c.bf16 %v753_v60, %v746_v16  ;;  %v523_v16 = vld [vmem:[%s10485_s19 + $0x180] sm:$0xff] }
 0x1a0   : > { %17262 = vst [vmem:[#allocation234_spill] sm:$0xff] %v12058_v17  ;;  %v12071_v54 = vadd.f32 %v2919_v20, %v2567_v55  ;;  %3360 = vmatprep.mubr.bf16.mxu0 %v12049_v19  ;;  %3553 = vmatprep.mubr.bf16.mxu1 %v17257_v49  ;;  %v10024_v20 = vld [vmem:[%s16781_s1 + $0x26c] ss:$16 sps:$4 sm:$0xff]   ;;  %v2577_v17 = vadd.f32 %v11706_v35, %v11580_v8 }
 0x1a1   : > { %v12078_v36 = vpop.f32.mrf.mxu0  ;;  %v2921_v30 = vpop.f32.mrf.mxu1  ;;  %4212 = vmatpush1.bf16.msra.mxu1 %v10010_v32  ;;  %v12096_v32 = vpack.c.bf16 %v516_v37, %v509_v42  ;;  %17268 = vst [vmem:[#allocation240_spill] sm:$0xff] %v12102_v58  ;;  %v10030_v35 = vld [vmem:[%s16781_s1 + $0x24c] ss:$16 sps:$4 sm:$0xff]  }
 0x1a2   : > { %17263 = vst [vmem:[#allocation235_spill] sm:$0xff] %v12071_v54  ;;  %v12087_v55 = vadd.f32 %v2921_v30, %v2569_v56  ;;  %4213 = vmatprep.subr.bf16.mxu1 %v10018_v34  ;;  %v12094_v54 = vpack.c.bf16 %v738_v44, %v731_v6  ;;  %v10022_v6 = vld [vmem:[%s16781_s1 + $0x268] ss:$16 sps:$4 sm:$0xff]   ;;  %v2579_v44 = vadd.f32 %v11721_v0, %v11594_v31 }
 0x1a3   : > { %v12092_v19 = vpop.f32.mrf.mxu0  ;;  %v2923_v28 = vpop.f32.mrf.mxu1  ;;  %17266 = vst [vmem:[#allocation238_spill] sm:$0xff] %v12096_v32  ;;  %v2581_v0 = vadd.f32 %v11730_v24, %v11580_v8  ;;  %v752_v30 = vld [vmem:[%s10485_s19 + $0x8a8] sm:$0xff]  ;;  %v530_v60 = vld [vmem:[%s10485_s19 + $0x1b8] sm:$0xff]  ;;  %v2583_v24 = vadd.f32 %v11744_v39, %v11594_v31 }
 0x1a4   : > { %17264 = vst [vmem:[#allocation236_spill] sm:$0xff] %v12087_v55  ;;  %17265 = vst [vmem:[#allocation237_spill] sm:$0xff] %v12094_v54  ;;  %v12100_v57 = vadd.f32 %v2923_v28, %v2571_v23  ;;  %v745_v23 = vld [vmem:[%s10485_s19 + $0x870] sm:$0xff] }
 0x1a5   : > { %v12104_v56 = vpop.f32.mrf.mxu0  ;;  %v2925_v34 = vpop.f32.mrf.mxu1  ;;  %4214 = vmatpush1.bf16.msra.mxu1 %v10016_v46 }
 0x1a6   : > { %17267 = vst [vmem:[#allocation239_spill] sm:$0xff] %v12100_v57  ;;  %v12111_v42 = vadd.f32 %v2925_v34, %v2573_v2  ;;  %4215 = vmatprep.subr.bf16.mxu1 %v10024_v20  ;;  %v760_v34 = vld [vmem:[%s10485_s19 + $0x8e8] sm:$0xff]  ;;  %v2587_v57 = vadd.f32 %v11750_v38, %v11580_v8 }
 0x1a7   : > { %v12116_v28 = vpop.f32.mrf.mxu0  ;;  %v2929_v46 = vpop.f32.mrf.mxu1  ;;  %3361 = vmatmul.mubr.bf16.gmra.mxu0 %v12094_v54  ;;  %9201 = vmatmul.mubr.msk.bf16.gmra.mxu1 %vm2345_vm0, %v12096_v32  ;;  %v767_v54 = vld [vmem:[%s10485_s19 + $0x920] sm:$0xff]  ;;  %v10028_v32 = vld [vmem:[%s16781_s1 + $0x248] ss:$16 sps:$4 sm:$0xff]   ;;  %v10048_v38 = vld [vmem:[%s16781_s1 + $0x20c] ss:$16 sps:$4 sm:$0xff]  }
 0x1a8   : > { %17269 = vst [vmem:[#allocation241_spill] sm:$0xff] %v12111_v42  ;;  %v12124_v37 = vadd.f32 %v2929_v46, %v2577_v17  ;;  %3370 = vmatprep.mubr.bf16.mxu0 %v12102_v58  ;;  %3563 = vmatprep.mubr.bf16.mxu1 %v17257_v49  ;;  %v10036_v46 = vld [vmem:[%s16781_s1 + $0x22c] ss:$16 sps:$4 sm:$0xff]   ;;  %v12147_v42 = vpack.c.bf16 %v752_v30, %v745_v23  ;;  %v10034_v23 = vld [vmem:[%s16781_s1 + $0x228] ss:$16 sps:$4 sm:$0xff]  }
 0x1a9   : > { %v12131_v2 = vpop.f32.mrf.mxu0  ;;  %v2931_v20 = vpop.f32.mrf.mxu1  ;;  %4216 = vmatpush1.bf16.msra.mxu1 %v10022_v6  ;;  %v12149_v6 = vpack.c.bf16 %v530_v60, %v523_v16  ;;  %v12155_v39 = vpack.c.bf16 %v767_v54, %v760_v34  ;;  %v2589_v30 = vadd.f32 %v11765_v10, %v11594_v31  ;;  %v2591_v10 = vadd.f32 %v11774_v47, %v11580_v8  ;;  %v766_v60 = vld [vmem:[%s10485_s19 + $0x918] sm:$0xff]  ;;  %v544_v34 = vld [vmem:[%s10485_s19 + $0x228] sm:$0xff] }
 0x1aa   : > { %17270 = vst [vmem:[#allocation242_spill] sm:$0xff] %v12124_v37  ;;  %v12140_v17 = vadd.f32 %v2931_v20, %v2579_v44  ;;  %4217 = vmatprep.subr.bf16.mxu1 %v10030_v35  ;;  %17272 = vst [vmem:[#allocation244_spill] sm:$0xff] %v12147_v42  ;;  %v537_v20 = vld [vmem:[%s10485_s19 + $0x1f0] sm:$0xff]  ;;  %v2593_v47 = vadd.f32 %v11788_v9, %v11594_v31 }
 0x1ab   : > { %v12145_v58 = vpop.f32.mrf.mxu0  ;;  %v2933_v37 = vpop.f32.mrf.mxu1  ;;  %17273 = vst [vmem:[#allocation245_spill] sm:$0xff] %v12149_v6  ;;  %17275 = vst [vmem:[#allocation247_spill] sm:$0xff] %v12155_v39 }
 0x1ac   : > { %17271 = vst [vmem:[#allocation243_spill] sm:$0xff] %v12140_v17  ;;  %v12153_v55 = vadd.f32 %v2933_v37, %v2581_v0  ;;  %v759_v0 = vld [vmem:[%s10485_s19 + $0x8e0] sm:$0xff] }
 0x1ad   : > { %v12157_v44 = vpop.f32.mrf.mxu0  ;;  %v2935_v35 = vpop.f32.mrf.mxu1  ;;  %4218 = vmatpush1.bf16.msra.mxu1 %v10028_v32 }
 0x1ae   : > { %17274 = vst [vmem:[#allocation246_spill] sm:$0xff] %v12153_v55  ;;  %v12164_v16 = vadd.f32 %v2935_v35, %v2583_v24  ;;  %4219 = vmatprep.subr.bf16.mxu1 %v10036_v46  ;;  %v774_v35 = vld [vmem:[%s10485_s19 + $0x958] sm:$0xff]  ;;  %v2597_v55 = vadd.f32 %v11800_v1, %v11580_v8 }
 0x1af   : > { %v12169_v54 = vpop.f32.mrf.mxu0  ;;  %v2939_v32 = vpop.f32.mrf.mxu1  ;;  %3371 = vmatmul.mubr.bf16.gmra.mxu0 %v12147_v42  ;;  %9202 = vmatmul.mubr.msk.bf16.gmra.mxu1 %vm2345_vm0, %v12149_v6  ;;  %v781_v42 = vld [vmem:[%s10485_s19 + $0x990] sm:$0xff]  ;;  %v10046_v6 = vld [vmem:[%s16781_s1 + $0x208] ss:$16 sps:$4 sm:$0xff]   ;;  %v10063_v1 = vld [vmem:[%s16781_s1 + $0x3cc] ss:$16 sps:$4 sm:$0xff]  }
 0x1b0   : > { %17276 = vst [vmem:[#allocation248_spill] sm:$0xff] %v12164_v16  ;;  %v12177_v37 = vadd.f32 %v2939_v32, %v2587_v57  ;;  %3380 = vmatprep.mubr.bf16.mxu0 %v12155_v39  ;;  %3573 = vmatprep.mubr.bf16.mxu1 %v17257_v49  ;;  %v10060_v32 = vld [vmem:[%s16781_s1 + $0x3ec] ss:$16 sps:$4 sm:$0xff]   ;;  %v12200_v16 = vpack.c.bf16 %v766_v60, %v759_v0  ;;  %v10058_v0 = vld [vmem:[%s16781_s1 + $0x3e8] ss:$16 sps:$4 sm:$0xff]  }
 0x1b1   : > { %v12184_v24 = vpop.f32.mrf.mxu0  ;;  %v2941_v46 = vpop.f32.mrf.mxu1  ;;  %4220 = vmatpush1.bf16.msra.mxu1 %v10034_v23  ;;  %v12202_v23 = vpack.c.bf16 %v544_v34, %v537_v20  ;;  %v12208_v9 = vpack.c.bf16 %v781_v42, %v774_v35  ;;  %v2599_v60 = vadd.f32 %v11815_v48, %v11594_v31  ;;  %v2601_v48 = vadd.f32 %v11824_v18, %v11580_v8  ;;  %v780_v34 = vld [vmem:[%s10485_s19 + $0x988] sm:$0xff]  ;;  %v558_v35 = vld [vmem:[%s10485_s19 + $0x298] sm:$0xff] }
 0x1b2   : > { %17277 = vst [vmem:[#allocation249_spill] sm:$0xff] %v12177_v37  ;;  %v12193_v57 = vadd.f32 %v2941_v46, %v2589_v30  ;;  %4221 = vmatprep.subr.bf16.mxu1 %v10048_v38  ;;  %17279 = vst [vmem:[#allocation251_spill] sm:$0xff] %v12200_v16  ;;  %v551_v46 = vld [vmem:[%s10485_s19 + $0x260] sm:$0xff]  ;;  %v2603_v18 = vadd.f32 %v11838_v50, %v11594_v31 }
 0x1b3   : > { %v12198_v39 = vpop.f32.mrf.mxu0  ;;  %v2943_v37 = vpop.f32.mrf.mxu1  ;;  %17280 = vst [vmem:[#allocation252_spill] sm:$0xff] %v12202_v23  ;;  %17282 = vst [vmem:[#allocation254_spill] sm:$0xff] %v12208_v9 }
 0x1b4   : > { %17278 = vst [vmem:[#allocation250_spill] sm:$0xff] %v12193_v57  ;;  %v12206_v17 = vadd.f32 %v2943_v37, %v2591_v10  ;;  %v773_v10 = vld [vmem:[%s10485_s19 + $0x950] sm:$0xff] }
 0x1b5   : > { %v12210_v30 = vpop.f32.mrf.mxu0  ;;  %v2945_v38 = vpop.f32.mrf.mxu1  ;;  %4222 = vmatpush1.bf16.msra.mxu1 %v10046_v6 }
 0x1b6   : > { %17281 = vst [vmem:[#allocation253_spill] sm:$0xff] %v12206_v17  ;;  %v12217_v20 = vadd.f32 %v2945_v38, %v2593_v47  ;;  %4223 = vmatprep.subr.bf16.mxu1 %v10060_v32  ;;  %v788_v38 = vld [vmem:[%s10485_s19 + $0x9c8] sm:$0xff]  ;;  %v2607_v17 = vadd.f32 %v11850_v45, %v11580_v8 }
 0x1b7   : > { %v12222_v42 = vpop.f32.mrf.mxu0  ;;  %v2949_v6 = vpop.f32.mrf.mxu1  ;;  %3381 = vmatmul.mubr.bf16.gmra.mxu0 %v12200_v16  ;;  %9203 = vmatmul.mubr.msk.bf16.gmra.mxu1 %vm2345_vm0, %v12202_v23  ;;  %v795_v16 = vld [vmem:[%s10485_s19 + $0xa00] sm:$0xff]  ;;  %v10061_v23 = vld [vmem:[%s16781_s1 + $0x3c8] ss:$16 sps:$4 sm:$0xff]  }
 0x1b8   : > { %17283 = vst [vmem:[#allocation255_spill] sm:$0xff] %v12217_v20  ;;  %v12230_v37 = vadd.f32 %v2949_v6, %v2597_v55  ;;  %3390 = vmatprep.mubr.bf16.mxu0 %v12208_v9  ;;  %3583 = vmatprep.mubr.bf16.mxu1 %v17257_v49  ;;  %v10066_v6 = vld [vmem:[%s16781_s1 + $0x3ac] ss:$16 sps:$4 sm:$0xff]   ;;  %v12253_v20 = vpack.c.bf16 %v780_v34, %v773_v10  ;;  %v10064_v10 = vld [vmem:[%s16781_s1 + $0x3a8] ss:$16 sps:$4 sm:$0xff]  }
 0x1b9   : > { %v12237_v47 = vpop.f32.mrf.mxu0  ;;  %v2951_v32 = vpop.f32.mrf.mxu1  ;;  %4224 = vmatpush2.bf16.msra.mxu1 %v10058_v0  ;;  %v12255_v0 = vpack.c.bf16 %v558_v35, %v551_v46  ;;  %v12261_v50 = vpack.c.bf16 %v795_v16, %v788_v38  ;;  %v2609_v34 = vadd.f32 %v11866_v43, %v11594_v31  ;;  %v794_v43 = vld [vmem:[%s10485_s19 + $0x9f8] sm:$0xff]  ;;  %v565_v35 = vld [vmem:[%s10485_s19 + $0x2d0] sm:$0xff] }
 0x1ba   : > { %17284 = vst [vmem:[#allocation256_spill] sm:$0xff] %v12230_v37  ;;  %v12246_v55 = vadd.f32 %v2951_v32, %v2599_v60  ;;  %4225 = vmatprep.subr.bf16.mxu1 %v10063_v1  ;;  %17285 = vst [vmem:[#allocation257_spill] sm:$0xff] %v12253_v20  ;;  %v572_v32 = vld [vmem:[%s10485_s19 + $0x308] sm:$0xff] }
 0x1bb   : > { %v12251_v9 = vpop.f32.mrf.mxu0  ;;  %v2953_v37 = vpop.f32.mrf.mxu1  ;;  %17286 = vst [vmem:[#allocation258_spill] sm:$0xff] %v12255_v0  ;;  %17288 = vst [vmem:[#allocation260_spill] sm:$0xff] %v12261_v50 }
 0x1bc   : > { %v12259_v57 = vadd.f32 %v2953_v37, %v2601_v48  ;;  %v2611_v48 = vadd.f32 %v11880_v27, %v11580_v8 }
 0x1bd   : > { %v12263_v60 = vpop.f32.mrf.mxu0  ;;  %v2955_v1 = vpop.f32.mrf.mxu1  ;;  %4226 = vmatpush2.bf16.msra.mxu1 %v10061_v23  ;;  %v787_v23 = vld [vmem:[%s10485_s19 + $0x9c0] sm:$0xff] }
 0x1be   : > { %17287 = vst [vmem:[#allocation259_spill] sm:$0xff] %v12259_v57  ;;  %v12270_v46 = vadd.f32 %v2955_v1, %v2603_v18  ;;  %4227 = vmatprep.subr.bf16.mxu1 %v10066_v6  ;;  %v802_v6 = vld [vmem:[%s10485_s19 + $0xa38] sm:$0xff]  ;;  %v809_v1 = vld [vmem:[%s10485_s19 + $0xa70] sm:$0xff] }
 0x1bf   : > { %v12272_v45 = vpop.f32.mrf.mxu0  ;;  %v2959_v16 = vpop.f32.mrf.mxu1  ;;  %3391 = vmatmul.mubr.bf16.gmra.mxu0 %v12253_v20  ;;  %9204 = vmatmul.mubr.msk.bf16.gmra.mxu1 %vm2345_vm0, %v12255_v0  ;;  %v2613_v0 = vadd.f32 %v11894_v13, %v11594_v31 }
 0x1c0   : > { %17289 = vst [vmem:[#allocation261_spill] sm:$0xff] %v12270_v46  ;;  %v12280_v37 = vadd.f32 %v2959_v16, %v2607_v17  ;;  %3400 = vmatprep.mubr.bf16.mxu0 %v12261_v50  ;;  %3593 = vmatprep.mubr.bf16.mxu1 %v17257_v49  ;;  %v12297_v16 = vpack.c.bf16 %v794_v43, %v787_v23 }
 0x1c1   : > { %v12287_v38 = vpop.f32.mrf.mxu0  ;;  %v2961_v18 = vpop.f32.mrf.mxu1  ;;  %4228 = vmatpush2.bf16.msra.mxu1 %v10064_v10  ;;  %v12299_v50 = vpack.c.bf16 %v572_v32, %v565_v35  ;;  %v12305_v10 = vpack.c.bf16 %v809_v1, %v802_v6  ;;  %v579_v35 = vld [vmem:[%s10485_s19 + $0x340] sm:$0xff]  ;;  %v2621_v32 = vadd.f32 %v11934_v12, %v11580_v8  ;;  %v10069_v1 = vld [vmem:[%s16781_s1 + $0x38c] ss:$16 sps:$4 sm:$0xff]  }
 0x1c2   : > { %17290 = vst [vmem:[#allocation262_spill] sm:$0xff] %v12280_v37  ;;  %v12293_v20 = vadd.f32 %v2961_v18, %v2609_v34  ;;  %17292 = vst [vmem:[#allocation264_spill] sm:$0xff] %v12297_v16  ;;  %v2617_v37 = vadd.f32 %v11906_v29, %v11580_v8  ;;  %v2619_v18 = vadd.f32 %v11920_v53, %v11594_v31  ;;  %v801_v29 = vld [vmem:[%s10485_s19 + $0xa30] sm:$0xff]  ;;  %v586_v53 = vld [vmem:[%s10485_s19 + $0x378] sm:$0xff]  ;;  %4229 = vmatprep.subr.bf16.mxu1 %v10069_v1 }
 0x1c3   : > { %v12295_v27 = vpop.f32.mrf.mxu0  ;;  %v2963_v17 = vpop.f32.mrf.mxu1  ;;  %17293 = vst [vmem:[#allocation265_spill] sm:$0xff] %v12299_v50  ;;  %17295 = vst [vmem:[#allocation267_spill] sm:$0xff] %v12305_v10  ;;  %v823_v12 = vld [vmem:[%s10485_s19 + $0xae0] sm:$0xff] }
 0x1c4   : > { %17291 = vst [vmem:[#allocation263_spill] sm:$0xff] %v12293_v20  ;;  %v12303_v46 = vadd.f32 %v2963_v17, %v2611_v48  ;;  %v808_v48 = vld [vmem:[%s10485_s19 + $0xa68] sm:$0xff] }
 0x1c5   : > { %v12307_v13 = vpop.f32.mrf.mxu0  ;;  %v2965_v34 = vpop.f32.mrf.mxu1 }
 0x1c6   : > { %17294 = vst [vmem:[#allocation266_spill] sm:$0xff] %v12303_v46  ;;  %v12311_v20 = vadd.f32 %v2965_v34, %v2613_v0  ;;  %v10067_v0 = vld [vmem:[%s16781_s1 + $0x388] ss:$16 sps:$4 sm:$0xff]   ;;  %v2627_v46 = vadd.f32 %v11958_v52, %v11580_v8 }
 0x1c7   : > { %v12313_v23 = vpop.f32.mrf.mxu0  ;;  %v2969_v43 = vpop.f32.mrf.mxu1  ;;  %3401 = vmatmul.mubr.bf16.gmra.mxu0 %v12297_v16  ;;  %9205 = vmatmul.mubr.msk.bf16.gmra.mxu1 %vm2345_vm0, %v12299_v50  ;;  %v816_v50 = vld [vmem:[%s10485_s19 + $0xaa8] sm:$0xff] }
 0x1c8   : > { %17296 = vst [vmem:[#allocation268_spill] sm:$0xff] %v12311_v20  ;;  %v12323_v6 = vadd.f32 %v2969_v43, %v2617_v37  ;;  %3410 = vmatprep.mubr.bf16.mxu0 %v12305_v10  ;;  %3603 = vmatprep.mubr.bf16.mxu1 %v17257_v49  ;;  %v2623_v37 = vadd.f32 %v11946_v15, %v11594_v31 }
 0x1c9   : > { %v12334_v17 = vpop.f32.mrf.mxu0  ;;  %v2971_v34 = vpop.f32.mrf.mxu1  ;;  %v12346_v20 = vpack.c.bf16 %v586_v53, %v579_v35  ;;  %4230 = vmatpush2.bf16.msra.mxu1 %v10067_v0  ;;  %v12352_v15 = vpack.c.bf16 %v823_v12, %v816_v50  ;;  %v815_v50 = vld [vmem:[%s10485_s19 + $0xaa0] sm:$0xff]  ;;  %v593_v53 = vld [vmem:[%s10485_s19 + $0x3b0] sm:$0xff]  ;;  %v600_v0 = vld [vmem:[%s10485_s19 + $0x3e8] sm:$0xff] }
 0x1ca   : > { %17297 = vst [vmem:[#allocation269_spill] sm:$0xff] %v12323_v6  ;;  %v12340_v43 = vadd.f32 %v2971_v34, %v2619_v18  ;;  %v12344_v6 = vpack.c.bf16 %v808_v48, %v801_v29  ;;  %v2629_v29 = vadd.f32 %v11972_v11, %v11594_v31  ;;  %v822_v11 = vld [vmem:[%s10485_s19 + $0xad8] sm:$0xff] }
 0x1cb   : > { %v12342_v10 = vpop.f32.mrf.mxu0  ;;  %v2973_v16 = vpop.f32.mrf.mxu1  ;;  %17299 = vst [vmem:[#allocation271_spill] sm:$0xff] %v12346_v20  ;;  %17301 = vst [vmem:[#allocation273_spill] sm:$0xff] %v12352_v15 }
 0x1cc   : > { %17298 = vst [vmem:[#allocation270_spill] sm:$0xff] %v12344_v6  ;;  %v12350_v57 = vadd.f32 %v2973_v16, %v2621_v32  ;;  %v2631_v16 = vadd.f32 %v11986_v14, %v11580_v8 }
 0x1cd   : > { %v12354_v18 = vpop.f32.mrf.mxu0  ;;  %v2975_v1 = vpop.f32.mrf.mxu1 }
 0x1ce   : > { %17300 = vst [vmem:[#allocation272_spill] sm:$0xff] %v12350_v57  ;;  %v12358_v48 = vadd.f32 %v2975_v1, %v2623_v37  ;;  %v830_v37 = vld [vmem:[%s10485_s19 + $0xb18] sm:$0xff]  ;;  %v837_v1 = vld [vmem:[%s10485_s19 + $0xb50] sm:$0xff] }
 0x1cf   : > { %v12360_v35 = vpop.f32.mrf.mxu0  ;;  %v2979_v52 = vpop.f32.mrf.mxu1  ;;  %3411 = vmatmul.mubr.bf16.gmra.mxu0 %v12344_v6  ;;  %9206 = vmatmul.mubr.msk.bf16.gmra.mxu1 %vm2345_vm0, %v12346_v20  ;;  %v2633_v20 = vadd.f32 %v12001_v21, %v11594_v31  ;;  %v12393_v57 = vpack.c.bf16 %v837_v1, %v830_v37  ;;  %v614_v1 = vld [vmem:[%s10485_s19 + $0x458] sm:$0xff] }
 0x1d0   : > { %17302 = vst [vmem:[#allocation274_spill] sm:$0xff] %v12358_v48  ;;  %v12368_v32 = vadd.f32 %v2979_v52, %v2627_v46  ;;  %3420 = vmatprep.mubr.bf16.mxu0 %v12352_v15  ;;  %3613 = vmatprep.mubr.bf16.mxu1 %v17257_v49  ;;  %v12385_v52 = vpack.c.bf16 %v822_v11, %v815_v50 }
 0x1d1   : > { %v12375_v34 = vpop.f32.mrf.mxu0  ;;  %v2981_v12 = vpop.f32.mrf.mxu1  ;;  %v12387_v15 = vpack.c.bf16 %v600_v0, %v593_v53  ;;  %17306 = vst [vmem:[#allocation278_spill] sm:$0xff] %v12393_v57 }
 0x1d2   : > { %17303 = vst [vmem:[#allocation275_spill] sm:$0xff] %v12368_v32  ;;  %v12381_v6 = vadd.f32 %v2981_v12, %v2629_v29  ;;  %17304 = vst [vmem:[#allocation276_spill] sm:$0xff] %v12385_v52  ;;  %v2637_v32 = vadd.f32 %v12010_v25, %v11580_v8  ;;  %v2639_v12 = vadd.f32 %v12027_v22, %v11594_v31  ;;  %v829_v25 = vld [vmem:[%s10485_s19 + $0xb10] sm:$0xff]  ;;  %v836_v22 = vld [vmem:[%s10485_s19 + $0xb48] sm:$0xff] }
 0x1d3   : > { %v12383_v14 = vpop.f32.mrf.mxu0  ;;  %v2983_v46 = vpop.f32.mrf.mxu1  ;;  %17305 = vst [vmem:[#allocation277_spill] sm:$0xff] %v12387_v15 }
 0x1d4   : > { %v12391_v48 = vadd.f32 %v2983_v46, %v2631_v16  ;;  %v2641_v16 = vadd.f32 %v12039_v5, %v11580_v8 }
 0x1d5   : > { %v12395_v21 = vpop.f32.mrf.mxu0  ;;  %v2985_v29 = vpop.f32.mrf.mxu1 }
 0x1d6   : > { %v12399_v50 = vadd.f32 %v2985_v29, %v2633_v20  ;;  %v607_v20 = vld [vmem:[%s10485_s19 + $0x420] sm:$0xff] }
 0x1d7   : > { %v2989_v11 = vpop.f32.mrf.mxu1  ;;  %v3182_v53 = vpop.f32.mrf.mxu0  ;;  %3421 = vmatmul.mubr.bf16.gmra.mxu0 %v12385_v52  ;;  %9207 = vmatmul.mubr.msk.bf16.gmra.mxu1 %vm2345_vm0, %v12387_v15  ;;  %v844_v52 = vld [vmem:[%s10485_s19 + $0xb88] sm:$0xff]  ;;  %v851_v15 = vld [vmem:[%s10485_s19 + $0xbc0] sm:$0xff] }
 0x1d8   : > { %17307 = vst [vmem:[#allocation279_spill] sm:$0xff] %v12399_v50  ;;  %v12407_v0 = vadd.f32 %v2989_v11, %v2637_v32  ;;  %v12410_v37 = vadd.f32 %v3182_v53, %v11620_v62  ;;  %3430 = vmatprep.mubr.bf16.mxu0 %v12393_v57  ;;  %3623 = vmatprep.mubr.bf16.mxu1 %v17257_v49  ;;  %v10070_v62 = vld [vmem:[%s16781_s1 + $0x368] ss:$16 sps:$4 sm:$0xff]   ;;  %v10072_v11 = vld [vmem:[%s16781_s1 + $0x36c] ss:$16 sps:$4 sm:$0xff]  }
 0x1d9   : > { %v2991_v46 = vpop.f32.mrf.mxu1  ;;  %v3184_v29 = vpop.f32.mrf.mxu0  ;;  %v2643_v50 = vadd.f32 %v12051_v3, %v11594_v31  ;;  %v2647_v3 = vadd.f32 %v12063_v61, %v11580_v8  ;;  %4231 = vmatprep.subr.bf16.mxu1 %v10072_v11  ;;  %v865_v11 = vld [vmem:[%s10485_s19 + $0xc30] sm:$0xff] }
 0x1da   : > { %17308 = vst [vmem:[#allocation280_spill] sm:$0xff] %v12407_v0  ;;  %17309 = vst [vmem:[#allocation281_spill] sm:$0xff] %v12410_v37  ;;  %v12421_v5 = vadd.f32 %v2991_v46, %v2639_v12  ;;  %v12424_v32 = vadd.f32 %v3184_v29, %v11634_v26  ;;  %v12432_v37 = vpack.c.bf16 %v836_v22, %v829_v25  ;;  %4232 = vmatpush2.bf16.msra.mxu1 %v10070_v62  ;;  %v858_v62 = vld [vmem:[%s10485_s19 + $0xbf8] sm:$0xff] }
 0x1db   : > { %v2993_v53 = vpop.f32.mrf.mxu1  ;;  %v3186_v57 = vpop.f32.mrf.mxu0  ;;  %v12434_v0 = vpack.c.bf16 %v614_v1, %v607_v20  ;;  %v12443_v46 = vpack.c.bf16 %v851_v15, %v844_v52  ;;  %v2649_v25 = vadd.f32 %v12078_v36, %v11594_v31  ;;  %v843_v15 = vld [vmem:[%s10485_s19 + $0xb80] sm:$0xff]  ;;  %v2651_v52 = vadd.f32 %v12092_v19, %v11580_v8  ;;  %v628_v20 = vld [vmem:[%s10485_s19 + $0x4c8] sm:$0xff] }
 0x1dc   : > { %17310 = vst [vmem:[#allocation282_spill] sm:$0xff] %v12424_v32  ;;  %17311 = vst [vmem:[#allocation283_spill] sm:$0xff] %v12432_v37  ;;  %v12438_v26 = vadd.f32 %v2993_v53, %v2641_v16  ;;  %v12441_v12 = vadd.f32 %v3186_v57, %v11644_v40  ;;  %v2653_v53 = vadd.f32 %v12104_v56, %v11594_v31 }
 0x1dd   : > { %17312 = vst [vmem:[#allocation284_spill] sm:$0xff] %v12434_v0  ;;  %17313 = vst [vmem:[#allocation285_spill] sm:$0xff] %v12443_v46  ;;  %v2995_v29 = vpop.f32.mrf.mxu1  ;;  %v3188_v32 = vpop.f32.mrf.mxu0 }
 0x1de   : > { %v12447_v22 = vadd.f32 %v2995_v29, %v2643_v50  ;;  %v12450_v61 = vadd.f32 %v3188_v32, %v11654_v51  ;;  %v850_v51 = vld [vmem:[%s10485_s19 + $0xbb8] sm:$0xff]  ;;  %v621_v50 = vld [vmem:[%s10485_s19 + $0x490] sm:$0xff] }
 0x1df   : > { %v2999_v40 = vpop.f32.mrf.mxu1  ;;  %v3192_v57 = vpop.f32.mrf.mxu0  ;;  %3431 = vmatmul.mubr.bf16.gmra.mxu0 %v12432_v37  ;;  %9208 = vmatmul.mubr.msk.bf16.gmra.mxu1 %vm2345_vm0, %v12434_v0 }
 0x1e0   : > { %v12458_v16 = vadd.f32 %v2999_v40, %v2647_v3  ;;  %v12461_v36 = vadd.f32 %v3192_v57, %v11664_v7  ;;  %3440 = vmatprep.mubr.bf16.mxu0 %v12443_v46  ;;  %3633 = vmatprep.mubr.bf16.mxu1 %v17257_v49  ;;  %v12477_v40 = vpack.c.bf16 %v850_v51, %v843_v15 }
 0x1e1   : > { %v3001_v1 = vpop.f32.mrf.mxu1  ;;  %v3194_v32 = vpop.f32.mrf.mxu0  ;;  %v12479_v57 = vpack.c.bf16 %v628_v20, %v621_v50  ;;  %v2657_v46 = vadd.f32 %v12116_v28, %v11580_v8  ;;  %v2659_v15 = vadd.f32 %v12131_v2, %v11594_v31  ;;  %v864_v20 = vld [vmem:[%s10485_s19 + $0xc28] sm:$0xff] }
 0x1e2   : > { %v12472_v19 = vadd.f32 %v3001_v1, %v2649_v25  ;;  %v12475_v3 = vadd.f32 %v3194_v32, %v11678_v63  ;;  %17314 = vst [vmem:[#allocation286_spill] sm:$0xff] %v12477_v40  ;;  %v12488_v25 = vpack.c.bf16 %v865_v11, %v858_v62  ;;  %v2661_v32 = vadd.f32 %v12145_v58, %v11580_v8  ;;  %v642_v11 = vld [vmem:[%s10485_s19 + $0x538] sm:$0xff] }
 0x1e3   : > { %v3003_v7 = vpop.f32.mrf.mxu1  ;;  %v3196_v29 = vpop.f32.mrf.mxu0  ;;  %17315 = vst [vmem:[#allocation287_spill] sm:$0xff] %v12479_v57  ;;  %v2663_v58 = vadd.f32 %v12157_v44, %v11594_v31  ;;  %v2667_v44 = vadd.f32 %v12169_v54, %v11580_v8  ;;  %v17325_v54 = vld [vmem:[#allocation190_spill] sm:$0xff] }
 0x1e4   : > { %v12483_v0 = vadd.f32 %v3003_v7, %v2651_v52  ;;  %v12486_v56 = vadd.f32 %v3196_v29, %v11688_v59  ;;  %17316 = vst [vmem:[#allocation288_spill] sm:$0xff] %v12488_v25  ;;  %v857_v59 = vld [vmem:[%s10485_s19 + $0xbf0] sm:$0xff] }
 0x1e5   : > { %v3005_v63 = vpop.f32.mrf.mxu1  ;;  %v3198_v1 = vpop.f32.mrf.mxu0  ;;  %v12531_v37 = vpack.c.bf16 %v864_v20, %v857_v59  ;;  %v2669_v59 = vadd.f32 %v12184_v24, %v11594_v31  ;;  %v17328_v24 = vld [vmem:[#allocation191_spill] sm:$0xff] }
 0x1e6   : > { %v12492_v51 = vadd.f32 %v3005_v63, %v2653_v53  ;;  %v12495_v50 = vadd.f32 %v3198_v1, %v11698_v4  ;;  %v635_v4 = vld [vmem:[%s10485_s19 + $0x500] sm:$0xff]  ;;  %v10075_v53 = vld [vmem:[%s16781_s1 + $0x4ec] ss:$16 sps:$4 sm:$0xff]  }
 0x1e7   : > { %v3009_v28 = vpop.f32.mrf.mxu1  ;;  %v3202_v52 = vpop.f32.mrf.mxu0  ;;  %3441 = vmatmul.mubr.bf16.gmra.mxu0 %v12477_v40  ;;  %9209 = vmatmul.mubr.msk.bf16.gmra.mxu1 %vm2345_vm0, %v12479_v57  ;;  %v872_v63 = vld [vmem:[%s10485_s19 + $0xc68] sm:$0xff]  ;;  %v879_v1 = vld [vmem:[%s10485_s19 + $0xca0] sm:$0xff]  ;;  %17320 = vst [vmem:[#allocation290_spill] sm:$0xff] %v12531_v37 }
 0x1e8   : > { %v12504_v2 = vadd.f32 %v3009_v28, %v2657_v46  ;;  %v12507_v62 = vadd.f32 %v3202_v52, %v11714_v33  ;;  %3450 = vmatprep.mubr.bf16.mxu0 %v12488_v25  ;;  %3643 = vmatprep.mubr.bf16.mxu1 %v17257_v49  ;;  %v17318_v33 = vld [vmem:[#allocation184_spill] sm:$0xff] }
 0x1e9   : > { %v3011_v7 = vpop.f32.mrf.mxu1  ;;  %v3204_v29 = vpop.f32.mrf.mxu0  ;;  %4560 = vmatprep.subr.bf16.mxu0 %v10075_v53  ;;  %v10076_v52 = vld [vmem:[%s16781_s1 + $0x348] ss:$16 sps:$4 sm:$0xff]   ;;  %v10078_v25 = vld [vmem:[%s16781_s1 + $0x34c] ss:$16 sps:$4 sm:$0xff]   ;;  %v17322_v53 = vld [vmem:[#allocation187_spill] sm:$0xff] }
 0x1ea   : > { %17317 = vst [vmem:[#allocation289_spill] sm:$0xff] %v12507_v62  ;;  %v12520_v46 = vadd.f32 %v3011_v7, %v2659_v15  ;;  %v12523_v28 = vadd.f32 %v3204_v29, %v17318_v33  ;;  %v12533_v62 = vpack.c.bf16 %v642_v11, %v635_v4  ;;  %v12542_v29 = vpack.c.bf16 %v879_v1, %v872_v63  ;;  %v878_v1 = vld [vmem:[%s10485_s19 + $0xc98] sm:$0xff] }
 0x1eb   : > { %v3013_v57 = vpop.f32.mrf.mxu1  ;;  %v3206_v40 = vpop.f32.mrf.mxu0  ;;  %4233 = vmatprep.subr.bf16.mxu1 %v10078_v25  ;;  %v871_v25 = vld [vmem:[%s10485_s19 + $0xc60] sm:$0xff]  ;;  %v2671_v4 = vadd.f32 %v12198_v39, %v11580_v8 }
 0x1ec   : > { %17319 = vst [vmem:[#allocation184_spill] sm:$0xff] %v12523_v28  ;;  %17321 = vst [vmem:[#allocation291_spill] sm:$0xff] %v12533_v62  ;;  %v12537_v15 = vadd.f32 %v3013_v57, %v2661_v32  ;;  %v12540_v7 = vadd.f32 %v3206_v40, %v17322_v53  ;;  %4234 = vmatpush2.bf16.msra.mxu1 %v10076_v52 }
 0x1ed   : > { %17323 = vst [vmem:[#allocation187_spill] sm:$0xff] %v12542_v29  ;;  %v3015_v33 = vpop.f32.mrf.mxu1  ;;  %v3208_v28 = vpop.f32.mrf.mxu0 }
 0x1ee   : > { %v12546_v20 = vadd.f32 %v3015_v33, %v2663_v58  ;;  %v12549_v57 = vadd.f32 %v3208_v28, %v17325_v54  ;;  %v649_v58 = vld [vmem:[%s10485_s19 + $0x570] sm:$0xff]  ;;  %v656_v28 = vld [vmem:[%s10485_s19 + $0x5a8] sm:$0xff]  ;;  %v886_v33 = vld [vmem:[%s10485_s19 + $0xcd8] sm:$0xff] }
 0x1ef   : > { %v3019_v40 = vpop.f32.mrf.mxu1  ;;  %v3212_v32 = vpop.f32.mrf.mxu0  ;;  %3451 = vmatmul.mubr.bf16.gmra.mxu0 %v12531_v37  ;;  %9210 = vmatmul.mubr.msk.bf16.gmra.mxu1 %vm2345_vm0, %v12533_v62  ;;  %v893_v54 = vld [vmem:[%s10485_s19 + $0xd10] sm:$0xff]  ;;  %v2673_v62 = vadd.f32 %v12210_v30, %v11594_v31  ;;  %v12578_v37 = vpack.c.bf16 %v656_v28, %v649_v58  ;;  %v17335_v58 = vld [vmem:[#allocation198_spill] sm:$0xff] }
 0x1f0   : > { %17324 = vst [vmem:[#allocation292_spill] sm:$0xff] %v12546_v20  ;;  %17326 = vst [vmem:[#allocation190_spill] sm:$0xff] %v12549_v57  ;;  %v12557_v11 = vadd.f32 %v3019_v40, %v2667_v44  ;;  %v12560_v63 = vadd.f32 %v3212_v32, %v17328_v24  ;;  %3460 = vmatprep.mubr.bf16.mxu0 %v12542_v29  ;;  %3653 = vmatprep.mubr.bf16.mxu1 %v17257_v49  ;;  %v17330_v44 = vld [vmem:[#allocation192_spill] sm:$0xff]  ;;  %v17333_v57 = vld [vmem:[#allocation195_spill] sm:$0xff] }
 0x1f1   : > { %v3021_v52 = vpop.f32.mrf.mxu1  ;;  %v3214_v53 = vpop.f32.mrf.mxu0  ;;  %v12576_v29 = vpack.c.bf16 %v878_v1, %v871_v25  ;;  %17332 = vst [vmem:[#allocation294_spill] sm:$0xff] %v12578_v37  ;;  %v12587_v30 = vpack.c.bf16 %v893_v54, %v886_v33  ;;  %v2679_v25 = vadd.f32 %v12237_v47, %v11594_v31  ;;  %v17337_v47 = vld [vmem:[#allocation199_spill] sm:$0xff]  ;;  %v892_v54 = vld [vmem:[%s10485_s19 + $0xd08] sm:$0xff] }
 0x1f2   : > { %17327 = vst [vmem:[#allocation293_spill] sm:$0xff] %v12557_v11  ;;  %17329 = vst [vmem:[#allocation191_spill] sm:$0xff] %v12560_v63  ;;  %v12571_v39 = vadd.f32 %v3021_v52, %v2669_v59  ;;  %v12574_v40 = vadd.f32 %v3214_v53, %v17330_v44  ;;  %v2677_v63 = vadd.f32 %v12222_v42, %v11580_v8  ;;  %v663_v44 = vld [vmem:[%s10485_s19 + $0x5e0] sm:$0xff] }
 0x1f3   : > { %v3023_v32 = vpop.f32.mrf.mxu1  ;;  %v3216_v24 = vpop.f32.mrf.mxu0  ;;  %17331 = vst [vmem:[#allocation192_spill] sm:$0xff] %v12576_v29  ;;  %17334 = vst [vmem:[#allocation195_spill] sm:$0xff] %v12587_v30  ;;  %v2681_v53 = vadd.f32 %v12251_v9, %v11580_v8 }
 0x1f4   : > { %v12582_v11 = vadd.f32 %v3023_v32, %v2671_v4  ;;  %v12585_v20 = vadd.f32 %v3216_v24, %v17333_v57  ;;  %v885_v4 = vld [vmem:[%s10485_s19 + $0xcd0] sm:$0xff]  ;;  %v670_v32 = vld [vmem:[%s10485_s19 + $0x618] sm:$0xff] }
 0x1f5   : > { %v3025_v59 = vpop.f32.mrf.mxu1  ;;  %v3218_v52 = vpop.f32.mrf.mxu0 }
 0x1f6   : > { %v12591_v1 = vadd.f32 %v3025_v59, %v2673_v62  ;;  %v12594_v28 = vadd.f32 %v3218_v52, %v17335_v58  ;;  %v900_v52 = vld [vmem:[%s10485_s19 + $0xd48] sm:$0xff]  ;;  %v907_v58 = vld [vmem:[%s10485_s19 + $0xd80] sm:$0xff] }
 0x1f7   : > { %v3029_v42 = vpop.f32.mrf.mxu1  ;;  %v3222_v57 = vpop.f32.mrf.mxu0  ;;  %3461 = vmatmul.mubr.bf16.gmra.mxu0 %v12576_v29  ;;  %9211 = vmatmul.mubr.msk.bf16.gmra.mxu1 %vm2345_vm0, %v12578_v37  ;;  %v2683_v37 = vadd.f32 %v12263_v60, %v11594_v31  ;;  %v2687_v60 = vadd.f32 %v12272_v45, %v11580_v8  ;;  %v17347_v45 = vld [vmem:[#allocation206_spill] sm:$0xff] }
 0x1f8   : > { %v12602_v33 = vadd.f32 %v3029_v42, %v2677_v63  ;;  %v12605_v62 = vadd.f32 %v3222_v57, %v17337_v47  ;;  %3470 = vmatprep.mubr.bf16.mxu0 %v12587_v30  ;;  %3663 = vmatprep.mubr.bf16.mxu1 %v17257_v49  ;;  %v17340_v63 = vld [vmem:[#allocation200_spill] sm:$0xff] }
 0x1f9   : > { %v3031_v24 = vpop.f32.mrf.mxu1  ;;  %v3224_v59 = vpop.f32.mrf.mxu0  ;;  %v10082_v57 = vld [vmem:[%s16781_s1 + $0x328] ss:$16 sps:$4 sm:$0xff]   ;;  %v10084_v47 = vld [vmem:[%s16781_s1 + $0x32c] ss:$16 sps:$4 sm:$0xff]  }
 0x1fa   : > { %17336 = vst [vmem:[#allocation198_spill] sm:$0xff] %v12602_v33  ;;  %17338 = vst [vmem:[#allocation199_spill] sm:$0xff] %v12605_v62  ;;  %v12616_v9 = vadd.f32 %v3031_v24, %v2679_v25  ;;  %v12619_v42 = vadd.f32 %v3224_v59, %v17340_v63  ;;  %v12627_v62 = vpack.c.bf16 %v892_v54, %v885_v4  ;;  %v17344_v24 = vld [vmem:[#allocation203_spill] sm:$0xff]  ;;  %4235 = vmatprep.subr.bf16.mxu1 %v10084_v47 }
 0x1fb   : > { %v3033_v30 = vpop.f32.mrf.mxu1  ;;  %v3226_v29 = vpop.f32.mrf.mxu0  ;;  %v12629_v33 = vpack.c.bf16 %v670_v32, %v663_v44  ;;  %v12638_v63 = vpack.c.bf16 %v907_v58, %v900_v52  ;;  %4236 = vmatpush2.bf16.msra.mxu1 %v10082_v57  ;;  %v2689_v4 = vadd.f32 %v12287_v38, %v11594_v31  ;;  %v899_v44 = vld [vmem:[%s10485_s19 + $0xd40] sm:$0xff]  ;;  %v2691_v32 = vadd.f32 %v12295_v27, %v11580_v8  ;;  %v17350_v38 = vld [vmem:[#allocation207_spill] sm:$0xff]  ;;  %v906_v58 = vld [vmem:[%s10485_s19 + $0xd78] sm:$0xff] }
 0x1fc   : > { %17339 = vst [vmem:[#allocation295_spill] sm:$0xff] %v12616_v9  ;;  %17341 = vst [vmem:[#allocation200_spill] sm:$0xff] %v12619_v42  ;;  %v12633_v25 = vadd.f32 %v3033_v30, %v2681_v53  ;;  %v12636_v59 = vadd.f32 %v3226_v29, %v17344_v24  ;;  %v914_v24 = vld [vmem:[%s10485_s19 + $0xdb8] sm:$0xff] }
 0x1fd   : > { %17342 = vst [vmem:[#allocation296_spill] sm:$0xff] %v12627_v62  ;;  %17343 = vst [vmem:[#allocation297_spill] sm:$0xff] %v12629_v33  ;;  %v3035_v42 = vpop.f32.mrf.mxu1  ;;  %v3228_v9 = vpop.f32.mrf.mxu0 }
 0x1fe   : > { %17345 = vst [vmem:[#allocation203_spill] sm:$0xff] %v12638_v63  ;;  %v12642_v54 = vadd.f32 %v3035_v42, %v2683_v37  ;;  %v12645_v30 = vadd.f32 %v3228_v9, %v17347_v45  ;;  %v677_v9 = vld [vmem:[%s10485_s19 + $0x650] sm:$0xff]  ;;  %v684_v42 = vld [vmem:[%s10485_s19 + $0x688] sm:$0xff] }
 0x1ff   : > { %v3039_v29 = vpop.f32.mrf.mxu1  ;;  %v3232_v53 = vpop.f32.mrf.mxu0  ;;  %3471 = vmatmul.mubr.bf16.gmra.mxu0 %v12627_v62  ;;  %9212 = vmatmul.mubr.msk.bf16.gmra.mxu1 %vm2345_vm0, %v12629_v33  ;;  %v921_v45 = vld [vmem:[%s10485_s19 + $0xdf0] sm:$0xff]  ;;  %v2693_v33 = vadd.f32 %v12307_v13, %v11594_v31  ;;  %v12674_v62 = vpack.c.bf16 %v684_v42, %v677_v9  ;;  %v17357_v9 = vld [vmem:[#allocation214_spill] sm:$0xff] }
 0x200   : > { %17346 = vst [vmem:[#allocation298_spill] sm:$0xff] %v12642_v54  ;;  %17348 = vst [vmem:[#allocation206_spill] sm:$0xff] %v12645_v30  ;;  %v12653_v52 = vadd.f32 %v3039_v29, %v2687_v60  ;;  %v12656_v37 = vadd.f32 %v3232_v53, %v17350_v38  ;;  %3480 = vmatprep.mubr.bf16.mxu0 %v12638_v63  ;;  %3673 = vmatprep.mubr.bf16.mxu1 %v17257_v49  ;;  %v17352_v60 = vld [vmem:[#allocation208_spill] sm:$0xff]  ;;  %v17355_v30 = vld [vmem:[#allocation211_spill] sm:$0xff] }
 0x201   : > { %v3041_v57 = vpop.f32.mrf.mxu1  ;;  %v3234_v47 = vpop.f32.mrf.mxu0  ;;  %v12672_v63 = vpack.c.bf16 %v906_v58, %v899_v44  ;;  %17354 = vst [vmem:[#allocation300_spill] sm:$0xff] %v12674_v62  ;;  %v12683_v13 = vpack.c.bf16 %v921_v45, %v914_v24  ;;  %v2699_v44 = vadd.f32 %v12334_v17, %v11594_v31  ;;  %v17358_v45 = vld [vmem:[#allocation215_spill] sm:$0xff] }
 0x202   : > { %17349 = vst [vmem:[#allocation299_spill] sm:$0xff] %v12653_v52  ;;  %17351 = vst [vmem:[#allocation207_spill] sm:$0xff] %v12656_v37  ;;  %v12667_v27 = vadd.f32 %v3041_v57, %v2689_v4  ;;  %v12670_v29 = vadd.f32 %v3234_v47, %v17352_v60  ;;  %v2697_v37 = vadd.f32 %v12313_v23, %v11580_v8  ;;  %v691_v60 = vld [vmem:[%s10485_s19 + $0x6c0] sm:$0xff] }
 0x203   : > { %v3043_v53 = vpop.f32.mrf.mxu1  ;;  %v3236_v38 = vpop.f32.mrf.mxu0  ;;  %17353 = vst [vmem:[#allocation208_spill] sm:$0xff] %v12672_v63  ;;  %17356 = vst [vmem:[#allocation211_spill] sm:$0xff] %v12683_v13  ;;  %v2701_v47 = vadd.f32 %v12342_v10, %v11580_v8  ;;  %v17359_v10 = vld [vmem:[#allocation216_spill] sm:$0xff] }
 0x204   : > { %v12678_v52 = vadd.f32 %v3043_v53, %v2691_v32  ;;  %v12681_v54 = vadd.f32 %v3236_v38, %v17355_v30  ;;  %v913_v30 = vld [vmem:[%s10485_s19 + $0xdb0] sm:$0xff]  ;;  %v698_v53 = vld [vmem:[%s10485_s19 + $0x6f8] sm:$0xff] }
 0x205   : > { %v3045_v4 = vpop.f32.mrf.mxu1  ;;  %v3238_v57 = vpop.f32.mrf.mxu0 }
 0x206   : > { %v12687_v58 = vadd.f32 %v3045_v4, %v2693_v33  ;;  %v12690_v42 = vadd.f32 %v3238_v57, %v17357_v9  ;;  %v920_v33 = vld [vmem:[%s10485_s19 + $0xde8] sm:$0xff]  ;;  %v2703_v57 = vadd.f32 %v12354_v18, %v11594_v31  ;;  %v2707_v18 = vadd.f32 %v12360_v35, %v11580_v8 }
 0x207   : > { %v3049_v23 = vpop.f32.mrf.mxu1  ;;  %v3242_v32 = vpop.f32.mrf.mxu0  ;;  %3481 = vmatmul.mubr.bf16.gmra.mxu0 %v12672_v63  ;;  %9213 = vmatmul.mubr.msk.bf16.gmra.mxu1 %vm2345_vm0, %v12674_v62  ;;  %v12721_v62 = vpack.c.bf16 %v920_v33, %v913_v30  ;;  %v12723_v63 = vpack.c.bf16 %v698_v53, %v691_v60  ;;  %v2709_v30 = vadd.f32 %v12375_v34, %v11594_v31  ;;  %v17364_v60 = vld [vmem:[#allocation221_spill] sm:$0xff] }
 0x208   : > { %v12698_v24 = vadd.f32 %v3049_v23, %v2697_v37  ;;  %v12701_v17 = vadd.f32 %v3242_v32, %v17358_v45  ;;  %3490 = vmatprep.mubr.bf16.mxu0 %v12683_v13  ;;  %3683 = vmatprep.mubr.bf16.mxu1 %v17257_v49  ;;  %v10088_v23 = vld [vmem:[%s16781_s1 + $0x308] ss:$16 sps:$4 sm:$0xff]   ;;  %v10090_v32 = vld [vmem:[%s16781_s1 + $0x30c] ss:$16 sps:$4 sm:$0xff]   ;;  %v17369_v34 = vld [vmem:[#allocation9_spill] sm:$0xff] }
 0x209   : > { %v3051_v38 = vpop.f32.mrf.mxu1  ;;  %v3244_v4 = vpop.f32.mrf.mxu0  ;;  %17361 = vst [vmem:[#allocation215_spill] sm:$0xff] %v12721_v62  ;;  %17362 = vst [vmem:[#allocation216_spill] sm:$0xff] %v12723_v63  ;;  %4237 = vmatprep.subr.bf16.mxu1 %v10090_v32 }
 0x20a   : > { %v12710_v9 = vadd.f32 %v3051_v38, %v2699_v44  ;;  %v12713_v37 = vadd.f32 %v3244_v4, %v17359_v10  ;;  %v17363_v38 = vld [vmem:[#allocation219_spill] sm:$0xff]  ;;  %4238 = vmatpush2.bf16.msra.mxu1 %v10088_v23  ;;  %v17367_v23 = vld [vmem:[#allocation222_spill] sm:$0xff] }
 0x20b   : > { %v3053_v45 = vpop.f32.mrf.mxu1  ;;  %v3246_v13 = vpop.f32.mrf.mxu0 }
 0x20c   : > { %17360 = vst [vmem:[#allocation214_spill] sm:$0xff] %v12713_v37  ;;  %v12727_v44 = vadd.f32 %v3053_v45, %v2701_v47  ;;  %v12730_v4 = vadd.f32 %v3246_v13, %v17363_v38  ;;  %v2711_v13 = vadd.f32 %v12383_v14, %v11580_v8 }
 0x20d   : > { %v3055_v10 = vpop.f32.mrf.mxu1  ;;  %v3248_v37 = vpop.f32.mrf.mxu0 }
 0x20e   : > { %v12734_v33 = vadd.f32 %v3055_v10, %v2703_v57  ;;  %v12737_v53 = vadd.f32 %v3248_v37, %v17364_v60  ;;  %v705_v57 = vld [vmem:[%s10485_s19 + $0x730] sm:$0xff]  ;;  %v712_v37 = vld [vmem:[%s10485_s19 + $0x768] sm:$0xff]  ;;  %v2713_v60 = vadd.f32 %v12395_v21, %v11594_v31 }
 0x20f   : > { %v3059_v35 = vpop.f32.mrf.mxu1  ;;  %v3252_v47 = vpop.f32.mrf.mxu0  ;;  %3491 = vmatmul.mubr.bf16.gmra.mxu0 %v12721_v62  ;;  %9214 = vmatmul.mubr.msk.bf16.gmra.mxu1 %vm2345_vm0, %v12723_v63  ;;  %v17371_v62 = vld [vmem:[#allocation223_spill] sm:$0xff]  ;;  %v10073_v21 = vld [vmem:[%s16781_s1 + $0x4e8] ss:$16 sps:$4 sm:$0xff]  }
 0x210   : > { %17365 = vst [vmem:[#allocation219_spill] sm:$0xff] %v12737_v53  ;;  %v12744_v32 = vadd.f32 %v3059_v35, %v2707_v18  ;;  %v12747_v45 = vadd.f32 %v3252_v47, %v17367_v23  ;;  %3693 = vmatprep.mubr.bf16.mxu1 %v17257_v49  ;;  %3886 = vmatprep.mubr.bf16.mxu0 %v17369_v34 }
 0x211   : > { %v3061_v38 = vpop.f32.mrf.mxu1  ;;  %v3254_v10 = vpop.f32.mrf.mxu0  ;;  %v12760_v47 = vpack.c.bf16 %v712_v37, %v705_v57  ;;  %v17379_v57 = vld [vmem:[#allocation228_spill] sm:$0xff] }
 0x212   : > { %17366 = vst [vmem:[#allocation221_spill] sm:$0xff] %v12744_v32  ;;  %17368 = vst [vmem:[#allocation222_spill] sm:$0xff] %v12747_v45  ;;  %v12755_v63 = vadd.f32 %v3061_v38, %v2709_v30  ;;  %v12758_v14 = vadd.f32 %v3254_v10, %v17371_v62  ;;  %v17375_v45 = vld [vmem:[#allocation226_spill] sm:$0xff]  ;;  %v17377_v62 = vld [vmem:[#allocation111_spill] sm:$0xff] }
 0x213   : > { %v3063_v18 = vpop.f32.mrf.mxu1  ;;  %v3256_v35 = vpop.f32.mrf.mxu0  ;;  %17373 = vst [vmem:[#allocation301_spill] sm:$0xff] %v12760_v47  ;;  %v2717_v30 = vadd.f32 %v17377_v62, %v11580_v8 }
 0x214   : > { %17370 = vst [vmem:[#allocation9_spill] sm:$0xff] %v12755_v63  ;;  %17372 = vst [vmem:[#allocation223_spill] sm:$0xff] %v12758_v14  ;;  %v12762_v23 = vadd.f32 %v3063_v18, %v2711_v13  ;;  %v12765_v34 = vadd.f32 %v3256_v35, %v17375_v45  ;;  %v10081_v13 = vld [vmem:[%s16781_s1 + $0x4cc] ss:$16 sps:$4 sm:$0xff]   ;;  %v17381_v18 = vld [vmem:[#allocation11_spill] sm:$0xff] }
 0x215   : > { %v3065_v32 = vpop.f32.mrf.mxu1  ;;  %v3258_v53 = vpop.f32.mrf.mxu0  ;;  %v17382_v35 = vld [vmem:[#allocation112_spill] sm:$0xff]  ;;  %v17412_v14 = vld [vmem:[#allocation239_spill] sm:$0xff] }
 0x216   : > { %17374 = vst [vmem:[#allocation302_spill] sm:$0xff] %v12762_v23  ;;  %17376 = vst [vmem:[#allocation226_spill] sm:$0xff] %v12765_v34  ;;  %v12772_v38 = vadd.f32 %v3065_v32, %v2713_v60  ;;  %v12775_v37 = vadd.f32 %v3258_v53, %v17379_v57  ;;  %v2719_v34 = vadd.f32 %v17382_v35, %v11594_v31  ;;  %v17384_v32 = vld [vmem:[#allocation229_spill] sm:$0xff] }
 0x217   : > { %v3069_v45 = vpop.f32.mrf.mxu1  ;;  %v3262_v10 = vpop.f32.mrf.mxu0  ;;  %9215 = vmatmul.mubr.msk.bf16.gmra.mxu1 %vm2345_vm0, %v12760_v47  ;;  %3887 = vmatmul.mubr.bf16.vlgmr.msra.gmra.mxu0 %v17381_v18  ;;  %v17386_v53 = vld [vmem:[#allocation13_spill] sm:$0xff]  ;;  %v10079_v18 = vld [vmem:[%s16781_s1 + $0x4c8] ss:$16 sps:$4 sm:$0xff]  }
 0x218   : > { %17378 = vst [vmem:[#allocation111_spill] sm:$0xff] %v12772_v38  ;;  %17380 = vst [vmem:[#allocation228_spill] sm:$0xff] %v12775_v37  ;;  %v12785_v62 = vadd.f32 %v3069_v45, %v2717_v30  ;;  %v12788_v60 = vadd.f32 %v3262_v10, %v17384_v32  ;;  %3703 = vmatprep.mubr.bf16.mxu1 %v17257_v49  ;;  %3896 = vmatprep.mubr.bf16.mxu0 %v17386_v53  ;;  %v719_v57 = vld [vmem:[%s10485_s19 + $0x7a0] sm:$0xff]  ;;  %v726_v37 = vld [vmem:[%s10485_s19 + $0x7d8] sm:$0xff] }
 0x219   : > { %v3071_v38 = vpop.f32.mrf.mxu1  ;;  %v3264_v23 = vpop.f32.mrf.mxu0  ;;  %4561 = vmatpush1.bf16.msra.mxu0 %v10073_v21  ;;  %v17387_v35 = vld [vmem:[#allocation113_spill] sm:$0xff]  ;;  %v10087_v32 = vld [vmem:[%s16781_s1 + $0x4ac] ss:$16 sps:$4 sm:$0xff]  }
 0x21a   : > { %17383 = vst [vmem:[#allocation11_spill] sm:$0xff] %v12785_v62  ;;  %17385 = vst [vmem:[#allocation112_spill] sm:$0xff] %v12788_v60  ;;  %v2721_v30 = vadd.f32 %v17387_v35, %v11580_v8  ;;  %v12799_v45 = vadd.f32 %v3071_v38, %v2719_v34  ;;  %v12802_v10 = vadd.f32 %v3264_v23, %v12037_v41  ;;  %4562 = vmatprep.subr.bf16.mxu0 %v10081_v13  ;;  %v10096_v21 = vld [vmem:[%s16781_s1 + $0x60c] ss:$16 sps:$4 sm:$0xff]  }
 0x21b   : > { %v3073_v53 = vpop.f32.mrf.mxu1  ;;  %v3266_v47 = vpop.f32.mrf.mxu0  ;;  %v12810_v60 = vpack.c.bf16 %v726_v37, %v719_v57  ;;  %v17391_v35 = vld [vmem:[#allocation118_spill] sm:$0xff]  ;;  %v17393_v41 = vld [vmem:[#allocation232_spill] sm:$0xff]  ;;  %4927 = vmatprep.subr.bf16.mxu1 %v10096_v21  ;;  %v17395_v37 = vld [vmem:[#allocation119_spill] sm:$0xff] }
 0x21c   : > { %17388 = vst [vmem:[#allocation229_spill] sm:$0xff] %v12799_v45  ;;  %17389 = vst [vmem:[#allocation13_spill] sm:$0xff] %v12802_v10  ;;  %v2723_v34 = vadd.f32 %v17391_v35, %v11594_v31  ;;  %v12814_v38 = vadd.f32 %v3073_v53, %v2721_v30  ;;  %v12817_v23 = vadd.f32 %v3266_v47, %v17393_v41  ;;  %v10085_v45 = vld [vmem:[%s16781_s1 + $0x4a8] ss:$16 sps:$4 sm:$0xff]   ;;  %v10093_v47 = vld [vmem:[%s16781_s1 + $0x48c] ss:$16 sps:$4 sm:$0xff]  }
 0x21d   : > { %17390 = vst [vmem:[#allocation113_spill] sm:$0xff] %v12810_v60  ;;  %v3075_v13 = vpop.f32.mrf.mxu1  ;;  %v3268_v10 = vpop.f32.mrf.mxu0  ;;  %4563 = vmatpush1.bf16.msra.mxu0 %v10079_v18  ;;  %v2727_v57 = vadd.f32 %v17395_v37, %v11580_v8  ;;  %v17397_v30 = vld [vmem:[#allocation234_spill] sm:$0xff]  ;;  %v17399_v35 = vld [vmem:[#allocation15_spill] sm:$0xff]  ;;  %v17400_v41 = vld [vmem:[#allocation120_spill] sm:$0xff] }
 0x21e   : > { %17392 = vst [vmem:[#allocation118_spill] sm:$0xff] %v12814_v38  ;;  %17394 = vst [vmem:[#allocation232_spill] sm:$0xff] %v12817_v23  ;;  %v12824_v62 = vadd.f32 %v3075_v13, %v2723_v34  ;;  %v12827_v53 = vadd.f32 %v3268_v10, %v17397_v30  ;;  %4564 = vmatprep.subr.bf16.mxu0 %v10087_v32  ;;  %v2729_v37 = vadd.f32 %v17400_v41, %v11594_v31  ;;  %v17402_v13 = vld [vmem:[#allocation235_spill] sm:$0xff]  ;;  %v17404_v32 = vld [vmem:[#allocation17_spill] sm:$0xff] }
 0x21f   : > { %v3079_v18 = vpop.f32.mrf.mxu1  ;;  %v3272_v21 = vpop.f32.mrf.mxu0  ;;  %9216 = vmatmul.mubr.msk.bf16.gmra.mxu1 %vm2345_vm0, %v12810_v60  ;;  %3897 = vmatmul.mubr.bf16.gmra.mxu0 %v17399_v35  ;;  %v733_v30 = vld [vmem:[%s10485_s19 + $0x810] sm:$0xff]  ;;  %v10091_v35 = vld [vmem:[%s16781_s1 + $0x488] ss:$16 sps:$4 sm:$0xff]   ;;  %v17405_v41 = vld [vmem:[#allocation121_spill] sm:$0xff] }
 0x220   : > { %17396 = vst [vmem:[#allocation119_spill] sm:$0xff] %v12824_v62  ;;  %17398 = vst [vmem:[#allocation234_spill] sm:$0xff] %v12827_v53  ;;  %v12837_v34 = vadd.f32 %v3079_v18, %v2727_v57  ;;  %v12840_v10 = vadd.f32 %v3272_v21, %v17402_v13  ;;  %3713 = vmatprep.mubr.bf16.mxu1 %v17257_v49  ;;  %3906 = vmatprep.mubr.bf16.mxu0 %v17404_v32  ;;  %v740_v53 = vld [vmem:[%s10485_s19 + $0x848] sm:$0xff]  ;;  %v17407_v21 = vld [vmem:[#allocation236_spill] sm:$0xff] }
 0x221   : > { %v3081_v62 = vpop.f32.mrf.mxu1  ;;  %v3274_v23 = vpop.f32.mrf.mxu0  ;;  %4565 = vmatpush1.bf16.msra.mxu0 %v10085_v45  ;;  %v2731_v57 = vadd.f32 %v17405_v41, %v11580_v8  ;;  %v17410_v45 = vld [vmem:[#allocation126_spill] sm:$0xff] }
 0x222   : > { %17401 = vst [vmem:[#allocation15_spill] sm:$0xff] %v12837_v34  ;;  %17403 = vst [vmem:[#allocation120_spill] sm:$0xff] %v12840_v10  ;;  %v12851_v18 = vadd.f32 %v3081_v62, %v2729_v37  ;;  %v12854_v13 = vadd.f32 %v3274_v23, %v17407_v21  ;;  %4566 = vmatprep.subr.bf16.mxu0 %v10093_v47  ;;  %v12856_v10 = vpack.c.bf16 %v740_v53, %v733_v30  ;;  %v17414_v23 = vld [vmem:[#allocation127_spill] sm:$0xff]  ;;  %v17416_v21 = vld [vmem:[#allocation241_spill] sm:$0xff] }
 0x223   : > { %v3083_v60 = vpop.f32.mrf.mxu1  ;;  %v3276_v32 = vpop.f32.mrf.mxu0  ;;  %v2733_v34 = vadd.f32 %v17410_v45, %v11594_v31  ;;  %v2737_v47 = vadd.f32 %v17414_v23, %v11580_v8  ;;  %v17421_v45 = vld [vmem:[#allocation242_spill] sm:$0xff] }
 0x224   : > { %17406 = vst [vmem:[#allocation235_spill] sm:$0xff] %v12851_v18  ;;  %17408 = vst [vmem:[#allocation17_spill] sm:$0xff] %v12854_v13  ;;  %v12860_v38 = vadd.f32 %v3083_v60, %v2731_v57  ;;  %v12863_v63 = vadd.f32 %v3276_v32, %v17412_v14  ;;  %v17418_v60 = vld [vmem:[#allocation19_spill] sm:$0xff]  ;;  %v747_v14 = vld [vmem:[%s10485_s19 + $0x880] sm:$0xff] }
 0x225   : > { %17409 = vst [vmem:[#allocation121_spill] sm:$0xff] %v12856_v10  ;;  %v3085_v41 = vpop.f32.mrf.mxu1  ;;  %v3278_v62 = vpop.f32.mrf.mxu0  ;;  %4567 = vmatpush1.bf16.msra.mxu0 %v10091_v35  ;;  %v17419_v57 = vld [vmem:[#allocation128_spill] sm:$0xff] }
 0x226   : > { %17411 = vst [vmem:[#allocation236_spill] sm:$0xff] %v12860_v38  ;;  %17413 = vst [vmem:[#allocation126_spill] sm:$0xff] %v12863_v63  ;;  %v12867_v37 = vadd.f32 %v3085_v41, %v2733_v34  ;;  %v12870_v53 = vadd.f32 %v3278_v62, %v17416_v21  ;;  %v2739_v32 = vadd.f32 %v17419_v57, %v11594_v31  ;;  %v17423_v34 = vld [vmem:[#allocation21_spill] sm:$0xff]  ;;  %v754_v41 = vld [vmem:[%s10485_s19 + $0x8b8] sm:$0xff] }
 0x227   : > { %v3089_v30 = vpop.f32.mrf.mxu1  ;;  %v3282_v13 = vpop.f32.mrf.mxu0  ;;  %9217 = vmatmul.mubr.msk.bf16.gmra.mxu1 %vm2345_vm0, %v12856_v10  ;;  %3907 = vmatmul.mubr.bf16.gmra.mxu0 %v17418_v60  ;;  %v10097_v62 = vld [vmem:[%s16781_s1 + $0x468] ss:$16 sps:$4 sm:$0xff]   ;;  %v10099_v21 = vld [vmem:[%s16781_s1 + $0x46c] ss:$16 sps:$4 sm:$0xff]  }
 0x228   : > { %17415 = vst [vmem:[#allocation239_spill] sm:$0xff] %v12867_v37  ;;  %17417 = vst [vmem:[#allocation127_spill] sm:$0xff] %v12870_v53  ;;  %v12878_v35 = vadd.f32 %v3089_v30, %v2737_v47  ;;  %v12881_v23 = vadd.f32 %v3282_v13, %v17421_v45  ;;  %3723 = vmatprep.mubr.bf16.mxu1 %v17257_v49  ;;  %3916 = vmatprep.mubr.bf16.mxu0 %v17423_v34  ;;  %v17424_v47 = vld [vmem:[#allocation129_spill] sm:$0xff]  ;;  %v17425_v45 = vld [vmem:[#allocation243_spill] sm:$0xff] }
 0x229   : > { %v3091_v60 = vpop.f32.mrf.mxu1  ;;  %v3284_v57 = vpop.f32.mrf.mxu0  ;;  %v2741_v30 = vadd.f32 %v17424_v47, %v11580_v8  ;;  %4568 = vmatprep.subr.bf16.mxu0 %v10099_v21  ;;  %v17428_v53 = vld [vmem:[#allocation134_spill] sm:$0xff] }
 0x22a   : > { %17420 = vst [vmem:[#allocation241_spill] sm:$0xff] %v12878_v35  ;;  %17422 = vst [vmem:[#allocation19_spill] sm:$0xff] %v12881_v23  ;;  %v12894_v13 = vadd.f32 %v3091_v60, %v2739_v32  ;;  %v12897_v10 = vadd.f32 %v3284_v57, %v17425_v45  ;;  %v12899_v35 = vpack.c.bf16 %v754_v41, %v747_v14  ;;  %4569 = vmatpush1.bf16.msra.mxu0 %v10097_v62  ;;  %v17430_v38 = vld [vmem:[#allocation246_spill] sm:$0xff]  ;;  %v17432_v57 = vld [vmem:[#allocation135_spill] sm:$0xff] }
 0x22b   : > { %v3093_v34 = vpop.f32.mrf.mxu1  ;;  %v3286_v23 = vpop.f32.mrf.mxu0  ;;  %v2743_v37 = vadd.f32 %v17428_v53, %v11594_v31  ;;  %v2747_v21 = vadd.f32 %v17432_v57, %v11580_v8  ;;  %v17434_v14 = vld [vmem:[#allocation248_spill] sm:$0xff]  ;;  %v17436_v53 = vld [vmem:[#allocation23_spill] sm:$0xff] }
 0x22c   : > { %17426 = vst [vmem:[#allocation128_spill] sm:$0xff] %v12897_v10  ;;  %17427 = vst [vmem:[#allocation242_spill] sm:$0xff] %v12899_v35  ;;  %v12903_v63 = vadd.f32 %v3093_v34, %v2741_v30  ;;  %v12906_v18 = vadd.f32 %v3286_v23, %v17430_v38  ;;  %v17437_v38 = vld [vmem:[#allocation136_spill] sm:$0xff]  ;;  %v17439_v34 = vld [vmem:[#allocation249_spill] sm:$0xff] }
 0x22d   : > { %v3095_v32 = vpop.f32.mrf.mxu1  ;;  %v3288_v60 = vpop.f32.mrf.mxu0  ;;  %v2749_v23 = vadd.f32 %v17437_v38, %v11594_v31 }
 0x22e   : > { %17429 = vst [vmem:[#allocation21_spill] sm:$0xff] %v12903_v63  ;;  %17431 = vst [vmem:[#allocation129_spill] sm:$0xff] %v12906_v18  ;;  %v12910_v47 = vadd.f32 %v3095_v32, %v2743_v37  ;;  %v12913_v41 = vadd.f32 %v3288_v60, %v17434_v14  ;;  %v17441_v37 = vld [vmem:[#allocation25_spill] sm:$0xff]  ;;  %v761_v32 = vld [vmem:[%s10485_s19 + $0x8f0] sm:$0xff] }
 0x22f   : > { %v3099_v62 = vpop.f32.mrf.mxu1  ;;  %v3292_v45 = vpop.f32.mrf.mxu0  ;;  %9218 = vmatmul.mubr.msk.bf16.gmra.mxu1 %vm2345_vm0, %v12899_v35  ;;  %3917 = vmatmul.mubr.bf16.gmra.mxu0 %v17436_v53  ;;  %v768_v60 = vld [vmem:[%s10485_s19 + $0x928] sm:$0xff]  ;;  %v17442_v35 = vld [vmem:[#allocation137_spill] sm:$0xff] }
 0x230   : > { %17433 = vst [vmem:[#allocation243_spill] sm:$0xff] %v12910_v47  ;;  %17435 = vst [vmem:[#allocation134_spill] sm:$0xff] %v12913_v41  ;;  %v12920_v30 = vadd.f32 %v3099_v62, %v2747_v21  ;;  %v12923_v18 = vadd.f32 %v3292_v45, %v17439_v34  ;;  %3733 = vmatprep.mubr.bf16.mxu1 %v17257_v49  ;;  %3926 = vmatprep.mubr.bf16.mxu0 %v17441_v37  ;;  %v17444_v47 = vld [vmem:[#allocation250_spill] sm:$0xff] }
 0x231   : > { %v3101_v57 = vpop.f32.mrf.mxu1  ;;  %v3294_v14 = vpop.f32.mrf.mxu0  ;;  %v2751_v41 = vadd.f32 %v17442_v35, %v11580_v8  ;;  %v12936_v45 = vpack.c.bf16 %v768_v60, %v761_v32  ;;  %v17447_v34 = vld [vmem:[#allocation142_spill] sm:$0xff] }
 0x232   : > { %17438 = vst [vmem:[#allocation246_spill] sm:$0xff] %v12920_v30  ;;  %17440 = vst [vmem:[#allocation135_spill] sm:$0xff] %v12923_v18  ;;  %v12931_v53 = vadd.f32 %v3101_v57, %v2749_v23  ;;  %v12934_v38 = vadd.f32 %v3294_v14, %v17444_v47  ;;  %v2753_v37 = vadd.f32 %v17447_v34, %v11594_v31  ;;  %v17449_v30 = vld [vmem:[#allocation253_spill] sm:$0xff]  ;;  %v17451_v57 = vld [vmem:[#allocation143_spill] sm:$0xff] }
 0x233   : > { %v3103_v21 = vpop.f32.mrf.mxu1  ;;  %v3296_v62 = vpop.f32.mrf.mxu0  ;;  %17446 = vst [vmem:[#allocation136_spill] sm:$0xff] %v12936_v45  ;;  %v2757_v47 = vadd.f32 %v17451_v57, %v11580_v8 }
 0x234   : > { %17443 = vst [vmem:[#allocation248_spill] sm:$0xff] %v12931_v53  ;;  %17445 = vst [vmem:[#allocation23_spill] sm:$0xff] %v12934_v38  ;;  %v12940_v18 = vadd.f32 %v3103_v21, %v2751_v41  ;;  %v12943_v63 = vadd.f32 %v3296_v62, %v17449_v30  ;;  %v17453_v38 = vld [vmem:[#allocation255_spill] sm:$0xff]  ;;  %v775_v30 = vld [vmem:[%s10485_s19 + $0x960] sm:$0xff] }
 0x235   : > { %v3105_v35 = vpop.f32.mrf.mxu1  ;;  %v3298_v23 = vpop.f32.mrf.mxu0  ;;  %v17455_v41 = vld [vmem:[#allocation27_spill] sm:$0xff]  ;;  %v17456_v21 = vld [vmem:[#allocation144_spill] sm:$0xff] }
 0x236   : > { %17448 = vst [vmem:[#allocation249_spill] sm:$0xff] %v12940_v18  ;;  %17450 = vst [vmem:[#allocation25_spill] sm:$0xff] %v12943_v63  ;;  %v12947_v14 = vadd.f32 %v3105_v35, %v2753_v37  ;;  %v12950_v53 = vadd.f32 %v3298_v23, %v17453_v38  ;;  %v2759_v62 = vadd.f32 %v17456_v21, %v11594_v31  ;;  %v17458_v63 = vld [vmem:[#allocation256_spill] sm:$0xff]  ;;  %v17460_v38 = vld [vmem:[#allocation29_spill] sm:$0xff] }
 0x237   : > { %v3109_v32 = vpop.f32.mrf.mxu1  ;;  %v3302_v60 = vpop.f32.mrf.mxu0  ;;  %9219 = vmatmul.mubr.msk.bf16.gmra.mxu1 %vm2345_vm0, %v12936_v45  ;;  %3927 = vmatmul.mubr.bf16.gmra.mxu0 %v17455_v41  ;;  %v782_v37 = vld [vmem:[%s10485_s19 + $0x998] sm:$0xff]  ;;  %v17466_v18 = vld [vmem:[#allocation259_spill] sm:$0xff] }
 0x238   : > { %17452 = vst [vmem:[#allocation137_spill] sm:$0xff] %v12947_v14  ;;  %17454 = vst [vmem:[#allocation250_spill] sm:$0xff] %v12950_v53  ;;  %v12958_v34 = vadd.f32 %v3109_v32, %v2757_v47  ;;  %v12961_v57 = vadd.f32 %v3302_v60, %v17458_v63  ;;  %3743 = vmatprep.mubr.bf16.mxu1 %v17257_v49  ;;  %3936 = vmatprep.mubr.bf16.mxu0 %v17460_v38  ;;  %v10100_v35 = vld [vmem:[%s16781_s1 + $0x448] ss:$16 sps:$4 sm:$0xff]   ;;  %v10102_v23 = vld [vmem:[%s16781_s1 + $0x44c] ss:$16 sps:$4 sm:$0xff]  }
 0x239   : > { %v3111_v41 = vpop.f32.mrf.mxu1  ;;  %v3304_v21 = vpop.f32.mrf.mxu0  ;;  %v17461_v47 = vld [vmem:[#allocation145_spill] sm:$0xff]  ;;  %4570 = vmatprep.subr.bf16.mxu0 %v10102_v23 }
 0x23a   : > { %17457 = vst [vmem:[#allocation142_spill] sm:$0xff] %v12958_v34  ;;  %17459 = vst [vmem:[#allocation253_spill] sm:$0xff] %v12961_v57  ;;  %v2761_v32 = vadd.f32 %v17461_v47, %v11580_v8  ;;  %v12974_v63 = vadd.f32 %v3111_v41, %v2759_v62  ;;  %v12977_v60 = vadd.f32 %v3304_v21, %v12246_v55  ;;  %4571 = vmatpush1.bf16.msra.mxu0 %v10100_v35  ;;  %v17464_v34 = vld [vmem:[#allocation150_spill] sm:$0xff]  ;;  %v17468_v55 = vld [vmem:[#allocation151_spill] sm:$0xff] }
 0x23b   : > { %v3113_v38 = vpop.f32.mrf.mxu1  ;;  %v3306_v45 = vpop.f32.mrf.mxu0  ;;  %v12979_v57 = vpack.c.bf16 %v782_v37, %v775_v30  ;;  %v2763_v53 = vadd.f32 %v17464_v34, %v11594_v31  ;;  %v2767_v23 = vadd.f32 %v17468_v55, %v11580_v8  ;;  %v17470_v30 = vld [vmem:[#allocation261_spill] sm:$0xff]  ;;  %v17472_v34 = vld [vmem:[#allocation31_spill] sm:$0xff] }
 0x23c   : > { %17462 = vst [vmem:[#allocation143_spill] sm:$0xff] %v12977_v60  ;;  %v12983_v14 = vadd.f32 %v3113_v38, %v2761_v32  ;;  %v12986_v10 = vadd.f32 %v3306_v45, %v17466_v18  ;;  %v17473_v18 = vld [vmem:[#allocation152_spill] sm:$0xff]  ;;  %v17475_v38 = vld [vmem:[#allocation262_spill] sm:$0xff] }
 0x23d   : > { %17463 = vst [vmem:[#allocation255_spill] sm:$0xff] %v12979_v57  ;;  %v3115_v62 = vpop.f32.mrf.mxu1  ;;  %v3308_v41 = vpop.f32.mrf.mxu0  ;;  %v2769_v45 = vadd.f32 %v17473_v18, %v11594_v31 }
 0x23e   : > { %17465 = vst [vmem:[#allocation27_spill] sm:$0xff] %v12983_v14  ;;  %17467 = vst [vmem:[#allocation144_spill] sm:$0xff] %v12986_v10  ;;  %v12990_v21 = vadd.f32 %v3115_v62, %v2763_v53  ;;  %v12993_v37 = vadd.f32 %v3308_v41, %v17470_v30  ;;  %v17477_v53 = vld [vmem:[#allocation33_spill] sm:$0xff]  ;;  %v789_v62 = vld [vmem:[%s10485_s19 + $0x9d0] sm:$0xff] }
 0x23f   : > { %v3119_v35 = vpop.f32.mrf.mxu1  ;;  %v3312_v47 = vpop.f32.mrf.mxu0  ;;  %9220 = vmatmul.mubr.msk.bf16.gmra.mxu1 %vm2345_vm0, %v12979_v57  ;;  %3937 = vmatmul.mubr.bf16.gmra.mxu0 %v17472_v34  ;;  %v796_v41 = vld [vmem:[%s10485_s19 + $0xa08] sm:$0xff]  ;;  %v17478_v57 = vld [vmem:[#allocation153_spill] sm:$0xff] }
 0x240   : > { %17469 = vst [vmem:[#allocation256_spill] sm:$0xff] %v12990_v21  ;;  %17471 = vst [vmem:[#allocation29_spill] sm:$0xff] %v12993_v37  ;;  %v13000_v32 = vadd.f32 %v3119_v35, %v2767_v23  ;;  %v13003_v10 = vadd.f32 %v3312_v47, %v17475_v38  ;;  %3753 = vmatprep.mubr.bf16.mxu1 %v17257_v49  ;;  %3946 = vmatprep.mubr.bf16.mxu0 %v17477_v53  ;;  %v17480_v21 = vld [vmem:[#allocation263_spill] sm:$0xff]  ;;  %v17483_v38 = vld [vmem:[#allocation158_spill] sm:$0xff] }
 0x241   : > { %v3121_v55 = vpop.f32.mrf.mxu1  ;;  %v3314_v30 = vpop.f32.mrf.mxu0  ;;  %v2771_v37 = vadd.f32 %v17478_v57, %v11580_v8  ;;  %v13016_v47 = vpack.c.bf16 %v796_v41, %v789_v62  ;;  %v2773_v53 = vadd.f32 %v17483_v38, %v11594_v31 }
 0x242   : > { %17474 = vst [vmem:[#allocation145_spill] sm:$0xff] %v13000_v32  ;;  %17476 = vst [vmem:[#allocation150_spill] sm:$0xff] %v13003_v10  ;;  %v13011_v34 = vadd.f32 %v3121_v55, %v2769_v45  ;;  %v13014_v18 = vadd.f32 %v3314_v30, %v17480_v21  ;;  %v17485_v32 = vld [vmem:[#allocation266_spill] sm:$0xff]  ;;  %v17487_v55 = vld [vmem:[#allocation159_spill] sm:$0xff] }
 0x243   : > { %v3123_v23 = vpop.f32.mrf.mxu1  ;;  %v3316_v35 = vpop.f32.mrf.mxu0  ;;  %17482 = vst [vmem:[#allocation261_spill] sm:$0xff] %v13016_v47  ;;  %v2777_v21 = vadd.f32 %v17487_v55, %v11580_v8 }
 0x244   : > { %17479 = vst [vmem:[#allocation259_spill] sm:$0xff] %v13011_v34  ;;  %17481 = vst [vmem:[#allocation151_spill] sm:$0xff] %v13014_v18  ;;  %v13020_v10 = vadd.f32 %v3123_v23, %v2771_v37  ;;  %v13023_v14 = vadd.f32 %v3316_v35, %v17485_v32  ;;  %v17489_v18 = vld [vmem:[#allocation268_spill] sm:$0xff]  ;;  %v17491_v37 = vld [vmem:[#allocation35_spill] sm:$0xff] }
 0x245   : > { %v3125_v57 = vpop.f32.mrf.mxu1  ;;  %v3318_v45 = vpop.f32.mrf.mxu0  ;;  %v803_v32 = vld [vmem:[%s10485_s19 + $0xa40] sm:$0xff]  ;;  %v17492_v23 = vld [vmem:[#allocation160_spill] sm:$0xff] }
 0x246   : > { %17484 = vst [vmem:[#allocation31_spill] sm:$0xff] %v13020_v10  ;;  %17486 = vst [vmem:[#allocation152_spill] sm:$0xff] %v13023_v14  ;;  %v13027_v30 = vadd.f32 %v3125_v57, %v2773_v53  ;;  %v13030_v34 = vadd.f32 %v3318_v45, %v17489_v18  ;;  %v2779_v35 = vadd.f32 %v17492_v23, %v11594_v31  ;;  %v17494_v14 = vld [vmem:[#allocation269_spill] sm:$0xff]  ;;  %v810_v53 = vld [vmem:[%s10485_s19 + $0xa78] sm:$0xff] }
 0x247   : > { %v3129_v62 = vpop.f32.mrf.mxu1  ;;  %v3322_v41 = vpop.f32.mrf.mxu0  ;;  %9221 = vmatmul.mubr.msk.bf16.gmra.mxu1 %vm2345_vm0, %v13016_v47  ;;  %3947 = vmatmul.mubr.bf16.gmra.mxu0 %v17491_v37  ;;  %v17496_v18 = vld [vmem:[#allocation37_spill] sm:$0xff]  ;;  %v10103_v57 = vld [vmem:[%s16781_s1 + $0x428] ss:$16 sps:$4 sm:$0xff]   ;;  %v10105_v45 = vld [vmem:[%s16781_s1 + $0x42c] ss:$16 sps:$4 sm:$0xff]  }
 0x248   : > { %17488 = vst [vmem:[#allocation262_spill] sm:$0xff] %v13027_v30  ;;  %17490 = vst [vmem:[#allocation33_spill] sm:$0xff] %v13030_v34  ;;  %v13038_v38 = vadd.f32 %v3129_v62, %v2777_v21  ;;  %v13041_v55 = vadd.f32 %v3322_v41, %v17494_v14  ;;  %3763 = vmatprep.mubr.bf16.mxu1 %v17257_v49  ;;  %3956 = vmatprep.mubr.bf16.mxu0 %v17496_v18  ;;  %v17497_v21 = vld [vmem:[#allocation162_spill] sm:$0xff]  ;;  %v17500_v10 = vld [vmem:[#allocation272_spill] sm:$0xff] }
 0x249   : > { %v3131_v37 = vpop.f32.mrf.mxu1  ;;  %v3324_v23 = vpop.f32.mrf.mxu0  ;;  %v2781_v62 = vadd.f32 %v17497_v21, %v11580_v8  ;;  %4572 = vmatprep.subr.bf16.mxu0 %v10105_v45 }
 0x24a   : > { %17493 = vst [vmem:[#allocation153_spill] sm:$0xff] %v13038_v38  ;;  %17495 = vst [vmem:[#allocation263_spill] sm:$0xff] %v13041_v55  ;;  %v13054_v14 = vadd.f32 %v3131_v37, %v2779_v35  ;;  %v13057_v41 = vadd.f32 %v3324_v23, %v12340_v43  ;;  %v13059_v55 = vpack.c.bf16 %v810_v53, %v803_v32  ;;  %4573 = vmatpush1.bf16.msra.mxu0 %v10103_v57  ;;  %v17499_v38 = vld [vmem:[#allocation167_spill] sm:$0xff]  ;;  %v17502_v43 = vld [vmem:[#allocation168_spill] sm:$0xff] }
 0x24b   : > { %v3133_v18 = vpop.f32.mrf.mxu1  ;;  %v3326_v47 = vpop.f32.mrf.mxu0  ;;  %v2783_v34 = vadd.f32 %v17499_v38, %v11594_v31  ;;  %v2787_v45 = vadd.f32 %v17502_v43, %v11580_v8  ;;  %v17503_v32 = vld [vmem:[#allocation274_spill] sm:$0xff]  ;;  %v17505_v38 = vld [vmem:[#allocation39_spill] sm:$0xff] }
 0x24c   : > { %17498 = vst [vmem:[#allocation158_spill] sm:$0xff] %v13059_v55  ;;  %v13063_v30 = vadd.f32 %v3133_v18, %v2781_v62  ;;  %v13066_v60 = vadd.f32 %v3326_v47, %v17500_v10  ;;  %v17506_v10 = vld [vmem:[#allocation169_spill] sm:$0xff]  ;;  %v17508_v18 = vld [vmem:[#allocation275_spill] sm:$0xff] }
 0x24d   : > { %v3135_v35 = vpop.f32.mrf.mxu1  ;;  %v3328_v37 = vpop.f32.mrf.mxu0  ;;  %v2789_v47 = vadd.f32 %v17506_v10, %v11594_v31 }
 0x24e   : > { %17501 = vst [vmem:[#allocation266_spill] sm:$0xff] %v13066_v60  ;;  %v13070_v23 = vadd.f32 %v3135_v35, %v2783_v34  ;;  %v13073_v53 = vadd.f32 %v3328_v37, %v17503_v32  ;;  %v17510_v34 = vld [vmem:[#allocation41_spill] sm:$0xff]  ;;  %v817_v35 = vld [vmem:[%s10485_s19 + $0xab0] sm:$0xff]  ;;  %v824_v37 = vld [vmem:[%s10485_s19 + $0xae8] sm:$0xff] }
 0x24f   : > { %v3139_v57 = vpop.f32.mrf.mxu1  ;;  %v3332_v21 = vpop.f32.mrf.mxu0  ;;  %9222 = vmatmul.mubr.msk.bf16.gmra.mxu1 %vm2345_vm0, %v13059_v55  ;;  %3957 = vmatmul.mubr.bf16.gmra.mxu0 %v17505_v38  ;;  %v17511_v55 = vld [vmem:[#allocation170_spill] sm:$0xff]  ;;  %v13096_v10 = vpack.c.bf16 %v824_v37, %v817_v35  ;;  %v17519_v35 = vld [vmem:[#allocation43_spill] sm:$0xff] }
 0x250   : > { %17504 = vst [vmem:[#allocation159_spill] sm:$0xff] %v13073_v53  ;;  %v13080_v62 = vadd.f32 %v3139_v57, %v2787_v45  ;;  %v13083_v60 = vadd.f32 %v3332_v21, %v17508_v18  ;;  %3773 = vmatprep.mubr.bf16.mxu1 %v17257_v49  ;;  %3966 = vmatprep.mubr.bf16.mxu0 %v17510_v34  ;;  %v17514_v18 = vld [vmem:[#allocation175_spill] sm:$0xff] }
 0x251   : > { %v3141_v43 = vpop.f32.mrf.mxu1  ;;  %v3334_v32 = vpop.f32.mrf.mxu0  ;;  %v2791_v53 = vadd.f32 %v17511_v55, %v11580_v8  ;;  %17513 = vst [vmem:[#allocation269_spill] sm:$0xff] %v13096_v10  ;;  %v2793_v34 = vadd.f32 %v17514_v18, %v11594_v31  ;;  %v831_v31 = vld [vmem:[%s10485_s19 + $0xb20] sm:$0xff]  ;;  %v838_v18 = vld [vmem:[%s10485_s19 + $0xb58] sm:$0xff] }
 0x252   : > { %17507 = vst [vmem:[#allocation268_spill] sm:$0xff] %v13080_v62  ;;  %17509 = vst [vmem:[#allocation35_spill] sm:$0xff] %v13083_v60  ;;  %v13091_v38 = vadd.f32 %v3141_v43, %v2789_v47  ;;  %v13094_v45 = vadd.f32 %v3334_v32, %v12381_v6  ;;  %v17517_v43 = vld [vmem:[#allocation279_spill] sm:$0xff] }
 0x253   : > { %v3143_v57 = vpop.f32.mrf.mxu1  ;;  %v3336_v21 = vpop.f32.mrf.mxu0 }
 0x254   : > { %17512 = vst [vmem:[#allocation160_spill] sm:$0xff] %v13094_v45  ;;  %v13100_v60 = vadd.f32 %v3143_v57, %v2791_v53  ;;  %v13103_v62 = vadd.f32 %v3336_v21, %v12391_v48  ;;  %v17520_v53 = vld [vmem:[#allocation280_spill] sm:$0xff]  ;;  %v17522_v48 = vld [vmem:[#allocation281_spill] sm:$0xff] }
 0x255   : > { %v3145_v8 = vpop.f32.mrf.mxu1  ;;  %v3338_v55 = vpop.f32.mrf.mxu0  ;;  %v17523_v21 = vld [vmem:[#allocation45_spill] sm:$0xff] }
 0x256   : > { %17515 = vst [vmem:[#allocation37_spill] sm:$0xff] %v13103_v62  ;;  %v13105_v47 = vadd.f32 %v3145_v8, %v2793_v34  ;;  %v13108_v6 = vadd.f32 %v3338_v55, %v17517_v43  ;;  %v10106_v34 = vld [vmem:[%s16781_s1 + $0x408] ss:$16 sps:$4 sm:$0xff]   ;;  %v10108_v8 = vld [vmem:[%s16781_s1 + $0x40c] ss:$16 sps:$4 sm:$0xff]  }
 0x257   : > { %v3342_v32 = vpop.f32.mrf.mxu0  ;;  %v3535_v45 = vpop.f32.mrf.mxu1  ;;  %9223 = vmatmul.mubr.msk.bf16.gmra.mxu1 %vm2345_vm0, %v13096_v10  ;;  %3967 = vmatmul.mubr.bf16.gmra.mxu0 %v17519_v35  ;;  %v17524_v35 = vld [vmem:[#allocation282_spill] sm:$0xff] }
 0x258   : > { %17516 = vst [vmem:[#allocation162_spill] sm:$0xff] %v13105_v47  ;;  %17518 = vst [vmem:[#allocation167_spill] sm:$0xff] %v13108_v6  ;;  %v13115_v37 = vadd.f32 %v3342_v32, %v17520_v53  ;;  %v3536_v57 = vadd.f32 %v3535_v45, %v17522_v48  ;;  %3783 = vmatprep.mubr.bf16.mxu1 %v17257_v49  ;;  %3976 = vmatprep.mubr.bf16.mxu0 %v17523_v21 }
 0x259   : > { %v3344_v55 = vpop.f32.mrf.mxu0  ;;  %v3537_v43 = vpop.f32.mrf.mxu1  ;;  %4574 = vmatprep.subr.bf16.mxu0 %v10108_v8  ;;  %v13131_v21 = vpack.c.bf16 %v838_v18, %v831_v31 }
 0x25a   : > { %17521 = vst [vmem:[#allocation272_spill] sm:$0xff] %v13115_v37  ;;  %v13128_v32 = vadd.f32 %v3344_v55, %v12421_v5  ;;  %v3538_v45 = vadd.f32 %v3537_v43, %v17524_v35  ;;  %4575 = vmatpush1.bf16.msra.mxu0 %v10106_v34  ;;  %v5266_v62 = vmax.f32 %v3536_v57, 0.0 }
 0x25b   : > { %v3346_v53 = vpop.f32.mrf.mxu0  ;;  %v3539_v48 = vpop.f32.mrf.mxu1  ;;  %17525 = vst [vmem:[#allocation168_spill] sm:$0xff] %v13131_v21 }
 0x25c   : > { %v13134_v10 = vadd.f32 %v3346_v53, %v12438_v26  ;;  %v3540_v37 = vadd.f32 %v3539_v48, %v12441_v12  ;;  %v5267_v43 = vmax.f32 %v3538_v45, 0.0  ;;  %v17526_v26 = vld [vmem:[#allocation47_spill] sm:$0xff] }
 0x25d   : > { %v3348_v6 = vpop.f32.mrf.mxu0  ;;  %v3541_v47 = vpop.f32.mrf.mxu1 }
 0x25e   : > { %v5270_v5 = vmax.f32 %v3540_v37, 0.0  ;;  %v13138_v55 = vadd.f32 %v3348_v6, %v12447_v22  ;;  %v3542_v8 = vadd.f32 %v3541_v47, %v12450_v61  ;;  %v17528_v22 = vld [vmem:[#allocation49_spill] sm:$0xff]  ;;  %v845_v61 = vld [vmem:[%s10485_s19 + $0xb90] sm:$0xff]  ;;  %v852_v47 = vld [vmem:[%s10485_s19 + $0xbc8] sm:$0xff] }
 0x25f   : > { %v3352_v31 = vpop.f32.mrf.mxu0  ;;  %v3545_v18 = vpop.f32.mrf.mxu1  ;;  %9224 = vmatmul.mubr.msk.bf16.gmra.mxu1 %vm2345_vm0, %v13131_v21  ;;  %3977 = vmatmul.mubr.bf16.gmra.mxu0 %v17526_v26 }
 0x260   : > { %v13144_v12 = vpack.c.bf16 %v5270_v5, %v5266_v62  ;;  %v5271_v34 = vmax.f32 %v3542_v8, 0.0  ;;  %v13147_v57 = vadd.f32 %v3352_v31, %v12458_v16  ;;  %v3546_v37 = vadd.f32 %v3545_v18, %v12461_v36  ;;  %3793 = vmatprep.mubr.bf16.mxu1 %v17257_v49  ;;  %3986 = vmatprep.mubr.bf16.mxu0 %v17528_v22 }
 0x261   : > { %v3354_v6 = vpop.f32.mrf.mxu0  ;;  %v3547_v35 = vpop.f32.mrf.mxu1  ;;  %v13160_v5 = vpack.c.bf16 %v852_v47, %v845_v61  ;;  %v859_v61 = vld [vmem:[%s10485_s19 + $0xc00] sm:$0xff] }
 0x262   : > { %17527 = vst [vmem:[#allocation274_spill] sm:$0xff] %v13144_v12  ;;  %v13155_v45 = vadd.f32 %v3354_v6, %v12472_v19  ;;  %v3548_v62 = vadd.f32 %v3547_v35, %v12475_v3  ;;  %v13158_v53 = vpack.c.bf16 %v5271_v34, %v5267_v43  ;;  %v5274_v26 = vmax.f32 %v3546_v37, 0.0  ;;  %v17533_v35 = vld [vmem:[#allocation289_spill] sm:$0xff]  ;;  %v17597_v12 = vld [vmem:[#allocation119_spill] sm:$0xff] }
 0x263   : > { %v3356_v48 = vpop.f32.mrf.mxu0  ;;  %v3549_v16 = vpop.f32.mrf.mxu1  ;;  %17530 = vst [vmem:[#allocation169_spill] sm:$0xff] %v13160_v5 }
 0x264   : > { %17529 = vst [vmem:[#allocation39_spill] sm:$0xff] %v13158_v53  ;;  %v13163_v36 = vadd.f32 %v3356_v48, %v12483_v0  ;;  %v3550_v8 = vadd.f32 %v3549_v16, %v12486_v56  ;;  %v5275_v43 = vmax.f32 %v3548_v62, 0.0  ;;  %v17531_v0 = vld [vmem:[#allocation51_spill] sm:$0xff]  ;;  %v866_v62 = vld [vmem:[%s10485_s19 + $0xc38] sm:$0xff] }
 0x265   : > { %v3358_v31 = vpop.f32.mrf.mxu0  ;;  %v3551_v18 = vpop.f32.mrf.mxu1  ;;  %v10109_v48 = vld [vmem:[%s16781_s1 + $0x5e8] ss:$16 sps:$4 sm:$0xff]   ;;  %v10111_v16 = vld [vmem:[%s16781_s1 + $0x5ec] ss:$16 sps:$4 sm:$0xff]  }
 0x266   : > { %v5278_v19 = vmax.f32 %v3550_v8, 0.0  ;;  %v13167_v22 = vadd.f32 %v3358_v31, %v12492_v51  ;;  %v3552_v3 = vadd.f32 %v3551_v18, %v12495_v50  ;;  %v17534_v50 = vld [vmem:[#allocation53_spill] sm:$0xff]  ;;  %v17535_v18 = vld [vmem:[#allocation184_spill] sm:$0xff]  ;;  %4576 = vmatprep.subr.bf16.mxu0 %v10111_v16 }
 0x267   : > { %v3362_v34 = vpop.f32.mrf.mxu0  ;;  %v3555_v6 = vpop.f32.mrf.mxu1  ;;  %9225 = vmatmul.mubr.msk.bf16.gmra.mxu1 %vm2345_vm0, %v13160_v5  ;;  %3987 = vmatmul.mubr.bf16.gmra.mxu0 %v17531_v0 }
 0x268   : > { %v13174_v56 = vpack.c.bf16 %v5278_v19, %v5274_v26  ;;  %v5279_v47 = vmax.f32 %v3552_v3, 0.0  ;;  %v13177_v37 = vadd.f32 %v3362_v34, %v12504_v2  ;;  %v3556_v51 = vadd.f32 %v3555_v6, %v17533_v35  ;;  %3803 = vmatprep.mubr.bf16.mxu1 %v17257_v49  ;;  %3996 = vmatprep.mubr.bf16.mxu0 %v17534_v50 }
 0x269   : > { %v3364_v8 = vpop.f32.mrf.mxu0  ;;  %v3557_v31 = vpop.f32.mrf.mxu1  ;;  %v13195_v6 = vpack.c.bf16 %v866_v62, %v859_v61  ;;  %4577 = vmatpush2.bf16.msra.mxu0 %v10109_v48 }
 0x26a   : > { %17532 = vst [vmem:[#allocation275_spill] sm:$0xff] %v13174_v56  ;;  %v13190_v2 = vadd.f32 %v3364_v8, %v12520_v46  ;;  %v3558_v26 = vadd.f32 %v3557_v31, %v17535_v18  ;;  %v13193_v19 = vpack.c.bf16 %v5279_v47, %v5275_v43  ;;  %v5282_v46 = vmax.f32 %v3556_v51, 0.0  ;;  %v17538_v31 = vld [vmem:[#allocation292_spill] sm:$0xff]  ;;  %v17539_v43 = vld [vmem:[#allocation190_spill] sm:$0xff] }
 0x26b   : > { %v3366_v3 = vpop.f32.mrf.mxu0  ;;  %v3559_v34 = vpop.f32.mrf.mxu1  ;;  %17537 = vst [vmem:[#allocation170_spill] sm:$0xff] %v13195_v6 }
 0x26c   : > { %17536 = vst [vmem:[#allocation41_spill] sm:$0xff] %v13193_v19  ;;  %v13198_v0 = vadd.f32 %v3366_v3, %v12537_v15  ;;  %v3560_v35 = vadd.f32 %v3559_v34, %v12540_v7  ;;  %v5283_v18 = vmax.f32 %v3558_v26, 0.0  ;;  %v17540_v15 = vld [vmem:[#allocation55_spill] sm:$0xff]  ;;  %v17542_v3 = vld [vmem:[#allocation293_spill] sm:$0xff]  ;;  %v880_v26 = vld [vmem:[%s10485_s19 + $0xca8] sm:$0xff] }
 0x26d   : > { %v3368_v50 = vpop.f32.mrf.mxu0  ;;  %v3561_v5 = vpop.f32.mrf.mxu1  ;;  %v17543_v34 = vld [vmem:[#allocation191_spill] sm:$0xff] }
 0x26e   : > { %v5286_v8 = vmax.f32 %v3560_v35, 0.0  ;;  %v13202_v16 = vadd.f32 %v3368_v50, %v17538_v31  ;;  %v3562_v47 = vadd.f32 %v3561_v5, %v17539_v43  ;;  %v17544_v50 = vld [vmem:[#allocation57_spill] sm:$0xff]  ;;  %v873_v5 = vld [vmem:[%s10485_s19 + $0xc70] sm:$0xff] }
 0x26f   : > { %v3372_v61 = vpop.f32.mrf.mxu0  ;;  %v3565_v62 = vpop.f32.mrf.mxu1  ;;  %9226 = vmatmul.mubr.msk.bf16.gmra.mxu1 %vm2345_vm0, %v13195_v6  ;;  %3997 = vmatmul.mubr.bf16.gmra.mxu0 %v17540_v15  ;;  %v13224_v15 = vpack.c.bf16 %v880_v26, %v873_v5  ;;  %v887_v5 = vld [vmem:[%s10485_s19 + $0xce0] sm:$0xff] }
 0x270   : > { %v13208_v7 = vpack.c.bf16 %v5286_v8, %v5282_v46  ;;  %v5287_v48 = vmax.f32 %v3562_v47, 0.0  ;;  %v13211_v51 = vadd.f32 %v3372_v61, %v17542_v3  ;;  %v3566_v35 = vadd.f32 %v3565_v62, %v17543_v34  ;;  %3813 = vmatprep.mubr.bf16.mxu1 %v17257_v49  ;;  %4006 = vmatprep.mubr.bf16.mxu0 %v17544_v50 }
 0x271   : > { %v3374_v31 = vpop.f32.mrf.mxu0  ;;  %v3567_v43 = vpop.f32.mrf.mxu1  ;;  %17546 = vst [vmem:[#allocation43_spill] sm:$0xff] %v13224_v15 }
 0x272   : > { %17541 = vst [vmem:[#allocation175_spill] sm:$0xff] %v13208_v7  ;;  %v13219_v6 = vadd.f32 %v3374_v31, %v12571_v39  ;;  %v3568_v46 = vadd.f32 %v3567_v43, %v12574_v40  ;;  %v13222_v8 = vpack.c.bf16 %v5287_v48, %v5283_v18  ;;  %v5290_v21 = vmax.f32 %v3566_v35, 0.0  ;;  %v17549_v35 = vld [vmem:[#allocation198_spill] sm:$0xff] }
 0x273   : > { %v3376_v47 = vpop.f32.mrf.mxu0  ;;  %v3569_v61 = vpop.f32.mrf.mxu1 }
 0x274   : > { %17545 = vst [vmem:[#allocation279_spill] sm:$0xff] %v13222_v8  ;;  %v13227_v62 = vadd.f32 %v3376_v47, %v12582_v11  ;;  %v3570_v3 = vadd.f32 %v3569_v61, %v12585_v20  ;;  %v5291_v18 = vmax.f32 %v3568_v46, 0.0  ;;  %v17547_v11 = vld [vmem:[#allocation59_spill] sm:$0xff]  ;;  %v894_v46 = vld [vmem:[%s10485_s19 + $0xd18] sm:$0xff] }
 0x275   : > { %v3378_v34 = vpop.f32.mrf.mxu0  ;;  %v3571_v50 = vpop.f32.mrf.mxu1  ;;  %v17550_v61 = vld [vmem:[#allocation199_spill] sm:$0xff] }
 0x276   : > { %v5294_v39 = vmax.f32 %v3570_v3, 0.0  ;;  %v13231_v31 = vadd.f32 %v3378_v34, %v12591_v1  ;;  %v3572_v40 = vadd.f32 %v3571_v50, %v12594_v28  ;;  %v17551_v28 = vld [vmem:[#allocation61_spill] sm:$0xff]  ;;  %v10112_v3 = vld [vmem:[%s16781_s1 + $0x5c8] ss:$16 sps:$4 sm:$0xff]  }
 0x277   : > { %v3382_v48 = vpop.f32.mrf.mxu0  ;;  %v3575_v43 = vpop.f32.mrf.mxu1  ;;  %9227 = vmatmul.mubr.msk.bf16.gmra.mxu1 %vm2345_vm0, %v13224_v15  ;;  %4007 = vmatmul.mubr.bf16.gmra.mxu0 %v17547_v11 }
 0x278   : > { %v13238_v20 = vpack.c.bf16 %v5294_v39, %v5290_v21  ;;  %v5295_v26 = vmax.f32 %v3572_v40, 0.0  ;;  %v13241_v47 = vadd.f32 %v3382_v48, %v17549_v35  ;;  %v3576_v1 = vadd.f32 %v3575_v43, %v17550_v61  ;;  %3823 = vmatprep.mubr.bf16.mxu1 %v17257_v49  ;;  %4016 = vmatprep.mubr.bf16.mxu0 %v17551_v28  ;;  %v10114_v21 = vld [vmem:[%s16781_s1 + $0x5cc] ss:$16 sps:$4 sm:$0xff]   ;;  %v17552_v39 = vld [vmem:[#allocation295_spill] sm:$0xff] }
 0x279   : > { %v3384_v34 = vpop.f32.mrf.mxu0  ;;  %v3577_v50 = vpop.f32.mrf.mxu1  ;;  %v17553_v48 = vld [vmem:[#allocation200_spill] sm:$0xff]  ;;  %4578 = vmatprep.subr.bf16.mxu0 %v10114_v21  ;;  %v13259_v28 = vpack.c.bf16 %v894_v46, %v887_v5  ;;  %v17557_v5 = vld [vmem:[#allocation206_spill] sm:$0xff] }
 0x27a   : > { %17548 = vst [vmem:[#allocation280_spill] sm:$0xff] %v13238_v20  ;;  %v13254_v40 = vadd.f32 %v3384_v34, %v17552_v39  ;;  %v3578_v43 = vadd.f32 %v3577_v50, %v17553_v48  ;;  %v13257_v11 = vpack.c.bf16 %v5295_v26, %v5291_v18  ;;  %4579 = vmatpush2.bf16.msra.mxu0 %v10112_v3  ;;  %v10117_v34 = vld [vmem:[%s16781_s1 + $0x5ac] ss:$16 sps:$4 sm:$0xff]   ;;  %v5298_v50 = vmax.f32 %v3576_v1, 0.0  ;;  %v17558_v48 = vld [vmem:[#allocation63_spill] sm:$0xff] }
 0x27b   : > { %v3386_v35 = vpop.f32.mrf.mxu0  ;;  %v3579_v61 = vpop.f32.mrf.mxu1  ;;  %17555 = vst [vmem:[#allocation45_spill] sm:$0xff] %v13259_v28  ;;  %v17556_v26 = vld [vmem:[#allocation298_spill] sm:$0xff]  ;;  %4580 = vmatprep.subr.bf16.mxu0 %v10117_v34 }
 0x27c   : > { %17554 = vst [vmem:[#allocation281_spill] sm:$0xff] %v13257_v11  ;;  %v13262_v15 = vadd.f32 %v3386_v35, %v12633_v25  ;;  %v3580_v20 = vadd.f32 %v3579_v61, %v12636_v59  ;;  %v10115_v25 = vld [vmem:[%s16781_s1 + $0x5a8] ss:$16 sps:$4 sm:$0xff]   ;;  %v5299_v59 = vmax.f32 %v3578_v43, 0.0  ;;  %v17560_v35 = vld [vmem:[#allocation299_spill] sm:$0xff] }
 0x27d   : > { %v3388_v7 = vpop.f32.mrf.mxu0  ;;  %v3581_v8 = vpop.f32.mrf.mxu1  ;;  %v17561_v61 = vld [vmem:[#allocation207_spill] sm:$0xff] }
 0x27e   : > { %v5302_v18 = vmax.f32 %v3580_v20, 0.0  ;;  %v13269_v21 = vadd.f32 %v3388_v7, %v17556_v26  ;;  %v3582_v46 = vadd.f32 %v3581_v8, %v17557_v5  ;;  %v17562_v26 = vld [vmem:[#allocation65_spill] sm:$0xff]  ;;  %v901_v43 = vld [vmem:[%s10485_s19 + $0xd50] sm:$0xff]  ;;  %v908_v5 = vld [vmem:[%s10485_s19 + $0xd88] sm:$0xff]  ;;  %4581 = vmatpush2.bf16.msra.mxu0 %v10115_v25 }
 0x27f   : > { %v3392_v3 = vpop.f32.mrf.mxu0  ;;  %v3585_v39 = vpop.f32.mrf.mxu1  ;;  %9228 = vmatmul.mubr.msk.bf16.gmra.mxu1 %vm2345_vm0, %v13259_v28  ;;  %4017 = vmatmul.mubr.bf16.gmra.mxu0 %v17558_v48 }
 0x280   : > { %v13278_v1 = vpack.c.bf16 %v5302_v18, %v5298_v50  ;;  %v5303_v20 = vmax.f32 %v3582_v46, 0.0  ;;  %v13281_v7 = vadd.f32 %v3392_v3, %v17560_v35  ;;  %v3586_v8 = vadd.f32 %v3585_v39, %v17561_v61  ;;  %3833 = vmatprep.mubr.bf16.mxu1 %v17257_v49  ;;  %4026 = vmatprep.mubr.bf16.mxu0 %v17562_v26  ;;  %v10120_v50 = vld [vmem:[%s16781_s1 + $0x58c] ss:$16 sps:$4 sm:$0xff]   ;;  %v10118_v3 = vld [vmem:[%s16781_s1 + $0x588] ss:$16 sps:$4 sm:$0xff]  }
 0x281   : > { %v3394_v11 = vpop.f32.mrf.mxu0  ;;  %v3587_v56 = vpop.f32.mrf.mxu1  ;;  %v13300_v61 = vpack.c.bf16 %v908_v5, %v901_v43  ;;  %4582 = vmatprep.subr.bf16.mxu0 %v10120_v50 }
 0x282   : > { %17559 = vst [vmem:[#allocation282_spill] sm:$0xff] %v13278_v1  ;;  %v13292_v18 = vadd.f32 %v3394_v11, %v12667_v27  ;;  %v3588_v46 = vadd.f32 %v3587_v56, %v12670_v29  ;;  %v13298_v39 = vpack.c.bf16 %v5303_v20, %v5299_v59  ;;  %v10123_v29 = vld [vmem:[%s16781_s1 + $0x56c] ss:$16 sps:$4 sm:$0xff]   ;;  %v5306_v56 = vmax.f32 %v3586_v8, 0.0  ;;  %4583 = vmatpush2.bf16.msra.mxu0 %v10118_v3  ;;  %v17565_v8 = vld [vmem:[#allocation67_spill] sm:$0xff]  ;;  %v17567_v3 = vld [vmem:[#allocation69_spill] sm:$0xff] }
 0x283   : > { %v3396_v48 = vpop.f32.mrf.mxu0  ;;  %v3589_v35 = vpop.f32.mrf.mxu1  ;;  %17564 = vst [vmem:[#allocation49_spill] sm:$0xff] %v13300_v61  ;;  %4584 = vmatprep.subr.bf16.mxu0 %v10123_v29  ;;  %v17588_v1 = vld [vmem:[#allocation11_spill] sm:$0xff] }
 0x284   : > { %17563 = vst [vmem:[#allocation47_spill] sm:$0xff] %v13298_v39  ;;  %v13303_v34 = vadd.f32 %v3396_v48, %v12678_v52  ;;  %v3590_v27 = vadd.f32 %v3589_v35, %v12681_v54  ;;  %v10121_v54 = vld [vmem:[%s16781_s1 + $0x568] ss:$16 sps:$4 sm:$0xff]   ;;  %v5307_v52 = vmax.f32 %v3588_v46, 0.0  ;;  %v915_v46 = vld [vmem:[%s10485_s19 + $0xdc0] sm:$0xff] }
 0x285   : > { %v3398_v11 = vpop.f32.mrf.mxu0  ;;  %v3591_v26 = vpop.f32.mrf.mxu1  ;;  %v922_v35 = vld [vmem:[%s10485_s19 + $0xdf8] sm:$0xff]  ;;  %s9000_s19 = sshll.u32 %s449_s14, 9 }
 0x286   : > { %v5310_v25 = vmax.f32 %v3590_v27, 0.0  ;;  %v13310_v59 = vadd.f32 %v3398_v11, %v12687_v58  ;;  %v3592_v20 = vadd.f32 %v3591_v26, %v12690_v42  ;;  %v10126_v26 = vld [vmem:[%s16781_s1 + $0x54c] ss:$16 sps:$4 sm:$0xff]   ;;  %4585 = vmatpush2.bf16.msra.mxu0 %v10121_v54  ;;  %s16587_s22 = scalar_lea.vmem [#allocation2], %s9000_s19 }
 0x287   : > { %v3402_v43 = vpop.f32.mrf.mxu0  ;;  %v3595_v5 = vpop.f32.mrf.mxu1  ;;  %9229 = vmatmul.mubr.msk.bf16.gmra.mxu1 %vm2345_vm0, %v13300_v61  ;;  %4027 = vmatmul.mubr.bf16.gmra.mxu0 %v17565_v8  ;;  %v13341_v8 = vpack.c.bf16 %v922_v35, %v915_v46  ;;  %v10129_v54 = vld [vmem:[%s16781_s1 + $0x52c] ss:$16 sps:$4 sm:$0xff]  }
 0x288   : > { %v13319_v50 = vpack.c.bf16 %v5310_v25, %v5306_v56  ;;  %v5311_v58 = vmax.f32 %v3592_v20, 0.0  ;;  %v13322_v48 = vadd.f32 %v3402_v43, %v12698_v24  ;;  %v3596_v42 = vadd.f32 %v3595_v5, %v12701_v17  ;;  %3843 = vmatprep.mubr.bf16.mxu1 %v17257_v49  ;;  %4036 = vmatprep.mubr.bf16.mxu0 %v17567_v3  ;;  %v17568_v24 = vld [vmem:[#allocation214_spill] sm:$0xff] }
 0x289   : > { %v3404_v27 = vpop.f32.mrf.mxu0  ;;  %v3597_v11 = vpop.f32.mrf.mxu1  ;;  %v10124_v17 = vld [vmem:[%s16781_s1 + $0x548] ss:$16 sps:$4 sm:$0xff]   ;;  %17570 = vst [vmem:[#allocation53_spill] sm:$0xff] %v13341_v8  ;;  %4586 = vmatprep.subr.bf16.mxu0 %v10126_v26 }
 0x28a   : > { %17566 = vst [vmem:[#allocation51_spill] sm:$0xff] %v13319_v50  ;;  %v13333_v56 = vadd.f32 %v3404_v27, %v12710_v9  ;;  %v3598_v25 = vadd.f32 %v3597_v11, %v17568_v24  ;;  %v13339_v20 = vpack.c.bf16 %v5311_v58, %v5307_v52  ;;  %v5314_v11 = vmax.f32 %v3596_v42, 0.0  ;;  %v17571_v58 = vld [vmem:[#allocation219_spill] sm:$0xff]  ;;  %4587 = vmatpush2.bf16.msra.mxu0 %v10124_v17 }
 0x28b   : > { %v3406_v43 = vpop.f32.mrf.mxu0  ;;  %v3599_v5 = vpop.f32.mrf.mxu1  ;;  %4588 = vmatprep.subr.bf16.mxu0 %v10129_v54  ;;  %v17581_v54 = vld [vmem:[#allocation302_spill] sm:$0xff] }
 0x28c   : > { %17569 = vst [vmem:[#allocation289_spill] sm:$0xff] %v13339_v20  ;;  %v13344_v29 = vadd.f32 %v3406_v43, %v12727_v44  ;;  %v3600_v9 = vadd.f32 %v3599_v5, %v12730_v4  ;;  %v10127_v44 = vld [vmem:[%s16781_s1 + $0x528] ss:$16 sps:$4 sm:$0xff]   ;;  %v5315_v35 = vmax.f32 %v3598_v25, 0.0  ;;  %v17572_v43 = vld [vmem:[#allocation71_spill] sm:$0xff] }
 0x28d   : > { %v3408_v3 = vpop.f32.mrf.mxu0  ;;  %v3601_v27 = vpop.f32.mrf.mxu1 }
 0x28e   : > { %v5318_v24 = vmax.f32 %v3600_v9, 0.0  ;;  %v13351_v52 = vadd.f32 %v3408_v3, %v12734_v33  ;;  %v3602_v46 = vadd.f32 %v3601_v27, %v17571_v58  ;;  %v17574_v33 = vld [vmem:[#allocation221_spill] sm:$0xff]  ;;  %v17575_v3 = vld [vmem:[#allocation222_spill] sm:$0xff]  ;;  %4589 = vmatpush2.bf16.msra.mxu0 %v10127_v44 }
 0x28f   : > { %v3412_v4 = vpop.f32.mrf.mxu0  ;;  %v3605_v26 = vpop.f32.mrf.mxu1  ;;  %9230 = vmatmul.mubr.msk.bf16.gmra.mxu1 %vm2345_vm0, %v13341_v8  ;;  %4037 = vmatmul.mubr.bf16.gmra.mxu0 %v17572_v43  ;;  %v17576_v27 = vld [vmem:[#allocation73_spill] sm:$0xff]  ;;  %v17577_v58 = vld [vmem:[#allocation42_spill] sm:$0xff] }
 0x290   : > { %v13360_v42 = vpack.c.bf16 %v5318_v24, %v5314_v11  ;;  %v5319_v5 = vmax.f32 %v3602_v46, 0.0  ;;  %v13363_v9 = vadd.f32 %v3412_v4, %v17574_v33  ;;  %v3606_v17 = vadd.f32 %v3605_v26, %v17575_v3  ;;  %4046 = vmatprep.mubr.bf16.mxu0 %v17576_v27  ;;  %4239 = vmatprep.mubr.bf16.mxu1 %v17577_v58  ;;  %v10132_v8 = vld [vmem:[%s16781_s1 + $0x50c] ss:$16 sps:$4 sm:$0xff]   ;;  %v17578_v43 = vld [vmem:[#allocation9_spill] sm:$0xff]  ;;  %v17579_v24 = vld [vmem:[#allocation223_spill] sm:$0xff] }
 0x291   : > { %v3414_v25 = vpop.f32.mrf.mxu0  ;;  %v3607_v61 = vpop.f32.mrf.mxu1  ;;  %v10130_v4 = vld [vmem:[%s16781_s1 + $0x508] ss:$16 sps:$4 sm:$0xff]   ;;  %4590 = vmatprep.subr.bf16.mxu0 %v10132_v8 }
 0x292   : > { %17573 = vst [vmem:[#allocation184_spill] sm:$0xff] %v13360_v42  ;;  %v13372_v11 = vadd.f32 %v3414_v25, %v17578_v43  ;;  %v3608_v46 = vadd.f32 %v3607_v61, %v17579_v24  ;;  %v13378_v26 = vpack.c.bf16 %v5319_v5, %v5315_v35  ;;  %v17582_v58 = vld [vmem:[#allocation226_spill] sm:$0xff]  ;;  %v5322_v43 = vmax.f32 %v3606_v17, 0.0  ;;  %v17583_v42 = vld [vmem:[#allocation111_spill] sm:$0xff]  ;;  %v17584_v35 = vld [vmem:[#allocation228_spill] sm:$0xff]  ;;  %4591 = vmatpush2.bf16.msra.mxu0 %v10130_v4 }
 0x293   : > { %v3416_v33 = vpop.f32.mrf.mxu0  ;;  %v3609_v3 = vpop.f32.mrf.mxu1  ;;  %v10094_v25 = vld [vmem:[%s16781_s1 + $0x608] ss:$16 sps:$4 sm:$0xff]  }
 0x294   : > { %17580 = vst [vmem:[#allocation292_spill] sm:$0xff] %v13378_v26  ;;  %v13381_v27 = vadd.f32 %v3416_v33, %v17581_v54  ;;  %v3610_v28 = vadd.f32 %v3609_v3, %v17582_v58  ;;  %v5323_v8 = vmax.f32 %v3608_v46, 0.0  ;;  %v17585_v54 = vld [vmem:[#allocation75_spill] sm:$0xff]  ;;  %v17586_v3 = vld [vmem:[#allocation44_spill] sm:$0xff]  ;;  %v17591_v46 = vld [vmem:[#allocation46_spill] sm:$0xff] }
 0x295   : > { %v3418_v61 = vpop.f32.mrf.mxu0  ;;  %v3611_v44 = vpop.f32.mrf.mxu1 }
 0x296   : > { %v5326_v24 = vmax.f32 %v3610_v28, 0.0  ;;  %v13388_v50 = vadd.f32 %v3418_v61, %v17583_v42  ;;  %v3612_v5 = vadd.f32 %v3611_v44, %v17584_v35  ;;  %v17589_v28 = vld [vmem:[#allocation112_spill] sm:$0xff]  ;;  %v17590_v42 = vld [vmem:[#allocation77_spill] sm:$0xff] }
 0x297   : > { %v3422_v26 = vpop.f32.mrf.mxu0  ;;  %v3615_v33 = vpop.f32.mrf.mxu1  ;;  %4047 = vmatmul.mubr.bf16.gmra.mxu0 %v17585_v54  ;;  %4240 = vmatmul.mubr.bf16.vlgmr.msra.gmra.mxu1 %v17586_v3  ;;  %v17592_v44 = vld [vmem:[#allocation229_spill] sm:$0xff] }
 0x298   : > { %v13393_v58 = vpack.c.bf16 %v5326_v24, %v5322_v43  ;;  %v5327_v20 = vmax.f32 %v3612_v5, 0.0  ;;  %v13396_v39 = vadd.f32 %v3422_v26, %v17588_v1  ;;  %v3616_v17 = vadd.f32 %v3615_v33, %v17589_v28  ;;  %4928 = vmatpush1.bf16.msra.mxu1 %v10094_v25  ;;  %4056 = vmatprep.mubr.bf16.mxu0 %v17590_v42  ;;  %v17593_v54 = vld [vmem:[#allocation13_spill] sm:$0xff]  ;;  %v17595_v1 = vld [vmem:[#allocation118_spill] sm:$0xff]  ;;  %v17596_v33 = vld [vmem:[#allocation232_spill] sm:$0xff] }
 0x299   : > { %v3424_v61 = vpop.f32.mrf.mxu0  ;;  %v3617_v4 = vpop.f32.mrf.mxu1  ;;  %4249 = vmatprep.mubr.bf16.mxu1 %v17591_v46 }
 0x29a   : > { %17587 = vst [vmem:[#allocation190_spill] sm:$0xff] %v13393_v58  ;;  %v13402_v35 = vadd.f32 %v3424_v61, %v17592_v44  ;;  %v3618_v3 = vadd.f32 %v3617_v4, %v17593_v54  ;;  %v13405_v43 = vpack.c.bf16 %v5327_v20, %v5323_v8  ;;  %v5330_v58 = vmax.f32 %v3616_v17, 0.0  ;;  %v17599_v61 = vld [vmem:[#allocation234_spill] sm:$0xff]  ;;  %v17600_v8 = vld [vmem:[#allocation79_spill] sm:$0xff]  ;;  %v17601_v54 = vld [vmem:[#allocation48_spill] sm:$0xff] }
 0x29b   : > { %v3426_v24 = vpop.f32.mrf.mxu0  ;;  %v3619_v5 = vpop.f32.mrf.mxu1  ;;  %v17605_v17 = vld [vmem:[#allocation120_spill] sm:$0xff] }
 0x29c   : > { %17594 = vst [vmem:[#allocation55_spill] sm:$0xff] %v13405_v43  ;;  %v13408_v26 = vadd.f32 %v3426_v24, %v17595_v1  ;;  %v3620_v25 = vadd.f32 %v3619_v5, %v17596_v33  ;;  %v5331_v53 = vmax.f32 %v3618_v3, 0.0  ;;  %v17603_v5 = vld [vmem:[#allocation15_spill] sm:$0xff]  ;;  %v17606_v43 = vld [vmem:[#allocation81_spill] sm:$0xff] }
 0x29d   : > { %v3428_v28 = vpop.f32.mrf.mxu0  ;;  %v3621_v42 = vpop.f32.mrf.mxu1 }
 0x29e   : > { %v5334_v19 = vmax.f32 %v3620_v25, 0.0  ;;  %v13412_v46 = vadd.f32 %v3428_v28, %v17597_v12  ;;  %v3622_v44 = vadd.f32 %v3621_v42, %v17599_v61  ;;  %v17607_v12 = vld [vmem:[#allocation50_spill] sm:$0xff]  ;;  %v17608_v42 = vld [vmem:[#allocation235_spill] sm:$0xff] }
 0x29f   : > { %v3432_v4 = vpop.f32.mrf.mxu0  ;;  %v3625_v20 = vpop.f32.mrf.mxu1  ;;  %4057 = vmatmul.mubr.bf16.gmra.mxu0 %v17600_v8  ;;  %4250 = vmatmul.mubr.bf16.gmra.mxu1 %v17601_v54  ;;  %v17610_v8 = vld [vmem:[#allocation17_spill] sm:$0xff] }
 0x2a0   : > { %17598 = vst [vmem:[#allocation293_spill] sm:$0xff] %v13412_v46  ;;  %v13417_v24 = vpack.c.bf16 %v5334_v19, %v5330_v58  ;;  %v5335_v1 = vmax.f32 %v3622_v44, 0.0  ;;  %v13420_v33 = vadd.f32 %v3432_v4, %v17603_v5  ;;  %v3626_v25 = vadd.f32 %v3625_v20, %v17605_v17  ;;  %4066 = vmatprep.mubr.bf16.mxu0 %v17606_v43  ;;  %v17612_v44 = vld [vmem:[#allocation236_spill] sm:$0xff]  ;;  %v17613_v5 = vld [vmem:[#allocation126_spill] sm:$0xff] }
 0x2a1   : > { %4259 = vmatprep.mubr.bf16.mxu1 %v17607_v12  ;;  %v3434_v28 = vpop.f32.mrf.mxu0  ;;  %v3627_v3 = vpop.f32.mrf.mxu1 }
 0x2a2   : > { %17602 = vst [vmem:[#allocation191_spill] sm:$0xff] %v13417_v24  ;;  %17604 = vst [vmem:[#allocation57_spill] sm:$0xff] %v13420_v33  ;;  %v13426_v61 = vadd.f32 %v3434_v28, %v17608_v42  ;;  %v3628_v49 = vadd.f32 %v3627_v3, %v17610_v8  ;;  %v13429_v54 = vpack.c.bf16 %v5335_v1, %v5331_v53  ;;  %v5338_v24 = vmax.f32 %v3626_v25, 0.0  ;;  %v17614_v33 = vld [vmem:[#allocation239_spill] sm:$0xff]  ;;  %v17618_v8 = vld [vmem:[#allocation52_spill] sm:$0xff] }
 0x2a3   : > { %v3436_v19 = vpop.f32.mrf.mxu0  ;;  %v3629_v58 = vpop.f32.mrf.mxu1  ;;  %v17616_v28 = vld [vmem:[#allocation127_spill] sm:$0xff] }
 0x2a4   : > { %17609 = vst [vmem:[#allocation59_spill] sm:$0xff] %v13426_v61  ;;  %17611 = vst [vmem:[#allocation198_spill] sm:$0xff] %v13429_v54  ;;  %v13432_v4 = vadd.f32 %v3436_v19, %v17612_v44  ;;  %v3630_v20 = vadd.f32 %v3629_v58, %v17613_v5  ;;  %v5339_v61 = vmax.f32 %v3628_v49, 0.0  ;;  %v17617_v1 = vld [vmem:[#allocation83_spill] sm:$0xff]  ;;  %v17620_v58 = vld [vmem:[#allocation241_spill] sm:$0xff] }
 0x2a5   : > { %v3438_v17 = vpop.f32.mrf.mxu0  ;;  %v3631_v43 = vpop.f32.mrf.mxu1  ;;  %v17622_v25 = vld [vmem:[#allocation19_spill] sm:$0xff]  ;;  %v17623_v54 = vld [vmem:[#allocation85_spill] sm:$0xff] }
 0x2a6   : > { %v5342_v12 = vmax.f32 %v3630_v20, 0.0  ;;  %v13436_v46 = vadd.f32 %v3438_v17, %v17614_v33  ;;  %v3632_v42 = vadd.f32 %v3631_v43, %v17616_v28  ;;  %v17624_v33 = vld [vmem:[#allocation54_spill] sm:$0xff]  ;;  %v17626_v28 = vld [vmem:[#allocation128_spill] sm:$0xff] }
 0x2a7   : > { %v3442_v3 = vpop.f32.mrf.mxu0  ;;  %v3635_v53 = vpop.f32.mrf.mxu1  ;;  %4067 = vmatmul.mubr.bf16.gmra.mxu0 %v17617_v1  ;;  %4260 = vmatmul.mubr.bf16.gmra.mxu1 %v17618_v8 }
 0x2a8   : > { %17615 = vst [vmem:[#allocation199_spill] sm:$0xff] %v13436_v46  ;;  %v13441_v19 = vpack.c.bf16 %v5342_v12, %v5338_v24  ;;  %v5343_v44 = vmax.f32 %v3632_v42, 0.0  ;;  %v13444_v5 = vadd.f32 %v3442_v3, %v17620_v58  ;;  %v3636_v20 = vadd.f32 %v3635_v53, %v17622_v25  ;;  %4076 = vmatprep.mubr.bf16.mxu0 %v17623_v54  ;;  %v17628_v42 = vld [vmem:[#allocation21_spill] sm:$0xff] }
 0x2a9   : > { %4269 = vmatprep.mubr.bf16.mxu1 %v17624_v33  ;;  %v3444_v17 = vpop.f32.mrf.mxu0  ;;  %v3637_v49 = vpop.f32.mrf.mxu1  ;;  %v17630_v58 = vld [vmem:[#allocation129_spill] sm:$0xff] }
 0x2aa   : > { %17619 = vst [vmem:[#allocation61_spill] sm:$0xff] %v13441_v19  ;;  %17621 = vst [vmem:[#allocation295_spill] sm:$0xff] %v13444_v5  ;;  %v13450_v43 = vadd.f32 %v3444_v17, %v12894_v13  ;;  %v3638_v1 = vadd.f32 %v3637_v49, %v17626_v28  ;;  %v13453_v8 = vpack.c.bf16 %v5343_v44, %v5339_v61  ;;  %v5346_v19 = vmax.f32 %v3636_v20, 0.0  ;;  %v17631_v5 = vld [vmem:[#allocation243_spill] sm:$0xff]  ;;  %v17633_v13 = vld [vmem:[#allocation134_spill] sm:$0xff] }
 0x2ab   : > { %v3446_v24 = vpop.f32.mrf.mxu0  ;;  %v3639_v12 = vpop.f32.mrf.mxu1  ;;  %v17634_v44 = vld [vmem:[#allocation87_spill] sm:$0xff]  ;;  %v17635_v28 = vld [vmem:[#allocation56_spill] sm:$0xff] }
 0x2ac   : > { %17625 = vst [vmem:[#allocation200_spill] sm:$0xff] %v13450_v43  ;;  %17627 = vst [vmem:[#allocation298_spill] sm:$0xff] %v13453_v8  ;;  %v13456_v3 = vadd.f32 %v3446_v24, %v17628_v42  ;;  %v3640_v53 = vadd.f32 %v3639_v12, %v17630_v58  ;;  %v5347_v43 = vmax.f32 %v3638_v1, 0.0  ;;  %v17637_v12 = vld [vmem:[#allocation246_spill] sm:$0xff]  ;;  %v17639_v20 = vld [vmem:[#allocation135_spill] sm:$0xff] }
 0x2ad   : > { %v3448_v25 = vpop.f32.mrf.mxu0  ;;  %v3641_v54 = vpop.f32.mrf.mxu1  ;;  %v17640_v8 = vld [vmem:[#allocation89_spill] sm:$0xff] }
 0x2ae   : > { %17629 = vst [vmem:[#allocation206_spill] sm:$0xff] %v13456_v3  ;;  %v5350_v33 = vmax.f32 %v3640_v53, 0.0  ;;  %v13460_v46 = vadd.f32 %v3448_v25, %v17631_v5  ;;  %v3642_v17 = vadd.f32 %v3641_v54, %v17633_v13  ;;  %v17641_v5 = vld [vmem:[#allocation58_spill] sm:$0xff]  ;;  %v17642_v54 = vld [vmem:[#allocation248_spill] sm:$0xff] }
 0x2af   : > { %v3452_v49 = vpop.f32.mrf.mxu0  ;;  %v3645_v61 = vpop.f32.mrf.mxu1  ;;  %4077 = vmatmul.mubr.bf16.gmra.mxu0 %v17634_v44  ;;  %4270 = vmatmul.mubr.bf16.gmra.mxu1 %v17635_v28  ;;  %v17644_v44 = vld [vmem:[#allocation23_spill] sm:$0xff] }
 0x2b0   : > { %17632 = vst [vmem:[#allocation63_spill] sm:$0xff] %v13460_v46  ;;  %v13465_v24 = vpack.c.bf16 %v5350_v33, %v5346_v19  ;;  %v5351_v42 = vmax.f32 %v3642_v17, 0.0  ;;  %v13468_v58 = vadd.f32 %v3452_v49, %v17637_v12  ;;  %v3646_v53 = vadd.f32 %v3645_v61, %v17639_v20  ;;  %4086 = vmatprep.mubr.bf16.mxu0 %v17640_v8  ;;  %v17646_v17 = vld [vmem:[#allocation249_spill] sm:$0xff] }
 0x2b1   : > { %4279 = vmatprep.mubr.bf16.mxu1 %v17641_v5  ;;  %v3454_v25 = vpop.f32.mrf.mxu0  ;;  %v3647_v1 = vpop.f32.mrf.mxu1  ;;  %v17647_v12 = vld [vmem:[#allocation25_spill] sm:$0xff] }
 0x2b2   : > { %17636 = vst [vmem:[#allocation299_spill] sm:$0xff] %v13465_v24  ;;  %17638 = vst [vmem:[#allocation207_spill] sm:$0xff] %v13468_v58  ;;  %v13474_v13 = vadd.f32 %v3454_v25, %v17642_v54  ;;  %v3648_v46 = vadd.f32 %v3647_v1, %v17644_v44  ;;  %v13477_v28 = vpack.c.bf16 %v5351_v42, %v5347_v43  ;;  %v5354_v24 = vmax.f32 %v3646_v53, 0.0  ;;  %v17648_v58 = vld [vmem:[#allocation137_spill] sm:$0xff]  ;;  %v17650_v25 = vld [vmem:[#allocation250_spill] sm:$0xff] }
 0x2b3   : > { %v3456_v19 = vpop.f32.mrf.mxu0  ;;  %v3649_v33 = vpop.f32.mrf.mxu1  ;;  %v17651_v42 = vld [vmem:[#allocation91_spill] sm:$0xff]  ;;  %v17652_v44 = vld [vmem:[#allocation60_spill] sm:$0xff]  ;;  %v17656_v53 = vld [vmem:[#allocation253_spill] sm:$0xff] }
 0x2b4   : > { %17643 = vst [vmem:[#allocation65_spill] sm:$0xff] %v13474_v13  ;;  %17645 = vst [vmem:[#allocation67_spill] sm:$0xff] %v13477_v28  ;;  %v13480_v49 = vadd.f32 %v3456_v19, %v17646_v17  ;;  %v3650_v61 = vadd.f32 %v3649_v33, %v17647_v12  ;;  %v5355_v13 = vmax.f32 %v3648_v46, 0.0  ;;  %v17654_v33 = vld [vmem:[#allocation142_spill] sm:$0xff]  ;;  %v17657_v28 = vld [vmem:[#allocation93_spill] sm:$0xff] }
 0x2b5   : > { %v3458_v20 = vpop.f32.mrf.mxu0  ;;  %v3651_v8 = vpop.f32.mrf.mxu1 }
 0x2b6   : > { %v5358_v5 = vmax.f32 %v3650_v61, 0.0  ;;  %v13484_v3 = vadd.f32 %v3458_v20, %v17648_v58  ;;  %v3652_v54 = vadd.f32 %v3651_v8, %v17650_v25  ;;  %v17658_v58 = vld [vmem:[#allocation62_spill] sm:$0xff]  ;;  %v17660_v25 = vld [vmem:[#allocation143_spill] sm:$0xff] }
 0x2b7   : > { %v3462_v1 = vpop.f32.mrf.mxu0  ;;  %v3655_v43 = vpop.f32.mrf.mxu1  ;;  %4087 = vmatmul.mubr.bf16.gmra.mxu0 %v17651_v42  ;;  %4280 = vmatmul.mubr.bf16.gmra.mxu1 %v17652_v44 }
 0x2b8   : > { %17649 = vst [vmem:[#allocation69_spill] sm:$0xff] %v13484_v3  ;;  %v13489_v19 = vpack.c.bf16 %v5358_v5, %v5354_v24  ;;  %v5359_v17 = vmax.f32 %v3652_v54, 0.0  ;;  %v13492_v12 = vadd.f32 %v3462_v1, %v17654_v33  ;;  %v3656_v61 = vadd.f32 %v3655_v43, %v17656_v53  ;;  %4096 = vmatprep.mubr.bf16.mxu0 %v17657_v28  ;;  %v17662_v54 = vld [vmem:[#allocation27_spill] sm:$0xff]  ;;  %v17664_v33 = vld [vmem:[#allocation144_spill] sm:$0xff] }
 0x2b9   : > { %4289 = vmatprep.mubr.bf16.mxu1 %v17658_v58  ;;  %v3464_v20 = vpop.f32.mrf.mxu0  ;;  %v3657_v46 = vpop.f32.mrf.mxu1 }
 0x2ba   : > { %17653 = vst [vmem:[#allocation214_spill] sm:$0xff] %v13489_v19  ;;  %17655 = vst [vmem:[#allocation219_spill] sm:$0xff] %v13492_v12  ;;  %v13498_v8 = vadd.f32 %v3464_v20, %v12974_v63  ;;  %v3658_v42 = vadd.f32 %v3657_v46, %v17660_v25  ;;  %v13501_v44 = vpack.c.bf16 %v5359_v17, %v5355_v13  ;;  %v5362_v19 = vmax.f32 %v3656_v61, 0.0  ;;  %v17665_v12 = vld [vmem:[#allocation256_spill] sm:$0xff]  ;;  %v17667_v63 = vld [vmem:[#allocation29_spill] sm:$0xff] }
 0x2bb   : > { %v3466_v24 = vpop.f32.mrf.mxu0  ;;  %v3659_v5 = vpop.f32.mrf.mxu1  ;;  %v17668_v17 = vld [vmem:[#allocation95_spill] sm:$0xff]  ;;  %v17669_v25 = vld [vmem:[#allocation64_spill] sm:$0xff]  ;;  %v17673_v61 = vld [vmem:[#allocation150_spill] sm:$0xff] }
 0x2bc   : > { %17659 = vst [vmem:[#allocation71_spill] sm:$0xff] %v13498_v8  ;;  %17661 = vst [vmem:[#allocation221_spill] sm:$0xff] %v13501_v44  ;;  %v13504_v1 = vadd.f32 %v3466_v24, %v17662_v54  ;;  %v3660_v43 = vadd.f32 %v3659_v5, %v17664_v33  ;;  %v5363_v8 = vmax.f32 %v3658_v42, 0.0  ;;  %v17671_v5 = vld [vmem:[#allocation145_spill] sm:$0xff] }
 0x2bd   : > { %v3468_v53 = vpop.f32.mrf.mxu0  ;;  %v3661_v28 = vpop.f32.mrf.mxu1  ;;  %v17674_v44 = vld [vmem:[#allocation97_spill] sm:$0xff] }
 0x2be   : > { %17663 = vst [vmem:[#allocation222_spill] sm:$0xff] %v13504_v1  ;;  %v5366_v58 = vmax.f32 %v3660_v43, 0.0  ;;  %v13508_v3 = vadd.f32 %v3468_v53, %v17665_v12  ;;  %v3662_v20 = vadd.f32 %v3661_v28, %v17667_v63  ;;  %v17675_v12 = vld [vmem:[#allocation66_spill] sm:$0xff]  ;;  %v17676_v28 = vld [vmem:[#allocation259_spill] sm:$0xff] }
 0x2bf   : > { %v3472_v46 = vpop.f32.mrf.mxu0  ;;  %v3665_v13 = vpop.f32.mrf.mxu1  ;;  %4097 = vmatmul.mubr.bf16.gmra.mxu0 %v17668_v17  ;;  %4290 = vmatmul.mubr.bf16.gmra.mxu1 %v17669_v25  ;;  %v17678_v17 = vld [vmem:[#allocation151_spill] sm:$0xff] }
 0x2c0   : > { %17666 = vst [vmem:[#allocation73_spill] sm:$0xff] %v13508_v3  ;;  %v13513_v24 = vpack.c.bf16 %v5366_v58, %v5362_v19  ;;  %v5367_v54 = vmax.f32 %v3662_v20, 0.0  ;;  %v13516_v33 = vadd.f32 %v3472_v46, %v17671_v5  ;;  %v3666_v43 = vadd.f32 %v3665_v13, %v17673_v61  ;;  %4106 = vmatprep.mubr.bf16.mxu0 %v17674_v44  ;;  %v17680_v20 = vld [vmem:[#allocation31_spill] sm:$0xff]  ;;  %v17681_v5 = vld [vmem:[#allocation152_spill] sm:$0xff] }
 0x2c1   : > { %4299 = vmatprep.mubr.bf16.mxu1 %v17675_v12  ;;  %v3474_v53 = vpop.f32.mrf.mxu0  ;;  %v3667_v42 = vpop.f32.mrf.mxu1 }
 0x2c2   : > { %17670 = vst [vmem:[#allocation42_spill] sm:$0xff] %v13513_v24  ;;  %17672 = vst [vmem:[#allocation9_spill] sm:$0xff] %v13516_v33  ;;  %v13522_v63 = vadd.f32 %v3474_v53, %v17676_v28  ;;  %v3668_v3 = vadd.f32 %v3667_v42, %v17678_v17  ;;  %v13525_v25 = vpack.c.bf16 %v5367_v54, %v5363_v8  ;;  %v5370_v24 = vmax.f32 %v3666_v43, 0.0  ;;  %v17682_v33 = vld [vmem:[#allocation262_spill] sm:$0xff]  ;;  %v17683_v53 = vld [vmem:[#allocation33_spill] sm:$0xff] }
 0x2c3   : > { %v3476_v19 = vpop.f32.mrf.mxu0  ;;  %v3669_v58 = vpop.f32.mrf.mxu1  ;;  %v17684_v54 = vld [vmem:[#allocation99_spill] sm:$0xff]  ;;  %v17685_v17 = vld [vmem:[#allocation68_spill] sm:$0xff] }
 0x2c4   : > { %17677 = vst [vmem:[#allocation223_spill] sm:$0xff] %v13522_v63  ;;  %17679 = vst [vmem:[#allocation302_spill] sm:$0xff] %v13525_v25  ;;  %v13528_v46 = vadd.f32 %v3476_v19, %v17680_v20  ;;  %v3670_v13 = vadd.f32 %v3669_v58, %v17681_v5  ;;  %v5371_v63 = vmax.f32 %v3668_v3, 0.0  ;;  %v17687_v58 = vld [vmem:[#allocation153_spill] sm:$0xff]  ;;  %v17688_v43 = vld [vmem:[#allocation263_spill] sm:$0xff] }
 0x2c5   : > { %v3478_v61 = vpop.f32.mrf.mxu0  ;;  %v3671_v44 = vpop.f32.mrf.mxu1  ;;  %v17689_v25 = vld [vmem:[#allocation101_spill] sm:$0xff] }
 0x2c6   : > { %v5374_v12 = vmax.f32 %v3670_v13, 0.0  ;;  %v13532_v1 = vadd.f32 %v3478_v61, %v17682_v33  ;;  %v3672_v28 = vadd.f32 %v3671_v44, %v17683_v53  ;;  %v17690_v33 = vld [vmem:[#allocation70_spill] sm:$0xff] }
 0x2c7   : > { %v3482_v42 = vpop.f32.mrf.mxu0  ;;  %v3675_v8 = vpop.f32.mrf.mxu1  ;;  %4107 = vmatmul.mubr.bf16.gmra.mxu0 %v17684_v54  ;;  %4300 = vmatmul.mubr.bf16.gmra.mxu1 %v17685_v17 }
 0x2c8   : > { %v13537_v19 = vpack.c.bf16 %v5374_v12, %v5370_v24  ;;  %v5375_v20 = vmax.f32 %v3672_v28, 0.0  ;;  %v13540_v5 = vadd.f32 %v3482_v42, %v17687_v58  ;;  %v3676_v13 = vadd.f32 %v3675_v8, %v17688_v43  ;;  %4116 = vmatprep.mubr.bf16.mxu0 %v17689_v25  ;;  %4309 = vmatprep.mubr.bf16.mxu1 %v17690_v33  ;;  %v17692_v42 = vld [vmem:[#allocation266_spill] sm:$0xff] }
 0x2c9   : > { %v3484_v61 = vpop.f32.mrf.mxu0  ;;  %v3677_v3 = vpop.f32.mrf.mxu1 }
 0x2ca   : > { %17686 = vst [vmem:[#allocation226_spill] sm:$0xff] %v13537_v19  ;;  %v13546_v44 = vadd.f32 %v3484_v61, %v13054_v14  ;;  %v3678_v53 = vadd.f32 %v3677_v3, %v13057_v41  ;;  %v13549_v54 = vpack.c.bf16 %v5375_v20, %v5371_v63  ;;  %v5378_v58 = vmax.f32 %v3676_v13, 0.0  ;;  %v17693_v14 = vld [vmem:[#allocation159_spill] sm:$0xff]  ;;  %v17695_v3 = vld [vmem:[#allocation72_spill] sm:$0xff] }
 0x2cb   : > { %v3486_v24 = vpop.f32.mrf.mxu0  ;;  %v3679_v12 = vpop.f32.mrf.mxu1  ;;  %v17694_v20 = vld [vmem:[#allocation103_spill] sm:$0xff] }
 0x2cc   : > { %17691 = vst [vmem:[#allocation111_spill] sm:$0xff] %v13549_v54  ;;  %v13552_v28 = vadd.f32 %v3486_v24, %v13063_v30  ;;  %v3680_v8 = vadd.f32 %v3679_v12, %v17692_v42  ;;  %v5379_v19 = vmax.f32 %v3678_v53, 0.0  ;;  %v17697_v12 = vld [vmem:[#allocation268_spill] sm:$0xff]  ;;  %v17699_v13 = vld [vmem:[#allocation35_spill] sm:$0xff]  ;;  %v17700_v54 = vld [vmem:[#allocation10_spill] sm:$0xff] }
 0x2cd   : > { %v3488_v17 = vpop.f32.mrf.mxu0  ;;  %v3681_v25 = vpop.f32.mrf.mxu1 }
 0x2ce   : > { %v5382_v43 = vmax.f32 %v3680_v8, 0.0  ;;  %v13556_v33 = vadd.f32 %v3488_v17, %v13070_v23  ;;  %v3682_v61 = vadd.f32 %v3681_v25, %v17693_v14  ;;  %v17701_v23 = vld [vmem:[#allocation74_spill] sm:$0xff]  ;;  %v17703_v14 = vld [vmem:[#allocation160_spill] sm:$0xff] }
 0x2cf   : > { %v3492_v41 = vpop.f32.mrf.mxu0  ;;  %v3685_v63 = vpop.f32.mrf.mxu1  ;;  %4117 = vmatmul.mubr.bf16.gmra.mxu0 %v17694_v20  ;;  %4310 = vmatmul.mubr.bf16.gmra.mxu1 %v17695_v3 }
 0x2d0   : > { %v13561_v30 = vpack.c.bf16 %v5382_v43, %v5378_v58  ;;  %v5383_v24 = vmax.f32 %v3682_v61, 0.0  ;;  %v13564_v42 = vadd.f32 %v3492_v41, %v17697_v12  ;;  %v3686_v8 = vadd.f32 %v3685_v63, %v17699_v13  ;;  %4126 = vmatprep.mubr.bf16.mxu0 %v17700_v54  ;;  %4319 = vmatprep.mubr.bf16.mxu1 %v17701_v23  ;;  %v17705_v41 = vld [vmem:[#allocation37_spill] sm:$0xff] }
 0x2d1   : > { %v3494_v17 = vpop.f32.mrf.mxu0  ;;  %v3687_v53 = vpop.f32.mrf.mxu1 }
 0x2d2   : > { %17696 = vst [vmem:[#allocation228_spill] sm:$0xff] %v13561_v30  ;;  %17698 = vst [vmem:[#allocation75_spill] sm:$0xff] %v13564_v42  ;;  %v13570_v25 = vadd.f32 %v3494_v17, %v13091_v38  ;;  %v3688_v20 = vadd.f32 %v3687_v53, %v17703_v14  ;;  %v13573_v3 = vpack.c.bf16 %v5383_v24, %v5379_v19  ;;  %v5386_v13 = vmax.f32 %v3686_v8, 0.0  ;;  %v17706_v30 = vld [vmem:[#allocation162_spill] sm:$0xff]  ;;  %v17707_v38 = vld [vmem:[#allocation167_spill] sm:$0xff] }
 0x2d3   : > { %v3496_v58 = vpop.f32.mrf.mxu0  ;;  %v3689_v43 = vpop.f32.mrf.mxu1  ;;  %v17708_v19 = vld [vmem:[#allocation12_spill] sm:$0xff]  ;;  %v17712_v8 = vld [vmem:[#allocation14_spill] sm:$0xff] }
 0x2d4   : > { %17702 = vst [vmem:[#allocation44_spill] sm:$0xff] %v13570_v25  ;;  %17704 = vst [vmem:[#allocation11_spill] sm:$0xff] %v13573_v3  ;;  %v13576_v61 = vadd.f32 %v3496_v58, %v13100_v60  ;;  %v3690_v63 = vadd.f32 %v3689_v43, %v17705_v41  ;;  %v17709_v24 = vld [vmem:[#allocation76_spill] sm:$0xff]  ;;  %v5387_v60 = vmax.f32 %v3688_v20, 0.0 }
 0x2d5   : > { %v3498_v12 = vpop.f32.mrf.mxu0  ;;  %v3691_v54 = vpop.f32.mrf.mxu1  ;;  %v17711_v43 = vld [vmem:[#allocation272_spill] sm:$0xff] }
 0x2d6   : > { %v5390_v23 = vmax.f32 %v3690_v63, 0.0  ;;  %v13580_v42 = vadd.f32 %v3498_v12, %v17706_v30  ;;  %v3692_v17 = vadd.f32 %v3691_v54, %v17707_v38  ;;  %v17713_v63 = vld [vmem:[#allocation78_spill] sm:$0xff] }
 0x2d7   : > { %v3695_v25 = vpop.f32.mrf.mxu1  ;;  %v13583_v53 = vpop.f32.mrf.mxu0  ;;  %4127 = vmatmul.mubr.bf16.gmra.mxu0 %v17708_v19  ;;  %4320 = vmatmul.mubr.bf16.gmra.mxu1 %v17709_v24 }
 0x2d8   : > { %v13587_v14 = vpack.c.bf16 %v5390_v23, %v5386_v13  ;;  %v5391_v58 = vmax.f32 %v3692_v17, 0.0  ;;  %v3696_v41 = vadd.f32 %v3695_v25, %v17711_v43  ;;  %4136 = vmatprep.mubr.bf16.mxu0 %v17712_v8  ;;  %4329 = vmatprep.mubr.bf16.mxu1 %v17713_v63  ;;  %v17715_v63 = vld [vmem:[#allocation16_spill] sm:$0xff] }
 0x2d9   : > { %v3697_v30 = vpop.f32.mrf.mxu1  ;;  %v13592_v12 = vpop.f32.mrf.mxu0 }
 0x2da   : > { %17710 = vst [vmem:[#allocation112_spill] sm:$0xff] %v13587_v14  ;;  %v3698_v54 = vadd.f32 %v3697_v30, %v13128_v32  ;;  %v13595_v38 = vpack.c.bf16 %v5391_v58, %v5387_v60  ;;  %v5394_v25 = vmax.f32 %v3696_v41, 0.0  ;;  %v17716_v32 = vld [vmem:[#allocation80_spill] sm:$0xff]  ;;  %v17719_v14 = vld [vmem:[#allocation82_spill] sm:$0xff] }
 0x2db   : > { %v3699_v19 = vpop.f32.mrf.mxu1  ;;  %v13597_v3 = vpop.f32.mrf.mxu0 }
 0x2dc   : > { %17714 = vst [vmem:[#allocation77_spill] sm:$0xff] %v13595_v38  ;;  %v3700_v20 = vadd.f32 %v3699_v19, %v13134_v10  ;;  %v5395_v60 = vmax.f32 %v3698_v54, 0.0  ;;  %v17718_v19 = vld [vmem:[#allocation18_spill] sm:$0xff] }
 0x2dd   : > { %v3701_v13 = vpop.f32.mrf.mxu1  ;;  %v13600_v23 = vpop.f32.mrf.mxu0 }
 0x2de   : > { %v5398_v17 = vmax.f32 %v3700_v20, 0.0  ;;  %v3702_v24 = vadd.f32 %v3701_v13, %v13138_v55 }
 0x2df   : > { %v3705_v43 = vpop.f32.mrf.mxu1  ;;  %v13603_v8 = vpop.f32.mrf.mxu0  ;;  %4137 = vmatmul.mubr.bf16.gmra.mxu0 %v17715_v63  ;;  %4330 = vmatmul.mubr.bf16.gmra.mxu1 %v17716_v32 }
 0x2e0   : > { %v13607_v58 = vpack.c.bf16 %v5398_v17, %v5394_v25  ;;  %v5399_v30 = vmax.f32 %v3702_v24, 0.0  ;;  %v3706_v10 = vadd.f32 %v3705_v43, %v13147_v57  ;;  %4146 = vmatprep.mubr.bf16.mxu0 %v17718_v19  ;;  %4339 = vmatprep.mubr.bf16.mxu1 %v17719_v14  ;;  %v10135_v14 = vld [vmem:[%s16783_s3 + $0x74] ss:$8 sps:$4 sm:$0xff]  }
 0x2e1   : > { %v3707_v41 = vpop.f32.mrf.mxu1  ;;  %v13612_v20 = vpop.f32.mrf.mxu0  ;;  %6046 = vmatprep.subr.bf16.mxu0 %v10135_v14  ;;  %v17727_v14 = vld [vmem:[#allocation24_spill] sm:$0xff] }
 0x2e2   : > { %17717 = vst [vmem:[#allocation46_spill] sm:$0xff] %v13607_v58  ;;  %v3708_v55 = vadd.f32 %v3707_v41, %v13155_v45  ;;  %v13615_v13 = vpack.c.bf16 %v5399_v30, %v5395_v60  ;;  %v5402_v57 = vmax.f32 %v3706_v10, 0.0  ;;  %v17721_v60 = vld [vmem:[#allocation20_spill] sm:$0xff] }
 0x2e3   : > { %v3709_v63 = vpop.f32.mrf.mxu1  ;;  %v13617_v38 = vpop.f32.mrf.mxu0  ;;  %v17722_v30 = vld [vmem:[#allocation84_spill] sm:$0xff] }
 0x2e4   : > { %17720 = vst [vmem:[#allocation229_spill] sm:$0xff] %v13615_v13  ;;  %v3710_v54 = vadd.f32 %v3709_v63, %v13163_v36  ;;  %v5403_v19 = vmax.f32 %v3708_v55, 0.0  ;;  %v17724_v63 = vld [vmem:[#allocation22_spill] sm:$0xff] }
 0x2e5   : > { %v3711_v25 = vpop.f32.mrf.mxu1  ;;  %v13620_v17 = vpop.f32.mrf.mxu0 }
 0x2e6   : > { %v5406_v24 = vmax.f32 %v3710_v54, 0.0  ;;  %v3712_v43 = vadd.f32 %v3711_v25, %v13167_v22  ;;  %v17725_v22 = vld [vmem:[#allocation86_spill] sm:$0xff] }
 0x2e7   : > { %v3715_v32 = vpop.f32.mrf.mxu1  ;;  %v13626_v45 = vpop.f32.mrf.mxu0  ;;  %4147 = vmatmul.mubr.bf16.gmra.mxu0 %v17721_v60  ;;  %4340 = vmatmul.mubr.bf16.gmra.mxu1 %v17722_v30 }
 0x2e8   : > { %v13630_v36 = vpack.c.bf16 %v5406_v24, %v5402_v57  ;;  %v5407_v41 = vmax.f32 %v3712_v43, 0.0  ;;  %v3716_v10 = vadd.f32 %v3715_v32, %v13177_v37  ;;  %4156 = vmatprep.mubr.bf16.mxu0 %v17724_v63  ;;  %4349 = vmatprep.mubr.bf16.mxu1 %v17725_v22 }
 0x2e9   : > { %v3717_v54 = vpop.f32.mrf.mxu1  ;;  %v13635_v25 = vpop.f32.mrf.mxu0 }
 0x2ea   : > { %17723 = vst [vmem:[#allocation13_spill] sm:$0xff] %v13630_v36  ;;  %v3718_v58 = vadd.f32 %v3717_v54, %v13190_v2  ;;  %v13638_v13 = vpack.c.bf16 %v5407_v41, %v5403_v19  ;;  %v5410_v37 = vmax.f32 %v3716_v10, 0.0  ;;  %v17728_v2 = vld [vmem:[#allocation88_spill] sm:$0xff]  ;;  %v17731_v36 = vld [vmem:[#allocation90_spill] sm:$0xff] }
 0x2eb   : > { %v3719_v60 = vpop.f32.mrf.mxu1  ;;  %v13640_v30 = vpop.f32.mrf.mxu0 }
 0x2ec   : > { %17726 = vst [vmem:[#allocation118_spill] sm:$0xff] %v13638_v13  ;;  %v3720_v55 = vadd.f32 %v3719_v60, %v13198_v0  ;;  %v5411_v19 = vmax.f32 %v3718_v58, 0.0  ;;  %v17730_v60 = vld [vmem:[#allocation26_spill] sm:$0xff] }
 0x2ed   : > { %v3721_v57 = vpop.f32.mrf.mxu1  ;;  %v13643_v24 = vpop.f32.mrf.mxu0 }
 0x2ee   : > { %v5414_v43 = vmax.f32 %v3720_v55, 0.0  ;;  %v3722_v32 = vadd.f32 %v3721_v57, %v13202_v16 }
 0x2ef   : > { %v3725_v63 = vpop.f32.mrf.mxu1  ;;  %v13646_v22 = vpop.f32.mrf.mxu0  ;;  %4157 = vmatmul.mubr.bf16.gmra.mxu0 %v17727_v14  ;;  %4350 = vmatmul.mubr.bf16.gmra.mxu1 %v17728_v2 }
 0x2f0   : > { %v13650_v41 = vpack.c.bf16 %v5414_v43, %v5410_v37  ;;  %v5415_v54 = vmax.f32 %v3722_v32, 0.0  ;;  %v3726_v0 = vadd.f32 %v3725_v63, %v13211_v51  ;;  %4166 = vmatprep.mubr.bf16.mxu0 %v17730_v60  ;;  %4359 = vmatprep.mubr.bf16.mxu1 %v17731_v36  ;;  %v17733_v60 = vld [vmem:[#allocation28_spill] sm:$0xff] }
 0x2f1   : > { %v3727_v10 = vpop.f32.mrf.mxu1  ;;  %v13655_v55 = vpop.f32.mrf.mxu0 }
 0x2f2   : > { %17729 = vst [vmem:[#allocation232_spill] sm:$0xff] %v13650_v41  ;;  %v3728_v16 = vadd.f32 %v3727_v10, %v13219_v6  ;;  %v13658_v57 = vpack.c.bf16 %v5415_v54, %v5411_v19  ;;  %v5418_v51 = vmax.f32 %v3726_v0, 0.0  ;;  %v17734_v6 = vld [vmem:[#allocation92_spill] sm:$0xff]  ;;  %v17737_v41 = vld [vmem:[#allocation94_spill] sm:$0xff] }
 0x2f3   : > { %v3729_v14 = vpop.f32.mrf.mxu1  ;;  %v13660_v13 = vpop.f32.mrf.mxu0 }
 0x2f4   : > { %17732 = vst [vmem:[#allocation119_spill] sm:$0xff] %v13658_v57  ;;  %v3730_v58 = vadd.f32 %v3729_v14, %v13227_v62  ;;  %v5419_v19 = vmax.f32 %v3728_v16, 0.0  ;;  %v17736_v14 = vld [vmem:[#allocation30_spill] sm:$0xff] }
 0x2f5   : > { %v3731_v37 = vpop.f32.mrf.mxu1  ;;  %v13663_v43 = vpop.f32.mrf.mxu0 }
 0x2f6   : > { %v5422_v32 = vmax.f32 %v3730_v58, 0.0  ;;  %v3732_v63 = vadd.f32 %v3731_v37, %v13231_v31 }
 0x2f7   : > { %v3735_v36 = vpop.f32.mrf.mxu1  ;;  %v13666_v2 = vpop.f32.mrf.mxu0  ;;  %4167 = vmatmul.mubr.bf16.gmra.mxu0 %v17733_v60  ;;  %4360 = vmatmul.mubr.bf16.gmra.mxu1 %v17734_v6 }
 0x2f8   : > { %v13670_v54 = vpack.c.bf16 %v5422_v32, %v5418_v51  ;;  %v5423_v10 = vmax.f32 %v3732_v63, 0.0  ;;  %v3736_v62 = vadd.f32 %v3735_v36, %v13241_v47  ;;  %4176 = vmatprep.mubr.bf16.mxu0 %v17736_v14  ;;  %4369 = vmatprep.mubr.bf16.mxu1 %v17737_v41  ;;  %v17739_v14 = vld [vmem:[#allocation32_spill] sm:$0xff] }
 0x2f9   : > { %v3737_v0 = vpop.f32.mrf.mxu1  ;;  %v13675_v58 = vpop.f32.mrf.mxu0 }
 0x2fa   : > { %17735 = vst [vmem:[#allocation234_spill] sm:$0xff] %v13670_v54  ;;  %v3738_v31 = vadd.f32 %v3737_v0, %v13254_v40  ;;  %v13678_v37 = vpack.c.bf16 %v5423_v10, %v5419_v19  ;;  %v5426_v47 = vmax.f32 %v3736_v62, 0.0  ;;  %v17740_v40 = vld [vmem:[#allocation96_spill] sm:$0xff]  ;;  %v17743_v54 = vld [vmem:[#allocation98_spill] sm:$0xff] }
 0x2fb   : > { %v3739_v60 = vpop.f32.mrf.mxu1  ;;  %v13680_v57 = vpop.f32.mrf.mxu0 }
 0x2fc   : > { %17738 = vst [vmem:[#allocation79_spill] sm:$0xff] %v13678_v37  ;;  %v3740_v16 = vadd.f32 %v3739_v60, %v13262_v15  ;;  %v5427_v19 = vmax.f32 %v3738_v31, 0.0  ;;  %v17742_v60 = vld [vmem:[#allocation34_spill] sm:$0xff] }
 0x2fd   : > { %v3741_v51 = vpop.f32.mrf.mxu1  ;;  %v13683_v32 = vpop.f32.mrf.mxu0 }
 0x2fe   : > { %v5430_v63 = vmax.f32 %v3740_v16, 0.0  ;;  %v3742_v36 = vadd.f32 %v3741_v51, %v13269_v21 }
 0x2ff   : > { %v3745_v41 = vpop.f32.mrf.mxu1  ;;  %v13686_v6 = vpop.f32.mrf.mxu0  ;;  %4177 = vmatmul.mubr.bf16.gmra.mxu0 %v17739_v14  ;;  %4370 = vmatmul.mubr.bf16.gmra.mxu1 %v17740_v40 }
 0x300   : > { %v13690_v10 = vpack.c.bf16 %v5430_v63, %v5426_v47  ;;  %v5431_v0 = vmax.f32 %v3742_v36, 0.0  ;;  %v3746_v15 = vadd.f32 %v3745_v41, %v13281_v7  ;;  %4186 = vmatprep.mubr.bf16.mxu0 %v17742_v60  ;;  %4379 = vmatprep.mubr.bf16.mxu1 %v17743_v54  ;;  %v17745_v60 = vld [vmem:[#allocation36_spill] sm:$0xff] }
 0x301   : > { %v3747_v62 = vpop.f32.mrf.mxu1  ;;  %v13695_v16 = vpop.f32.mrf.mxu0 }
 0x302   : > { %17741 = vst [vmem:[#allocation48_spill] sm:$0xff] %v13690_v10  ;;  %v3748_v21 = vadd.f32 %v3747_v62, %v13292_v18  ;;  %v13698_v51 = vpack.c.bf16 %v5431_v0, %v5427_v19  ;;  %v5434_v7 = vmax.f32 %v3746_v15, 0.0  ;;  %v17746_v18 = vld [vmem:[#allocation100_spill] sm:$0xff]  ;;  %v17749_v10 = vld [vmem:[#allocation102_spill] sm:$0xff] }
 0x303   : > { %v3749_v14 = vpop.f32.mrf.mxu1  ;;  %v13700_v37 = vpop.f32.mrf.mxu0 }
 0x304   : > { %17744 = vst [vmem:[#allocation15_spill] sm:$0xff] %v13698_v51  ;;  %v3750_v31 = vadd.f32 %v3749_v14, %v13303_v34  ;;  %v5435_v19 = vmax.f32 %v3748_v21, 0.0  ;;  %v17748_v14 = vld [vmem:[#allocation38_spill] sm:$0xff] }
 0x305   : > { %v3751_v47 = vpop.f32.mrf.mxu1  ;;  %v13703_v63 = vpop.f32.mrf.mxu0 }
 0x306   : > { %v5438_v36 = vmax.f32 %v3750_v31, 0.0  ;;  %v3752_v41 = vadd.f32 %v3751_v47, %v13310_v59 }
 0x307   : > { %v3755_v54 = vpop.f32.mrf.mxu1  ;;  %v13706_v40 = vpop.f32.mrf.mxu0  ;;  %4187 = vmatmul.mubr.bf16.gmra.mxu0 %v17745_v60  ;;  %4380 = vmatmul.mubr.bf16.gmra.mxu1 %v17746_v18 }
 0x308   : > { %v13710_v0 = vpack.c.bf16 %v5438_v36, %v5434_v7  ;;  %v5439_v62 = vmax.f32 %v3752_v41, 0.0  ;;  %v3756_v34 = vadd.f32 %v3755_v54, %v13322_v48  ;;  %4196 = vmatprep.mubr.bf16.mxu0 %v17748_v14  ;;  %4389 = vmatprep.mubr.bf16.mxu1 %v17749_v10  ;;  %v17751_v14 = vld [vmem:[#allocation40_spill] sm:$0xff] }
 0x309   : > { %v3757_v15 = vpop.f32.mrf.mxu1  ;;  %v13715_v31 = vpop.f32.mrf.mxu0 }
 0x30a   : > { %17747 = vst [vmem:[#allocation120_spill] sm:$0xff] %v13710_v0  ;;  %v3758_v59 = vadd.f32 %v3757_v15, %v13333_v56  ;;  %v13718_v47 = vpack.c.bf16 %v5439_v62, %v5435_v19  ;;  %v5442_v48 = vmax.f32 %v3756_v34, 0.0  ;;  %v17752_v56 = vld [vmem:[#allocation104_spill] sm:$0xff]  ;;  %v17755_v0 = vld [vmem:[#allocation106_spill] sm:$0xff] }
 0x30b   : > { %v3759_v60 = vpop.f32.mrf.mxu1  ;;  %v13720_v51 = vpop.f32.mrf.mxu0 }
 0x30c   : > { %17750 = vst [vmem:[#allocation81_spill] sm:$0xff] %v13718_v47  ;;  %v3760_v21 = vadd.f32 %v3759_v60, %v13344_v29  ;;  %v5443_v19 = vmax.f32 %v3758_v59, 0.0  ;;  %v17754_v60 = vld [vmem:[#allocation105_spill] sm:$0xff] }
 0x30d   : > { %v3761_v7 = vpop.f32.mrf.mxu1  ;;  %v13723_v36 = vpop.f32.mrf.mxu0 }
 0x30e   : > { %v5446_v41 = vmax.f32 %v3760_v21, 0.0  ;;  %v3762_v54 = vadd.f32 %v3761_v7, %v13351_v52 }
 0x30f   : > { %v3765_v10 = vpop.f32.mrf.mxu1  ;;  %v13726_v18 = vpop.f32.mrf.mxu0  ;;  %4197 = vmatmul.mubr.bf16.gmra.mxu0 %v17751_v14  ;;  %4390 = vmatmul.mubr.bf16.gmra.mxu1 %v17752_v56 }
 0x310   : > { %v13730_v62 = vpack.c.bf16 %v5446_v41, %v5442_v48  ;;  %v5447_v15 = vmax.f32 %v3762_v54, 0.0  ;;  %v3766_v29 = vadd.f32 %v3765_v10, %v13363_v9  ;;  %4399 = vmatprep.mubr.bf16.mxu1 %v17754_v60  ;;  %4592 = vmatprep.mubr.bf16.mxu0 %v17755_v0  ;;  %v10133_v9 = vld [vmem:[%s16783_s3 + $0x70] ss:$8 sps:$4 sm:$0xff]  }
 0x311   : > { %v3767_v34 = vpop.f32.mrf.mxu1  ;;  %v13735_v21 = vpop.f32.mrf.mxu0 }
 0x312   : > { %17753 = vst [vmem:[#allocation50_spill] sm:$0xff] %v13730_v62  ;;  %v3768_v52 = vadd.f32 %v3767_v34, %v13372_v11  ;;  %v13738_v7 = vpack.c.bf16 %v5447_v15, %v5443_v19  ;;  %v5450_v0 = vmax.f32 %v3766_v29, 0.0  ;;  %v10138_v11 = vld [vmem:[%s16783_s3 + $0x64] ss:$8 sps:$4 sm:$0xff]   ;;  %v17757_v15 = vld [vmem:[#allocation107_spill] sm:$0xff] }
 0x313   : > { %v3769_v14 = vpop.f32.mrf.mxu1  ;;  %v13740_v47 = vpop.f32.mrf.mxu0 }
 0x314   : > { %17756 = vst [vmem:[#allocation235_spill] sm:$0xff] %v13738_v7  ;;  %v3770_v59 = vadd.f32 %v3769_v14, %v13381_v27  ;;  %v17758_v27 = vld [vmem:[#allocation108_spill] sm:$0xff]  ;;  %v5451_v60 = vmax.f32 %v3768_v52, 0.0  ;;  %v10136_v52 = vld [vmem:[%s16783_s3 + $0x60] ss:$8 sps:$4 sm:$0xff]  }
 0x315   : > { %v3771_v48 = vpop.f32.mrf.mxu1  ;;  %v13743_v41 = vpop.f32.mrf.mxu0 }
 0x316   : > { %v5454_v54 = vmax.f32 %v3770_v59, 0.0  ;;  %v3772_v10 = vadd.f32 %v3771_v48, %v13388_v50  ;;  %v17760_v59 = vld [vmem:[#allocation109_spill] sm:$0xff]  ;;  %v17761_v50 = vld [vmem:[#allocation110_spill] sm:$0xff]  ;;  %v10147_v48 = vld [vmem:[%s16783_s3 + $0x174] ss:$8 sps:$4 sm:$0xff]  }
 0x317   : > { %v3775_v56 = vpop.f32.mrf.mxu1  ;;  %v13752_v19 = vpop.f32.mrf.mxu0  ;;  %4400 = vmatmul.mubr.bf16.gmra.mxu1 %v17757_v15  ;;  %4593 = vmatmul.mubr.bf16.vlgmr.msra.gmra.mxu0 %v17758_v27 }
 0x318   : > { %v13756_v34 = vpack.c.bf16 %v5454_v54, %v5450_v0  ;;  %v5455_v14 = vmax.f32 %v3772_v10, 0.0  ;;  %v3776_v29 = vadd.f32 %v3775_v56, %v13396_v39  ;;  %4409 = vmatprep.mubr.bf16.mxu1 %v17760_v59  ;;  %4602 = vmatprep.mubr.bf16.mxu0 %v17761_v50  ;;  %v10141_v39 = vld [vmem:[%s16783_s3 + $0x54] ss:$8 sps:$4 sm:$0xff]   ;;  %v17765_v59 = vld [vmem:[#allocation293_spill] sm:$0xff] }
 0x319   : > { %v3777_v62 = vpop.f32.mrf.mxu1  ;;  %v13764_v7 = vpop.f32.mrf.mxu0  ;;  %6047 = vmatpush1.bf16.msra.mxu0 %v10133_v9  ;;  %6399 = vmatprep.subr.bf16.mxu1 %v10147_v48 }
 0x31a   : > { %17759 = vst [vmem:[#allocation17_spill] sm:$0xff] %v13756_v34  ;;  %v3778_v0 = vadd.f32 %v3777_v62, %v13402_v35  ;;  %6048 = vmatprep.subr.bf16.mxu0 %v10138_v11  ;;  %v13773_v54 = vpack.c.bf16 %v5455_v14, %v5451_v60  ;;  %v10139_v35 = vld [vmem:[%s16783_s3 + $0x50] ss:$8 sps:$4 sm:$0xff]   ;;  %v5458_v62 = vmax.f32 %v3776_v29, 0.0  ;;  %v10144_v60 = vld [vmem:[%s16783_s3 + $0x44] ss:$8 sps:$4 sm:$0xff]  }
 0x31b   : > { %v3779_v10 = vpop.f32.mrf.mxu1  ;;  %v13775_v56 = vpop.f32.mrf.mxu0  ;;  %v17770_v29 = vld [vmem:[#allocation57_spill] sm:$0xff] }
 0x31c   : > { %17762 = vst [vmem:[#allocation236_spill] sm:$0xff] %v13773_v54  ;;  %17763 = vst [vmem:[#allocation126_spill] sm:$0xff] %v13775_v56  ;;  %v3780_v15 = vadd.f32 %v3779_v10, %v13408_v26  ;;  %v17767_v26 = vld [vmem:[#allocation114_spill] sm:$0xff]  ;;  %v17768_v10 = vld [vmem:[#allocation115_spill] sm:$0xff] }
 0x31d   : > { %v3781_v9 = vpop.f32.mrf.mxu1  ;;  %v13778_v27 = vpop.f32.mrf.mxu0  ;;  %6049 = vmatpush1.bf16.msra.mxu0 %v10136_v52  ;;  %v5459_v52 = vmax.f32 %v3778_v0, 0.0 }
 0x31e   : > { %17764 = vst [vmem:[#allocation239_spill] sm:$0xff] %v13778_v27  ;;  %v5462_v11 = vmax.f32 %v3780_v15, 0.0  ;;  %v3782_v50 = vadd.f32 %v3781_v9, %v17765_v59  ;;  %6050 = vmatprep.subr.bf16.mxu0 %v10141_v39  ;;  %v17771_v27 = vld [vmem:[#allocation116_spill] sm:$0xff]  ;;  %v17772_v39 = vld [vmem:[#allocation117_spill] sm:$0xff] }
 0x31f   : > { %v3785_v14 = vpop.f32.mrf.mxu1  ;;  %v13787_v48 = vpop.f32.mrf.mxu0  ;;  %4410 = vmatmul.mubr.bf16.gmra.mxu1 %v17767_v26  ;;  %4603 = vmatmul.mubr.bf16.gmra.mxu0 %v17768_v10  ;;  %v10142_v26 = vld [vmem:[%s16783_s3 + $0x40] ss:$8 sps:$4 sm:$0xff]  }
 0x320   : > { %17766 = vst [vmem:[#allocation127_spill] sm:$0xff] %v13787_v48  ;;  %v13791_v34 = vpack.c.bf16 %v5462_v11, %v5458_v62  ;;  %v5463_v54 = vmax.f32 %v3782_v50, 0.0  ;;  %v3786_v15 = vadd.f32 %v3785_v14, %v17770_v29  ;;  %4419 = vmatprep.mubr.bf16.mxu1 %v17771_v27  ;;  %4612 = vmatprep.mubr.bf16.mxu0 %v17772_v39  ;;  %v17774_v48 = vld [vmem:[#allocation59_spill] sm:$0xff] }
 0x321   : > { %v3787_v9 = vpop.f32.mrf.mxu1  ;;  %v13796_v59 = vpop.f32.mrf.mxu0  ;;  %6051 = vmatpush1.bf16.msra.mxu0 %v10139_v35  ;;  %v17778_v39 = vld [vmem:[#allocation199_spill] sm:$0xff] }
 0x322   : > { %17769 = vst [vmem:[#allocation83_spill] sm:$0xff] %v13791_v34  ;;  %17773 = vst [vmem:[#allocation52_spill] sm:$0xff] %v13796_v59  ;;  %v3788_v10 = vadd.f32 %v3787_v9, %v17774_v48  ;;  %6052 = vmatprep.subr.bf16.mxu0 %v10144_v60  ;;  %v13802_v0 = vpack.c.bf16 %v5463_v54, %v5459_v52  ;;  %v5466_v29 = vmax.f32 %v3786_v15, 0.0  ;;  %v10148_v48 = vld [vmem:[%s16783_s3 + $0x30] ss:$8 sps:$4 sm:$0xff]  }
 0x323   : > { %v3789_v62 = vpop.f32.mrf.mxu1  ;;  %v13804_v11 = vpop.f32.mrf.mxu0  ;;  %v10150_v54 = vld [vmem:[%s16783_s3 + $0x34] ss:$8 sps:$4 sm:$0xff]  }
 0x324   : > { %17775 = vst [vmem:[#allocation241_spill] sm:$0xff] %v13802_v0  ;;  %17776 = vst [vmem:[#allocation19_spill] sm:$0xff] %v13804_v11  ;;  %v3790_v27 = vadd.f32 %v3789_v62, %v13432_v4  ;;  %v17780_v4 = vld [vmem:[#allocation122_spill] sm:$0xff]  ;;  %v17781_v9 = vld [vmem:[#allocation123_spill] sm:$0xff] }
 0x325   : > { %v3791_v50 = vpop.f32.mrf.mxu1  ;;  %v13807_v14 = vpop.f32.mrf.mxu0  ;;  %6053 = vmatpush1.bf16.msra.mxu0 %v10142_v26  ;;  %v5467_v26 = vmax.f32 %v3788_v10, 0.0  ;;  %v17785_v0 = vld [vmem:[#allocation125_spill] sm:$0xff]  ;;  %v17787_v59 = vld [vmem:[#allocation200_spill] sm:$0xff] }
 0x326   : > { %17777 = vst [vmem:[#allocation85_spill] sm:$0xff] %v13807_v14  ;;  %v5470_v35 = vmax.f32 %v3790_v27, 0.0  ;;  %v3792_v34 = vadd.f32 %v3791_v50, %v17778_v39  ;;  %v17783_v27 = vld [vmem:[#allocation295_spill] sm:$0xff]  ;;  %v17784_v39 = vld [vmem:[#allocation124_spill] sm:$0xff]  ;;  %6054 = vmatprep.subr.bf16.mxu0 %v10150_v54  ;;  %v17793_v54 = vld [vmem:[#allocation130_spill] sm:$0xff] }
 0x327   : > { %v3795_v60 = vpop.f32.mrf.mxu1  ;;  %v13816_v52 = vpop.f32.mrf.mxu0  ;;  %4420 = vmatmul.mubr.bf16.gmra.mxu1 %v17780_v4  ;;  %4613 = vmatmul.mubr.bf16.gmra.mxu0 %v17781_v9 }
 0x328   : > { %17779 = vst [vmem:[#allocation54_spill] sm:$0xff] %v13816_v52  ;;  %v13820_v15 = vpack.c.bf16 %v5470_v35, %v5466_v29  ;;  %v5471_v62 = vmax.f32 %v3792_v34, 0.0  ;;  %v3796_v50 = vadd.f32 %v3795_v60, %v17783_v27  ;;  %4429 = vmatprep.mubr.bf16.mxu1 %v17784_v39  ;;  %4622 = vmatprep.mubr.bf16.mxu0 %v17785_v0  ;;  %v17789_v29 = vld [vmem:[#allocation206_spill] sm:$0xff]  ;;  %v17791_v0 = vld [vmem:[#allocation63_spill] sm:$0xff] }
 0x329   : > { %v3797_v14 = vpop.f32.mrf.mxu1  ;;  %v13825_v11 = vpop.f32.mrf.mxu0  ;;  %6055 = vmatpush1.bf16.msra.mxu0 %v10148_v48 }
 0x32a   : > { %17782 = vst [vmem:[#allocation128_spill] sm:$0xff] %v13820_v15  ;;  %17786 = vst [vmem:[#allocation21_spill] sm:$0xff] %v13825_v11  ;;  %v3798_v52 = vadd.f32 %v3797_v14, %v17787_v59  ;;  %v13828_v4 = vpack.c.bf16 %v5471_v62, %v5467_v26  ;;  %v5474_v27 = vmax.f32 %v3796_v50, 0.0  ;;  %v17794_v59 = vld [vmem:[#allocation131_spill] sm:$0xff] }
 0x32b   : > { %v3799_v9 = vpop.f32.mrf.mxu1  ;;  %v13830_v10 = vpop.f32.mrf.mxu0  ;;  %v17796_v62 = vld [vmem:[#allocation207_spill] sm:$0xff] }
 0x32c   : > { %17788 = vst [vmem:[#allocation129_spill] sm:$0xff] %v13828_v4  ;;  %v3800_v34 = vadd.f32 %v3799_v9, %v17789_v29  ;;  %v5475_v14 = vmax.f32 %v3798_v52, 0.0  ;;  %v17797_v29 = vld [vmem:[#allocation132_spill] sm:$0xff]  ;;  %v17798_v4 = vld [vmem:[#allocation133_spill] sm:$0xff] }
 0x32d   : > { %v3801_v35 = vpop.f32.mrf.mxu1  ;;  %v13833_v60 = vpop.f32.mrf.mxu0 }
 0x32e   : > { %17790 = vst [vmem:[#allocation243_spill] sm:$0xff] %v13833_v60  ;;  %v5478_v39 = vmax.f32 %v3800_v34, 0.0  ;;  %v3802_v15 = vadd.f32 %v3801_v35, %v17791_v0  ;;  %v17800_v35 = vld [vmem:[#allocation65_spill] sm:$0xff] }
 0x32f   : > { %v3805_v56 = vpop.f32.mrf.mxu1  ;;  %v13836_v11 = vpop.f32.mrf.mxu0  ;;  %4430 = vmatmul.mubr.bf16.gmra.mxu1 %v17793_v54  ;;  %4623 = vmatmul.mubr.bf16.gmra.mxu0 %v17794_v59  ;;  %v17804_v59 = vld [vmem:[#allocation69_spill] sm:$0xff] }
 0x330   : > { %17792 = vst [vmem:[#allocation134_spill] sm:$0xff] %v13836_v11  ;;  %v13840_v48 = vpack.c.bf16 %v5478_v39, %v5474_v27  ;;  %v5479_v26 = vmax.f32 %v3802_v15, 0.0  ;;  %v3806_v9 = vadd.f32 %v3805_v56, %v17796_v62  ;;  %4439 = vmatprep.mubr.bf16.mxu1 %v17797_v29  ;;  %4632 = vmatprep.mubr.bf16.mxu0 %v17798_v4  ;;  %v10154_v4 = vld [vmem:[%s16783_s3 + $0x20] ss:$8 sps:$4 sm:$0xff]  }
 0x331   : > { %v3807_v50 = vpop.f32.mrf.mxu1  ;;  %v13845_v34 = vpop.f32.mrf.mxu0 }
 0x332   : > { %17795 = vst [vmem:[#allocation87_spill] sm:$0xff] %v13840_v48  ;;  %17799 = vst [vmem:[#allocation56_spill] sm:$0xff] %v13845_v34  ;;  %v3808_v0 = vadd.f32 %v3807_v50, %v17800_v35  ;;  %v13848_v11 = vpack.c.bf16 %v5479_v26, %v5475_v14  ;;  %v5482_v56 = vmax.f32 %v3806_v9, 0.0  ;;  %v10156_v14 = vld [vmem:[%s16783_s3 + $0x24] ss:$8 sps:$4 sm:$0xff]  }
 0x333   : > { %v3809_v54 = vpop.f32.mrf.mxu1  ;;  %v13850_v60 = vpop.f32.mrf.mxu0  ;;  %v17806_v50 = vld [vmem:[#allocation138_spill] sm:$0xff]  ;;  %v17811_v48 = vld [vmem:[#allocation141_spill] sm:$0xff]  ;;  %6056 = vmatprep.subr.bf16.mxu0 %v10156_v14 }
 0x334   : > { %17801 = vst [vmem:[#allocation246_spill] sm:$0xff] %v13848_v11  ;;  %17802 = vst [vmem:[#allocation135_spill] sm:$0xff] %v13850_v60  ;;  %v3810_v52 = vadd.f32 %v3809_v54, %v13480_v49  ;;  %v17807_v49 = vld [vmem:[#allocation139_spill] sm:$0xff]  ;;  %v5483_v35 = vmax.f32 %v3808_v0, 0.0  ;;  %6057 = vmatpush1.bf16.msra.mxu0 %v10154_v4  ;;  %v17819_v14 = vld [vmem:[#allocation146_spill] sm:$0xff] }
 0x335   : > { %v3811_v27 = vpop.f32.mrf.mxu1  ;;  %v13853_v15 = vpop.f32.mrf.mxu0  ;;  %v17813_v60 = vld [vmem:[#allocation71_spill] sm:$0xff] }
 0x336   : > { %17803 = vst [vmem:[#allocation89_spill] sm:$0xff] %v13853_v15  ;;  %v5486_v39 = vmax.f32 %v3810_v52, 0.0  ;;  %v3812_v62 = vadd.f32 %v3811_v27, %v17804_v59  ;;  %v17809_v52 = vld [vmem:[#allocation219_spill] sm:$0xff]  ;;  %v17810_v59 = vld [vmem:[#allocation140_spill] sm:$0xff] }
 0x337   : > { %v3815_v26 = vpop.f32.mrf.mxu1  ;;  %v13862_v29 = vpop.f32.mrf.mxu0  ;;  %4440 = vmatmul.mubr.bf16.gmra.mxu1 %v17806_v50  ;;  %4633 = vmatmul.mubr.bf16.gmra.mxu0 %v17807_v49 }
 0x338   : > { %17805 = vst [vmem:[#allocation58_spill] sm:$0xff] %v13862_v29  ;;  %v13866_v9 = vpack.c.bf16 %v5486_v39, %v5482_v56  ;;  %v5487_v54 = vmax.f32 %v3812_v62, 0.0  ;;  %v3816_v27 = vadd.f32 %v3815_v26, %v17809_v52  ;;  %4449 = vmatprep.mubr.bf16.mxu1 %v17810_v59  ;;  %4642 = vmatprep.mubr.bf16.mxu0 %v17811_v48  ;;  %v17815_v56 = vld [vmem:[#allocation222_spill] sm:$0xff]  ;;  %v17817_v48 = vld [vmem:[#allocation73_spill] sm:$0xff] }
 0x339   : > { %v3817_v11 = vpop.f32.mrf.mxu1  ;;  %v13871_v15 = vpop.f32.mrf.mxu0 }
 0x33a   : > { %17808 = vst [vmem:[#allocation248_spill] sm:$0xff] %v13866_v9  ;;  %17812 = vst [vmem:[#allocation23_spill] sm:$0xff] %v13871_v15  ;;  %v3818_v29 = vadd.f32 %v3817_v11, %v17813_v60  ;;  %v13874_v50 = vpack.c.bf16 %v5487_v54, %v5483_v35  ;;  %v5490_v52 = vmax.f32 %v3816_v27, 0.0  ;;  %v17820_v11 = vld [vmem:[#allocation147_spill] sm:$0xff]  ;;  %v17822_v54 = vld [vmem:[#allocation9_spill] sm:$0xff] }
 0x33b   : > { %v3819_v49 = vpop.f32.mrf.mxu1  ;;  %v13876_v0 = vpop.f32.mrf.mxu0 }
 0x33c   : > { %17814 = vst [vmem:[#allocation249_spill] sm:$0xff] %v13874_v50  ;;  %v3820_v39 = vadd.f32 %v3819_v49, %v17815_v56  ;;  %v5491_v60 = vmax.f32 %v3818_v29, 0.0  ;;  %v17823_v56 = vld [vmem:[#allocation148_spill] sm:$0xff]  ;;  %v17824_v50 = vld [vmem:[#allocation149_spill] sm:$0xff] }
 0x33d   : > { %v3821_v62 = vpop.f32.mrf.mxu1  ;;  %v13879_v26 = vpop.f32.mrf.mxu0 }
 0x33e   : > { %17816 = vst [vmem:[#allocation25_spill] sm:$0xff] %v13879_v26  ;;  %v5494_v59 = vmax.f32 %v3820_v39, 0.0  ;;  %v3822_v9 = vadd.f32 %v3821_v62, %v17817_v48  ;;  %v17825_v62 = vld [vmem:[#allocation223_spill] sm:$0xff] }
 0x33f   : > { %v3825_v34 = vpop.f32.mrf.mxu1  ;;  %v13882_v15 = vpop.f32.mrf.mxu0  ;;  %4450 = vmatmul.mubr.bf16.gmra.mxu1 %v17819_v14  ;;  %4643 = vmatmul.mubr.bf16.gmra.mxu0 %v17820_v11 }
 0x340   : > { %17818 = vst [vmem:[#allocation137_spill] sm:$0xff] %v13882_v15  ;;  %v13886_v4 = vpack.c.bf16 %v5494_v59, %v5490_v52  ;;  %v5495_v35 = vmax.f32 %v3822_v9, 0.0  ;;  %v3826_v49 = vadd.f32 %v3825_v34, %v17822_v54  ;;  %4459 = vmatprep.mubr.bf16.mxu1 %v17823_v56  ;;  %4652 = vmatprep.mubr.bf16.mxu0 %v17824_v50  ;;  %v10160_v50 = vld [vmem:[%s16783_s3 + $0x10] ss:$8 sps:$4 sm:$0xff]   ;;  %v17827_v56 = vld [vmem:[#allocation154_spill] sm:$0xff] }
 0x341   : > { %v3827_v27 = vpop.f32.mrf.mxu1  ;;  %v13891_v39 = vpop.f32.mrf.mxu0 }
 0x342   : > { %17821 = vst [vmem:[#allocation250_spill] sm:$0xff] %v13886_v4  ;;  %v3828_v48 = vadd.f32 %v3827_v27, %v17825_v62  ;;  %v13894_v15 = vpack.c.bf16 %v5495_v35, %v5491_v60  ;;  %v5498_v34 = vmax.f32 %v3826_v49, 0.0  ;;  %v10162_v60 = vld [vmem:[%s16783_s3 + $0x14] ss:$8 sps:$4 sm:$0xff]  }
 0x343   : > { %v3829_v14 = vpop.f32.mrf.mxu1  ;;  %v13896_v26 = vpop.f32.mrf.mxu0  ;;  %6058 = vmatprep.subr.bf16.mxu0 %v10162_v60 }
 0x344   : > { %17826 = vst [vmem:[#allocation91_spill] sm:$0xff] %v13894_v15  ;;  %v3830_v29 = vadd.f32 %v3829_v14, %v13528_v46  ;;  %v17828_v46 = vld [vmem:[#allocation155_spill] sm:$0xff]  ;;  %v5499_v27 = vmax.f32 %v3828_v48, 0.0  ;;  %v17830_v14 = vld [vmem:[#allocation156_spill] sm:$0xff]  ;;  %6059 = vmatpush1.bf16.msra.mxu0 %v10160_v50 }
 0x345   : > { %v3831_v52 = vpop.f32.mrf.mxu1  ;;  %v13899_v9 = vpop.f32.mrf.mxu0 }
 0x346   : > { %v5502_v59 = vmax.f32 %v3830_v29, 0.0  ;;  %v3832_v11 = vadd.f32 %v3831_v52, %v13532_v1  ;;  %v17831_v29 = vld [vmem:[#allocation157_spill] sm:$0xff] }
 0x347   : > { %v3835_v35 = vpop.f32.mrf.mxu1  ;;  %v13908_v54 = vpop.f32.mrf.mxu0  ;;  %4460 = vmatmul.mubr.bf16.gmra.mxu1 %v17827_v56  ;;  %4653 = vmatmul.mubr.bf16.gmra.mxu0 %v17828_v46 }
 0x348   : > { %v13912_v49 = vpack.c.bf16 %v5502_v59, %v5498_v34  ;;  %v5503_v62 = vmax.f32 %v3832_v11, 0.0  ;;  %v3836_v1 = vadd.f32 %v3835_v35, %v13540_v5  ;;  %4469 = vmatprep.mubr.bf16.mxu1 %v17830_v14  ;;  %4662 = vmatprep.mubr.bf16.mxu0 %v17831_v29  ;;  %v17835_v11 = vld [vmem:[#allocation161_spill] sm:$0xff] }
 0x349   : > { %v3837_v52 = vpop.f32.mrf.mxu1  ;;  %v13917_v4 = vpop.f32.mrf.mxu0  ;;  %v1355_v35 = vsub.s32 2, %v17835_v11  ;;  %v1359_v60 = vsub.s32 3, %v17835_v11 }
 0x34a   : > { %17829 = vst [vmem:[#allocation60_spill] sm:$0xff] %v13912_v49  ;;  %v3838_v15 = vadd.f32 %v3837_v52, %v13546_v44  ;;  %v13920_v56 = vpack.c.bf16 %v5503_v62, %v5499_v27  ;;  %v5506_v14 = vmax.f32 %v3836_v1, 0.0  ;;  %v17836_v27 = vld [vmem:[#allocation163_spill] sm:$0xff]  ;;  %v17837_v62 = vld [vmem:[#allocation164_spill] sm:$0xff]  ;;  %v17841_v1 = vld [vmem:[#allocation166_spill] sm:$0xff] }
 0x34b   : > { %v3839_v46 = vpop.f32.mrf.mxu1  ;;  %v13922_v48 = vpop.f32.mrf.mxu0 }
 0x34c   : > { %17832 = vst [vmem:[#allocation142_spill] sm:$0xff] %v13920_v56  ;;  %17833 = vst [vmem:[#allocation253_spill] sm:$0xff] %v13922_v48  ;;  %v3840_v34 = vadd.f32 %v3839_v46, %v13552_v28  ;;  %v5507_v52 = vmax.f32 %v3838_v15, 0.0  ;;  %v17839_v56 = vld [vmem:[#allocation75_spill] sm:$0xff]  ;;  %v17840_v48 = vld [vmem:[#allocation165_spill] sm:$0xff] }
 0x34d   : > { %v3841_v59 = vpop.f32.mrf.mxu1  ;;  %v13925_v5 = vpop.f32.mrf.mxu0 }
 0x34e   : > { %17834 = vst [vmem:[#allocation93_spill] sm:$0xff] %v13925_v5  ;;  %v5510_v29 = vmax.f32 %v3840_v34, 0.0  ;;  %v3842_v49 = vadd.f32 %v3841_v59, %v13556_v33  ;;  %v10259_v59 = vld [vmem:[%s16782_s2] sm:$0xf] }
 0x34f   : > { %v3845_v44 = vpop.f32.mrf.mxu1  ;;  %v13930_v50 = vpop.f32.mrf.mxu0  ;;  %4470 = vmatmul.mubr.bf16.gmra.mxu1 %v17836_v27  ;;  %4663 = vmatmul.mubr.bf16.gmra.mxu0 %v17837_v62  ;;  %v13944_v27 = vrot.slane %v10259_v59, %v1355_v35  ;;  %v17843_v62 = vld [vmem:[#allocation44_spill] sm:$0xff] }
 0x350   : > { %v13934_v28 = vpack.c.bf16 %v5510_v29, %v5506_v14  ;;  %v5511_v46 = vmax.f32 %v3842_v49, 0.0  ;;  %v3846_v5 = vadd.f32 %v3845_v44, %v17839_v56  ;;  %4479 = vmatprep.mubr.bf16.mxu1 %v17840_v48  ;;  %4672 = vmatprep.mubr.bf16.mxu0 %v17841_v1  ;;  %v13949_v49 = vrot.slane %v10259_v59, %v1359_v60  ;;  %v10166_v60 = vld [vmem:[%s16783_s3] ss:$8 sps:$4 sm:$0xff]   ;;  %v17846_v59 = vld [vmem:[#allocation171_spill] sm:$0xff] }
 0x351   : > { %v3847_v33 = vpop.f32.mrf.mxu1  ;;  %v13939_v34 = vpop.f32.mrf.mxu0  ;;  %v3889_v11 = vadd.f32 %v13583_v53, %v13944_v27  ;;  %v17847_v53 = vld [vmem:[#allocation172_spill] sm:$0xff] }
 0x352   : > { %17838 = vst [vmem:[#allocation62_spill] sm:$0xff] %v13934_v28  ;;  %17842 = vst [vmem:[#allocation143_spill] sm:$0xff] %v13939_v34  ;;  %v3848_v15 = vadd.f32 %v3847_v33, %v17843_v62  ;;  %v13947_v14 = vpack.c.bf16 %v5511_v46, %v5507_v52  ;;  %v5514_v28 = vmax.f32 %v3846_v5, 0.0  ;;  %v10168_v52 = vld [vmem:[%s16783_s3 + $0x4] ss:$8 sps:$4 sm:$0xff]  }
 0x353   : > { %v3849_v56 = vpop.f32.mrf.mxu1  ;;  %v13951_v29 = vpop.f32.mrf.mxu0  ;;  %6060 = vmatprep.subr.bf16.mxu0 %v10168_v52  ;;  %v3899_v52 = vadd.f32 %v13603_v8, %v13944_v27 }
 0x354   : > { %17844 = vst [vmem:[#allocation27_spill] sm:$0xff] %v13947_v14  ;;  %v3850_v48 = vadd.f32 %v3849_v56, %v13576_v61  ;;  %v3891_v61 = vadd.f32 %v13592_v12, %v13949_v49  ;;  %v5515_v5 = vmax.f32 %v3848_v15, 0.0  ;;  %6061 = vmatpush1.bf16.msra.mxu0 %v10166_v60 }
 0x355   : > { %v3851_v44 = vpop.f32.mrf.mxu1  ;;  %v13954_v1 = vpop.f32.mrf.mxu0 }
 0x356   : > { %v5518_v35 = vmax.f32 %v3850_v48, 0.0  ;;  %v3852_v34 = vadd.f32 %v3851_v44, %v13580_v42  ;;  %v17849_v48 = vld [vmem:[#allocation173_spill] sm:$0xff]  ;;  %v17850_v44 = vld [vmem:[#allocation174_spill] sm:$0xff] }
 0x357   : > { %v13967_v46 = vpop.f32.mrf.mxu0  ;;  %v4241_v33 = vpop.f32.mrf.mxu1  ;;  %4480 = vmatmul.mubr.bf16.gmra.mxu1 %v17846_v59  ;;  %4673 = vmatmul.mubr.bf16.gmra.mxu0 %v17847_v53 }
 0x358   : > { %17845 = vst [vmem:[#allocation144_spill] sm:$0xff] %v13967_v46  ;;  %v13971_v42 = vpack.c.bf16 %v5518_v35, %v5514_v28  ;;  %v5519_v62 = vmax.f32 %v3852_v34, 0.0  ;;  %v13973_v56 = vadd.f32 %v4241_v33, %v3889_v11  ;;  %4489 = vmatprep.mubr.bf16.mxu1 %v17849_v48  ;;  %4682 = vmatprep.mubr.bf16.mxu0 %v17850_v44  ;;  %v17854_v48 = vld [vmem:[#allocation178_spill] sm:$0xff]  ;;  %v17855_v44 = vld [vmem:[#allocation179_spill] sm:$0xff] }
 0x359   : > { %v13977_v14 = vpop.f32.mrf.mxu0  ;;  %v4243_v12 = vpop.f32.mrf.mxu1  ;;  %v3893_v46 = vadd.f32 %v13597_v3, %v13944_v27  ;;  %v3895_v34 = vadd.f32 %v13600_v23, %v13949_v49  ;;  %v3901_v23 = vadd.f32 %v13612_v20, %v13949_v49  ;;  %v3905_v20 = vadd.f32 %v13620_v17, %v13949_v49 }
 0x35a   : > { %17848 = vst [vmem:[#allocation256_spill] sm:$0xff] %v13971_v42  ;;  %v13981_v59 = vadd.f32 %v4243_v12, %v3891_v61  ;;  %v13983_v15 = vpack.c.bf16 %v5519_v62, %v5515_v5  ;;  %v17852_v5 = vld [vmem:[#allocation176_spill] sm:$0xff]  ;;  %v17853_v62 = vld [vmem:[#allocation177_spill] sm:$0xff]  ;;  %v17862_v42 = vld [vmem:[#allocation183_spill] sm:$0xff] }
 0x35b   : > { %v13985_v28 = vpop.f32.mrf.mxu0  ;;  %v4245_v11 = vpop.f32.mrf.mxu1 }
 0x35c   : > { %17851 = vst [vmem:[#allocation29_spill] sm:$0xff] %v13983_v15  ;;  %v13989_v35 = vadd.f32 %v4245_v11, %v3893_v46  ;;  %v3903_v11 = vadd.f32 %v13617_v38, %v13944_v27  ;;  %v10172_v38 = vld [vmem:[%s16783_s3 + $0xf0] ss:$8 sps:$4 sm:$0xff]  }
 0x35d   : > { %v13991_v33 = vpop.f32.mrf.mxu0  ;;  %v4247_v53 = vpop.f32.mrf.mxu1 }
 0x35e   : > { %v13995_v3 = vadd.f32 %v4247_v53, %v3895_v34 }
 0x35f   : > { %v13997_v61 = vpop.f32.mrf.mxu0  ;;  %v4251_v60 = vpop.f32.mrf.mxu1  ;;  %4490 = vmatmul.mubr.bf16.gmra.mxu1 %v17852_v5  ;;  %4683 = vmatmul.mubr.bf16.gmra.mxu0 %v17853_v62 }
 0x360   : > { %v14003_v46 = vadd.f32 %v4251_v60, %v3899_v52  ;;  %4499 = vmatprep.mubr.bf16.mxu1 %v17854_v48  ;;  %4692 = vmatprep.mubr.bf16.mxu0 %v17855_v44  ;;  %v3909_v48 = vadd.f32 %v13626_v45, %v13944_v27  ;;  %v3911_v45 = vadd.f32 %v13635_v25, %v13949_v49 }
 0x361   : > { %v14007_v12 = vpop.f32.mrf.mxu0  ;;  %v4253_v8 = vpop.f32.mrf.mxu1  ;;  %v3915_v25 = vadd.f32 %v13643_v24, %v13949_v49  ;;  %v3921_v24 = vadd.f32 %v13655_v55, %v13949_v49  ;;  %v3925_v55 = vadd.f32 %v13663_v43, %v13949_v49 }
 0x362   : > { %v14011_v34 = vadd.f32 %v4253_v8, %v3901_v23  ;;  %v10174_v23 = vld [vmem:[%s16783_s3 + $0xf4] ss:$8 sps:$4 sm:$0xff]  }
 0x363   : > { %v14013_v53 = vpop.f32.mrf.mxu0  ;;  %v4255_v5 = vpop.f32.mrf.mxu1  ;;  %6062 = vmatprep.subr.bf16.mxu0 %v10174_v23  ;;  %v3919_v23 = vadd.f32 %v13646_v22, %v13944_v27 }
 0x364   : > { %v14017_v52 = vadd.f32 %v4255_v5, %v3903_v11  ;;  %v17859_v11 = vld [vmem:[#allocation180_spill] sm:$0xff]  ;;  %v17860_v5 = vld [vmem:[#allocation181_spill] sm:$0xff]  ;;  %6063 = vmatpush2.bf16.msra.mxu0 %v10172_v38 }
 0x365   : > { %v14019_v60 = vpop.f32.mrf.mxu0  ;;  %v4257_v62 = vpop.f32.mrf.mxu1  ;;  %v17865_v38 = vld [vmem:[#allocation185_spill] sm:$0xff] }
 0x366   : > { %17856 = vst [vmem:[#allocation95_spill] sm:$0xff] %v14017_v52  ;;  %v14023_v44 = vadd.f32 %v4257_v62, %v3905_v20  ;;  %v17861_v62 = vld [vmem:[#allocation182_spill] sm:$0xff] }
 0x367   : > { %v14031_v8 = vpop.f32.mrf.mxu0  ;;  %v4261_v17 = vpop.f32.mrf.mxu1  ;;  %4500 = vmatmul.mubr.bf16.gmra.mxu1 %v17859_v11  ;;  %4693 = vmatmul.mubr.bf16.gmra.mxu0 %v17860_v5 }
 0x368   : > { %17857 = vst [vmem:[#allocation64_spill] sm:$0xff] %v14023_v44  ;;  %17858 = vst [vmem:[#allocation145_spill] sm:$0xff] %v14031_v8  ;;  %v14037_v20 = vadd.f32 %v4261_v17, %v3909_v48  ;;  %4509 = vmatprep.mubr.bf16.mxu1 %v17861_v62  ;;  %4702 = vmatprep.mubr.bf16.mxu0 %v17862_v42  ;;  %v3913_v8 = vadd.f32 %v13640_v30, %v13944_v27 }
 0x369   : > { %v14041_v15 = vpop.f32.mrf.mxu0  ;;  %v4263_v44 = vpop.f32.mrf.mxu1 }
 0x36a   : > { %v14045_v52 = vadd.f32 %v4263_v44, %v3911_v45  ;;  %v17866_v45 = vld [vmem:[#allocation186_spill] sm:$0xff] }
 0x36b   : > { %v14047_v11 = vpop.f32.mrf.mxu0  ;;  %v4265_v5 = vpop.f32.mrf.mxu1 }
 0x36c   : > { %v14051_v48 = vadd.f32 %v4265_v5, %v3913_v8  ;;  %v17868_v5 = vld [vmem:[#allocation188_spill] sm:$0xff] }
 0x36d   : > { %v14053_v17 = vpop.f32.mrf.mxu0  ;;  %v4267_v42 = vpop.f32.mrf.mxu1 }
 0x36e   : > { %17863 = vst [vmem:[#allocation150_spill] sm:$0xff] %v14051_v48  ;;  %17864 = vst [vmem:[#allocation97_spill] sm:$0xff] %v14053_v17  ;;  %v14057_v62 = vadd.f32 %v4267_v42, %v3915_v25  ;;  %v17869_v48 = vld [vmem:[#allocation189_spill] sm:$0xff]  ;;  %v3923_v25 = vadd.f32 %v13660_v13, %v13944_v27 }
 0x36f   : > { %v14059_v30 = vpop.f32.mrf.mxu0  ;;  %v4271_v44 = vpop.f32.mrf.mxu1  ;;  %4510 = vmatmul.mubr.bf16.gmra.mxu1 %v17865_v38  ;;  %4703 = vmatmul.mubr.bf16.gmra.mxu0 %v17866_v45  ;;  %v10178_v13 = vld [vmem:[%s16783_s3 + $0xe0] ss:$8 sps:$4 sm:$0xff]  }
 0x370   : > { %v14065_v8 = vadd.f32 %v4271_v44, %v3919_v23  ;;  %4519 = vmatprep.mubr.bf16.mxu1 %v17868_v5  ;;  %4712 = vmatprep.mubr.bf16.mxu0 %v17869_v48  ;;  %v3929_v48 = vadd.f32 %v13666_v2, %v13944_v27  ;;  %v3931_v2 = vadd.f32 %v13675_v58, %v13949_v49 }
 0x371   : > { %v14069_v17 = vpop.f32.mrf.mxu0  ;;  %v4273_v22 = vpop.f32.mrf.mxu1  ;;  %v3935_v58 = vadd.f32 %v13683_v32, %v13949_v49 }
 0x372   : > { %17867 = vst [vmem:[#allocation66_spill] sm:$0xff] %v14065_v8  ;;  %v14073_v42 = vadd.f32 %v4273_v22, %v3921_v24  ;;  %v10180_v24 = vld [vmem:[%s16783_s3 + $0xe4] ss:$8 sps:$4 sm:$0xff]  }
 0x373   : > { %v14075_v38 = vpop.f32.mrf.mxu0  ;;  %v4275_v45 = vpop.f32.mrf.mxu1  ;;  %6064 = vmatprep.subr.bf16.mxu0 %v10180_v24  ;;  %v10186_v24 = vld [vmem:[%s16783_s3 + $0xd4] ss:$8 sps:$4 sm:$0xff]  }
 0x374   : > { %17870 = vst [vmem:[#allocation259_spill] sm:$0xff] %v14073_v42  ;;  %v14079_v23 = vadd.f32 %v4275_v45, %v3923_v25  ;;  %v17875_v25 = vld [vmem:[#allocation193_spill] sm:$0xff]  ;;  %v17876_v45 = vld [vmem:[#allocation194_spill] sm:$0xff]  ;;  %6065 = vmatpush2.bf16.msra.mxu0 %v10178_v13  ;;  %v10184_v13 = vld [vmem:[%s16783_s3 + $0xd0] ss:$8 sps:$4 sm:$0xff]  }
 0x375   : > { %v14081_v44 = vpop.f32.mrf.mxu0  ;;  %v4277_v5 = vpop.f32.mrf.mxu1  ;;  %6066 = vmatprep.subr.bf16.mxu0 %v10186_v24  ;;  %v3945_v24 = vadd.f32 %v13703_v63, %v13949_v49 }
 0x376   : > { %17871 = vst [vmem:[#allocation151_spill] sm:$0xff] %v14079_v23  ;;  %17872 = vst [vmem:[#allocation31_spill] sm:$0xff] %v14081_v44  ;;  %v14085_v8 = vadd.f32 %v4277_v5, %v3925_v55  ;;  %v17877_v5 = vld [vmem:[#allocation196_spill] sm:$0xff] }
 0x377   : > { %v14093_v22 = vpop.f32.mrf.mxu0  ;;  %v4281_v43 = vpop.f32.mrf.mxu1  ;;  %4520 = vmatmul.mubr.bf16.gmra.mxu1 %v17875_v25  ;;  %4713 = vmatmul.mubr.bf16.gmra.mxu0 %v17876_v45 }
 0x378   : > { %17873 = vst [vmem:[#allocation152_spill] sm:$0xff] %v14085_v8  ;;  %17874 = vst [vmem:[#allocation262_spill] sm:$0xff] %v14093_v22  ;;  %v14099_v55 = vadd.f32 %v4281_v43, %v3929_v48  ;;  %4529 = vmatprep.mubr.bf16.mxu1 %v17877_v5  ;;  %v17878_v8 = vld [vmem:[#allocation197_spill] sm:$0xff]  ;;  %v3933_v22 = vadd.f32 %v13680_v57, %v13944_v27  ;;  %v3939_v57 = vadd.f32 %v13686_v6, %v13944_v27  ;;  %v17883_v5 = vld [vmem:[#allocation202_spill] sm:$0xff] }
 0x379   : > { %4722 = vmatprep.mubr.bf16.mxu0 %v17878_v8  ;;  %v14103_v23 = vpop.f32.mrf.mxu0  ;;  %v4283_v44 = vpop.f32.mrf.mxu1  ;;  %v17886_v6 = vld [vmem:[#allocation205_spill] sm:$0xff]  ;;  %6067 = vmatpush2.bf16.msra.mxu0 %v10184_v13  ;;  %v3949_v13 = vadd.f32 %v13706_v40, %v13944_v27  ;;  %v17893_v40 = vld [vmem:[#allocation212_spill] sm:$0xff] }
 0x37a   : > { %v14107_v42 = vadd.f32 %v4283_v44, %v3931_v2 }
 0x37b   : > { %v14109_v25 = vpop.f32.mrf.mxu0  ;;  %v4285_v45 = vpop.f32.mrf.mxu1 }
 0x37c   : > { %v14113_v48 = vadd.f32 %v4285_v45, %v3933_v22  ;;  %v17882_v22 = vld [vmem:[#allocation201_spill] sm:$0xff]  ;;  %v3941_v45 = vadd.f32 %v13695_v16, %v13949_v49 }
 0x37d   : > { %v14115_v43 = vpop.f32.mrf.mxu0  ;;  %v4287_v8 = vpop.f32.mrf.mxu1  ;;  %v10187_v16 = vld [vmem:[%s16783_s3 + $0xc0] ss:$8 sps:$4 sm:$0xff]  }
 0x37e   : > { %17879 = vst [vmem:[#allocation33_spill] sm:$0xff] %v14113_v48  ;;  %17880 = vst [vmem:[#allocation99_spill] sm:$0xff] %v14115_v43  ;;  %v14122_v44 = vadd.f32 %v4287_v8, %v3935_v58  ;;  %v17885_v43 = vld [vmem:[#allocation204_spill] sm:$0xff] }
 0x37f   : > { %v14127_v2 = vpop.f32.mrf.mxu0  ;;  %v4291_v32 = vpop.f32.mrf.mxu1  ;;  %4530 = vmatmul.mubr.bf16.gmra.mxu1 %v17882_v22  ;;  %4723 = vmatmul.mubr.bf16.gmra.mxu0 %v17883_v5  ;;  %v3943_v22 = vadd.f32 %v13700_v37, %v13944_v27  ;;  %v10192_v37 = vld [vmem:[%s16783_s3 + $0xb4] ss:$8 sps:$4 sm:$0xff]  }
 0x380   : > { %17881 = vst [vmem:[#allocation68_spill] sm:$0xff] %v14122_v44  ;;  %v14133_v48 = vadd.f32 %v4291_v32, %v3939_v57  ;;  %4539 = vmatprep.mubr.bf16.mxu1 %v17885_v43  ;;  %4732 = vmatprep.mubr.bf16.mxu0 %v17886_v6  ;;  %v10189_v44 = vld [vmem:[%s16783_s3 + $0xc4] ss:$8 sps:$4 sm:$0xff]  }
 0x381   : > { %v14137_v58 = vpop.f32.mrf.mxu0  ;;  %v4293_v8 = vpop.f32.mrf.mxu1  ;;  %6068 = vmatprep.subr.bf16.mxu0 %v10189_v44  ;;  %v10190_v44 = vld [vmem:[%s16783_s3 + $0xb0] ss:$8 sps:$4 sm:$0xff]  }
 0x382   : > { %17884 = vst [vmem:[#allocation153_spill] sm:$0xff] %v14133_v48  ;;  %v14144_v5 = vadd.f32 %v4293_v8, %v3941_v45  ;;  %6069 = vmatpush2.bf16.msra.mxu0 %v10187_v16 }
 0x383   : > { %v14149_v43 = vpop.f32.mrf.mxu0  ;;  %v4295_v57 = vpop.f32.mrf.mxu1  ;;  %6070 = vmatprep.subr.bf16.mxu0 %v10192_v37  ;;  %v3955_v37 = vadd.f32 %v13723_v36, %v13949_v49 }
 0x384   : > { %v14153_v32 = vadd.f32 %v4295_v57, %v3943_v22  ;;  %v17890_v22 = vld [vmem:[#allocation209_spill] sm:$0xff]  ;;  %v17891_v57 = vld [vmem:[#allocation210_spill] sm:$0xff] }
 0x385   : > { %v14155_v6 = vpop.f32.mrf.mxu0  ;;  %v4297_v48 = vpop.f32.mrf.mxu1 }
 0x386   : > { %17887 = vst [vmem:[#allocation263_spill] sm:$0xff] %v14153_v32  ;;  %17888 = vst [vmem:[#allocation101_spill] sm:$0xff] %v14155_v6  ;;  %v14162_v45 = vadd.f32 %v4297_v48, %v3945_v24  ;;  %v3951_v32 = vadd.f32 %v13715_v31, %v13949_v49  ;;  %v17894_v48 = vld [vmem:[#allocation213_spill] sm:$0xff]  ;;  %6071 = vmatpush2.bf16.msra.mxu0 %v10190_v44 }
 0x387   : > { %v14167_v63 = vpop.f32.mrf.mxu0  ;;  %v4301_v8 = vpop.f32.mrf.mxu1  ;;  %4540 = vmatmul.mubr.bf16.gmra.mxu1 %v17890_v22  ;;  %4733 = vmatmul.mubr.bf16.gmra.mxu0 %v17891_v57  ;;  %v3953_v22 = vadd.f32 %v13720_v51, %v13944_v27  ;;  %v10196_v31 = vld [vmem:[%s16783_s3 + $0xa0] ss:$8 sps:$4 sm:$0xff]   ;;  %v10201_v51 = vld [vmem:[%s16783_s3 + $0x94] ss:$8 sps:$4 sm:$0xff]  }
 0x388   : > { %17889 = vst [vmem:[#allocation70_spill] sm:$0xff] %v14162_v45  ;;  %v14173_v6 = vadd.f32 %v4301_v8, %v3949_v13  ;;  %4549 = vmatprep.mubr.bf16.mxu1 %v17893_v40  ;;  %4742 = vmatprep.mubr.bf16.mxu0 %v17894_v48  ;;  %v10198_v45 = vld [vmem:[%s16783_s3 + $0xa4] ss:$8 sps:$4 sm:$0xff]  }
 0x389   : > { %v14177_v16 = vpop.f32.mrf.mxu0  ;;  %v4303_v24 = vpop.f32.mrf.mxu1  ;;  %6072 = vmatprep.subr.bf16.mxu0 %v10198_v45  ;;  %v10199_v45 = vld [vmem:[%s16783_s3 + $0x90] ss:$8 sps:$4 sm:$0xff]  }
 0x38a   : > { %17892 = vst [vmem:[#allocation266_spill] sm:$0xff] %v14173_v6  ;;  %v14184_v57 = vadd.f32 %v4303_v24, %v3951_v32  ;;  %v3959_v32 = vadd.f32 %v13726_v18, %v13944_v27  ;;  %6073 = vmatpush2.bf16.msra.mxu0 %v10196_v31  ;;  %v17901_v18 = vld [vmem:[#allocation220_spill] sm:$0xff] }
 0x38b   : > { %v14189_v13 = vpop.f32.mrf.mxu0  ;;  %v4305_v8 = vpop.f32.mrf.mxu1  ;;  %6074 = vmatprep.subr.bf16.mxu0 %v10201_v51  ;;  %v3965_v51 = vadd.f32 %v13743_v41, %v13949_v49 }
 0x38c   : > { %v14193_v40 = vadd.f32 %v4305_v8, %v3953_v22  ;;  %v17898_v22 = vld [vmem:[#allocation217_spill] sm:$0xff]  ;;  %v17899_v8 = vld [vmem:[#allocation218_spill] sm:$0xff] }
 0x38d   : > { %v14195_v48 = vpop.f32.mrf.mxu0  ;;  %v4307_v6 = vpop.f32.mrf.mxu1 }
 0x38e   : > { %17895 = vst [vmem:[#allocation159_spill] sm:$0xff] %v14193_v40  ;;  %17896 = vst [vmem:[#allocation103_spill] sm:$0xff] %v14195_v48  ;;  %v14202_v44 = vadd.f32 %v4307_v6, %v3955_v37  ;;  %v3961_v40 = vadd.f32 %v13735_v21, %v13949_v49  ;;  %v17902_v6 = vmov 0   ;;  %6075 = vmatpush2.bf16.msra.mxu0 %v10199_v45  ;;  %v10202_v21 = vld [vmem:[%s16783_s3 + $0x80] ss:$8 sps:$4 sm:$0xff]  }
 0x38f   : > { %v14207_v36 = vpop.f32.mrf.mxu0  ;;  %v4311_v24 = vpop.f32.mrf.mxu1  ;;  %4550 = vmatmul.mubr.bf16.gmra.mxu1 %v17898_v22  ;;  %4743 = vmatmul.mubr.bf16.gmra.mxu0 %v17899_v8  ;;  %v3963_v22 = vadd.f32 %v13740_v47, %v13944_v27  ;;  %v10145_v47 = vld [vmem:[%s16783_s3 + $0x170] ss:$8 sps:$4 sm:$0xff]  }
 0x390   : > { %17897 = vst [vmem:[#allocation72_spill] sm:$0xff] %v14202_v44  ;;  %v14213_v48 = vadd.f32 %v4311_v24, %v3959_v32  ;;  %4752 = vmatprep.mubr.bf16.mxu0 %v17901_v18  ;;  %4945 = vmatprep.mubr.bf16.mxu1 %v17902_v6  ;;  %v10204_v44 = vld [vmem:[%s16783_s3 + $0x84] ss:$8 sps:$4 sm:$0xff]  }
 0x391   : > { %v14217_v31 = vpop.f32.mrf.mxu0  ;;  %v4313_v37 = vpop.f32.mrf.mxu1  ;;  %6076 = vmatprep.subr.bf16.mxu0 %v10204_v44 }
 0x392   : > { %17900 = vst [vmem:[#allocation268_spill] sm:$0xff] %v14213_v48  ;;  %v14224_v8 = vadd.f32 %v4313_v37, %v3961_v40  ;;  %v10153_v37 = vld [vmem:[%s16783_s3 + $0x164] ss:$8 sps:$4 sm:$0xff]   ;;  %6077 = vmatpush2.bf16.msra.mxu0 %v10202_v21  ;;  %v17911_v48 = vld [vmem:[#allocation227_spill] sm:$0xff] }
 0x393   : > { %v14229_v32 = vpop.f32.mrf.mxu0  ;;  %v4315_v24 = vpop.f32.mrf.mxu1  ;;  %7079 = vmatprep.subr.bf16.mxu0 %v17902_v6 }
 0x394   : > { %17903 = vst [vmem:[#allocation35_spill] sm:$0xff] %v14224_v8  ;;  %17904 = vst [vmem:[#allocation10_spill] sm:$0xff] %v14229_v32  ;;  %v14233_v18 = vadd.f32 %v4315_v24, %v3963_v22  ;;  %v3969_v8 = vadd.f32 %v13752_v19, %v13944_v27  ;;  %v17908_v24 = vld [vmem:[#allocation224_spill] sm:$0xff]  ;;  %v10151_v19 = vld [vmem:[%s16783_s3 + $0x160] ss:$8 sps:$4 sm:$0xff]  }
 0x395   : > { %v14238_v40 = vpop.f32.mrf.mxu0  ;;  %v4317_v45 = vpop.f32.mrf.mxu1 }
 0x396   : > { %17905 = vst [vmem:[#allocation74_spill] sm:$0xff] %v14233_v18  ;;  %17906 = vst [vmem:[#allocation160_spill] sm:$0xff] %v14238_v40  ;;  %v14245_v44 = vadd.f32 %v4317_v45, %v3965_v51  ;;  %v17909_v18 = vld [vmem:[#allocation225_spill] sm:$0xff]  ;;  %v3971_v40 = vadd.f32 %v13764_v7, %v13949_v49  ;;  %v17913_v7 = vld [vmem:[#allocation126_spill] sm:$0xff] }
 0x397   : > { %v14247_v41 = vpop.f32.mrf.mxu0  ;;  %v4321_v22 = vpop.f32.mrf.mxu1  ;;  %4753 = vmatmul.mubr.bf16.gmra.mxu0 %v17908_v24  ;;  %9231 = vmatmul.mubr.msk.bf16.vlgmr.msra.gmra.mxu1 %vm2345_vm0, %v17909_v18  ;;  %v10159_v18 = vld [vmem:[%s16783_s3 + $0x154] ss:$8 sps:$4 sm:$0xff]  }
 0x398   : > { %17907 = vst [vmem:[#allocation37_spill] sm:$0xff] %v14245_v44  ;;  %v14254_v32 = vadd.f32 %v4321_v22, %v3969_v8  ;;  %6400 = vmatpush1.bf16.msra.mxu1 %v10145_v47  ;;  %4762 = vmatprep.mubr.bf16.mxu0 %v17911_v48  ;;  %v3973_v8 = vadd.f32 %v17913_v7, %v13944_v27  ;;  %v17916_v22 = vld [vmem:[#allocation239_spill] sm:$0xff] }
 0x399   : > { %v14260_v21 = vpop.f32.mrf.mxu0  ;;  %v4323_v51 = vpop.f32.mrf.mxu1  ;;  %4955 = vmatprep.mubr.bf16.mxu1 %v17902_v6  ;;  %6401 = vmatprep.subr.bf16.mxu1 %v10153_v37  ;;  %v3975_v24 = vadd.f32 %v17916_v22, %v13949_v49  ;;  %v10157_v7 = vld [vmem:[%s16783_s3 + $0x150] ss:$8 sps:$4 sm:$0xff]   ;;  %v10165_v22 = vld [vmem:[%s16783_s3 + $0x144] ss:$8 sps:$4 sm:$0xff]  }
 0x39a   : > { %17910 = vst [vmem:[#allocation162_spill] sm:$0xff] %v14254_v32  ;;  %17912 = vst [vmem:[#allocation167_spill] sm:$0xff] %v14260_v21  ;;  %v14268_v47 = vadd.f32 %v4323_v51, %v3971_v40  ;;  %v17919_v40 = vld [vmem:[#allocation127_spill] sm:$0xff] }
 0x39b   : > { %v14271_v48 = vpop.f32.mrf.mxu0  ;;  %v4325_v45 = vpop.f32.mrf.mxu1  ;;  %v3979_v51 = vadd.f32 %v17919_v40, %v13944_v27  ;;  %v17926_v40 = vld [vmem:[#allocation233_spill] sm:$0xff] }
 0x39c   : > { %17914 = vst [vmem:[#allocation12_spill] sm:$0xff] %v14268_v47  ;;  %17915 = vst [vmem:[#allocation76_spill] sm:$0xff] %v14271_v48  ;;  %v14275_v32 = vadd.f32 %v4325_v45, %v3973_v8  ;;  %6402 = vmatpush1.bf16.msra.mxu1 %v10151_v19  ;;  %v17922_v45 = vld [vmem:[#allocation230_spill] sm:$0xff] }
 0x39d   : > { %v14277_v37 = vpop.f32.mrf.mxu0  ;;  %v4327_v21 = vpop.f32.mrf.mxu1  ;;  %6403 = vmatprep.subr.bf16.mxu1 %v10159_v18 }
 0x39e   : > { %17917 = vst [vmem:[#allocation272_spill] sm:$0xff] %v14275_v32  ;;  %17918 = vst [vmem:[#allocation14_spill] sm:$0xff] %v14277_v37  ;;  %v14284_v47 = vadd.f32 %v4327_v21, %v3975_v24  ;;  %v17923_v32 = vld [vmem:[#allocation231_spill] sm:$0xff]  ;;  %v17924_v37 = vld [vmem:[#allocation52_spill] sm:$0xff] }
 0x39f   : > { %v14289_v8 = vpop.f32.mrf.mxu0  ;;  %v4331_v19 = vpop.f32.mrf.mxu1  ;;  %4763 = vmatmul.mubr.bf16.gmra.mxu0 %v17922_v45  ;;  %9232 = vmatmul.mubr.msk.bf16.gmra.mxu1 %vm2345_vm0, %v17923_v32  ;;  %v3981_v18 = vadd.f32 %v17924_v37, %v13949_v49  ;;  %v10163_v45 = vld [vmem:[%s16783_s3 + $0x140] ss:$8 sps:$4 sm:$0xff]   ;;  %v10171_v37 = vld [vmem:[%s16783_s3 + $0x134] ss:$8 sps:$4 sm:$0xff]  }
 0x3a0   : > { %17920 = vst [vmem:[#allocation78_spill] sm:$0xff] %v14284_v47  ;;  %17921 = vst [vmem:[#allocation16_spill] sm:$0xff] %v14289_v8  ;;  %v14296_v48 = vadd.f32 %v4331_v19, %v3979_v51  ;;  %4772 = vmatprep.mubr.bf16.mxu0 %v17926_v40  ;;  %4965 = vmatprep.mubr.bf16.mxu1 %v17902_v6  ;;  %v17928_v47 = vld [vmem:[#allocation19_spill] sm:$0xff]  ;;  %v17931_v40 = vld [vmem:[#allocation85_spill] sm:$0xff] }
 0x3a1   : > { %v14300_v21 = vpop.f32.mrf.mxu0  ;;  %v4333_v24 = vpop.f32.mrf.mxu1  ;;  %6404 = vmatpush1.bf16.msra.mxu1 %v10157_v7  ;;  %v3983_v32 = vadd.f32 %v17928_v47, %v13944_v27  ;;  %v3985_v7 = vadd.f32 %v17931_v40, %v13949_v49  ;;  %v10169_v47 = vld [vmem:[%s16783_s3 + $0x130] ss:$8 sps:$4 sm:$0xff]   ;;  %v10177_v40 = vld [vmem:[%s16783_s3 + $0x124] ss:$8 sps:$4 sm:$0xff]  }
 0x3a2   : > { %17925 = vst [vmem:[#allocation80_spill] sm:$0xff] %v14296_v48  ;;  %17927 = vst [vmem:[#allocation18_spill] sm:$0xff] %v14300_v21  ;;  %v14307_v8 = vadd.f32 %v4333_v24, %v3981_v18  ;;  %6405 = vmatprep.subr.bf16.mxu1 %v10165_v22  ;;  %v17934_v22 = vld [vmem:[#allocation54_spill] sm:$0xff] }
 0x3a3   : > { %v14312_v51 = vpop.f32.mrf.mxu0  ;;  %v4335_v19 = vpop.f32.mrf.mxu1  ;;  %v3989_v18 = vadd.f32 %v17934_v22, %v13944_v27  ;;  %v3993_v22 = vadd.f32 %v13830_v10, %v13944_v27  ;;  %v10181_v10 = vld [vmem:[%s16783_s3 + $0x110] ss:$8 sps:$4 sm:$0xff]  }
 0x3a4   : > { %17929 = vst [vmem:[#allocation82_spill] sm:$0xff] %v14307_v8  ;;  %17930 = vst [vmem:[#allocation20_spill] sm:$0xff] %v14312_v51  ;;  %v14316_v48 = vadd.f32 %v4335_v19, %v3983_v32 }
 0x3a5   : > { %v14318_v21 = vpop.f32.mrf.mxu0  ;;  %v4337_v44 = vpop.f32.mrf.mxu1  ;;  %6406 = vmatpush1.bf16.msra.mxu1 %v10163_v45  ;;  %v17937_v45 = vld [vmem:[#allocation238_spill] sm:$0xff] }
 0x3a6   : > { %17932 = vst [vmem:[#allocation84_spill] sm:$0xff] %v14316_v48  ;;  %17933 = vst [vmem:[#allocation22_spill] sm:$0xff] %v14318_v21  ;;  %v14325_v24 = vadd.f32 %v4337_v44, %v3985_v7  ;;  %6407 = vmatprep.subr.bf16.mxu1 %v10171_v37  ;;  %v17936_v48 = vld [vmem:[#allocation237_spill] sm:$0xff]  ;;  %v17940_v44 = vld [vmem:[#allocation240_spill] sm:$0xff] }
 0x3a7   : > { %v14330_v32 = vpop.f32.mrf.mxu0  ;;  %v4341_v19 = vpop.f32.mrf.mxu1  ;;  %4773 = vmatmul.mubr.bf16.gmra.mxu0 %v17936_v48  ;;  %9233 = vmatmul.mubr.msk.bf16.gmra.mxu1 %vm2345_vm0, %v17937_v45  ;;  %v17938_v21 = vld [vmem:[#allocation21_spill] sm:$0xff] }
 0x3a8   : > { %17935 = vst [vmem:[#allocation86_spill] sm:$0xff] %v14325_v24  ;;  %v3991_v8 = vadd.f32 %v17938_v21, %v13949_v49  ;;  %v14337_v51 = vadd.f32 %v4341_v19, %v3989_v18  ;;  %4782 = vmatprep.mubr.bf16.mxu0 %v17940_v44  ;;  %4975 = vmatprep.mubr.bf16.mxu1 %v17902_v6  ;;  %v10175_v48 = vld [vmem:[%s16783_s3 + $0x120] ss:$8 sps:$4 sm:$0xff]   ;;  %v10183_v21 = vld [vmem:[%s16783_s3 + $0x114] ss:$8 sps:$4 sm:$0xff]  }
 0x3a9   : > { %v14341_v37 = vpop.f32.mrf.mxu0  ;;  %v4343_v7 = vpop.f32.mrf.mxu1  ;;  %6408 = vmatpush1.bf16.msra.mxu1 %v10169_v47  ;;  %v17944_v44 = vld [vmem:[#allocation243_spill] sm:$0xff] }
 0x3aa   : > { %17939 = vst [vmem:[#allocation24_spill] sm:$0xff] %v14337_v51  ;;  %17941 = vst [vmem:[#allocation88_spill] sm:$0xff] %v14341_v37  ;;  %v14348_v45 = vadd.f32 %v4343_v7, %v3991_v8  ;;  %6409 = vmatprep.subr.bf16.mxu1 %v10177_v40  ;;  %v3995_v47 = vadd.f32 %v17944_v44, %v13949_v49  ;;  %v17947_v8 = vld [vmem:[#allocation134_spill] sm:$0xff] }
 0x3ab   : > { %v14353_v18 = vpop.f32.mrf.mxu0  ;;  %v4345_v19 = vpop.f32.mrf.mxu1  ;;  %v3999_v40 = vadd.f32 %v17947_v8, %v13944_v27  ;;  %v10195_v44 = vld [vmem:[%s16783_s3 + $0x104] ss:$8 sps:$4 sm:$0xff]   ;;  %v17956_v8 = vld [vmem:[#allocation135_spill] sm:$0xff] }
 0x3ac   : > { %17942 = vst [vmem:[#allocation26_spill] sm:$0xff] %v14348_v45  ;;  %17943 = vst [vmem:[#allocation90_spill] sm:$0xff] %v14353_v18  ;;  %v14357_v51 = vadd.f32 %v4345_v19, %v3993_v22 }
 0x3ad   : > { %v14359_v37 = vpop.f32.mrf.mxu0  ;;  %v4347_v24 = vpop.f32.mrf.mxu1  ;;  %6410 = vmatpush1.bf16.msra.mxu1 %v10175_v48  ;;  %v17951_v48 = vld [vmem:[#allocation245_spill] sm:$0xff] }
 0x3ae   : > { %17945 = vst [vmem:[#allocation28_spill] sm:$0xff] %v14357_v51  ;;  %17946 = vst [vmem:[#allocation92_spill] sm:$0xff] %v14359_v37  ;;  %v14366_v7 = vadd.f32 %v4347_v24, %v3995_v47  ;;  %6411 = vmatprep.subr.bf16.mxu1 %v10183_v21  ;;  %v17950_v51 = vld [vmem:[#allocation244_spill] sm:$0xff]  ;;  %v17954_v24 = vld [vmem:[#allocation247_spill] sm:$0xff] }
 0x3af   : > { %v14371_v22 = vpop.f32.mrf.mxu0  ;;  %v4351_v19 = vpop.f32.mrf.mxu1  ;;  %4783 = vmatmul.mubr.bf16.gmra.mxu0 %v17950_v51  ;;  %9234 = vmatmul.mubr.msk.bf16.gmra.mxu1 %vm2345_vm0, %v17951_v48  ;;  %v17952_v37 = vld [vmem:[#allocation56_spill] sm:$0xff]  ;;  %v10193_v51 = vld [vmem:[%s16783_s3 + $0x100] ss:$8 sps:$4 sm:$0xff]   ;;  %v4003_v48 = vadd.f32 %v17956_v8, %v13944_v27 }
 0x3b0   : > { %17948 = vst [vmem:[#allocation30_spill] sm:$0xff] %v14366_v7  ;;  %17949 = vst [vmem:[#allocation94_spill] sm:$0xff] %v14371_v22  ;;  %v4001_v45 = vadd.f32 %v17952_v37, %v13949_v49  ;;  %v14378_v18 = vadd.f32 %v4351_v19, %v3999_v40  ;;  %4792 = vmatprep.mubr.bf16.mxu0 %v17954_v24  ;;  %4985 = vmatprep.mubr.bf16.mxu1 %v17902_v6  ;;  %v10207_v37 = vld [vmem:[%s16783_s3 + $0x1f4] ss:$8 sps:$4 sm:$0xff]   ;;  %v17959_v24 = vld [vmem:[#allocation89_spill] sm:$0xff] }
 0x3b1   : > { %v14382_v21 = vpop.f32.mrf.mxu0  ;;  %v4353_v47 = vpop.f32.mrf.mxu1  ;;  %6412 = vmatpush1.bf16.msra.mxu1 %v10181_v10  ;;  %v4005_v10 = vadd.f32 %v17959_v24, %v13949_v49  ;;  %v10210_v24 = vld [vmem:[%s16783_s3 + $0x1e4] ss:$8 sps:$4 sm:$0xff]  }
 0x3b2   : > { %17953 = vst [vmem:[#allocation32_spill] sm:$0xff] %v14378_v18  ;;  %17955 = vst [vmem:[#allocation96_spill] sm:$0xff] %v14382_v21  ;;  %v14389_v7 = vadd.f32 %v4353_v47, %v4001_v45  ;;  %6413 = vmatprep.subr.bf16.mxu1 %v10195_v44  ;;  %v10205_v45 = vld [vmem:[%s16783_s3 + $0x1f0] ss:$8 sps:$4 sm:$0xff]   ;;  %v17962_v44 = vld [vmem:[#allocation58_spill] sm:$0xff] }
 0x3b3   : > { %v14394_v40 = vpop.f32.mrf.mxu0  ;;  %v4355_v19 = vpop.f32.mrf.mxu1  ;;  %v4009_v47 = vadd.f32 %v17962_v44, %v13944_v27  ;;  %v4013_v44 = vadd.f32 %v13876_v0, %v13944_v27  ;;  %v10211_v0 = vld [vmem:[%s16783_s3 + $0x1d0] ss:$8 sps:$4 sm:$0xff]  }
 0x3b4   : > { %17957 = vst [vmem:[#allocation34_spill] sm:$0xff] %v14389_v7  ;;  %17958 = vst [vmem:[#allocation98_spill] sm:$0xff] %v14394_v40  ;;  %v14398_v18 = vadd.f32 %v4355_v19, %v4003_v48 }
 0x3b5   : > { %v14400_v21 = vpop.f32.mrf.mxu0  ;;  %v4357_v22 = vpop.f32.mrf.mxu1  ;;  %6414 = vmatpush1.bf16.msra.mxu1 %v10193_v51  ;;  %v17965_v51 = vld [vmem:[#allocation252_spill] sm:$0xff] }
 0x3b6   : > { %17960 = vst [vmem:[#allocation36_spill] sm:$0xff] %v14398_v18  ;;  %17961 = vst [vmem:[#allocation100_spill] sm:$0xff] %v14400_v21  ;;  %v14407_v8 = vadd.f32 %v4357_v22, %v4005_v10  ;;  %6415 = vmatprep.subr.bf16.mxu1 %v10207_v37  ;;  %v17964_v18 = vld [vmem:[#allocation251_spill] sm:$0xff]  ;;  %v17968_v22 = vld [vmem:[#allocation254_spill] sm:$0xff] }
 0x3b7   : > { %v14412_v48 = vpop.f32.mrf.mxu0  ;;  %v4361_v19 = vpop.f32.mrf.mxu1  ;;  %4793 = vmatmul.mubr.bf16.gmra.mxu0 %v17964_v18  ;;  %9235 = vmatmul.mubr.msk.bf16.gmra.mxu1 %vm2345_vm0, %v17965_v51  ;;  %v17966_v21 = vld [vmem:[#allocation23_spill] sm:$0xff]  ;;  %v10208_v18 = vld [vmem:[%s16783_s3 + $0x1e0] ss:$8 sps:$4 sm:$0xff]  }
 0x3b8   : > { %17963 = vst [vmem:[#allocation38_spill] sm:$0xff] %v14407_v8  ;;  %v4011_v7 = vadd.f32 %v17966_v21, %v13949_v49  ;;  %v14419_v40 = vadd.f32 %v4361_v19, %v4009_v47  ;;  %4802 = vmatprep.mubr.bf16.mxu0 %v17968_v22  ;;  %4995 = vmatprep.mubr.bf16.mxu1 %v17902_v6  ;;  %v10213_v21 = vld [vmem:[%s16783_s3 + $0x1d4] ss:$8 sps:$4 sm:$0xff]   ;;  %v17972_v22 = vld [vmem:[#allocation25_spill] sm:$0xff] }
 0x3b9   : > { %v14423_v37 = vpop.f32.mrf.mxu0  ;;  %v4363_v10 = vpop.f32.mrf.mxu1  ;;  %6416 = vmatpush2.bf16.msra.mxu1 %v10205_v45  ;;  %v4015_v45 = vadd.f32 %v17972_v22, %v13949_v49  ;;  %v17975_v22 = vld [vmem:[#allocation257_spill] sm:$0xff] }
 0x3ba   : > { %17967 = vst [vmem:[#allocation102_spill] sm:$0xff] %v14419_v40  ;;  %17969 = vst [vmem:[#allocation40_spill] sm:$0xff] %v14423_v37  ;;  %v14430_v51 = vadd.f32 %v4363_v10, %v4011_v7  ;;  %6417 = vmatprep.subr.bf16.mxu1 %v10210_v24  ;;  %v17974_v7 = vld [vmem:[#allocation137_spill] sm:$0xff] }
 0x3bb   : > { %v14435_v47 = vpop.f32.mrf.mxu0  ;;  %v4365_v19 = vpop.f32.mrf.mxu1  ;;  %v4019_v24 = vadd.f32 %v17974_v7, %v13944_v27 }
 0x3bc   : > { %17970 = vst [vmem:[#allocation104_spill] sm:$0xff] %v14430_v51  ;;  %17971 = vst [vmem:[#allocation105_spill] sm:$0xff] %v14435_v47  ;;  %v14439_v40 = vadd.f32 %v4365_v19, %v4013_v44  ;;  %v17976_v44 = vld [vmem:[#allocation258_spill] sm:$0xff] }
 0x3bd   : > { %v14441_v37 = vpop.f32.mrf.mxu0  ;;  %v4367_v8 = vpop.f32.mrf.mxu1  ;;  %6418 = vmatpush2.bf16.msra.mxu1 %v10208_v18  ;;  %v4021_v18 = vadd.f32 %v13891_v39, %v13949_v49  ;;  %v4025_v39 = vadd.f32 %v13899_v9, %v13949_v49  ;;  %v4031_v9 = vadd.f32 %v13917_v4, %v13949_v49 }
 0x3be   : > { %17973 = vst [vmem:[#allocation106_spill] sm:$0xff] %v14439_v40  ;;  %v14448_v10 = vadd.f32 %v4367_v8, %v4015_v45  ;;  %6419 = vmatprep.subr.bf16.mxu1 %v10213_v21  ;;  %v17978_v40 = vld [vmem:[#allocation260_spill] sm:$0xff]  ;;  %v4023_v45 = vadd.f32 %v13896_v26, %v13944_v27 }
 0x3bf   : > { %v14450_v51 = vpop.f32.mrf.mxu0  ;;  %v4371_v47 = vpop.f32.mrf.mxu1  ;;  %4803 = vmatmul.mubr.bf16.gmra.mxu0 %v17975_v22  ;;  %9236 = vmatmul.mubr.msk.bf16.gmra.mxu1 %vm2345_vm0, %v17976_v44 }
 0x3c0   : > { %v14457_v19 = vadd.f32 %v4371_v47, %v4019_v24  ;;  %4812 = vmatprep.mubr.bf16.mxu0 %v17978_v40  ;;  %5005 = vmatprep.mubr.bf16.mxu1 %v17902_v6 }
 0x3c1   : > { %v14461_v8 = vpop.f32.mrf.mxu0  ;;  %v4373_v21 = vpop.f32.mrf.mxu1  ;;  %6420 = vmatpush2.bf16.msra.mxu1 %v10211_v0 }
 0x3c2   : > { %17977 = vst [vmem:[#allocation107_spill] sm:$0xff] %v14457_v19  ;;  %17979 = vst [vmem:[#allocation108_spill] sm:$0xff] %v14461_v8  ;;  %v14465_v7 = vadd.f32 %v4373_v21, %v4021_v18  ;;  %v4029_v19 = vadd.f32 %v13908_v54, %v13944_v27  ;;  %v17985_v18 = vld [vmem:[#allocation264_spill] sm:$0xff]  ;;  %v17986_v21 = vld [vmem:[#allocation265_spill] sm:$0xff] }
 0x3c3   : > { %v14467_v22 = vpop.f32.mrf.mxu0  ;;  %v4375_v44 = vpop.f32.mrf.mxu1  ;;  %v10214_v54 = vld [vmem:[%s16783_s3 + $0x1c0] ss:$8 sps:$4 sm:$0xff]  }
 0x3c4   : > { %17980 = vst [vmem:[#allocation109_spill] sm:$0xff] %v14465_v7  ;;  %v14471_v47 = vadd.f32 %v4375_v44, %v4023_v45  ;;  %v17988_v44 = vld [vmem:[#allocation267_spill] sm:$0xff] }
 0x3c5   : > { %v14473_v40 = vpop.f32.mrf.mxu0  ;;  %v4377_v24 = vpop.f32.mrf.mxu1 }
 0x3c6   : > { %17981 = vst [vmem:[#allocation110_spill] sm:$0xff] %v14471_v47  ;;  %17982 = vst [vmem:[#allocation293_spill] sm:$0xff] %v14473_v40  ;;  %v14477_v0 = vadd.f32 %v4377_v24, %v4025_v39  ;;  %v10216_v39 = vld [vmem:[%s16783_s3 + $0x1c4] ss:$8 sps:$4 sm:$0xff]  }
 0x3c7   : > { %v14479_v8 = vpop.f32.mrf.mxu0  ;;  %v4381_v26 = vpop.f32.mrf.mxu1  ;;  %4813 = vmatmul.mubr.bf16.gmra.mxu0 %v17985_v18  ;;  %9237 = vmatmul.mubr.msk.bf16.gmra.mxu1 %vm2345_vm0, %v17986_v21  ;;  %v17990_v21 = vld [vmem:[#allocation253_spill] sm:$0xff] }
 0x3c8   : > { %17983 = vst [vmem:[#allocation114_spill] sm:$0xff] %v14477_v0  ;;  %17984 = vst [vmem:[#allocation115_spill] sm:$0xff] %v14479_v8  ;;  %v14486_v45 = vadd.f32 %v4381_v26, %v4029_v19  ;;  %4822 = vmatprep.mubr.bf16.mxu0 %v17988_v44  ;;  %5015 = vmatprep.mubr.bf16.mxu1 %v17902_v6  ;;  %v4033_v4 = vadd.f32 %v17990_v21, %v13944_v27  ;;  %v17996_v21 = vld [vmem:[#allocation271_spill] sm:$0xff] }
 0x3c9   : > { %v14496_v24 = vpop.f32.mrf.mxu0  ;;  %v4383_v18 = vpop.f32.mrf.mxu1  ;;  %6421 = vmatprep.subr.bf16.mxu1 %v10216_v39 }
 0x3ca   : > { %17987 = vst [vmem:[#allocation57_spill] sm:$0xff] %v14486_v45  ;;  %17989 = vst [vmem:[#allocation116_spill] sm:$0xff] %v14496_v24  ;;  %v14500_v19 = vadd.f32 %v4383_v18, %v4031_v9  ;;  %6422 = vmatpush2.bf16.msra.mxu1 %v10214_v54  ;;  %v17991_v45 = vld [vmem:[#allocation93_spill] sm:$0xff]  ;;  %v4039_v24 = vadd.f32 %v13930_v50, %v13944_v27  ;;  %v17995_v18 = vld [vmem:[#allocation270_spill] sm:$0xff] }
 0x3cb   : > { %v14502_v26 = vpop.f32.mrf.mxu0  ;;  %v4385_v44 = vpop.f32.mrf.mxu1  ;;  %v4035_v0 = vadd.f32 %v17991_v45, %v13949_v49  ;;  %v17997_v45 = vld [vmem:[#allocation143_spill] sm:$0xff] }
 0x3cc   : > { %v14506_v8 = vadd.f32 %v4385_v44, %v4033_v4  ;;  %v4041_v54 = vadd.f32 %v17997_v45, %v13949_v49  ;;  %v17999_v44 = vld [vmem:[#allocation273_spill] sm:$0xff]  ;;  %v4045_v45 = vadd.f32 %v13954_v1, %v13949_v49  ;;  %v4051_v1 = vadd.f32 %v13977_v14, %v13949_v49  ;;  %v10217_v14 = vld [vmem:[%s16783_s3 + $0x1b0] ss:$8 sps:$4 sm:$0xff]  }
 0x3cd   : > { %v14508_v47 = vpop.f32.mrf.mxu0  ;;  %v4387_v40 = vpop.f32.mrf.mxu1 }
 0x3ce   : > { %17992 = vst [vmem:[#allocation117_spill] sm:$0xff] %v14506_v8  ;;  %v14512_v7 = vadd.f32 %v4387_v40, %v4035_v0  ;;  %v4043_v0 = vadd.f32 %v13951_v29, %v13944_v27 }
 0x3cf   : > { %v14514_v9 = vpop.f32.mrf.mxu0  ;;  %v4391_v39 = vpop.f32.mrf.mxu1  ;;  %4823 = vmatmul.mubr.bf16.gmra.mxu0 %v17995_v18  ;;  %9238 = vmatmul.mubr.msk.bf16.gmra.mxu1 %vm2345_vm0, %v17996_v21 }
 0x3d0   : > { %17993 = vst [vmem:[#allocation59_spill] sm:$0xff] %v14512_v7  ;;  %17994 = vst [vmem:[#allocation199_spill] sm:$0xff] %v14514_v9  ;;  %v14521_v4 = vadd.f32 %v4391_v39, %v4039_v24  ;;  %4832 = vmatprep.mubr.bf16.mxu0 %v17999_v44  ;;  %5025 = vmatprep.mubr.bf16.mxu1 %v17902_v6 }
 0x3d1   : > { %v14525_v50 = vpop.f32.mrf.mxu0  ;;  %v4393_v40 = vpop.f32.mrf.mxu1 }
 0x3d2   : > { %17998 = vst [vmem:[#allocation122_spill] sm:$0xff] %v14521_v4  ;;  %18000 = vst [vmem:[#allocation123_spill] sm:$0xff] %v14525_v50  ;;  %v14529_v7 = vadd.f32 %v4393_v40, %v4041_v54  ;;  %v18002_v4 = vld [vmem:[#allocation144_spill] sm:$0xff]  ;;  %v18004_v40 = vld [vmem:[#allocation277_spill] sm:$0xff] }
 0x3d3   : > { %v14531_v18 = vpop.f32.mrf.mxu0  ;;  %v4395_v21 = vpop.f32.mrf.mxu1  ;;  %v4049_v50 = vadd.f32 %v18002_v4, %v13944_v27  ;;  %v18003_v54 = vld [vmem:[#allocation276_spill] sm:$0xff] }
 0x3d4   : > { %v14535_v24 = vadd.f32 %v4395_v21, %v4043_v0 }
 0x3d5   : > { %v14537_v39 = vpop.f32.mrf.mxu0  ;;  %v4397_v44 = vpop.f32.mrf.mxu1 }
 0x3d6   : > { %18001 = vst [vmem:[#allocation295_spill] sm:$0xff] %v14535_v24  ;;  %v14541_v9 = vadd.f32 %v4397_v44, %v4045_v45  ;;  %v18006_v24 = vld [vmem:[#allocation278_spill] sm:$0xff]  ;;  %v4053_v44 = vadd.f32 %v13985_v28, %v13944_v27 }
 0x3d7   : > { %v4401_v8 = vpop.f32.mrf.mxu1  ;;  %v4594_v29 = vpop.f32.mrf.mxu0  ;;  %4833 = vmatmul.mubr.bf16.gmra.mxu0 %v18003_v54  ;;  %9239 = vmatmul.mubr.msk.bf16.gmra.mxu1 %vm2345_vm0, %v18004_v40 }
 0x3d8   : > { %v14548_v0 = vadd.f32 %v4401_v8, %v4049_v50  ;;  %v14551_v21 = vadd.f32 %v4594_v29, %v13973_v56  ;;  %4842 = vmatprep.mubr.bf16.mxu0 %v18006_v24  ;;  %5035 = vmatprep.mubr.bf16.mxu1 %v17902_v6  ;;  %v10219_v56 = vld [vmem:[%s16783_s3 + $0x1b4] ss:$8 sps:$4 sm:$0xff]   ;;  %v4055_v24 = vadd.f32 %v13991_v33, %v13949_v49 }
 0x3d9   : > { %v4403_v4 = vpop.f32.mrf.mxu1  ;;  %v4596_v45 = vpop.f32.mrf.mxu0  ;;  %6423 = vmatprep.subr.bf16.mxu1 %v10219_v56  ;;  %v18009_v33 = vld [vmem:[#allocation283_spill] sm:$0xff] }
 0x3da   : > { %18005 = vst [vmem:[#allocation124_spill] sm:$0xff] %v14551_v21  ;;  %v14557_v54 = vadd.f32 %v4403_v4, %v4051_v1  ;;  %v14560_v40 = vadd.f32 %v4596_v45, %v13981_v59  ;;  %6424 = vmatpush2.bf16.msra.mxu1 %v10217_v14  ;;  %v4059_v4 = vadd.f32 %v13997_v61, %v13944_v27  ;;  %v18011_v61 = vld [vmem:[#allocation285_spill] sm:$0xff] }
 0x3db   : > { %v4405_v8 = vpop.f32.mrf.mxu1  ;;  %v4598_v50 = vpop.f32.mrf.mxu0 }
 0x3dc   : > { %18007 = vst [vmem:[#allocation125_spill] sm:$0xff] %v14557_v54  ;;  %18008 = vst [vmem:[#allocation200_spill] sm:$0xff] %v14560_v40  ;;  %v14570_v29 = vadd.f32 %v4405_v8, %v4053_v44  ;;  %v14573_v28 = vadd.f32 %v4598_v50, %v13989_v35  ;;  %v18010_v44 = vld [vmem:[#allocation284_spill] sm:$0xff]  ;;  %v4061_v35 = vadd.f32 %v14007_v12, %v13949_v49 }
 0x3dd   : > { %v4407_v59 = vpop.f32.mrf.mxu1  ;;  %v4600_v1 = vpop.f32.mrf.mxu0  ;;  %v4063_v50 = vadd.f32 %v14013_v53, %v13944_v27 }
 0x3de   : > { %v14577_v45 = vadd.f32 %v4407_v59, %v4055_v24  ;;  %v14580_v40 = vadd.f32 %v4600_v1, %v13995_v3  ;;  %v18014_v1 = vld [vmem:[#allocation95_spill] sm:$0xff] }
 0x3df   : > { %v4411_v54 = vpop.f32.mrf.mxu1  ;;  %v4604_v21 = vpop.f32.mrf.mxu0  ;;  %4843 = vmatmul.mubr.bf16.gmra.mxu0 %v18009_v33  ;;  %9240 = vmatmul.mubr.msk.bf16.gmra.mxu1 %vm2345_vm0, %v18010_v44 }
 0x3e0   : > { %v14587_v56 = vadd.f32 %v4411_v54, %v4059_v4  ;;  %v14590_v14 = vadd.f32 %v4604_v21, %v14003_v46  ;;  %4852 = vmatprep.mubr.bf16.mxu0 %v18011_v61  ;;  %5045 = vmatprep.mubr.bf16.mxu1 %v17902_v6  ;;  %v4065_v46 = vadd.f32 %v14019_v60, %v13949_v49  ;;  %v18015_v61 = vld [vmem:[#allocation145_spill] sm:$0xff]  ;;  %v18018_v60 = vld [vmem:[#allocation287_spill] sm:$0xff] }
 0x3e1   : > { %v4413_v3 = vpop.f32.mrf.mxu1  ;;  %v4606_v8 = vpop.f32.mrf.mxu0  ;;  %v4069_v53 = vadd.f32 %v18015_v61, %v13944_v27 }
 0x3e2   : > { %v14596_v24 = vadd.f32 %v4413_v3, %v4061_v35  ;;  %v14599_v59 = vadd.f32 %v4606_v8, %v14011_v34  ;;  %v18016_v3 = vld [vmem:[#allocation64_spill] sm:$0xff] }
 0x3e3   : > { %v4415_v12 = vpop.f32.mrf.mxu1  ;;  %v4608_v54 = vpop.f32.mrf.mxu0 }
 0x3e4   : > { %18012 = vst [vmem:[#allocation206_spill] sm:$0xff] %v14596_v24  ;;  %18013 = vst [vmem:[#allocation63_spill] sm:$0xff] %v14599_v59  ;;  %v14603_v21 = vadd.f32 %v4415_v12, %v4063_v50  ;;  %v14606_v4 = vadd.f32 %v4608_v54, %v18014_v1  ;;  %v18017_v24 = vld [vmem:[#allocation286_spill] sm:$0xff]  ;;  %v4071_v50 = vadd.f32 %v14041_v15, %v13949_v49 }
 0x3e5   : > { %v4417_v33 = vpop.f32.mrf.mxu1  ;;  %v4610_v44 = vpop.f32.mrf.mxu0  ;;  %v10221_v15 = vld [vmem:[%s16783_s3 + $0x1a0] ss:$8 sps:$4 sm:$0xff]  }
 0x3e6   : > { %v14610_v35 = vadd.f32 %v4417_v33, %v4065_v46  ;;  %v14613_v34 = vadd.f32 %v4610_v44, %v18016_v3  ;;  %v18020_v46 = vld [vmem:[#allocation288_spill] sm:$0xff]  ;;  %v18023_v3 = vld [vmem:[#allocation97_spill] sm:$0xff] }
 0x3e7   : > { %v4421_v8 = vpop.f32.mrf.mxu1  ;;  %v4614_v59 = vpop.f32.mrf.mxu0  ;;  %4853 = vmatmul.mubr.bf16.gmra.mxu0 %v18017_v24  ;;  %9241 = vmatmul.mubr.msk.bf16.gmra.mxu1 %vm2345_vm0, %v18018_v60  ;;  %v4073_v24 = vadd.f32 %v14047_v11, %v13944_v27  ;;  %v18024_v11 = vld [vmem:[#allocation150_spill] sm:$0xff] }
 0x3e8   : > { %v14620_v12 = vadd.f32 %v4421_v8, %v4069_v53  ;;  %v14623_v54 = vadd.f32 %v4614_v59, %v14037_v20  ;;  %4862 = vmatprep.mubr.bf16.mxu0 %v18020_v46  ;;  %5055 = vmatprep.mubr.bf16.mxu1 %v17902_v6  ;;  %v10223_v20 = vld [vmem:[%s16783_s3 + $0x1a4] ss:$8 sps:$4 sm:$0xff]   ;;  %v4075_v8 = vadd.f32 %v18023_v3, %v13949_v49 }
 0x3e9   : > { %v4423_v1 = vpop.f32.mrf.mxu1  ;;  %v4616_v33 = vpop.f32.mrf.mxu0  ;;  %6425 = vmatprep.subr.bf16.mxu1 %v10223_v20  ;;  %v18026_v3 = vld [vmem:[#allocation290_spill] sm:$0xff]  ;;  %v4081_v20 = vadd.f32 %v14069_v17, %v13949_v49 }
 0x3ea   : > { %18019 = vst [vmem:[#allocation130_spill] sm:$0xff] %v14623_v54  ;;  %v14629_v44 = vadd.f32 %v4423_v1, %v4071_v50  ;;  %v14632_v61 = vadd.f32 %v4616_v33, %v14045_v52  ;;  %6426 = vmatpush2.bf16.msra.mxu1 %v10221_v15  ;;  %v4079_v1 = vadd.f32 %v14059_v30, %v13944_v27  ;;  %v18029_v15 = vld [vmem:[#allocation66_spill] sm:$0xff]  ;;  %v18031_v30 = vld [vmem:[#allocation187_spill] sm:$0xff] }
 0x3eb   : > { %v4425_v59 = vpop.f32.mrf.mxu1  ;;  %v4618_v53 = vpop.f32.mrf.mxu0 }
 0x3ec   : > { %18021 = vst [vmem:[#allocation131_spill] sm:$0xff] %v14629_v44  ;;  %18022 = vst [vmem:[#allocation207_spill] sm:$0xff] %v14632_v61  ;;  %v14642_v60 = vadd.f32 %v4425_v59, %v4073_v24  ;;  %v14645_v50 = vadd.f32 %v4618_v53, %v18024_v11  ;;  %v18027_v24 = vld [vmem:[#allocation291_spill] sm:$0xff]  ;;  %v4083_v11 = vadd.f32 %v14075_v38, %v13944_v27 }
 0x3ed   : > { %v4427_v52 = vpop.f32.mrf.mxu1  ;;  %v4620_v46 = vpop.f32.mrf.mxu0 }
 0x3ee   : > { %v14649_v33 = vadd.f32 %v4427_v52, %v4075_v8  ;;  %v14652_v61 = vadd.f32 %v4620_v46, %v14057_v62  ;;  %v18033_v46 = vld [vmem:[#allocation259_spill] sm:$0xff] }
 0x3ef   : > { %v4431_v44 = vpop.f32.mrf.mxu1  ;;  %v4624_v54 = vpop.f32.mrf.mxu0  ;;  %4863 = vmatmul.mubr.bf16.gmra.mxu0 %v18026_v3  ;;  %9242 = vmatmul.mubr.msk.bf16.gmra.mxu1 %vm2345_vm0, %v18027_v24 }
 0x3f0   : > { %18025 = vst [vmem:[#allocation132_spill] sm:$0xff] %v14652_v61  ;;  %v14659_v59 = vadd.f32 %v4431_v44, %v4079_v1  ;;  %v14662_v53 = vadd.f32 %v4624_v54, %v18029_v15  ;;  %4872 = vmatprep.mubr.bf16.mxu0 %v18031_v30  ;;  %5065 = vmatprep.mubr.bf16.mxu1 %v17902_v6  ;;  %v18035_v1 = vld [vmem:[#allocation31_spill] sm:$0xff]  ;;  %v18037_v61 = vld [vmem:[#allocation262_spill] sm:$0xff] }
 0x3f1   : > { %v4433_v62 = vpop.f32.mrf.mxu1  ;;  %v4626_v8 = vpop.f32.mrf.mxu0  ;;  %v4085_v54 = vadd.f32 %v18035_v1, %v13949_v49  ;;  %v18036_v15 = vld [vmem:[#allocation151_spill] sm:$0xff]  ;;  %v4089_v38 = vadd.f32 %v18037_v61, %v13944_v27  ;;  %v18040_v1 = vld [vmem:[#allocation294_spill] sm:$0xff] }
 0x3f2   : > { %18028 = vst [vmem:[#allocation133_spill] sm:$0xff] %v14659_v59  ;;  %18030 = vst [vmem:[#allocation65_spill] sm:$0xff] %v14662_v53  ;;  %v14668_v52 = vadd.f32 %v4433_v62, %v4081_v20  ;;  %v14671_v3 = vadd.f32 %v4626_v8, %v18033_v46  ;;  %v18038_v62 = vld [vmem:[#allocation152_spill] sm:$0xff]  ;;  %v18043_v61 = vld [vmem:[#allocation195_spill] sm:$0xff] }
 0x3f3   : > { %v4435_v17 = vpop.f32.mrf.mxu1  ;;  %v4628_v44 = vpop.f32.mrf.mxu0 }
 0x3f4   : > { %18032 = vst [vmem:[#allocation69_spill] sm:$0xff] %v14668_v52  ;;  %18034 = vst [vmem:[#allocation138_spill] sm:$0xff] %v14671_v3  ;;  %v14675_v24 = vadd.f32 %v4435_v17, %v4083_v11  ;;  %v14678_v30 = vadd.f32 %v4628_v44, %v18036_v15  ;;  %v18039_v52 = vld [vmem:[#allocation192_spill] sm:$0xff]  ;;  %v4091_v11 = vadd.f32 %v14103_v23, %v13949_v49 }
 0x3f5   : > { %v4437_v53 = vpop.f32.mrf.mxu1  ;;  %v4630_v59 = vpop.f32.mrf.mxu0  ;;  %v10225_v23 = vld [vmem:[%s16783_s3 + $0x190] ss:$8 sps:$4 sm:$0xff]  }
 0x3f6   : > { %v14682_v20 = vadd.f32 %v4437_v53, %v4085_v54  ;;  %v14685_v8 = vadd.f32 %v4630_v59, %v18038_v62  ;;  %v18046_v62 = vld [vmem:[#allocation99_spill] sm:$0xff] }
 0x3f7   : > { %v4441_v46 = vpop.f32.mrf.mxu1  ;;  %v4634_v3 = vpop.f32.mrf.mxu0  ;;  %4873 = vmatmul.mubr.bf16.gmra.mxu0 %v18039_v52  ;;  %9243 = vmatmul.mubr.msk.bf16.gmra.mxu1 %vm2345_vm0, %v18040_v1  ;;  %v4093_v52 = vadd.f32 %v14109_v25, %v13944_v27  ;;  %v18047_v25 = vld [vmem:[#allocation33_spill] sm:$0xff] }
 0x3f8   : > { %v14692_v17 = vadd.f32 %v4441_v46, %v4089_v38  ;;  %v14695_v44 = vadd.f32 %v4634_v3, %v14099_v55  ;;  %4882 = vmatprep.mubr.bf16.mxu0 %v18043_v61  ;;  %5075 = vmatprep.mubr.bf16.mxu1 %v17902_v6  ;;  %v10227_v55 = vld [vmem:[%s16783_s3 + $0x194] ss:$8 sps:$4 sm:$0xff]   ;;  %v4095_v46 = vadd.f32 %v18046_v62, %v13949_v49 }
 0x3f9   : > { %v4443_v59 = vpop.f32.mrf.mxu1  ;;  %v4636_v53 = vpop.f32.mrf.mxu0  ;;  %6427 = vmatprep.subr.bf16.mxu1 %v10227_v55  ;;  %v18049_v62 = vld [vmem:[#allocation296_spill] sm:$0xff]  ;;  %v4101_v55 = vadd.f32 %v14137_v58, %v13949_v49 }
 0x3fa   : > { %18041 = vst [vmem:[#allocation139_spill] sm:$0xff] %v14692_v17  ;;  %18042 = vst [vmem:[#allocation219_spill] sm:$0xff] %v14695_v44  ;;  %v14701_v54 = vadd.f32 %v4443_v59, %v4091_v11  ;;  %v14704_v15 = vadd.f32 %v4636_v53, %v14107_v42  ;;  %6428 = vmatpush2.bf16.msra.mxu1 %v10225_v23  ;;  %v4099_v59 = vadd.f32 %v14127_v2, %v13944_v27  ;;  %v18051_v23 = vld [vmem:[#allocation153_spill] sm:$0xff]  ;;  %v18053_v2 = vld [vmem:[#allocation203_spill] sm:$0xff] }
 0x3fb   : > { %v4445_v3 = vpop.f32.mrf.mxu1  ;;  %v4638_v38 = vpop.f32.mrf.mxu0 }
 0x3fc   : > { %18044 = vst [vmem:[#allocation140_spill] sm:$0xff] %v14701_v54  ;;  %18045 = vst [vmem:[#allocation141_spill] sm:$0xff] %v14704_v15  ;;  %v14714_v1 = vadd.f32 %v4445_v3, %v4093_v52  ;;  %v14717_v11 = vadd.f32 %v4638_v38, %v18047_v25  ;;  %v18048_v15 = vld [vmem:[#allocation68_spill] sm:$0xff]  ;;  %v18050_v52 = vld [vmem:[#allocation297_spill] sm:$0xff]  ;;  %v4103_v25 = vadd.f32 %v14149_v43, %v13944_v27 }
 0x3fd   : > { %v4447_v42 = vpop.f32.mrf.mxu1  ;;  %v4640_v61 = vpop.f32.mrf.mxu0  ;;  %v4109_v43 = vadd.f32 %v14167_v63, %v13944_v27  ;;  %v18065_v63 = vld [vmem:[#allocation211_spill] sm:$0xff] }
 0x3fe   : > { %v14721_v53 = vadd.f32 %v4447_v42, %v4095_v46  ;;  %v14724_v54 = vadd.f32 %v4640_v61, %v18048_v15 }
 0x3ff   : > { %v4451_v44 = vpop.f32.mrf.mxu1  ;;  %v4644_v17 = vpop.f32.mrf.mxu0  ;;  %4883 = vmatmul.mubr.bf16.gmra.mxu0 %v18049_v62  ;;  %9244 = vmatmul.mubr.msk.bf16.gmra.mxu1 %vm2345_vm0, %v18050_v52  ;;  %v18057_v52 = vld [vmem:[#allocation263_spill] sm:$0xff] }
 0x400   : > { %v14731_v3 = vadd.f32 %v4451_v44, %v4099_v59  ;;  %v14734_v38 = vadd.f32 %v4644_v17, %v18051_v23  ;;  %4892 = vmatprep.mubr.bf16.mxu0 %v18053_v2  ;;  %5085 = vmatprep.mubr.bf16.mxu1 %v17902_v6  ;;  %v18056_v59 = vld [vmem:[#allocation101_spill] sm:$0xff] }
 0x401   : > { %v4453_v15 = vpop.f32.mrf.mxu1  ;;  %v4646_v46 = vpop.f32.mrf.mxu0  ;;  %v4105_v17 = vadd.f32 %v18056_v59, %v13949_v49  ;;  %v18061_v59 = vld [vmem:[#allocation300_spill] sm:$0xff] }
 0x402   : > { %18052 = vst [vmem:[#allocation71_spill] sm:$0xff] %v14734_v38  ;;  %v14740_v42 = vadd.f32 %v4453_v15, %v4101_v55  ;;  %v14743_v61 = vadd.f32 %v4646_v46, %v14144_v5  ;;  %v18058_v15 = vld [vmem:[#allocation70_spill] sm:$0xff] }
 0x403   : > { %v4455_v58 = vpop.f32.mrf.mxu1  ;;  %v4648_v44 = vpop.f32.mrf.mxu0 }
 0x404   : > { %18054 = vst [vmem:[#allocation222_spill] sm:$0xff] %v14740_v42  ;;  %18055 = vst [vmem:[#allocation73_spill] sm:$0xff] %v14743_v61  ;;  %v14747_v62 = vadd.f32 %v4455_v58, %v4103_v25  ;;  %v14750_v23 = vadd.f32 %v4648_v44, %v18057_v52  ;;  %v18060_v42 = vld [vmem:[#allocation208_spill] sm:$0xff]  ;;  %v4111_v25 = vadd.f32 %v14177_v16, %v13949_v49  ;;  %v18063_v44 = vld [vmem:[#allocation266_spill] sm:$0xff] }
 0x405   : > { %v4457_v2 = vpop.f32.mrf.mxu1  ;;  %v4650_v38 = vpop.f32.mrf.mxu0  ;;  %v10229_v16 = vld [vmem:[%s16783_s3 + $0x180] ss:$8 sps:$4 sm:$0xff]  }
 0x406   : > { %v14754_v55 = vadd.f32 %v4457_v2, %v4105_v17  ;;  %v14757_v5 = vadd.f32 %v4650_v38, %v18058_v15 }
 0x407   : > { %v4461_v46 = vpop.f32.mrf.mxu1  ;;  %v4654_v61 = vpop.f32.mrf.mxu0  ;;  %4893 = vmatmul.mubr.bf16.gmra.mxu0 %v18060_v42  ;;  %9245 = vmatmul.mubr.msk.bf16.gmra.mxu1 %vm2345_vm0, %v18061_v59  ;;  %v4113_v42 = vadd.f32 %v14189_v13, %v13944_v27  ;;  %v18068_v59 = vld [vmem:[#allocation103_spill] sm:$0xff] }
 0x408   : > { %18059 = vst [vmem:[#allocation146_spill] sm:$0xff] %v14757_v5  ;;  %v14764_v58 = vadd.f32 %v4461_v46, %v4109_v43  ;;  %v14767_v52 = vadd.f32 %v4654_v61, %v18063_v44  ;;  %4902 = vmatprep.mubr.bf16.mxu0 %v18065_v63  ;;  %5095 = vmatprep.mubr.bf16.mxu1 %v17902_v6  ;;  %v10231_v61 = vld [vmem:[%s16783_s3 + $0x184] ss:$8 sps:$4 sm:$0xff]   ;;  %v18069_v13 = vld [vmem:[#allocation159_spill] sm:$0xff] }
 0x409   : > { %v4463_v38 = vpop.f32.mrf.mxu1  ;;  %v4656_v17 = vpop.f32.mrf.mxu0  ;;  %v4115_v44 = vadd.f32 %v18068_v59, %v13949_v49  ;;  %6429 = vmatprep.subr.bf16.mxu1 %v10231_v61  ;;  %v18072_v59 = vld [vmem:[#allocation215_spill] sm:$0xff]  ;;  %v4121_v61 = vadd.f32 %v14217_v31, %v13949_v49 }
 0x40a   : > { %18062 = vst [vmem:[#allocation147_spill] sm:$0xff] %v14764_v58  ;;  %18064 = vst [vmem:[#allocation9_spill] sm:$0xff] %v14767_v52  ;;  %v14773_v2 = vadd.f32 %v4463_v38, %v4111_v25  ;;  %v14776_v15 = vadd.f32 %v4656_v17, %v14184_v57  ;;  %6430 = vmatpush2.bf16.msra.mxu1 %v10229_v16  ;;  %v4119_v17 = vadd.f32 %v14207_v36, %v13944_v27  ;;  %v18075_v16 = vld [vmem:[#allocation268_spill] sm:$0xff]  ;;  %v18077_v36 = vld [vmem:[#allocation39_spill] sm:$0xff] }
 0x40b   : > { %v4465_v43 = vpop.f32.mrf.mxu1  ;;  %v4658_v46 = vpop.f32.mrf.mxu0 }
 0x40c   : > { %18066 = vst [vmem:[#allocation148_spill] sm:$0xff] %v14773_v2  ;;  %18067 = vst [vmem:[#allocation149_spill] sm:$0xff] %v14776_v15  ;;  %v14786_v63 = vadd.f32 %v4465_v43, %v4113_v42  ;;  %v14789_v25 = vadd.f32 %v4658_v46, %v18069_v13  ;;  %v18070_v2 = vld [vmem:[#allocation72_spill] sm:$0xff]  ;;  %v18078_v13 = vld [vmem:[#allocation10_spill] sm:$0xff] }
 0x40d   : > { %v4467_v57 = vpop.f32.mrf.mxu1  ;;  %v4660_v38 = vpop.f32.mrf.mxu0  ;;  %v18073_v42 = vld [vmem:[#allocation216_spill] sm:$0xff] }
 0x40e   : > { %v14793_v15 = vadd.f32 %v4467_v57, %v4115_v44  ;;  %v14796_v52 = vadd.f32 %v4660_v38, %v18070_v2  ;;  %v4123_v57 = vadd.f32 %v18078_v13, %v13944_v27  ;;  %v18087_v13 = vld [vmem:[#allocation37_spill] sm:$0xff] }
 0x40f   : > { %v4471_v58 = vpop.f32.mrf.mxu1  ;;  %v4664_v5 = vpop.f32.mrf.mxu0  ;;  %4903 = vmatmul.mubr.bf16.gmra.mxu0 %v18072_v59  ;;  %9246 = vmatmul.mubr.msk.bf16.gmra.mxu1 %vm2345_vm0, %v18073_v42  ;;  %v18080_v59 = vld [vmem:[#allocation35_spill] sm:$0xff] }
 0x410   : > { %18071 = vst [vmem:[#allocation223_spill] sm:$0xff] %v14796_v52  ;;  %v14803_v43 = vadd.f32 %v4471_v58, %v4119_v17  ;;  %v14806_v46 = vadd.f32 %v4664_v5, %v18075_v16  ;;  %6078 = vmatprep.mubr.bf16.mxu0 %v18077_v36  ;;  %5105 = vmatprep.mubr.bf16.mxu1 %v17902_v6  ;;  %v18082_v17 = vld [vmem:[#allocation160_spill] sm:$0xff]  ;;  %v18084_v36 = vld [vmem:[#allocation74_spill] sm:$0xff] }
 0x411   : > { %v4473_v2 = vpop.f32.mrf.mxu1  ;;  %v4666_v44 = vpop.f32.mrf.mxu0  ;;  %v4125_v5 = vadd.f32 %v18082_v17, %v13949_v49 }
 0x412   : > { %18074 = vst [vmem:[#allocation154_spill] sm:$0xff] %v14803_v43  ;;  %18076 = vst [vmem:[#allocation155_spill] sm:$0xff] %v14806_v46  ;;  %v14812_v38 = vadd.f32 %v4473_v2, %v4121_v61  ;;  %v14815_v42 = vadd.f32 %v4666_v44, %v18080_v59  ;;  %v10220_v61 = vld [vmem:[%s16785_s5 + $0x38] sm:$0xff]   ;;  %v4129_v2 = vadd.f32 %v14247_v41, %v13944_v27  ;;  %v18095_v41 = vld [vmem:[#allocation41_spill] sm:$0xff] }
 0x413   : > { %v4475_v31 = vpop.f32.mrf.mxu1  ;;  %v4668_v58 = vpop.f32.mrf.mxu0 }
 0x414   : > { %18079 = vst [vmem:[#allocation156_spill] sm:$0xff] %v14812_v38  ;;  %18081 = vst [vmem:[#allocation157_spill] sm:$0xff] %v14815_v42  ;;  %v14819_v16 = vadd.f32 %v4475_v31, %v4123_v57  ;;  %v14822_v46 = vadd.f32 %v4668_v58, %v18084_v36  ;;  %v18089_v31 = vld [vmem:[#allocation301_spill] sm:$0xff]  ;;  %v18090_v58 = vld [vmem:[#allocation274_spill] sm:$0xff] }
 0x415   : > { %v4477_v43 = vpop.f32.mrf.mxu1  ;;  %v4670_v52 = vpop.f32.mrf.mxu0  ;;  %v18091_v36 = vld [vmem:[#allocation167_spill] sm:$0xff]  ;;  %v18093_v42 = vld [vmem:[#allocation162_spill] sm:$0xff] }
 0x416   : > { %18083 = vst [vmem:[#allocation163_spill] sm:$0xff] %v14819_v16  ;;  %18085 = vst [vmem:[#allocation164_spill] sm:$0xff] %v14822_v46  ;;  %v14829_v44 = vadd.f32 %v4477_v43, %v4125_v5  ;;  %v14832_v59 = vadd.f32 %v4670_v52, %v18087_v13  ;;  %v4131_v46 = vadd.f32 %v18091_v36, %v13949_v49  ;;  %v10224_v5 = vld [vmem:[%s16785_s5 + $0x30] sm:$0xff]   ;;  %v18096_v13 = vld [vmem:[#allocation76_spill] sm:$0xff] }
 0x417   : > { %v4481_v17 = vpop.f32.mrf.mxu1  ;;  %v4674_v57 = vpop.f32.mrf.mxu0  ;;  %9247 = vmatmul.mubr.msk.bf16.gmra.mxu1 %vm2345_vm0, %v18089_v31  ;;  %6079 = vmatmul.mubr.bf16.vlgmr.msra.gmra.mxu0 %v18090_v58  ;;  %v4133_v31 = vadd.f32 %v18096_v13, %v13944_v27  ;;  %v18100_v36 = vld [vmem:[#allocation14_spill] sm:$0xff] }
 0x418   : > { %18086 = vst [vmem:[#allocation75_spill] sm:$0xff] %v14829_v44  ;;  %18088 = vst [vmem:[#allocation165_spill] sm:$0xff] %v14832_v59  ;;  %v14839_v16 = vadd.f32 %v4481_v17, %v4129_v2  ;;  %v14842_v38 = vadd.f32 %v4674_v57, %v18093_v42  ;;  %6088 = vmatprep.mubr.bf16.mxu0 %v18095_v41  ;;  %5115 = vmatprep.mubr.bf16.mxu1 %v17902_v6  ;;  %v18098_v2 = vld [vmem:[#allocation12_spill] sm:$0xff] }
 0x419   : > { %v4483_v52 = vpop.f32.mrf.mxu1  ;;  %v4676_v43 = vpop.f32.mrf.mxu0  ;;  %7080 = vmatpush1.bf16.msra.mxu0 %v10220_v61  ;;  %v4135_v41 = vadd.f32 %v18100_v36, %v13949_v49 }
 0x41a   : > { %18092 = vst [vmem:[#allocation166_spill] sm:$0xff] %v14839_v16  ;;  %18094 = vst [vmem:[#allocation44_spill] sm:$0xff] %v14842_v38  ;;  %v14851_v58 = vadd.f32 %v4483_v52, %v4131_v46  ;;  %v14854_v17 = vadd.f32 %v4676_v43, %v18098_v2  ;;  %7081 = vmatprep.subr.bf16.mxu0 %v17902_v6  ;;  %v18102_v38 = vld [vmem:[#allocation272_spill] sm:$0xff]  ;;  %v10228_v46 = vld [vmem:[%s16785_s5 + $0x28] sm:$0xff]  }
 0x41b   : > { %v4485_v42 = vpop.f32.mrf.mxu1  ;;  %v4678_v57 = vpop.f32.mrf.mxu0  ;;  %v18104_v52 = vld [vmem:[#allocation16_spill] sm:$0xff]  ;;  %v18106_v2 = vld [vmem:[#allocation78_spill] sm:$0xff] }
 0x41c   : > { %18097 = vst [vmem:[#allocation171_spill] sm:$0xff] %v14851_v58  ;;  %18099 = vst [vmem:[#allocation172_spill] sm:$0xff] %v14854_v17  ;;  %v14859_v61 = vadd.f32 %v4485_v42, %v4133_v31  ;;  %v14862_v16 = vadd.f32 %v4678_v57, %v18102_v38  ;;  %v4139_v43 = vadd.f32 %v18104_v52, %v13944_v27  ;;  %v18108_v42 = vld [vmem:[#allocation113_spill] sm:$0xff]  ;;  %v18110_v57 = vld [vmem:[#allocation18_spill] sm:$0xff] }
 0x41d   : > { %v4487_v59 = vpop.f32.mrf.mxu1  ;;  %v4680_v44 = vpop.f32.mrf.mxu0  ;;  %7082 = vmatpush1.bf16.msra.mxu0 %v10224_v5  ;;  %v18109_v5 = vld [vmem:[#allocation275_spill] sm:$0xff]  ;;  %v4141_v36 = vadd.f32 %v18110_v57, %v13949_v49  ;;  %v18112_v52 = vld [vmem:[#allocation80_spill] sm:$0xff] }
 0x41e   : > { %18101 = vst [vmem:[#allocation173_spill] sm:$0xff] %v14859_v61  ;;  %18103 = vst [vmem:[#allocation174_spill] sm:$0xff] %v14862_v16  ;;  %v14869_v13 = vadd.f32 %v4487_v59, %v4135_v41  ;;  %v14872_v17 = vadd.f32 %v4680_v44, %v18106_v2  ;;  %7083 = vmatprep.subr.bf16.mxu0 %v17902_v6  ;;  %v18114_v41 = vld [vmem:[#allocation279_spill] sm:$0xff] }
 0x41f   : > { %v4491_v31 = vpop.f32.mrf.mxu1  ;;  %v4684_v38 = vpop.f32.mrf.mxu0  ;;  %9248 = vmatmul.mubr.msk.bf16.gmra.mxu1 %vm2345_vm0, %v18108_v42  ;;  %6089 = vmatmul.mubr.bf16.gmra.mxu0 %v18109_v5  ;;  %v10232_v42 = vld [vmem:[%s16785_s5 + $0x20] sm:$0xff]   ;;  %v18115_v5 = vld [vmem:[#allocation20_spill] sm:$0xff] }
 0x420   : > { %18105 = vst [vmem:[#allocation176_spill] sm:$0xff] %v14869_v13  ;;  %18107 = vst [vmem:[#allocation177_spill] sm:$0xff] %v14872_v17  ;;  %v14880_v16 = vadd.f32 %v4491_v31, %v4139_v43  ;;  %v14883_v59 = vadd.f32 %v4684_v38, %v18112_v52  ;;  %6098 = vmatprep.mubr.bf16.mxu0 %v18114_v41  ;;  %5125 = vmatprep.mubr.bf16.mxu1 %v17902_v6  ;;  %v18116_v43 = vld [vmem:[#allocation82_spill] sm:$0xff] }
 0x421   : > { %v4493_v44 = vpop.f32.mrf.mxu1  ;;  %v4686_v2 = vpop.f32.mrf.mxu0  ;;  %7084 = vmatpush1.bf16.msra.mxu0 %v10228_v46  ;;  %v4143_v17 = vadd.f32 %v18115_v5, %v13944_v27  ;;  %v18118_v41 = vld [vmem:[#allocation22_spill] sm:$0xff] }
 0x422   : > { %18111 = vst [vmem:[#allocation178_spill] sm:$0xff] %v14880_v16  ;;  %18113 = vst [vmem:[#allocation179_spill] sm:$0xff] %v14883_v59  ;;  %v14892_v57 = vadd.f32 %v4493_v44, %v4141_v36  ;;  %v14895_v31 = vadd.f32 %v4686_v2, %v18116_v43  ;;  %7085 = vmatprep.subr.bf16.mxu0 %v17902_v6  ;;  %v4145_v59 = vadd.f32 %v18118_v41, %v13949_v49  ;;  %v18120_v16 = vld [vmem:[#allocation84_spill] sm:$0xff]  ;;  %v18123_v2 = vld [vmem:[#allocation86_spill] sm:$0xff] }
 0x423   : > { %v4495_v38 = vpop.f32.mrf.mxu1  ;;  %v4688_v52 = vpop.f32.mrf.mxu0  ;;  %v4149_v36 = vadd.f32 %v14330_v32, %v13944_v27  ;;  %v18129_v32 = vld [vmem:[#allocation24_spill] sm:$0xff] }
 0x424   : > { %18117 = vst [vmem:[#allocation180_spill] sm:$0xff] %v14895_v31  ;;  %v14900_v46 = vadd.f32 %v4495_v38, %v4143_v17  ;;  %v14903_v13 = vadd.f32 %v4688_v52, %v18120_v16  ;;  %v18125_v17 = vld [vmem:[#allocation121_spill] sm:$0xff]  ;;  %v18126_v16 = vld [vmem:[#allocation175_spill] sm:$0xff]  ;;  %v18127_v38 = vld [vmem:[#allocation88_spill] sm:$0xff] }
 0x425   : > { %v4497_v61 = vpop.f32.mrf.mxu1  ;;  %v4690_v58 = vpop.f32.mrf.mxu0  ;;  %7086 = vmatpush1.bf16.msra.mxu0 %v10232_v42  ;;  %v4151_v42 = vadd.f32 %v18127_v38, %v13949_v49  ;;  %v18143_v31 = vld [vmem:[#allocation242_spill] sm:$0xff] }
 0x426   : > { %18119 = vst [vmem:[#allocation181_spill] sm:$0xff] %v14900_v46  ;;  %18121 = vst [vmem:[#allocation182_spill] sm:$0xff] %v14903_v13  ;;  %v14907_v44 = vadd.f32 %v4497_v61, %v4145_v59  ;;  %v14910_v5 = vadd.f32 %v4690_v58, %v18123_v2  ;;  %7087 = vmatprep.subr.bf16.mxu0 %v17902_v6  ;;  %v18131_v59 = vld [vmem:[#allocation281_spill] sm:$0xff]  ;;  %v10233_v58 = vld [vmem:[%s16785_s5 + $0x18] sm:$0xff]  }
 0x427   : > { %v4501_v43 = vpop.f32.mrf.mxu1  ;;  %v4694_v41 = vpop.f32.mrf.mxu0  ;;  %9249 = vmatmul.mubr.msk.bf16.gmra.mxu1 %vm2345_vm0, %v18125_v17  ;;  %6099 = vmatmul.mubr.bf16.gmra.mxu0 %v18126_v16  ;;  %v18132_v16 = vld [vmem:[#allocation90_spill] sm:$0xff] }
 0x428   : > { %18122 = vst [vmem:[#allocation183_spill] sm:$0xff] %v14907_v44  ;;  %18124 = vst [vmem:[#allocation185_spill] sm:$0xff] %v14910_v5  ;;  %v14918_v52 = vadd.f32 %v4501_v43, %v4149_v36  ;;  %v14921_v61 = vadd.f32 %v4694_v41, %v18129_v32  ;;  %6108 = vmatprep.mubr.bf16.mxu0 %v18131_v59  ;;  %5135 = vmatprep.mubr.bf16.mxu1 %v17902_v6  ;;  %v18134_v36 = vld [vmem:[#allocation26_spill] sm:$0xff]  ;;  %v18136_v32 = vld [vmem:[#allocation92_spill] sm:$0xff] }
 0x429   : > { %v4503_v2 = vpop.f32.mrf.mxu1  ;;  %v4696_v17 = vpop.f32.mrf.mxu0  ;;  %v4153_v5 = vadd.f32 %v18132_v16, %v13944_v27  ;;  %7088 = vmatpush1.bf16.msra.mxu0 %v10233_v58  ;;  %v4155_v59 = vadd.f32 %v18136_v32, %v13949_v49  ;;  %v18141_v58 = vld [vmem:[#allocation30_spill] sm:$0xff]  ;;  %v18147_v32 = vld [vmem:[#allocation32_spill] sm:$0xff] }
 0x42a   : > { %18128 = vst [vmem:[#allocation186_spill] sm:$0xff] %v14918_v52  ;;  %18130 = vst [vmem:[#allocation188_spill] sm:$0xff] %v14921_v61  ;;  %v14930_v44 = vadd.f32 %v4503_v2, %v4151_v42  ;;  %v14933_v43 = vadd.f32 %v4696_v17, %v18134_v36  ;;  %7089 = vmatprep.subr.bf16.mxu0 %v17902_v6  ;;  %v18137_v52 = vld [vmem:[#allocation28_spill] sm:$0xff]  ;;  %v18139_v42 = vld [vmem:[#allocation94_spill] sm:$0xff] }
 0x42b   : > { %v4505_v41 = vpop.f32.mrf.mxu1  ;;  %v4698_v38 = vpop.f32.mrf.mxu0  ;;  %v4159_v2 = vadd.f32 %v18139_v42, %v13944_v27  ;;  %v18150_v42 = vld [vmem:[#allocation98_spill] sm:$0xff] }
 0x42c   : > { %18133 = vst [vmem:[#allocation189_spill] sm:$0xff] %v14930_v44  ;;  %18135 = vst [vmem:[#allocation193_spill] sm:$0xff] %v14933_v43  ;;  %v14938_v61 = vadd.f32 %v4505_v41, %v4153_v5  ;;  %v14941_v13 = vadd.f32 %v4698_v38, %v18137_v52  ;;  %v18144_v5 = vld [vmem:[#allocation280_spill] sm:$0xff] }
 0x42d   : > { %v4507_v46 = vpop.f32.mrf.mxu1  ;;  %v4700_v16 = vpop.f32.mrf.mxu0  ;;  %v18145_v52 = vld [vmem:[#allocation96_spill] sm:$0xff] }
 0x42e   : > { %18138 = vst [vmem:[#allocation194_spill] sm:$0xff] %v14941_v13  ;;  %v14945_v17 = vadd.f32 %v4507_v46, %v4155_v59  ;;  %v14948_v36 = vadd.f32 %v4700_v16, %v18141_v58  ;;  %v4161_v41 = vadd.f32 %v18145_v52, %v13949_v49  ;;  %v18149_v46 = vld [vmem:[#allocation47_spill] sm:$0xff]  ;;  %v4163_v58 = vadd.f32 %v18150_v42, %v13944_v27 }
 0x42f   : > { %v4511_v43 = vpop.f32.mrf.mxu1  ;;  %v4704_v44 = vpop.f32.mrf.mxu0  ;;  %9250 = vmatmul.mubr.msk.bf16.gmra.mxu1 %vm2345_vm0, %v18143_v31  ;;  %6109 = vmatmul.mubr.bf16.gmra.mxu0 %v18144_v5  ;;  %v18152_v5 = vld [vmem:[#allocation34_spill] sm:$0xff]  ;;  %v4169_v42 = vadd.f32 %v14412_v48, %v13944_v27  ;;  %v18165_v48 = vld [vmem:[#allocation289_spill] sm:$0xff] }
 0x430   : > { %18140 = vst [vmem:[#allocation196_spill] sm:$0xff] %v14945_v17  ;;  %18142 = vst [vmem:[#allocation197_spill] sm:$0xff] %v14948_v36  ;;  %v14955_v38 = vadd.f32 %v4511_v43, %v4159_v2  ;;  %v14958_v13 = vadd.f32 %v4704_v44, %v18147_v32  ;;  %6118 = vmatprep.mubr.bf16.mxu0 %v18149_v46  ;;  %5145 = vmatprep.mubr.bf16.mxu1 %v17902_v6  ;;  %v18154_v2 = vld [vmem:[#allocation100_spill] sm:$0xff] }
 0x431   : > { %v4513_v59 = vpop.f32.mrf.mxu1  ;;  %v4706_v16 = vpop.f32.mrf.mxu0  ;;  %v4165_v44 = vadd.f32 %v18154_v2, %v13949_v49  ;;  %v18155_v46 = vld [vmem:[#allocation36_spill] sm:$0xff] }
 0x432   : > { %18146 = vst [vmem:[#allocation201_spill] sm:$0xff] %v14955_v38  ;;  %18148 = vst [vmem:[#allocation202_spill] sm:$0xff] %v14958_v13  ;;  %v14964_v31 = vadd.f32 %v4513_v59, %v4161_v41  ;;  %v14967_v36 = vadd.f32 %v4706_v16, %v18152_v5  ;;  %v18157_v59 = vld [vmem:[#allocation38_spill] sm:$0xff] }
 0x433   : > { %v4515_v52 = vpop.f32.mrf.mxu1  ;;  %v4708_v43 = vpop.f32.mrf.mxu0 }
 0x434   : > { %18151 = vst [vmem:[#allocation204_spill] sm:$0xff] %v14964_v31  ;;  %18153 = vst [vmem:[#allocation205_spill] sm:$0xff] %v14967_v36  ;;  %v14971_v32 = vadd.f32 %v4515_v52, %v4163_v58  ;;  %v14974_v13 = vadd.f32 %v4708_v43, %v18155_v46  ;;  %v18159_v31 = vld [vmem:[#allocation136_spill] sm:$0xff]  ;;  %v18160_v58 = vld [vmem:[#allocation282_spill] sm:$0xff] }
 0x435   : > { %v4517_v38 = vpop.f32.mrf.mxu1  ;;  %v4710_v17 = vpop.f32.mrf.mxu0  ;;  %v18161_v52 = vld [vmem:[#allocation40_spill] sm:$0xff]  ;;  %v18163_v46 = vld [vmem:[#allocation102_spill] sm:$0xff] }
 0x436   : > { %18156 = vst [vmem:[#allocation209_spill] sm:$0xff] %v14974_v13  ;;  %v14978_v41 = vadd.f32 %v4517_v38, %v4165_v44  ;;  %v14981_v16 = vadd.f32 %v4710_v17, %v18157_v59  ;;  %v4171_v43 = vadd.f32 %v18161_v52, %v13949_v49  ;;  %v10234_v17 = vld [vmem:[%s16785_s5 + $0x10] sm:$0xff]   ;;  %v18166_v44 = vld [vmem:[#allocation105_spill] sm:$0xff] }
 0x437   : > { %v4521_v5 = vpop.f32.mrf.mxu1  ;;  %v4714_v36 = vpop.f32.mrf.mxu0  ;;  %9251 = vmatmul.mubr.msk.bf16.gmra.mxu1 %vm2345_vm0, %v18159_v31  ;;  %6119 = vmatmul.mubr.bf16.gmra.mxu0 %v18160_v58  ;;  %v4173_v59 = vadd.f32 %v18166_v44, %v13944_v27 }
 0x438   : > { %18158 = vst [vmem:[#allocation210_spill] sm:$0xff] %v14981_v16  ;;  %v14988_v2 = vadd.f32 %v4521_v5, %v4169_v42  ;;  %v14991_v13 = vadd.f32 %v4714_v36, %v18163_v46  ;;  %6128 = vmatprep.mubr.bf16.mxu0 %v18165_v48  ;;  %5155 = vmatprep.mubr.bf16.mxu1 %v17902_v6  ;;  %v18167_v42 = vld [vmem:[#allocation104_spill] sm:$0xff] }
 0x439   : > { %v4523_v38 = vpop.f32.mrf.mxu1  ;;  %v4716_v31 = vpop.f32.mrf.mxu0  ;;  %7090 = vmatpush1.bf16.msra.mxu0 %v10234_v17  ;;  %v4175_v46 = vadd.f32 %v14441_v37, %v13949_v49  ;;  %v18174_v37 = vld [vmem:[#allocation51_spill] sm:$0xff] }
 0x43a   : > { %18162 = vst [vmem:[#allocation212_spill] sm:$0xff] %v14988_v2  ;;  %18164 = vst [vmem:[#allocation213_spill] sm:$0xff] %v14991_v13  ;;  %v15000_v58 = vadd.f32 %v4523_v38, %v4171_v43  ;;  %v15003_v5 = vadd.f32 %v4716_v31, %v18167_v42  ;;  %7091 = vmatprep.subr.bf16.mxu0 %v17902_v6  ;;  %v18169_v13 = vld [vmem:[#allocation106_spill] sm:$0xff]  ;;  %v4179_v43 = vadd.f32 %v14450_v51, %v13944_v27  ;;  %v18179_v51 = vld [vmem:[#allocation292_spill] sm:$0xff] }
 0x43b   : > { %v4525_v36 = vpop.f32.mrf.mxu1  ;;  %v4718_v52 = vpop.f32.mrf.mxu0 }
 0x43c   : > { %18168 = vst [vmem:[#allocation217_spill] sm:$0xff] %v15003_v5  ;;  %v15008_v48 = vadd.f32 %v4525_v36, %v4173_v59  ;;  %v15011_v2 = vadd.f32 %v4718_v52, %v18169_v13  ;;  %v18173_v5 = vld [vmem:[#allocation255_spill] sm:$0xff]  ;;  %v18175_v13 = vld [vmem:[#allocation108_spill] sm:$0xff] }
 0x43d   : > { %v4527_v16 = vpop.f32.mrf.mxu1  ;;  %v4720_v44 = vpop.f32.mrf.mxu0  ;;  %v4181_v59 = vadd.f32 %v18175_v13, %v13949_v49  ;;  %v18177_v52 = vld [vmem:[#allocation107_spill] sm:$0xff] }
 0x43e   : > { %18170 = vst [vmem:[#allocation218_spill] sm:$0xff] %v15011_v2  ;;  %v15015_v38 = vadd.f32 %v4527_v16, %v4175_v46  ;;  %v15018_v17 = vadd.f32 %v4720_v44, %v14448_v10  ;;  %v4183_v46 = vadd.f32 %v14467_v22, %v13944_v27  ;;  %v18181_v44 = vld [vmem:[#allocation109_spill] sm:$0xff] }
 0x43f   : > { %v4531_v31 = vpop.f32.mrf.mxu1  ;;  %v4724_v42 = vpop.f32.mrf.mxu0  ;;  %9252 = vmatmul.mubr.msk.bf16.gmra.mxu1 %vm2345_vm0, %v18173_v5  ;;  %6129 = vmatmul.mubr.bf16.gmra.mxu0 %v18174_v37 }
 0x440   : > { %18171 = vst [vmem:[#allocation220_spill] sm:$0xff] %v15015_v38  ;;  %18172 = vst [vmem:[#allocation224_spill] sm:$0xff] %v15018_v17  ;;  %v15025_v36 = vadd.f32 %v4531_v31, %v4179_v43  ;;  %v15028_v2 = vadd.f32 %v4724_v42, %v18177_v52  ;;  %6138 = vmatprep.mubr.bf16.mxu0 %v18179_v51  ;;  %5165 = vmatprep.mubr.bf16.mxu1 %v17902_v6  ;;  %v18183_v31 = vld [vmem:[#allocation293_spill] sm:$0xff]  ;;  %v18184_v51 = vld [vmem:[#allocation110_spill] sm:$0xff] }
 0x441   : > { %v4533_v10 = vpop.f32.mrf.mxu1  ;;  %v4726_v16 = vpop.f32.mrf.mxu0  ;;  %v4185_v42 = vadd.f32 %v18183_v31, %v13949_v49  ;;  %v18186_v38 = vld [vmem:[#allocation115_spill] sm:$0xff] }
 0x442   : > { %18176 = vst [vmem:[#allocation225_spill] sm:$0xff] %v15025_v36  ;;  %18178 = vst [vmem:[#allocation227_spill] sm:$0xff] %v15028_v2  ;;  %v15034_v5 = vadd.f32 %v4533_v10, %v4181_v59  ;;  %v15037_v37 = vadd.f32 %v4726_v16, %v18181_v44  ;;  %v4189_v22 = vadd.f32 %v18186_v38, %v13944_v27  ;;  %v18187_v10 = vld [vmem:[#allocation114_spill] sm:$0xff]  ;;  %v18194_v38 = vld [vmem:[#allocation55_spill] sm:$0xff] }
 0x443   : > { %v4535_v13 = vpop.f32.mrf.mxu1  ;;  %v4728_v43 = vpop.f32.mrf.mxu0 }
 0x444   : > { %18180 = vst [vmem:[#allocation126_spill] sm:$0xff] %v15034_v5  ;;  %18182 = vst [vmem:[#allocation239_spill] sm:$0xff] %v15037_v37  ;;  %v15041_v52 = vadd.f32 %v4535_v13, %v4183_v46  ;;  %v15044_v2 = vadd.f32 %v4728_v43, %v18184_v51  ;;  %v18188_v5 = vld [vmem:[#allocation261_spill] sm:$0xff]  ;;  %v18189_v46 = vld [vmem:[#allocation184_spill] sm:$0xff] }
 0x445   : > { %v4537_v36 = vpop.f32.mrf.mxu1  ;;  %v4730_v17 = vpop.f32.mrf.mxu0  ;;  %v18190_v13 = vld [vmem:[#allocation116_spill] sm:$0xff]  ;;  %v18192_v51 = vld [vmem:[#allocation57_spill] sm:$0xff] }
 0x446   : > { %18185 = vst [vmem:[#allocation127_spill] sm:$0xff] %v15044_v2  ;;  %v15048_v59 = vadd.f32 %v4537_v36, %v4185_v42  ;;  %v15051_v16 = vadd.f32 %v4730_v17, %v18187_v10  ;;  %v4191_v43 = vadd.f32 %v18190_v13, %v13949_v49  ;;  %v10235_v17 = vld [vmem:[%s16785_s5 + $0x8] sm:$0xff]   ;;  %v4193_v42 = vadd.f32 %v14502_v26, %v13944_v27 }
 0x447   : > { %v4541_v44 = vpop.f32.mrf.mxu1  ;;  %v4734_v37 = vpop.f32.mrf.mxu0  ;;  %9253 = vmatmul.mubr.msk.bf16.gmra.mxu1 %vm2345_vm0, %v18188_v5  ;;  %6139 = vmatmul.mubr.bf16.gmra.mxu0 %v18189_v46  ;;  %v4195_v46 = vadd.f32 %v14508_v47, %v13949_v49  ;;  %v18202_v47 = vld [vmem:[#allocation190_spill] sm:$0xff] }
 0x448   : > { %v15058_v31 = vadd.f32 %v4541_v44, %v4189_v22  ;;  %v15061_v2 = vadd.f32 %v4734_v37, %v18192_v51  ;;  %6148 = vmatprep.mubr.bf16.mxu0 %v18194_v38  ;;  %5175 = vmatprep.mubr.bf16.mxu1 %v17902_v6  ;;  %v18197_v51 = vld [vmem:[#allocation117_spill] sm:$0xff] }
 0x449   : > { %v4543_v36 = vpop.f32.mrf.mxu1  ;;  %v4736_v5 = vpop.f32.mrf.mxu0  ;;  %7092 = vmatpush1.bf16.msra.mxu0 %v10235_v17  ;;  %v18200_v17 = vld [vmem:[#allocation59_spill] sm:$0xff] }
 0x44a   : > { %18191 = vst [vmem:[#allocation230_spill] sm:$0xff] %v15058_v31  ;;  %18193 = vst [vmem:[#allocation231_spill] sm:$0xff] %v15061_v2  ;;  %v15070_v10 = vadd.f32 %v4543_v36, %v4191_v43  ;;  %v15073_v22 = vadd.f32 %v4736_v5, %v14500_v19  ;;  %7093 = vmatprep.subr.bf16.mxu0 %v17902_v6  ;;  %v18199_v43 = vld [vmem:[#allocation199_spill] sm:$0xff]  ;;  %v18201_v31 = vld [vmem:[#allocation158_spill] sm:$0xff] }
 0x44b   : > { %v4545_v37 = vpop.f32.mrf.mxu1  ;;  %v4738_v44 = vpop.f32.mrf.mxu0  ;;  %v4199_v36 = vadd.f32 %v18199_v43, %v13944_v27  ;;  %v4203_v43 = vadd.f32 %v14531_v18, %v13944_v27 }
 0x44c   : > { %18195 = vst [vmem:[#allocation52_spill] sm:$0xff] %v15070_v10  ;;  %18196 = vst [vmem:[#allocation233_spill] sm:$0xff] %v15073_v22  ;;  %v15078_v13 = vadd.f32 %v4545_v37, %v4193_v42  ;;  %v15081_v38 = vadd.f32 %v4738_v44, %v18197_v51  ;;  %v18203_v42 = vld [vmem:[#allocation123_spill] sm:$0xff]  ;;  %v18205_v51 = vld [vmem:[#allocation122_spill] sm:$0xff] }
 0x44d   : > { %v4547_v2 = vpop.f32.mrf.mxu1  ;;  %v4740_v26 = vpop.f32.mrf.mxu0  ;;  %v4201_v37 = vadd.f32 %v18203_v42, %v13949_v49  ;;  %v18208_v42 = vld [vmem:[#allocation295_spill] sm:$0xff] }
 0x44e   : > { %18198 = vst [vmem:[#allocation19_spill] sm:$0xff] %v15081_v38  ;;  %v15085_v19 = vadd.f32 %v4547_v2, %v4195_v46  ;;  %v15088_v5 = vadd.f32 %v4740_v26, %v18200_v17  ;;  %v18207_v2 = vld [vmem:[#allocation198_spill] sm:$0xff] }
 0x44f   : > { %v4551_v22 = vpop.f32.mrf.mxu1  ;;  %v4744_v10 = vpop.f32.mrf.mxu0  ;;  %9254 = vmatmul.mubr.msk.bf16.gmra.mxu1 %vm2345_vm0, %v18201_v31  ;;  %6149 = vmatmul.mubr.bf16.gmra.mxu0 %v18202_v47 }
 0x450   : > { %v15095_v44 = vadd.f32 %v4551_v22, %v4199_v36  ;;  %v15098_v38 = vadd.f32 %v4744_v10, %v18205_v51  ;;  %6158 = vmatprep.mubr.bf16.mxu0 %v18207_v2  ;;  %5185 = vmatprep.mubr.bf16.mxu1 %v17902_v6  ;;  %v4205_v10 = vadd.f32 %v14537_v39, %v13949_v49  ;;  %v18214_v39 = vld [vmem:[#allocation298_spill] sm:$0xff] }
 0x451   : > { %v4553_v46 = vpop.f32.mrf.mxu1  ;;  %v4746_v26 = vpop.f32.mrf.mxu0 }
 0x452   : > { %18204 = vst [vmem:[#allocation85_spill] sm:$0xff] %v15095_v44  ;;  %18206 = vst [vmem:[#allocation54_spill] sm:$0xff] %v15098_v38  ;;  %v15104_v31 = vadd.f32 %v4553_v46, %v4201_v37  ;;  %v15107_v17 = vadd.f32 %v4746_v26, %v14529_v7  ;;  %v18211_v37 = vld [vmem:[#allocation269_spill] sm:$0xff]  ;;  %v18212_v46 = vld [vmem:[#allocation191_spill] sm:$0xff] }
 0x453   : > { %v4555_v47 = vpop.f32.mrf.mxu1  ;;  %v4748_v22 = vpop.f32.mrf.mxu0  ;;  %v10236_v26 = vld [vmem:[%s16785_s5] sm:$0xff]  }
 0x454   : > { %v15111_v36 = vadd.f32 %v4555_v47, %v4203_v43  ;;  %v15114_v51 = vadd.f32 %v4748_v22, %v18208_v42  ;;  %v18215_v43 = vld [vmem:[#allocation124_spill] sm:$0xff]  ;;  %v18216_v22 = vld [vmem:[#allocation125_spill] sm:$0xff]  ;;  %7094 = vmatpush1.bf16.msra.mxu0 %v10236_v26 }
 0x455   : > { %v4557_v2 = vpop.f32.mrf.mxu1  ;;  %v4750_v38 = vpop.f32.mrf.mxu0  ;;  %7095 = vmatprep.subr.bf16.mxu0 %v17902_v6 }
 0x456   : > { %v15116_v44 = vadd.f32 %v4557_v2, %v4205_v10  ;;  %v15119_v27 = vadd.f32 %v4750_v38, %v14541_v9 }
 0x457   : > { %v4754_v18 = vpop.f32.mrf.mxu0  ;;  %v4947_v7 = vpop.f32.mrf.mxu1  ;;  %9255 = vmatmul.mubr.msk.bf16.gmra.mxu1 %vm2345_vm0, %v18211_v37  ;;  %6159 = vmatmul.mubr.bf16.gmra.mxu0 %v18212_v46 }
 0x458   : > { %18209 = vst [vmem:[#allocation237_spill] sm:$0xff] %v15116_v44  ;;  %18210 = vst [vmem:[#allocation238_spill] sm:$0xff] %v15119_v27  ;;  %v15125_v49 = vadd.f32 %v4754_v18, %v14548_v0  ;;  %6168 = vmatprep.mubr.bf16.mxu0 %v18214_v39  ;;  %5195 = vmatprep.mubr.bf16.mxu1 %v17902_v6  ;;  %v4948_v47 = vadd.f32 %v4947_v7, %v18215_v43  ;;  %v18217_v0 = vld [vmem:[#allocation200_spill] sm:$0xff] }
 0x459   : > { %v4756_v9 = vpop.f32.mrf.mxu0  ;;  %v4949_v38 = vpop.f32.mrf.mxu1 }
 0x45a   : > { %18213 = vst [vmem:[#allocation21_spill] sm:$0xff] %v15125_v49  ;;  %v15134_v10 = vadd.f32 %v4756_v9, %v18216_v22  ;;  %v4950_v18 = vadd.f32 %v4949_v38, %v18217_v0  ;;  %v5268_v27 = vmax.f32 %v4948_v47, 0.0  ;;  %v18218_v22 = vld [vmem:[#allocation168_spill] sm:$0xff]  ;;  %v18219_v38 = vld [vmem:[#allocation61_spill] sm:$0xff]  ;;  %v18221_v47 = vld [vmem:[#allocation67_spill] sm:$0xff] }
 0x45b   : > { %v4758_v42 = vpop.f32.mrf.mxu0  ;;  %v4951_v2 = vpop.f32.mrf.mxu1  ;;  %v18222_v0 = vld [vmem:[#allocation206_spill] sm:$0xff] }
 0x45c   : > { %v15139_v37 = vadd.f32 %v4758_v42, %v14570_v29  ;;  %v4952_v46 = vadd.f32 %v4951_v2, %v14573_v28  ;;  %v5269_v29 = vmax.f32 %v4950_v18, 0.0 }
 0x45d   : > { %v4760_v39 = vpop.f32.mrf.mxu0  ;;  %v4953_v49 = vpop.f32.mrf.mxu1 }
 0x45e   : > { %v5272_v44 = vmax.f32 %v4952_v46, 0.0  ;;  %v15143_v7 = vadd.f32 %v4760_v39, %v14577_v45  ;;  %v4954_v26 = vadd.f32 %v4953_v49, %v14580_v40 }
 0x45f   : > { %v4764_v9 = vpop.f32.mrf.mxu0  ;;  %v4957_v43 = vpop.f32.mrf.mxu1  ;;  %9256 = vmatmul.mubr.msk.bf16.gmra.mxu1 %vm2345_vm0, %v18218_v22  ;;  %6169 = vmatmul.mubr.bf16.gmra.mxu0 %v18219_v38 }
 0x460   : > { %v15149_v42 = vpack.c.bf16 %v5272_v44, %v5268_v27  ;;  %v5273_v28 = vmax.f32 %v4954_v26, 0.0  ;;  %v15152_v2 = vadd.f32 %v4764_v9, %v14587_v56  ;;  %6178 = vmatprep.mubr.bf16.mxu0 %v18221_v47  ;;  %5205 = vmatprep.mubr.bf16.mxu1 %v17902_v6  ;;  %v4958_v49 = vadd.f32 %v4957_v43, %v14590_v14  ;;  %v18223_v27 = vld [vmem:[#allocation63_spill] sm:$0xff] }
 0x461   : > { %v4766_v45 = vpop.f32.mrf.mxu0  ;;  %v4959_v40 = vpop.f32.mrf.mxu1 }
 0x462   : > { %18220 = vst [vmem:[#allocation240_spill] sm:$0xff] %v15152_v2  ;;  %v15158_v46 = vadd.f32 %v4766_v45, %v18222_v0  ;;  %v15160_v39 = vpack.c.bf16 %v5273_v28, %v5269_v29  ;;  %v4960_v26 = vadd.f32 %v4959_v40, %v18223_v27  ;;  %v5276_v47 = vmax.f32 %v4958_v49, 0.0  ;;  %v18224_v45 = vld [vmem:[#allocation169_spill] sm:$0xff]  ;;  %v18225_v40 = vld [vmem:[#allocation299_spill] sm:$0xff]  ;;  %v18227_v27 = vld [vmem:[#allocation130_spill] sm:$0xff] }
 0x463   : > { %v4768_v18 = vpop.f32.mrf.mxu0  ;;  %v4961_v44 = vpop.f32.mrf.mxu1  ;;  %v18226_v49 = vld [vmem:[#allocation221_spill] sm:$0xff] }
 0x464   : > { %v15164_v56 = vadd.f32 %v4768_v18, %v14603_v21  ;;  %v4962_v9 = vadd.f32 %v4961_v44, %v14606_v4  ;;  %v5277_v21 = vmax.f32 %v4960_v26, 0.0 }
 0x465   : > { %v4770_v22 = vpop.f32.mrf.mxu0  ;;  %v4963_v38 = vpop.f32.mrf.mxu1 }
 0x466   : > { %v5280_v2 = vmax.f32 %v4962_v9, 0.0  ;;  %v15168_v14 = vadd.f32 %v4770_v22, %v14610_v35  ;;  %v4964_v43 = vadd.f32 %v4963_v38, %v14613_v34  ;;  %v10237_v35 = vld [vmem:[%s16785_s5 + $0x78] sm:$0xff]   ;;  %v18228_v22 = vld [vmem:[#allocation131_spill] sm:$0xff] }
 0x467   : > { %v4774_v29 = vpop.f32.mrf.mxu0  ;;  %v4967_v28 = vpop.f32.mrf.mxu1  ;;  %9257 = vmatmul.mubr.msk.bf16.gmra.mxu1 %vm2345_vm0, %v18224_v45  ;;  %6179 = vmatmul.mubr.bf16.gmra.mxu0 %v18225_v40 }
 0x468   : > { %v15174_v0 = vpack.c.bf16 %v5280_v2, %v5276_v47  ;;  %v5281_v4 = vmax.f32 %v4964_v43, 0.0  ;;  %v15177_v18 = vadd.f32 %v4774_v29, %v14620_v12  ;;  %6188 = vmatprep.mubr.bf16.mxu0 %v18226_v49  ;;  %5215 = vmatprep.mubr.bf16.mxu1 %v17902_v6  ;;  %v4968_v9 = vadd.f32 %v4967_v28, %v18227_v27  ;;  %v18230_v47 = vld [vmem:[#allocation207_spill] sm:$0xff] }
 0x469   : > { %v4776_v34 = vpop.f32.mrf.mxu0  ;;  %v4969_v44 = vpop.f32.mrf.mxu1  ;;  %7096 = vmatpush2.bf16.msra.mxu0 %v10237_v35 }
 0x46a   : > { %v15186_v26 = vadd.f32 %v4776_v34, %v18228_v22  ;;  %v15188_v2 = vpack.c.bf16 %v5281_v4, %v5277_v21  ;;  %7097 = vmatprep.subr.bf16.mxu0 %v17902_v6  ;;  %v4970_v43 = vadd.f32 %v4969_v44, %v18230_v47  ;;  %v5284_v28 = vmax.f32 %v4968_v9, 0.0  ;;  %v18233_v21 = vld [vmem:[#allocation132_spill] sm:$0xff]  ;;  %v18235_v44 = vld [vmem:[#allocation214_spill] sm:$0xff] }
 0x46b   : > { %v4778_v12 = vpop.f32.mrf.mxu0  ;;  %v4971_v38 = vpop.f32.mrf.mxu1  ;;  %v18238_v9 = vld [vmem:[#allocation302_spill] sm:$0xff] }
 0x46c   : > { %18229 = vst [vmem:[#allocation243_spill] sm:$0xff] %v15186_v26  ;;  %v15193_v29 = vadd.f32 %v4778_v12, %v14642_v60  ;;  %v4972_v45 = vadd.f32 %v4971_v38, %v14645_v50  ;;  %v18234_v26 = vld [vmem:[#allocation170_spill] sm:$0xff]  ;;  %v5285_v60 = vmax.f32 %v4970_v43, 0.0  ;;  %v18236_v38 = vld [vmem:[#allocation133_spill] sm:$0xff] }
 0x46d   : > { %v4780_v40 = vpop.f32.mrf.mxu0  ;;  %v4973_v49 = vpop.f32.mrf.mxu1 }
 0x46e   : > { %18231 = vst [vmem:[#allocation134_spill] sm:$0xff] %v15193_v29  ;;  %v5288_v27 = vmax.f32 %v4972_v45, 0.0  ;;  %v15197_v34 = vadd.f32 %v4780_v40, %v14649_v33  ;;  %v4974_v4 = vadd.f32 %v4973_v49, %v18233_v21  ;;  %v18239_v40 = vld [vmem:[#allocation65_spill] sm:$0xff] }
 0x46f   : > { %v4784_v35 = vpop.f32.mrf.mxu0  ;;  %v4977_v22 = vpop.f32.mrf.mxu1  ;;  %9258 = vmatmul.mubr.msk.bf16.gmra.mxu1 %vm2345_vm0, %v18234_v26  ;;  %6189 = vmatmul.mubr.bf16.gmra.mxu0 %v18235_v44  ;;  %v18240_v21 = vld [vmem:[#allocation69_spill] sm:$0xff] }
 0x470   : > { %18232 = vst [vmem:[#allocation244_spill] sm:$0xff] %v15197_v34  ;;  %v15203_v12 = vpack.c.bf16 %v5288_v27, %v5284_v28  ;;  %v5289_v50 = vmax.f32 %v4974_v4, 0.0  ;;  %v15206_v47 = vadd.f32 %v4784_v35, %v18236_v38  ;;  %6198 = vmatprep.mubr.bf16.mxu0 %v18238_v9  ;;  %5225 = vmatprep.mubr.bf16.mxu1 %v17902_v6  ;;  %v18241_v27 = vld [vmem:[#allocation138_spill] sm:$0xff] }
 0x471   : > { %v4786_v33 = vpop.f32.mrf.mxu0  ;;  %v4979_v45 = vpop.f32.mrf.mxu1  ;;  %v4978_v49 = vadd.f32 %v4977_v22, %v18239_v40  ;;  %v18242_v40 = vld [vmem:[#allocation43_spill] sm:$0xff] }
 0x472   : > { %18237 = vst [vmem:[#allocation245_spill] sm:$0xff] %v15206_v47  ;;  %v15212_v34 = vadd.f32 %v4786_v33, %v18240_v21  ;;  %v15214_v26 = vpack.c.bf16 %v5289_v50, %v5285_v60  ;;  %v4980_v4 = vadd.f32 %v4979_v45, %v18241_v27  ;;  %v18243_v45 = vld [vmem:[#allocation42_spill] sm:$0xff] }
 0x473   : > { %v4788_v43 = vpop.f32.mrf.mxu0  ;;  %v4981_v28 = vpop.f32.mrf.mxu1  ;;  %v5292_v47 = vmax.f32 %v4978_v49, 0.0  ;;  %v18246_v49 = vld [vmem:[#allocation111_spill] sm:$0xff] }
 0x474   : > { %v15218_v35 = vadd.f32 %v4788_v43, %v14675_v24  ;;  %v4982_v44 = vadd.f32 %v4981_v28, %v14678_v30  ;;  %v5293_v24 = vmax.f32 %v4980_v4, 0.0  ;;  %v18244_v43 = vld [vmem:[#allocation139_spill] sm:$0xff] }
 0x475   : > { %v4790_v38 = vpop.f32.mrf.mxu0  ;;  %v4983_v9 = vpop.f32.mrf.mxu1 }
 0x476   : > { %v5296_v29 = vmax.f32 %v4982_v44, 0.0  ;;  %v15222_v22 = vadd.f32 %v4790_v38, %v14682_v20  ;;  %v4984_v33 = vadd.f32 %v4983_v9, %v14685_v8  ;;  %v10238_v20 = vld [vmem:[%s16785_s5 + $0x70] sm:$0xff]   ;;  %v18248_v9 = vld [vmem:[#allocation140_spill] sm:$0xff] }
 0x477   : > { %v4794_v60 = vpop.f32.mrf.mxu0  ;;  %v4987_v50 = vpop.f32.mrf.mxu1  ;;  %9259 = vmatmul.mubr.msk.bf16.gmra.mxu1 %vm2345_vm0, %v18242_v40  ;;  %6199 = vmatmul.mubr.bf16.gmra.mxu0 %v18243_v45  ;;  %v18247_v44 = vld [vmem:[#allocation219_spill] sm:$0xff] }
 0x478   : > { %v15228_v21 = vpack.c.bf16 %v5296_v29, %v5292_v47  ;;  %v5297_v30 = vmax.f32 %v4984_v33, 0.0  ;;  %v15231_v28 = vadd.f32 %v4794_v60, %v18244_v43  ;;  %6208 = vmatprep.mubr.bf16.mxu0 %v18246_v49  ;;  %5235 = vmatprep.mubr.bf16.mxu1 %v17902_v6  ;;  %v4988_v38 = vadd.f32 %v4987_v50, %v18247_v44  ;;  %v18249_v60 = vld [vmem:[#allocation141_spill] sm:$0xff] }
 0x479   : > { %v4796_v8 = vpop.f32.mrf.mxu0  ;;  %v4989_v27 = vpop.f32.mrf.mxu1  ;;  %7098 = vmatpush2.bf16.msra.mxu0 %v10238_v20 }
 0x47a   : > { %18245 = vst [vmem:[#allocation56_spill] sm:$0xff] %v15231_v28  ;;  %v15240_v4 = vadd.f32 %v4796_v8, %v18248_v9  ;;  %v15242_v29 = vpack.c.bf16 %v5297_v30, %v5293_v24  ;;  %7099 = vmatprep.subr.bf16.mxu0 %v17902_v6  ;;  %v4990_v40 = vadd.f32 %v4989_v27, %v18249_v60  ;;  %v5300_v50 = vmax.f32 %v4988_v38, 0.0  ;;  %v18251_v9 = vld [vmem:[#allocation45_spill] sm:$0xff]  ;;  %v18252_v27 = vld [vmem:[#allocation226_spill] sm:$0xff]  ;;  %v18254_v38 = vld [vmem:[#allocation11_spill] sm:$0xff] }
 0x47b   : > { %v4798_v47 = vpop.f32.mrf.mxu0  ;;  %v4991_v33 = vpop.f32.mrf.mxu1 }
 0x47c   : > { %v15247_v45 = vadd.f32 %v4798_v47, %v14714_v1  ;;  %v4992_v43 = vadd.f32 %v4991_v33, %v14717_v11  ;;  %v5301_v1 = vmax.f32 %v4990_v40, 0.0 }
 0x47d   : > { %v4800_v49 = vpop.f32.mrf.mxu0  ;;  %v4993_v28 = vpop.f32.mrf.mxu1 }
 0x47e   : > { %v5304_v44 = vmax.f32 %v4992_v43, 0.0  ;;  %v15251_v8 = vadd.f32 %v4800_v49, %v14721_v53  ;;  %v4994_v24 = vadd.f32 %v4993_v28, %v14724_v54  ;;  %v18255_v28 = vld [vmem:[#allocation71_spill] sm:$0xff]  ;;  %v18256_v43 = vld [vmem:[#allocation222_spill] sm:$0xff] }
 0x47f   : > { %v4804_v30 = vpop.f32.mrf.mxu0  ;;  %v4997_v20 = vpop.f32.mrf.mxu1  ;;  %9260 = vmatmul.mubr.msk.bf16.gmra.mxu1 %vm2345_vm0, %v18251_v9  ;;  %6209 = vmatmul.mubr.bf16.gmra.mxu0 %v18252_v27 }
 0x480   : > { %18250 = vst [vmem:[#allocation247_spill] sm:$0xff] %v15251_v8  ;;  %v15257_v47 = vpack.c.bf16 %v5304_v44, %v5300_v50  ;;  %v5305_v11 = vmax.f32 %v4994_v24, 0.0  ;;  %v15260_v33 = vadd.f32 %v4804_v30, %v14731_v3  ;;  %6218 = vmatprep.mubr.bf16.mxu0 %v18254_v38  ;;  %5245 = vmatprep.mubr.bf16.mxu1 %v17902_v6  ;;  %v18258_v44 = vld [vmem:[#allocation73_spill] sm:$0xff] }
 0x481   : > { %v4806_v53 = vpop.f32.mrf.mxu0  ;;  %v4999_v54 = vpop.f32.mrf.mxu1  ;;  %v4998_v60 = vadd.f32 %v4997_v20, %v18255_v28 }
 0x482   : > { %18253 = vst [vmem:[#allocation135_spill] sm:$0xff] %v15260_v33  ;;  %v15266_v49 = vadd.f32 %v4806_v53, %v18256_v43  ;;  %v15268_v9 = vpack.c.bf16 %v5305_v11, %v5301_v1  ;;  %v5000_v24 = vadd.f32 %v4999_v54, %v18258_v44  ;;  %v18261_v53 = vld [vmem:[#allocation146_spill] sm:$0xff]  ;;  %v18262_v43 = vld [vmem:[#allocation49_spill] sm:$0xff]  ;;  %v18263_v54 = vld [vmem:[#allocation228_spill] sm:$0xff] }
 0x483   : > { %v4808_v40 = vpop.f32.mrf.mxu0  ;;  %v5001_v50 = vpop.f32.mrf.mxu1  ;;  %v5308_v33 = vmax.f32 %v4998_v60, 0.0  ;;  %v18266_v60 = vld [vmem:[#allocation77_spill] sm:$0xff] }
 0x484   : > { %18257 = vst [vmem:[#allocation89_spill] sm:$0xff] %v15266_v49  ;;  %v15272_v3 = vadd.f32 %v4808_v40, %v14747_v62  ;;  %v5002_v30 = vadd.f32 %v5001_v50, %v14750_v23  ;;  %v5309_v62 = vmax.f32 %v5000_v24, 0.0  ;;  %v18264_v50 = vld [vmem:[#allocation147_spill] sm:$0xff] }
 0x485   : > { %v4810_v27 = vpop.f32.mrf.mxu0  ;;  %v5003_v38 = vpop.f32.mrf.mxu1  ;;  %v18285_v49 = vld [vmem:[#allocation75_spill] sm:$0xff] }
 0x486   : > { %18259 = vst [vmem:[#allocation58_spill] sm:$0xff] %v15272_v3  ;;  %v5312_v8 = vmax.f32 %v5002_v30, 0.0  ;;  %v15276_v20 = vadd.f32 %v4810_v27, %v14754_v55  ;;  %v5004_v28 = vadd.f32 %v5003_v38, %v18261_v53  ;;  %v10239_v55 = vld [vmem:[%s16785_s5 + $0x68] sm:$0xff]   ;;  %v18267_v38 = vld [vmem:[#allocation9_spill] sm:$0xff] }
 0x487   : > { %v4814_v1 = vpop.f32.mrf.mxu0  ;;  %v5007_v11 = vpop.f32.mrf.mxu1  ;;  %9261 = vmatmul.mubr.msk.bf16.gmra.mxu1 %vm2345_vm0, %v18262_v43  ;;  %6219 = vmatmul.mubr.bf16.gmra.mxu0 %v18263_v54  ;;  %v18268_v43 = vld [vmem:[#allocation148_spill] sm:$0xff] }
 0x488   : > { %18260 = vst [vmem:[#allocation251_spill] sm:$0xff] %v15276_v20  ;;  %v15282_v40 = vpack.c.bf16 %v5312_v8, %v5308_v33  ;;  %v5313_v23 = vmax.f32 %v5004_v28, 0.0  ;;  %v15285_v44 = vadd.f32 %v4814_v1, %v18264_v50  ;;  %6228 = vmatprep.mubr.bf16.mxu0 %v18266_v60  ;;  %5255 = vmatprep.mubr.bf16.mxu1 %v17902_v6  ;;  %v18270_v1 = vld [vmem:[#allocation149_spill] sm:$0xff] }
 0x489   : > { %v4816_v30 = vpop.f32.mrf.mxu0  ;;  %v5009_v27 = vpop.f32.mrf.mxu1  ;;  %v5008_v53 = vadd.f32 %v5007_v11, %v18267_v38  ;;  %7100 = vmatpush2.bf16.msra.mxu0 %v10239_v55 }
 0x48a   : > { %18265 = vst [vmem:[#allocation252_spill] sm:$0xff] %v15285_v44  ;;  %v15294_v24 = vadd.f32 %v4816_v30, %v18268_v43  ;;  %v15296_v8 = vpack.c.bf16 %v5313_v23, %v5309_v62  ;;  %7101 = vmatprep.subr.bf16.mxu0 %v17902_v6  ;;  %v5010_v54 = vadd.f32 %v5009_v27, %v18270_v1  ;;  %v18273_v62 = vld [vmem:[#allocation223_spill] sm:$0xff]  ;;  %v18275_v27 = vld [vmem:[#allocation112_spill] sm:$0xff] }
 0x48b   : > { %v4818_v33 = vpop.f32.mrf.mxu0  ;;  %v5011_v28 = vpop.f32.mrf.mxu1  ;;  %v5316_v11 = vmax.f32 %v5008_v53, 0.0  ;;  %v18278_v53 = vld [vmem:[#allocation229_spill] sm:$0xff] }
 0x48c   : > { %18269 = vst [vmem:[#allocation23_spill] sm:$0xff] %v15294_v24  ;;  %v15301_v50 = vadd.f32 %v4818_v33, %v14786_v63  ;;  %v5012_v60 = vadd.f32 %v5011_v28, %v14789_v25  ;;  %v18274_v24 = vld [vmem:[#allocation53_spill] sm:$0xff]  ;;  %v5317_v63 = vmax.f32 %v5010_v54, 0.0  ;;  %v18276_v28 = vld [vmem:[#allocation154_spill] sm:$0xff] }
 0x48d   : > { %v4820_v44 = vpop.f32.mrf.mxu0  ;;  %v5013_v20 = vpop.f32.mrf.mxu1 }
 0x48e   : > { %18271 = vst [vmem:[#allocation254_spill] sm:$0xff] %v15301_v50  ;;  %v5320_v38 = vmax.f32 %v5012_v60, 0.0  ;;  %v15305_v30 = vadd.f32 %v4820_v44, %v14793_v15  ;;  %v5014_v23 = vadd.f32 %v5013_v20, %v18273_v62  ;;  %v18279_v44 = vld [vmem:[#allocation155_spill] sm:$0xff]  ;;  %v18280_v62 = vld [vmem:[#allocation156_spill] sm:$0xff] }
 0x48f   : > { %v4824_v55 = vpop.f32.mrf.mxu0  ;;  %v5017_v43 = vpop.f32.mrf.mxu1  ;;  %9262 = vmatmul.mubr.msk.bf16.gmra.mxu1 %vm2345_vm0, %v18274_v24  ;;  %6229 = vmatmul.mubr.bf16.gmra.mxu0 %v18275_v27  ;;  %v18282_v27 = vld [vmem:[#allocation163_spill] sm:$0xff] }
 0x490   : > { %18272 = vst [vmem:[#allocation25_spill] sm:$0xff] %v15305_v30  ;;  %v15311_v33 = vpack.c.bf16 %v5320_v38, %v5316_v11  ;;  %v5321_v25 = vmax.f32 %v5014_v23, 0.0  ;;  %v15314_v1 = vadd.f32 %v4824_v55, %v18276_v28  ;;  %6238 = vmatprep.mubr.bf16.mxu0 %v18278_v53  ;;  %6431 = vmatprep.mubr.bf16.mxu1 %v15160_v39  ;;  %v18281_v38 = vld [vmem:[#allocation157_spill] sm:$0xff]  ;;  %v18284_v28 = vld [vmem:[#allocation164_spill] sm:$0xff] }
 0x491   : > { %v4826_v15 = vpop.f32.mrf.mxu0  ;;  %v5019_v20 = vpop.f32.mrf.mxu1  ;;  %v5018_v60 = vadd.f32 %v5017_v43, %v18279_v44 }
 0x492   : > { %18277 = vst [vmem:[#allocation137_spill] sm:$0xff] %v15314_v1  ;;  %v15320_v30 = vadd.f32 %v4826_v15, %v18280_v62  ;;  %v15322_v24 = vpack.c.bf16 %v5321_v25, %v5317_v63  ;;  %v5020_v23 = vadd.f32 %v5019_v20, %v18281_v38  ;;  %v18287_v15 = vld [vmem:[#allocation165_spill] sm:$0xff]  ;;  %v18288_v62 = vld [vmem:[#allocation46_spill] sm:$0xff] }
 0x493   : > { %v4828_v54 = vpop.f32.mrf.mxu0  ;;  %v5021_v11 = vpop.f32.mrf.mxu1  ;;  %v5324_v50 = vmax.f32 %v5018_v60, 0.0  ;;  %v18291_v60 = vld [vmem:[#allocation118_spill] sm:$0xff] }
 0x494   : > { %v15326_v55 = vadd.f32 %v4828_v54, %v18282_v27  ;;  %v5022_v53 = vadd.f32 %v5021_v11, %v18284_v28  ;;  %v5325_v20 = vmax.f32 %v5020_v23, 0.0  ;;  %v18289_v11 = vld [vmem:[#allocation166_spill] sm:$0xff] }
 0x495   : > { %v4830_v1 = vpop.f32.mrf.mxu0  ;;  %v5023_v39 = vpop.f32.mrf.mxu1 }
 0x496   : > { %18283 = vst [vmem:[#allocation257_spill] sm:$0xff] %v15326_v55  ;;  %v5328_v3 = vmax.f32 %v5022_v53, 0.0  ;;  %v15330_v43 = vadd.f32 %v4830_v1, %v18285_v49  ;;  %v5024_v44 = vadd.f32 %v5023_v39, %v18287_v15  ;;  %v10240_v49 = vld [vmem:[%s16785_s5 + $0x60] sm:$0xff]   ;;  %v18292_v53 = vld [vmem:[#allocation44_spill] sm:$0xff] }
 0x497   : > { %v4834_v63 = vpop.f32.mrf.mxu0  ;;  %v5027_v25 = vpop.f32.mrf.mxu1  ;;  %6239 = vmatmul.mubr.bf16.gmra.mxu0 %v18288_v62  ;;  %6432 = vmatmul.mubr.bf16.vlgmr.msra.gmra.mxu1 %v15149_v42  ;;  %v18293_v42 = vld [vmem:[#allocation171_spill] sm:$0xff]  ;;  %v18302_v55 = vld [vmem:[#allocation13_spill] sm:$0xff] }
 0x498   : > { %18286 = vst [vmem:[#allocation258_spill] sm:$0xff] %v15330_v43  ;;  %v15335_v54 = vpack.c.bf16 %v5328_v3, %v5324_v50  ;;  %v5329_v38 = vmax.f32 %v5024_v44, 0.0  ;;  %v15338_v27 = vadd.f32 %v4834_v63, %v18289_v11  ;;  %6248 = vmatprep.mubr.bf16.mxu0 %v18291_v60  ;;  %6441 = vmatprep.mubr.bf16.mxu1 %v15188_v2  ;;  %v18295_v44 = vld [vmem:[#allocation172_spill] sm:$0xff]  ;;  %v18296_v63 = vld [vmem:[#allocation173_spill] sm:$0xff]  ;;  %v18298_v11 = vld [vmem:[#allocation174_spill] sm:$0xff] }
 0x499   : > { %v4836_v1 = vpop.f32.mrf.mxu0  ;;  %v5029_v28 = vpop.f32.mrf.mxu1  ;;  %v5028_v39 = vadd.f32 %v5027_v25, %v18292_v53  ;;  %7102 = vmatpush2.bf16.msra.mxu0 %v10240_v49 }
 0x49a   : > { %18290 = vst [vmem:[#allocation260_spill] sm:$0xff] %v15338_v27  ;;  %v15347_v23 = vadd.f32 %v4836_v1, %v18293_v42  ;;  %v15349_v3 = vpack.c.bf16 %v5329_v38, %v5325_v20  ;;  %7103 = vmatprep.subr.bf16.mxu0 %v17902_v6  ;;  %v5030_v2 = vadd.f32 %v5029_v28, %v18295_v44  ;;  %v18299_v1 = vld [vmem:[#allocation176_spill] sm:$0xff]  ;;  %v18301_v20 = vld [vmem:[#allocation177_spill] sm:$0xff] }
 0x49b   : > { %v4838_v50 = vpop.f32.mrf.mxu0  ;;  %v5031_v15 = vpop.f32.mrf.mxu1  ;;  %v5332_v25 = vmax.f32 %v5028_v39, 0.0  ;;  %v18305_v39 = vld [vmem:[#allocation119_spill] sm:$0xff] }
 0x49c   : > { %18294 = vst [vmem:[#allocation264_spill] sm:$0xff] %v15347_v23  ;;  %v15354_v62 = vadd.f32 %v4838_v50, %v18296_v63  ;;  %v5032_v60 = vadd.f32 %v5031_v15, %v18298_v11  ;;  %v5333_v28 = vmax.f32 %v5030_v2, 0.0  ;;  %v18303_v15 = vld [vmem:[#allocation178_spill] sm:$0xff] }
 0x49d   : > { %v4840_v27 = vpop.f32.mrf.mxu0  ;;  %v5033_v43 = vpop.f32.mrf.mxu1 }
 0x49e   : > { %18297 = vst [vmem:[#allocation265_spill] sm:$0xff] %v15354_v62  ;;  %v5336_v53 = vmax.f32 %v5032_v60, 0.0  ;;  %v15358_v42 = vadd.f32 %v4840_v27, %v18299_v1  ;;  %v5034_v38 = vadd.f32 %v5033_v43, %v18301_v20  ;;  %v18306_v43 = vld [vmem:[#allocation179_spill] sm:$0xff]  ;;  %v18308_v20 = vld [vmem:[#allocation181_spill] sm:$0xff] }
 0x49f   : > { %v4844_v49 = vpop.f32.mrf.mxu0  ;;  %v5037_v23 = vpop.f32.mrf.mxu1  ;;  %6249 = vmatmul.mubr.bf16.gmra.mxu0 %v18302_v55  ;;  %6442 = vmatmul.mubr.bf16.gmra.mxu1 %v15174_v0  ;;  %v18310_v62 = vld [vmem:[#allocation183_spill] sm:$0xff] }
 0x4a0   : > { %18300 = vst [vmem:[#allocation267_spill] sm:$0xff] %v15358_v42  ;;  %v15363_v50 = vpack.c.bf16 %v5336_v53, %v5332_v25  ;;  %v5337_v44 = vmax.f32 %v5034_v38, 0.0  ;;  %v15366_v63 = vadd.f32 %v4844_v49, %v18303_v15  ;;  %6258 = vmatprep.mubr.bf16.mxu0 %v18305_v39  ;;  %6451 = vmatprep.mubr.bf16.mxu1 %v15214_v26  ;;  %v18307_v25 = vld [vmem:[#allocation180_spill] sm:$0xff]  ;;  %v18309_v49 = vld [vmem:[#allocation182_spill] sm:$0xff] }
 0x4a1   : > { %v4846_v27 = vpop.f32.mrf.mxu0  ;;  %v5039_v11 = vpop.f32.mrf.mxu1  ;;  %v5038_v60 = vadd.f32 %v5037_v23, %v18306_v43  ;;  %v18313_v43 = vld [vmem:[#allocation232_spill] sm:$0xff] }
 0x4a2   : > { %18304 = vst [vmem:[#allocation253_spill] sm:$0xff] %v15366_v63  ;;  %v15372_v1 = vadd.f32 %v4846_v27, %v14892_v57  ;;  %v15374_v55 = vpack.c.bf16 %v5337_v44, %v5333_v28  ;;  %v5040_v53 = vadd.f32 %v5039_v11, %v18307_v25  ;;  %v18312_v57 = vld [vmem:[#allocation185_spill] sm:$0xff] }
 0x4a3   : > { %v4848_v0 = vpop.f32.mrf.mxu0  ;;  %v5041_v2 = vpop.f32.mrf.mxu1  ;;  %v5340_v63 = vmax.f32 %v5038_v60, 0.0  ;;  %v18316_v60 = vld [vmem:[#allocation79_spill] sm:$0xff] }
 0x4a4   : > { %v15378_v38 = vadd.f32 %v4848_v0, %v18308_v20  ;;  %v5042_v15 = vadd.f32 %v5041_v2, %v18309_v49  ;;  %v5341_v11 = vmax.f32 %v5040_v53, 0.0  ;;  %v18314_v2 = vld [vmem:[#allocation186_spill] sm:$0xff] }
 0x4a5   : > { %v4850_v39 = vpop.f32.mrf.mxu0  ;;  %v5043_v26 = vpop.f32.mrf.mxu1 }
 0x4a6   : > { %v5344_v42 = vmax.f32 %v5042_v15, 0.0  ;;  %v15382_v23 = vadd.f32 %v4850_v39, %v18310_v62  ;;  %v5044_v27 = vadd.f32 %v5043_v26, %v18312_v57  ;;  %v10241_v62 = vld [vmem:[%s16785_s5 + $0x58] sm:$0xff]  }
 0x4a7   : > { %v4854_v28 = vpop.f32.mrf.mxu0  ;;  %v5047_v44 = vpop.f32.mrf.mxu1  ;;  %6259 = vmatmul.mubr.bf16.gmra.mxu0 %v18313_v43  ;;  %6452 = vmatmul.mubr.bf16.gmra.mxu1 %v15203_v12  ;;  %v18317_v39 = vld [vmem:[#allocation188_spill] sm:$0xff]  ;;  %v18318_v12 = vld [vmem:[#allocation189_spill] sm:$0xff]  ;;  %v18321_v43 = vld [vmem:[#allocation194_spill] sm:$0xff] }
 0x4a8   : > { %18311 = vst [vmem:[#allocation93_spill] sm:$0xff] %v15382_v23  ;;  %v15387_v0 = vpack.c.bf16 %v5344_v42, %v5340_v63  ;;  %v5345_v25 = vmax.f32 %v5044_v27, 0.0  ;;  %v15390_v20 = vadd.f32 %v4854_v28, %v18314_v2  ;;  %6268 = vmatprep.mubr.bf16.mxu0 %v18316_v60  ;;  %6461 = vmatprep.mubr.bf16.mxu1 %v15242_v29  ;;  %v18320_v27 = vld [vmem:[#allocation193_spill] sm:$0xff]  ;;  %v18325_v23 = vld [vmem:[#allocation234_spill] sm:$0xff] }
 0x4a9   : > { %v4856_v49 = vpop.f32.mrf.mxu0  ;;  %v5049_v15 = vpop.f32.mrf.mxu1  ;;  %v5048_v26 = vadd.f32 %v5047_v44, %v18317_v39  ;;  %7104 = vmatpush2.bf16.msra.mxu0 %v10241_v62 }
 0x4aa   : > { %18315 = vst [vmem:[#allocation270_spill] sm:$0xff] %v15390_v20  ;;  %v15399_v53 = vadd.f32 %v4856_v49, %v18318_v12  ;;  %v15401_v42 = vpack.c.bf16 %v5345_v25, %v5341_v11  ;;  %7105 = vmatprep.subr.bf16.mxu0 %v17902_v6  ;;  %v5050_v29 = vadd.f32 %v5049_v15, %v18320_v27  ;;  %v18322_v49 = vld [vmem:[#allocation196_spill] sm:$0xff]  ;;  %v18324_v11 = vld [vmem:[#allocation197_spill] sm:$0xff] }
 0x4ab   : > { %v4858_v63 = vpop.f32.mrf.mxu0  ;;  %v5051_v57 = vpop.f32.mrf.mxu1  ;;  %v5348_v44 = vmax.f32 %v5048_v26, 0.0  ;;  %v18328_v26 = vld [vmem:[#allocation15_spill] sm:$0xff] }
 0x4ac   : > { %18319 = vst [vmem:[#allocation271_spill] sm:$0xff] %v15399_v53  ;;  %v15406_v28 = vadd.f32 %v4858_v63, %v14938_v61  ;;  %v5052_v2 = vadd.f32 %v5051_v57, %v18321_v43  ;;  %v5349_v15 = vmax.f32 %v5050_v29, 0.0  ;;  %v18326_v57 = vld [vmem:[#allocation201_spill] sm:$0xff] }
 0x4ad   : > { %v4860_v60 = vpop.f32.mrf.mxu0  ;;  %v5053_v20 = vpop.f32.mrf.mxu1 }
 0x4ae   : > { %v5352_v39 = vmax.f32 %v5052_v2, 0.0  ;;  %v15410_v12 = vadd.f32 %v4860_v60, %v18322_v49  ;;  %v5054_v25 = vadd.f32 %v5053_v20, %v18324_v11  ;;  %v18329_v20 = vld [vmem:[#allocation202_spill] sm:$0xff]  ;;  %v18330_v49 = vld [vmem:[#allocation204_spill] sm:$0xff] }
 0x4af   : > { %v4864_v62 = vpop.f32.mrf.mxu0  ;;  %v5057_v53 = vpop.f32.mrf.mxu1  ;;  %6269 = vmatmul.mubr.bf16.gmra.mxu0 %v18325_v23  ;;  %6462 = vmatmul.mubr.bf16.gmra.mxu1 %v15228_v21 }
 0x4b0   : > { %18323 = vst [vmem:[#allocation143_spill] sm:$0xff] %v15410_v12  ;;  %v15415_v61 = vpack.c.bf16 %v5352_v39, %v5348_v44  ;;  %v5353_v63 = vmax.f32 %v5054_v25, 0.0  ;;  %v15418_v27 = vadd.f32 %v4864_v62, %v18326_v57  ;;  %6278 = vmatprep.mubr.bf16.mxu0 %v18328_v26  ;;  %6471 = vmatprep.mubr.bf16.mxu1 %v15268_v9  ;;  %v18331_v44 = vld [vmem:[#allocation205_spill] sm:$0xff] }
 0x4b1   : > { %v4866_v43 = vpop.f32.mrf.mxu0  ;;  %v5059_v2 = vpop.f32.mrf.mxu1  ;;  %v5058_v60 = vadd.f32 %v5057_v53, %v18329_v20  ;;  %v18332_v62 = vld [vmem:[#allocation209_spill] sm:$0xff] }
 0x4b2   : > { %18327 = vst [vmem:[#allocation273_spill] sm:$0xff] %v15418_v27  ;;  %v15424_v11 = vadd.f32 %v4866_v43, %v18330_v49  ;;  %v15426_v23 = vpack.c.bf16 %v5353_v63, %v5349_v15  ;;  %v5060_v39 = vadd.f32 %v5059_v2, %v18331_v44  ;;  %v18333_v43 = vld [vmem:[#allocation210_spill] sm:$0xff]  ;;  %v18334_v49 = vld [vmem:[#allocation48_spill] sm:$0xff] }
 0x4b3   : > { %v4868_v21 = vpop.f32.mrf.mxu0  ;;  %v5061_v29 = vpop.f32.mrf.mxu1  ;;  %v5356_v27 = vmax.f32 %v5058_v60, 0.0  ;;  %v18337_v60 = vld [vmem:[#allocation81_spill] sm:$0xff] }
 0x4b4   : > { %v15430_v25 = vadd.f32 %v4868_v21, %v14971_v32  ;;  %v5062_v57 = vadd.f32 %v5061_v29, %v18332_v62  ;;  %v5357_v2 = vmax.f32 %v5060_v39, 0.0  ;;  %v18335_v29 = vld [vmem:[#allocation212_spill] sm:$0xff] }
 0x4b5   : > { %v4870_v26 = vpop.f32.mrf.mxu0  ;;  %v5063_v9 = vpop.f32.mrf.mxu1 }
 0x4b6   : > { %v5360_v12 = vmax.f32 %v5062_v57, 0.0  ;;  %v15434_v53 = vadd.f32 %v4870_v26, %v14978_v41  ;;  %v5064_v20 = vadd.f32 %v5063_v9, %v18333_v43  ;;  %v10242_v41 = vld [vmem:[%s16785_s5 + $0x50] sm:$0xff]   ;;  %v18338_v26 = vld [vmem:[#allocation213_spill] sm:$0xff] }
 0x4b7   : > { %v4874_v15 = vpop.f32.mrf.mxu0  ;;  %v5067_v63 = vpop.f32.mrf.mxu1  ;;  %6279 = vmatmul.mubr.bf16.gmra.mxu0 %v18334_v49  ;;  %6472 = vmatmul.mubr.bf16.gmra.mxu1 %v15257_v47  ;;  %v18340_v43 = vld [vmem:[#allocation217_spill] sm:$0xff] }
 0x4b8   : > { %v15439_v32 = vpack.c.bf16 %v5360_v12, %v5356_v27  ;;  %v5361_v21 = vmax.f32 %v5064_v20, 0.0  ;;  %v15442_v44 = vadd.f32 %v4874_v15, %v18335_v29  ;;  %6288 = vmatprep.mubr.bf16.mxu0 %v18337_v60  ;;  %6481 = vmatprep.mubr.bf16.mxu1 %v15296_v8  ;;  %v5068_v9 = vadd.f32 %v5067_v63, %v18338_v26  ;;  %v18341_v15 = vld [vmem:[#allocation218_spill] sm:$0xff] }
 0x4b9   : > { %v4876_v62 = vpop.f32.mrf.mxu0  ;;  %v5069_v57 = vpop.f32.mrf.mxu1  ;;  %7106 = vmatpush2.bf16.msra.mxu0 %v10242_v41 }
 0x4ba   : > { %18336 = vst [vmem:[#allocation144_spill] sm:$0xff] %v15442_v44  ;;  %v15451_v47 = vadd.f32 %v4876_v62, %v15000_v58  ;;  %v15453_v12 = vpack.c.bf16 %v5361_v21, %v5357_v2  ;;  %7107 = vmatprep.subr.bf16.mxu0 %v17902_v6  ;;  %v5070_v8 = vadd.f32 %v5069_v57, %v18340_v43  ;;  %v5364_v63 = vmax.f32 %v5068_v9, 0.0  ;;  %v18342_v58 = vld [vmem:[#allocation220_spill] sm:$0xff]  ;;  %v18348_v9 = vld [vmem:[#allocation235_spill] sm:$0xff] }
 0x4bb   : > { %v4878_v27 = vpop.f32.mrf.mxu0  ;;  %v5071_v39 = vpop.f32.mrf.mxu1  ;;  %v18344_v2 = vld [vmem:[#allocation224_spill] sm:$0xff] }
 0x4bc   : > { %18339 = vst [vmem:[#allocation276_spill] sm:$0xff] %v15451_v47  ;;  %v15458_v20 = vadd.f32 %v4878_v27, %v15008_v48  ;;  %v5072_v49 = vadd.f32 %v5071_v39, %v18341_v15  ;;  %v18345_v44 = vld [vmem:[#allocation120_spill] sm:$0xff]  ;;  %v5365_v57 = vmax.f32 %v5070_v8, 0.0  ;;  %v18346_v39 = vld [vmem:[#allocation225_spill] sm:$0xff] }
 0x4bd   : > { %v4880_v29 = vpop.f32.mrf.mxu0  ;;  %v5073_v60 = vpop.f32.mrf.mxu1 }
 0x4be   : > { %v5368_v26 = vmax.f32 %v5072_v49, 0.0  ;;  %v15462_v62 = vadd.f32 %v4880_v29, %v18342_v58  ;;  %v5074_v21 = vadd.f32 %v5073_v60, %v18344_v2  ;;  %v18349_v29 = vld [vmem:[#allocation227_spill] sm:$0xff]  ;;  %v18350_v58 = vld [vmem:[#allocation126_spill] sm:$0xff] }
 0x4bf   : > { %v4884_v41 = vpop.f32.mrf.mxu0  ;;  %v5077_v47 = vpop.f32.mrf.mxu1  ;;  %6289 = vmatmul.mubr.bf16.gmra.mxu0 %v18345_v44  ;;  %6482 = vmatmul.mubr.bf16.gmra.mxu1 %v15282_v40 }
 0x4c0   : > { %18343 = vst [vmem:[#allocation277_spill] sm:$0xff] %v15462_v62  ;;  %v15467_v48 = vpack.c.bf16 %v5368_v26, %v5364_v63  ;;  %v5369_v27 = vmax.f32 %v5074_v21, 0.0  ;;  %v15470_v43 = vadd.f32 %v4884_v41, %v18346_v39  ;;  %6298 = vmatprep.mubr.bf16.mxu0 %v18348_v9  ;;  %6491 = vmatprep.mubr.bf16.mxu1 %v15322_v24  ;;  %v18351_v63 = vld [vmem:[#allocation239_spill] sm:$0xff] }
 0x4c1   : > { %v4886_v15 = vpop.f32.mrf.mxu0  ;;  %v5079_v49 = vpop.f32.mrf.mxu1  ;;  %v5078_v60 = vadd.f32 %v5077_v47, %v18349_v29  ;;  %v18352_v41 = vld [vmem:[#allocation127_spill] sm:$0xff]  ;;  %v18353_v29 = vld [vmem:[#allocation50_spill] sm:$0xff] }
 0x4c2   : > { %18347 = vst [vmem:[#allocation278_spill] sm:$0xff] %v15470_v43  ;;  %v15476_v2 = vadd.f32 %v4886_v15, %v18350_v58  ;;  %v15478_v44 = vpack.c.bf16 %v5369_v27, %v5365_v57  ;;  %v5080_v26 = vadd.f32 %v5079_v49, %v18351_v63 }
 0x4c3   : > { %v4888_v40 = vpop.f32.mrf.mxu0  ;;  %v5081_v8 = vpop.f32.mrf.mxu1  ;;  %v5372_v43 = vmax.f32 %v5078_v60, 0.0  ;;  %v18355_v60 = vld [vmem:[#allocation236_spill] sm:$0xff] }
 0x4c4   : > { %v15482_v21 = vadd.f32 %v4888_v40, %v15041_v52  ;;  %v5082_v39 = vadd.f32 %v5081_v8, %v18352_v41  ;;  %v5373_v49 = vmax.f32 %v5080_v26, 0.0  ;;  %v18354_v40 = vld [vmem:[#allocation230_spill] sm:$0xff]  ;;  %v18356_v41 = vld [vmem:[#allocation231_spill] sm:$0xff] }
 0x4c5   : > { %v4890_v9 = vpop.f32.mrf.mxu0  ;;  %v5083_v24 = vpop.f32.mrf.mxu1 }
 0x4c6   : > { %v5376_v62 = vmax.f32 %v5082_v39, 0.0  ;;  %v15486_v47 = vadd.f32 %v4890_v9, %v15048_v59  ;;  %v5084_v15 = vadd.f32 %v5083_v24, %v15051_v16  ;;  %v10243_v59 = vld [vmem:[%s16785_s5 + $0x48] sm:$0xff]   ;;  %v18358_v24 = vld [vmem:[#allocation233_spill] sm:$0xff] }
 0x4c7   : > { %v4894_v57 = vpop.f32.mrf.mxu0  ;;  %v5087_v27 = vpop.f32.mrf.mxu1  ;;  %6299 = vmatmul.mubr.bf16.gmra.mxu0 %v18353_v29  ;;  %6492 = vmatmul.mubr.bf16.gmra.mxu1 %v15311_v33  ;;  %v18357_v33 = vld [vmem:[#allocation52_spill] sm:$0xff] }
 0x4c8   : > { %v15491_v52 = vpack.c.bf16 %v5376_v62, %v5372_v43  ;;  %v5377_v58 = vmax.f32 %v5084_v15, 0.0  ;;  %v15494_v8 = vadd.f32 %v4894_v57, %v18354_v40  ;;  %6308 = vmatprep.mubr.bf16.mxu0 %v18355_v60  ;;  %6501 = vmatprep.mubr.bf16.mxu1 %v15349_v3  ;;  %v5088_v39 = vadd.f32 %v5087_v27, %v18356_v41  ;;  %v18359_v57 = vld [vmem:[#allocation19_spill] sm:$0xff] }
 0x4c9   : > { %v4896_v16 = vpop.f32.mrf.mxu0  ;;  %v5089_v63 = vpop.f32.mrf.mxu1  ;;  %7108 = vmatpush2.bf16.msra.mxu0 %v10243_v59 }
 0x4ca   : > { %v15503_v26 = vadd.f32 %v4896_v16, %v18357_v33  ;;  %v15505_v62 = vpack.c.bf16 %v5377_v58, %v5373_v49  ;;  %7109 = vmatprep.subr.bf16.mxu0 %v17902_v6  ;;  %v5090_v3 = vadd.f32 %v5089_v63, %v18358_v24  ;;  %v5380_v27 = vmax.f32 %v5088_v39, 0.0  ;;  %v18360_v33 = vld [vmem:[#allocation17_spill] sm:$0xff] }
 0x4cb   : > { %v4898_v43 = vpop.f32.mrf.mxu0  ;;  %v5091_v9 = vpop.f32.mrf.mxu1  ;;  %v18362_v39 = vld [vmem:[#allocation241_spill] sm:$0xff] }
 0x4cc   : > { %v15510_v15 = vadd.f32 %v4898_v43, %v15078_v13  ;;  %v5092_v29 = vadd.f32 %v5091_v9, %v18359_v57  ;;  %v5381_v6 = vmax.f32 %v5090_v3, 0.0  ;;  %v18361_v43 = vld [vmem:[#allocation85_spill] sm:$0xff] }
 0x4cd   : > { %v4900_v40 = vpop.f32.mrf.mxu0  ;;  %v5093_v60 = vpop.f32.mrf.mxu1 }
 0x4ce   : > { %v5384_v41 = vmax.f32 %v5092_v29, 0.0  ;;  %v15514_v16 = vadd.f32 %v4900_v40, %v15085_v19  ;;  %v5094_v49 = vadd.f32 %v5093_v60, %v15088_v5  ;;  %v18363_v5 = vld [vmem:[#allocation54_spill] sm:$0xff] }
 0x4cf   : > { %v4904_v58 = vpop.f32.mrf.mxu0  ;;  %v5097_v59 = vpop.f32.mrf.mxu1  ;;  %6309 = vmatmul.mubr.bf16.gmra.mxu0 %v18360_v33  ;;  %6502 = vmatmul.mubr.bf16.gmra.mxu1 %v15335_v54 }
 0x4d0   : > { %v15519_v13 = vpack.c.bf16 %v5384_v41, %v5380_v27  ;;  %v5385_v63 = vmax.f32 %v5094_v49, 0.0  ;;  %v15522_v9 = vadd.f32 %v4904_v58, %v18361_v43  ;;  %6318 = vmatprep.mubr.bf16.mxu0 %v18362_v39  ;;  %6511 = vmatprep.mubr.bf16.mxu1 %v15374_v55  ;;  %v5098_v57 = vadd.f32 %v5097_v59, %v18363_v5  ;;  %v18364_v43 = vld [vmem:[#allocation237_spill] sm:$0xff] }
 0x4d1   : > { %v4906_v19 = vpop.f32.mrf.mxu0  ;;  %v5099_v24 = vpop.f32.mrf.mxu1  ;;  %v10244_v5 = vld [vmem:[%s16785_s5 + $0x40] sm:$0xff]  }
 0x4d2   : > { %v15528_v29 = vadd.f32 %v4906_v19, %v15104_v31  ;;  %v15530_v40 = vpack.c.bf16 %v5385_v63, %v5381_v6  ;;  %v5100_v60 = vadd.f32 %v5099_v24, %v15107_v17  ;;  %v5388_v58 = vmax.f32 %v5098_v57, 0.0  ;;  %v18365_v31 = vld [vmem:[#allocation238_spill] sm:$0xff]  ;;  %v18366_v19 = vld [vmem:[#allocation83_spill] sm:$0xff]  ;;  %v18367_v24 = vld [vmem:[#allocation129_spill] sm:$0xff]  ;;  %7110 = vmatpush2.bf16.msra.mxu0 %v10244_v5 }
 0x4d3   : > { %v4908_v54 = vpop.f32.mrf.mxu0  ;;  %v5101_v3 = vpop.f32.mrf.mxu1  ;;  %v18370_v5 = vld [vmem:[#allocation246_spill] sm:$0xff] }
 0x4d4   : > { %v15534_v27 = vadd.f32 %v4908_v54, %v15111_v36  ;;  %v5102_v41 = vadd.f32 %v5101_v3, %v15114_v51  ;;  %v5389_v17 = vmax.f32 %v5100_v60, 0.0  ;;  %v18368_v3 = vld [vmem:[#allocation21_spill] sm:$0xff] }
 0x4d5   : > { %v4910_v49 = vpop.f32.mrf.mxu0  ;;  %v5103_v55 = vpop.f32.mrf.mxu1 }
 0x4d6   : > { %v5392_v33 = vmax.f32 %v5102_v41, 0.0  ;;  %v15538_v59 = vadd.f32 %v4910_v49, %v18364_v43  ;;  %v5104_v39 = vadd.f32 %v5103_v55, %v18365_v31 }
 0x4d7   : > { %v5107_v6 = vpop.f32.mrf.mxu1  ;;  %v15541_v63 = vpop.f32.mrf.mxu0  ;;  %6319 = vmatmul.mubr.bf16.gmra.mxu0 %v18366_v19  ;;  %6512 = vmatmul.mubr.bf16.gmra.mxu1 %v15363_v50 }
 0x4d8   : > { %v15545_v36 = vpack.c.bf16 %v5392_v33, %v5388_v58  ;;  %v5393_v51 = vmax.f32 %v5104_v39, 0.0  ;;  %6328 = vmatprep.mubr.bf16.mxu0 %v18367_v24  ;;  %6521 = vmatprep.mubr.bf16.mxu1 %v15401_v42  ;;  %v5108_v41 = vadd.f32 %v5107_v6, %v18368_v3  ;;  %v18369_v6 = vld [vmem:[#allocation128_spill] sm:$0xff] }
 0x4d9   : > { %v5109_v57 = vpop.f32.mrf.mxu1  ;;  %v15552_v54 = vpop.f32.mrf.mxu0  ;;  %v18371_v3 = vld [vmem:[#allocation240_spill] sm:$0xff] }
 0x4da   : > { %v15555_v49 = vpack.c.bf16 %v5393_v51, %v5389_v17  ;;  %v5110_v55 = vadd.f32 %v5109_v57, %v15134_v10  ;;  %v5396_v43 = vmax.f32 %v5108_v41, 0.0 }
 0x4db   : > { %v5111_v50 = vpop.f32.mrf.mxu1  ;;  %v15557_v60 = vpop.f32.mrf.mxu0 }
 0x4dc   : > { %v5112_v58 = vadd.f32 %v5111_v50, %v15139_v37  ;;  %v5397_v17 = vmax.f32 %v5110_v55, 0.0 }
 0x4dd   : > { %v5113_v42 = vpop.f32.mrf.mxu1  ;;  %v15561_v33 = vpop.f32.mrf.mxu0 }
 0x4de   : > { %v5400_v31 = vmax.f32 %v5112_v58, 0.0  ;;  %v5114_v39 = vadd.f32 %v5113_v42, %v15143_v7 }
 0x4df   : > { %v5117_v19 = vpop.f32.mrf.mxu1  ;;  %v15564_v24 = vpop.f32.mrf.mxu0  ;;  %6329 = vmatmul.mubr.bf16.gmra.mxu0 %v18369_v6  ;;  %6522 = vmatmul.mubr.bf16.gmra.mxu1 %v15387_v0 }
 0x4e0   : > { %v15568_v51 = vpack.c.bf16 %v5400_v31, %v5396_v43  ;;  %v5401_v10 = vmax.f32 %v5114_v39, 0.0  ;;  %6338 = vmatprep.mubr.bf16.mxu0 %v18370_v5  ;;  %6531 = vmatprep.mubr.bf16.mxu1 %v15426_v23  ;;  %v5118_v7 = vadd.f32 %v5117_v19, %v18371_v3  ;;  %v18374_v19 = vld [vmem:[#allocation87_spill] sm:$0xff] }
 0x4e1   : > { %v5119_v37 = vpop.f32.mrf.mxu1  ;;  %v15572_v57 = vpop.f32.mrf.mxu0 }
 0x4e2   : > { %v15575_v41 = vpack.c.bf16 %v5401_v10, %v5397_v17  ;;  %v5120_v0 = vadd.f32 %v5119_v37, %v15158_v46  ;;  %v5404_v31 = vmax.f32 %v5118_v7, 0.0  ;;  %v18375_v37 = vld [vmem:[#allocation249_spill] sm:$0xff] }
 0x4e3   : > { %v5121_v50 = vpop.f32.mrf.mxu1  ;;  %v15577_v58 = vpop.f32.mrf.mxu0 }
 0x4e4   : > { %v5122_v55 = vadd.f32 %v5121_v50, %v15164_v56  ;;  %v5405_v17 = vmax.f32 %v5120_v0, 0.0  ;;  %v18378_v0 = vld [vmem:[#allocation134_spill] sm:$0xff] }
 0x4e5   : > { %v5123_v42 = vpop.f32.mrf.mxu1  ;;  %v15581_v43 = vpop.f32.mrf.mxu0 }
 0x4e6   : > { %18372 = vst [vmem:[#allocation283_spill] sm:$0xff] %v15581_v43  ;;  %v5408_v39 = vmax.f32 %v5122_v55, 0.0  ;;  %v5124_v23 = vadd.f32 %v5123_v42, %v15168_v14  ;;  %v18377_v42 = vld [vmem:[#allocation243_spill] sm:$0xff] }
 0x4e7   : > { %v5127_v6 = vpop.f32.mrf.mxu1  ;;  %v15584_v5 = vpop.f32.mrf.mxu0  ;;  %6339 = vmatmul.mubr.bf16.gmra.mxu0 %v18374_v19  ;;  %6532 = vmatmul.mubr.bf16.gmra.mxu1 %v15415_v61 }
 0x4e8   : > { %18373 = vst [vmem:[#allocation284_spill] sm:$0xff] %v15584_v5  ;;  %v15588_v10 = vpack.c.bf16 %v5408_v39, %v5404_v31  ;;  %v5409_v46 = vmax.f32 %v5124_v23, 0.0  ;;  %6348 = vmatprep.mubr.bf16.mxu0 %v18375_v37  ;;  %6541 = vmatprep.mubr.bf16.mxu1 %v15453_v12  ;;  %v5128_v14 = vadd.f32 %v5127_v6, %v15177_v18  ;;  %v18379_v12 = vld [vmem:[#allocation244_spill] sm:$0xff] }
 0x4e9   : > { %v5129_v56 = vpop.f32.mrf.mxu1  ;;  %v15592_v3 = vpop.f32.mrf.mxu0  ;;  %v18380_v18 = vld [vmem:[#allocation248_spill] sm:$0xff] }
 0x4ea   : > { %18376 = vst [vmem:[#allocation285_spill] sm:$0xff] %v15592_v3  ;;  %v15595_v7 = vpack.c.bf16 %v5409_v46, %v5405_v17  ;;  %v5130_v61 = vadd.f32 %v5129_v56, %v18377_v42  ;;  %v5412_v19 = vmax.f32 %v5128_v14, 0.0  ;;  %v18381_v56 = vld [vmem:[#allocation91_spill] sm:$0xff]  ;;  %v18383_v42 = vld [vmem:[#allocation245_spill] sm:$0xff] }
 0x4eb   : > { %v5131_v50 = vpop.f32.mrf.mxu1  ;;  %v15597_v55 = vpop.f32.mrf.mxu0 }
 0x4ec   : > { %v5132_v31 = vadd.f32 %v5131_v50, %v18378_v0  ;;  %v5413_v6 = vmax.f32 %v5130_v61, 0.0 }
 0x4ed   : > { %v5133_v39 = vpop.f32.mrf.mxu1  ;;  %v15601_v23 = vpop.f32.mrf.mxu0 }
 0x4ee   : > { %v5416_v37 = vmax.f32 %v5132_v31, 0.0  ;;  %v5134_v5 = vadd.f32 %v5133_v39, %v18379_v12 }
 0x4ef   : > { %v5137_v43 = vpop.f32.mrf.mxu1  ;;  %v15604_v3 = vpop.f32.mrf.mxu0  ;;  %6349 = vmatmul.mubr.bf16.gmra.mxu0 %v18380_v18  ;;  %6542 = vmatmul.mubr.bf16.gmra.mxu1 %v15439_v32 }
 0x4f0   : > { %v15608_v17 = vpack.c.bf16 %v5416_v37, %v5412_v19  ;;  %v5417_v46 = vmax.f32 %v5134_v5, 0.0  ;;  %6358 = vmatprep.mubr.bf16.mxu0 %v18381_v56  ;;  %6551 = vmatprep.mubr.bf16.mxu1 %v15478_v44  ;;  %v5138_v0 = vadd.f32 %v5137_v43, %v18383_v42  ;;  %v18385_v43 = vld [vmem:[#allocation250_spill] sm:$0xff] }
 0x4f1   : > { %v5139_v50 = vpop.f32.mrf.mxu1  ;;  %v15612_v14 = vpop.f32.mrf.mxu0 }
 0x4f2   : > { %18382 = vst [vmem:[#allocation95_spill] sm:$0xff] %v15612_v14  ;;  %v15615_v31 = vpack.c.bf16 %v5417_v46, %v5413_v6  ;;  %v5140_v32 = vadd.f32 %v5139_v50, %v15212_v34  ;;  %v5420_v37 = vmax.f32 %v5138_v0, 0.0  ;;  %v18386_v50 = vld [vmem:[#allocation142_spill] sm:$0xff]  ;;  %v18388_v0 = vld [vmem:[#allocation56_spill] sm:$0xff] }
 0x4f3   : > { %v5141_v39 = vpop.f32.mrf.mxu1  ;;  %v15617_v12 = vpop.f32.mrf.mxu0 }
 0x4f4   : > { %v5142_v61 = vadd.f32 %v5141_v39, %v15218_v35  ;;  %v5421_v6 = vmax.f32 %v5140_v32, 0.0 }
 0x4f5   : > { %v5143_v19 = vpop.f32.mrf.mxu1  ;;  %v15621_v5 = vpop.f32.mrf.mxu0 }
 0x4f6   : > { %v5424_v18 = vmax.f32 %v5142_v61, 0.0  ;;  %v5144_v44 = vadd.f32 %v5143_v19, %v15222_v22 }
 0x4f7   : > { %v5147_v56 = vpop.f32.mrf.mxu1  ;;  %v15624_v14 = vpop.f32.mrf.mxu0  ;;  %6359 = vmatmul.mubr.bf16.gmra.mxu0 %v18385_v43  ;;  %6552 = vmatmul.mubr.bf16.gmra.mxu1 %v15467_v48 }
 0x4f8   : > { %18384 = vst [vmem:[#allocation145_spill] sm:$0xff] %v15624_v14  ;;  %v15628_v46 = vpack.c.bf16 %v5424_v18, %v5420_v37  ;;  %v5425_v34 = vmax.f32 %v5144_v44, 0.0  ;;  %6368 = vmatprep.mubr.bf16.mxu0 %v18386_v50  ;;  %6561 = vmatprep.mubr.bf16.mxu1 %v15505_v62  ;;  %v5148_v22 = vadd.f32 %v5147_v56, %v18388_v0  ;;  %v18391_v62 = vld [vmem:[#allocation247_spill] sm:$0xff]  ;;  %v18393_v56 = vld [vmem:[#allocation60_spill] sm:$0xff] }
 0x4f9   : > { %v5149_v35 = vpop.f32.mrf.mxu1  ;;  %v15632_v42 = vpop.f32.mrf.mxu0 }
 0x4fa   : > { %18387 = vst [vmem:[#allocation64_spill] sm:$0xff] %v15632_v42  ;;  %v15635_v39 = vpack.c.bf16 %v5425_v34, %v5421_v6  ;;  %v5150_v48 = vadd.f32 %v5149_v35, %v15240_v4  ;;  %v5428_v44 = vmax.f32 %v5148_v22, 0.0  ;;  %v18394_v35 = vld [vmem:[#allocation27_spill] sm:$0xff] }
 0x4fb   : > { %v5151_v61 = vpop.f32.mrf.mxu1  ;;  %v15637_v19 = vpop.f32.mrf.mxu0  ;;  %v18396_v22 = vld [vmem:[#allocation135_spill] sm:$0xff] }
 0x4fc   : > { %18389 = vst [vmem:[#allocation286_spill] sm:$0xff] %v15637_v19  ;;  %v5152_v32 = vadd.f32 %v5151_v61, %v15247_v45  ;;  %v5429_v6 = vmax.f32 %v5150_v48, 0.0  ;;  %v18399_v48 = vld [vmem:[#allocation58_spill] sm:$0xff] }
 0x4fd   : > { %v5153_v37 = vpop.f32.mrf.mxu1  ;;  %v15641_v18 = vpop.f32.mrf.mxu0 }
 0x4fe   : > { %18390 = vst [vmem:[#allocation287_spill] sm:$0xff] %v15641_v18  ;;  %v5432_v43 = vmax.f32 %v5152_v32, 0.0  ;;  %v5154_v50 = vadd.f32 %v5153_v37, %v18391_v62 }
 0x4ff   : > { %v5157_v14 = vpop.f32.mrf.mxu1  ;;  %v15644_v42 = vpop.f32.mrf.mxu0  ;;  %6369 = vmatmul.mubr.bf16.gmra.mxu0 %v18393_v56  ;;  %6562 = vmatmul.mubr.bf16.gmra.mxu1 %v15491_v52  ;;  %v18398_v56 = vld [vmem:[#allocation89_spill] sm:$0xff] }
 0x500   : > { %18392 = vst [vmem:[#allocation288_spill] sm:$0xff] %v15644_v42  ;;  %v15648_v34 = vpack.c.bf16 %v5432_v43, %v5428_v44  ;;  %v5433_v4 = vmax.f32 %v5154_v50, 0.0  ;;  %6378 = vmatprep.mubr.bf16.mxu0 %v18394_v35  ;;  %6571 = vmatprep.mubr.bf16.mxu1 %v15530_v40  ;;  %v5158_v61 = vadd.f32 %v5157_v14, %v18396_v22  ;;  %v18401_v40 = vld [vmem:[#allocation251_spill] sm:$0xff]  ;;  %v18403_v14 = vld [vmem:[#allocation62_spill] sm:$0xff]  ;;  %v18404_v22 = vld [vmem:[#allocation29_spill] sm:$0xff] }
 0x501   : > { %v5159_v45 = vpop.f32.mrf.mxu1  ;;  %v15652_v0 = vpop.f32.mrf.mxu0 }
 0x502   : > { %18395 = vst [vmem:[#allocation97_spill] sm:$0xff] %v15652_v0  ;;  %v15655_v32 = vpack.c.bf16 %v5433_v4, %v5429_v6  ;;  %v5160_v52 = vadd.f32 %v5159_v45, %v18398_v56  ;;  %v5436_v35 = vmax.f32 %v5158_v61, 0.0  ;;  %v18406_v56 = vld [vmem:[#allocation252_spill] sm:$0xff] }
 0x503   : > { %v5161_v37 = vpop.f32.mrf.mxu1  ;;  %v15657_v62 = vpop.f32.mrf.mxu0 }
 0x504   : > { %18397 = vst [vmem:[#allocation150_spill] sm:$0xff] %v15657_v62  ;;  %v5162_v44 = vadd.f32 %v5161_v37, %v18399_v48  ;;  %v5437_v6 = vmax.f32 %v5160_v52, 0.0  ;;  %v18408_v52 = vld [vmem:[#allocation254_spill] sm:$0xff] }
 0x505   : > { %v5163_v43 = vpop.f32.mrf.mxu1  ;;  %v15661_v50 = vpop.f32.mrf.mxu0 }
 0x506   : > { %18400 = vst [vmem:[#allocation290_spill] sm:$0xff] %v15661_v50  ;;  %v5440_v42 = vmax.f32 %v5162_v44, 0.0  ;;  %v5164_v18 = vadd.f32 %v5163_v43, %v18401_v40 }
 0x507   : > { %v5167_v19 = vpop.f32.mrf.mxu1  ;;  %v15664_v0 = vpop.f32.mrf.mxu0  ;;  %6379 = vmatmul.mubr.bf16.gmra.mxu0 %v18403_v14  ;;  %6572 = vmatmul.mubr.bf16.gmra.mxu1 %v15519_v13  ;;  %v18407_v14 = vld [vmem:[#allocation23_spill] sm:$0xff] }
 0x508   : > { %18402 = vst [vmem:[#allocation291_spill] sm:$0xff] %v15664_v0  ;;  %v15668_v4 = vpack.c.bf16 %v5440_v42, %v5436_v35  ;;  %v5441_v45 = vmax.f32 %v5164_v18, 0.0  ;;  %6388 = vmatprep.mubr.bf16.mxu0 %v18404_v22  ;;  %6581 = vmatprep.mubr.bf16.mxu1 %v15555_v49  ;;  %v5168_v48 = vadd.f32 %v5167_v19, %v18406_v56  ;;  %v18410_v49 = vld [vmem:[#allocation25_spill] sm:$0xff]  ;;  %v18412_v19 = vld [vmem:[#allocation256_spill] sm:$0xff] }
 0x509   : > { %v5169_v37 = vpop.f32.mrf.mxu1  ;;  %v15672_v61 = vpop.f32.mrf.mxu0 }
 0x50a   : > { %18405 = vst [vmem:[#allocation66_spill] sm:$0xff] %v15672_v61  ;;  %v15675_v44 = vpack.c.bf16 %v5441_v45, %v5437_v6  ;;  %v5170_v13 = vadd.f32 %v5169_v37, %v18407_v14  ;;  %v5444_v22 = vmax.f32 %v5168_v48, 0.0  ;;  %v18414_v48 = vld [vmem:[#allocation137_spill] sm:$0xff] }
 0x50b   : > { %v5171_v43 = vpop.f32.mrf.mxu1  ;;  %v15677_v40 = vpop.f32.mrf.mxu0 }
 0x50c   : > { %v5172_v42 = vadd.f32 %v5171_v43, %v18408_v52  ;;  %v5445_v6 = vmax.f32 %v5170_v13, 0.0 }
 0x50d   : > { %v5173_v35 = vpop.f32.mrf.mxu1  ;;  %v15681_v18 = vpop.f32.mrf.mxu0 }
 0x50e   : > { %18409 = vst [vmem:[#allocation187_spill] sm:$0xff] %v15681_v18  ;;  %v5448_v0 = vmax.f32 %v5172_v42, 0.0  ;;  %v5174_v50 = vadd.f32 %v5173_v35, %v18410_v49 }
 0x50f   : > { %v5177_v62 = vpop.f32.mrf.mxu1  ;;  %v15684_v61 = vpop.f32.mrf.mxu0  ;;  %6389 = vmatmul.mubr.bf16.gmra.mxu0 %v18412_v19  ;;  %6582 = vmatmul.mubr.bf16.gmra.mxu1 %v15545_v36  ;;  %v18416_v19 = vld [vmem:[#allocation257_spill] sm:$0xff] }
 0x510   : > { %18411 = vst [vmem:[#allocation259_spill] sm:$0xff] %v15684_v61  ;;  %v15688_v45 = vpack.c.bf16 %v5448_v0, %v5444_v22  ;;  %v5449_v37 = vmax.f32 %v5174_v50, 0.0  ;;  %6591 = vmatprep.mubr.bf16.mxu1 %v15575_v41  ;;  %v5178_v14 = vadd.f32 %v5177_v62, %v18414_v48  ;;  %v18418_v41 = vld [vmem:[#allocation258_spill] sm:$0xff]  ;;  %v18421_v48 = vld [vmem:[#allocation260_spill] sm:$0xff] }
 0x511   : > { %v5179_v56 = vpop.f32.mrf.mxu1  ;;  %v15691_v43 = vpop.f32.mrf.mxu0 }
 0x512   : > { %18413 = vst [vmem:[#allocation31_spill] sm:$0xff] %v15691_v43  ;;  %v15694_v52 = vpack.c.bf16 %v5449_v37, %v5445_v6  ;;  %v5180_v49 = vadd.f32 %v5179_v56, %v15320_v30  ;;  %v5452_v50 = vmax.f32 %v5178_v14, 0.0 }
 0x513   : > { %v5181_v42 = vpop.f32.mrf.mxu1  ;;  %v15696_v35 = vpop.f32.mrf.mxu0 }
 0x514   : > { %18415 = vst [vmem:[#allocation151_spill] sm:$0xff] %v15696_v35  ;;  %v5182_v36 = vadd.f32 %v5181_v42, %v18416_v19  ;;  %v5453_v62 = vmax.f32 %v5180_v49, 0.0 }
 0x515   : > { %v5183_v13 = vpop.f32.mrf.mxu1  ;;  %v15700_v0 = vpop.f32.mrf.mxu0 }
 0x516   : > { %18417 = vst [vmem:[#allocation262_spill] sm:$0xff] %v15700_v0  ;;  %v5456_v22 = vmax.f32 %v5182_v36, 0.0  ;;  %v5184_v61 = vadd.f32 %v5183_v13, %v18418_v41  ;;  %v18422_v13 = vld [vmem:[#allocation264_spill] sm:$0xff] }
 0x517   : > { %v5187_v18 = vpop.f32.mrf.mxu1  ;;  %v15703_v43 = vpop.f32.mrf.mxu0  ;;  %6592 = vmatmul.mubr.bf16.gmra.mxu1 %v15568_v51 }
 0x518   : > { %18419 = vst [vmem:[#allocation152_spill] sm:$0xff] %v15703_v43  ;;  %v15706_v6 = vpack.c.bf16 %v5456_v22, %v5452_v50  ;;  %v5457_v37 = vmax.f32 %v5184_v61, 0.0  ;;  %6601 = vmatprep.mubr.bf16.mxu1 %v15595_v7  ;;  %v5188_v42 = vadd.f32 %v5187_v18, %v18421_v48  ;;  %v18423_v43 = vld [vmem:[#allocation265_spill] sm:$0xff]  ;;  %v18424_v7 = vld [vmem:[#allocation267_spill] sm:$0xff] }
 0x519   : > { %v5189_v30 = vpop.f32.mrf.mxu1  ;;  %v15709_v56 = vpop.f32.mrf.mxu0  ;;  %v18427_v48 = vld [vmem:[#allocation253_spill] sm:$0xff] }
 0x51a   : > { %18420 = vst [vmem:[#allocation192_spill] sm:$0xff] %v15709_v56  ;;  %v15712_v14 = vpack.c.bf16 %v5457_v37, %v5453_v62  ;;  %v5190_v41 = vadd.f32 %v5189_v30, %v18422_v13  ;;  %v5460_v61 = vmax.f32 %v5188_v42, 0.0 }
 0x51b   : > { %v5191_v19 = vpop.f32.mrf.mxu1  ;;  %v15714_v36 = vpop.f32.mrf.mxu0 }
 0x51c   : > { %v5192_v51 = vadd.f32 %v5191_v19, %v18423_v43  ;;  %v5461_v18 = vmax.f32 %v5190_v41, 0.0 }
 0x51d   : > { %v5193_v49 = vpop.f32.mrf.mxu1  ;;  %v15718_v50 = vpop.f32.mrf.mxu0 }
 0x51e   : > { %v5464_v22 = vmax.f32 %v5192_v51, 0.0  ;;  %v5194_v0 = vadd.f32 %v5193_v49, %v18424_v7 }
 0x51f   : > { %v5197_v35 = vpop.f32.mrf.mxu1  ;;  %v15721_v56 = vpop.f32.mrf.mxu0  ;;  %6602 = vmatmul.mubr.bf16.gmra.mxu1 %v15588_v10 }
 0x520   : > { %18425 = vst [vmem:[#allocation294_spill] sm:$0xff] %v15721_v56  ;;  %v15724_v62 = vpack.c.bf16 %v5464_v22, %v5460_v61  ;;  %v5465_v37 = vmax.f32 %v5194_v0, 0.0  ;;  %6611 = vmatprep.mubr.bf16.mxu1 %v15615_v31  ;;  %v5198_v19 = vadd.f32 %v5197_v35, %v18427_v48  ;;  %v18429_v31 = vld [vmem:[#allocation93_spill] sm:$0xff] }
 0x521   : > { %v5199_v30 = vpop.f32.mrf.mxu1  ;;  %v15727_v43 = vpop.f32.mrf.mxu0 }
 0x522   : > { %18426 = vst [vmem:[#allocation195_spill] sm:$0xff] %v15727_v43  ;;  %v15730_v42 = vpack.c.bf16 %v5465_v37, %v5461_v18  ;;  %v5200_v49 = vadd.f32 %v5199_v30, %v15372_v1  ;;  %v5468_v0 = vmax.f32 %v5198_v19, 0.0  ;;  %v18432_v30 = vld [vmem:[#allocation270_spill] sm:$0xff] }
 0x523   : > { %v5201_v13 = vpop.f32.mrf.mxu1  ;;  %v15732_v51 = vpop.f32.mrf.mxu0 }
 0x524   : > { %v5202_v10 = vadd.f32 %v5201_v13, %v15378_v38  ;;  %v5469_v35 = vmax.f32 %v5200_v49, 0.0 }
 0x525   : > { %v5203_v41 = vpop.f32.mrf.mxu1  ;;  %v15736_v61 = vpop.f32.mrf.mxu0 }
 0x526   : > { %18428 = vst [vmem:[#allocation99_spill] sm:$0xff] %v15736_v61  ;;  %v5472_v22 = vmax.f32 %v5202_v10, 0.0  ;;  %v5204_v7 = vadd.f32 %v5203_v41, %v18429_v31  ;;  %v18433_v41 = vld [vmem:[#allocation271_spill] sm:$0xff] }
 0x527   : > { %v5207_v56 = vpop.f32.mrf.mxu1  ;;  %v15739_v43 = vpop.f32.mrf.mxu0  ;;  %6612 = vmatmul.mubr.bf16.gmra.mxu1 %v15608_v17 }
 0x528   : > { %18430 = vst [vmem:[#allocation33_spill] sm:$0xff] %v15739_v43  ;;  %v15742_v18 = vpack.c.bf16 %v5472_v22, %v5468_v0  ;;  %v5473_v37 = vmax.f32 %v5204_v7, 0.0  ;;  %6621 = vmatprep.mubr.bf16.mxu1 %v15635_v39  ;;  %v5208_v48 = vadd.f32 %v5207_v56, %v18432_v30  ;;  %v18434_v39 = vld [vmem:[#allocation143_spill] sm:$0xff]  ;;  %v18436_v30 = vld [vmem:[#allocation273_spill] sm:$0xff] }
 0x529   : > { %v5209_v1 = vpop.f32.mrf.mxu1  ;;  %v15745_v38 = vpop.f32.mrf.mxu0 }
 0x52a   : > { %18431 = vst [vmem:[#allocation68_spill] sm:$0xff] %v15745_v38  ;;  %v15748_v19 = vpack.c.bf16 %v5473_v37, %v5469_v35  ;;  %v5210_v31 = vadd.f32 %v5209_v1, %v18433_v41  ;;  %v5476_v22 = vmax.f32 %v5208_v48, 0.0  ;;  %v10245_v41 = vld [vmem:[%s16787_s7 + $0x38] sm:$0xff]  }
 0x52b   : > { %v5211_v13 = vpop.f32.mrf.mxu1  ;;  %v15750_v10 = vpop.f32.mrf.mxu0  ;;  %9545 = vmatprep.subr.bf16.mxu1 %v10245_v41 }
 0x52c   : > { %v5212_v17 = vadd.f32 %v5211_v13, %v15406_v28  ;;  %v5477_v56 = vmax.f32 %v5210_v31, 0.0  ;;  %9546 = vmatpush3.bf16.msra.mxu1 %v10245_v41 }
 0x52d   : > { %v5213_v49 = vpop.f32.mrf.mxu1  ;;  %v15754_v0 = vpop.f32.mrf.mxu0 }
 0x52e   : > { %v5480_v7 = vmax.f32 %v5212_v17, 0.0  ;;  %v5214_v43 = vadd.f32 %v5213_v49, %v18434_v39 }
 0x52f   : > { %v5217_v61 = vpop.f32.mrf.mxu1  ;;  %v15757_v38 = vpop.f32.mrf.mxu0  ;;  %6622 = vmatmul.mubr.bf16.gmra.mxu1 %v15628_v46 }
 0x530   : > { %18435 = vst [vmem:[#allocation296_spill] sm:$0xff] %v15757_v38  ;;  %v15760_v35 = vpack.c.bf16 %v5480_v7, %v5476_v22  ;;  %v5481_v37 = vmax.f32 %v5214_v43, 0.0  ;;  %6631 = vmatprep.mubr.bf16.mxu1 %v15655_v32  ;;  %v5218_v13 = vadd.f32 %v5217_v61, %v18436_v30 }
 0x531   : > { %v5219_v1 = vpop.f32.mrf.mxu1  ;;  %v15763_v28 = vpop.f32.mrf.mxu0 }
 0x532   : > { %v15766_v48 = vpack.c.bf16 %v5481_v37, %v5477_v56  ;;  %v5220_v46 = vadd.f32 %v5219_v1, %v15424_v11  ;;  %v5484_v22 = vmax.f32 %v5218_v13, 0.0 }
 0x533   : > { %v5221_v17 = vpop.f32.mrf.mxu1  ;;  %v15771_v49 = vpop.f32.mrf.mxu0 }
 0x534   : > { %v5222_v43 = vadd.f32 %v5221_v17, %v15430_v25  ;;  %v5485_v37 = vmax.f32 %v5220_v46, 0.0  ;;  %v18440_v17 = vld [vmem:[#allocation144_spill] sm:$0xff] }
 0x535   : > { %v5223_v32 = vpop.f32.mrf.mxu1  ;;  %v15775_v31 = vpop.f32.mrf.mxu0 }
 0x536   : > { %18437 = vst [vmem:[#allocation297_spill] sm:$0xff] %v15775_v31  ;;  %v5488_v61 = vmax.f32 %v5222_v43, 0.0  ;;  %v5224_v7 = vadd.f32 %v5223_v32, %v15434_v53  ;;  %v18441_v32 = vld [vmem:[#allocation276_spill] sm:$0xff] }
 0x537   : > { %v5227_v39 = vpop.f32.mrf.mxu1  ;;  %v15778_v56 = vpop.f32.mrf.mxu0  ;;  %6632 = vmatmul.mubr.bf16.gmra.mxu1 %v15648_v34 }
 0x538   : > { %18438 = vst [vmem:[#allocation153_spill] sm:$0xff] %v15778_v56  ;;  %v15781_v30 = vpack.c.bf16 %v5488_v61, %v5484_v22  ;;  %v5489_v11 = vmax.f32 %v5224_v7, 0.0  ;;  %6641 = vmatprep.mubr.bf16.mxu1 %v15675_v44  ;;  %v5228_v41 = vadd.f32 %v5227_v39, %v18440_v17  ;;  %v18442_v44 = vld [vmem:[#allocation277_spill] sm:$0xff]  ;;  %v18444_v17 = vld [vmem:[#allocation278_spill] sm:$0xff] }
 0x539   : > { %v5229_v25 = vpop.f32.mrf.mxu1  ;;  %v15784_v1 = vpop.f32.mrf.mxu0 }
 0x53a   : > { %18439 = vst [vmem:[#allocation203_spill] sm:$0xff] %v15784_v1  ;;  %v15787_v13 = vpack.c.bf16 %v5489_v11, %v5485_v37  ;;  %v5230_v56 = vadd.f32 %v5229_v25, %v18441_v32  ;;  %v5492_v61 = vmax.f32 %v5228_v41, 0.0 }
 0x53b   : > { %v5231_v43 = vpop.f32.mrf.mxu1  ;;  %v15789_v53 = vpop.f32.mrf.mxu0 }
 0x53c   : > { %v5232_v34 = vadd.f32 %v5231_v43, %v15458_v20  ;;  %v5493_v39 = vmax.f32 %v5230_v56, 0.0 }
 0x53d   : > { %v5233_v46 = vpop.f32.mrf.mxu1  ;;  %v15793_v22 = vpop.f32.mrf.mxu0 }
 0x53e   : > { %v5496_v7 = vmax.f32 %v5232_v34, 0.0  ;;  %v5234_v31 = vadd.f32 %v5233_v46, %v18442_v44 }
 0x53f   : > { %v5237_v38 = vpop.f32.mrf.mxu1  ;;  %v15796_v1 = vpop.f32.mrf.mxu0  ;;  %6642 = vmatmul.mubr.bf16.gmra.mxu1 %v15668_v4 }
 0x540   : > { %18443 = vst [vmem:[#allocation101_spill] sm:$0xff] %v15796_v1  ;;  %v15799_v37 = vpack.c.bf16 %v5496_v7, %v5492_v61  ;;  %v5497_v11 = vmax.f32 %v5234_v31, 0.0  ;;  %6651 = vmatprep.mubr.bf16.mxu1 %v15694_v52  ;;  %v5238_v43 = vadd.f32 %v5237_v38, %v18444_v17 }
 0x541   : > { %v5239_v25 = vpop.f32.mrf.mxu1  ;;  %v15802_v20 = vpop.f32.mrf.mxu0 }
 0x542   : > { %v15805_v41 = vpack.c.bf16 %v5497_v11, %v5493_v39  ;;  %v5240_v46 = vadd.f32 %v5239_v25, %v15476_v2  ;;  %v5500_v31 = vmax.f32 %v5238_v43, 0.0 }
 0x543   : > { %v5241_v32 = vpop.f32.mrf.mxu1  ;;  %v15807_v34 = vpop.f32.mrf.mxu0 }
 0x544   : > { %v5242_v4 = vadd.f32 %v5241_v32, %v15482_v21  ;;  %v5501_v38 = vmax.f32 %v5240_v46, 0.0 }
 0x545   : > { %v5243_v56 = vpop.f32.mrf.mxu1  ;;  %v15811_v61 = vpop.f32.mrf.mxu0 }
 0x546   : > { %v5504_v7 = vmax.f32 %v5242_v4, 0.0  ;;  %v5244_v52 = vadd.f32 %v5243_v56, %v15486_v47 }
 0x547   : > { %v5247_v44 = vpop.f32.mrf.mxu1  ;;  %v15814_v1 = vpop.f32.mrf.mxu0  ;;  %6652 = vmatmul.mubr.bf16.gmra.mxu1 %v15688_v45 }
 0x548   : > { %v15817_v39 = vpack.c.bf16 %v5504_v7, %v5500_v31  ;;  %v5505_v11 = vmax.f32 %v5244_v52, 0.0  ;;  %6661 = vmatprep.mubr.bf16.mxu1 %v15712_v14  ;;  %v5248_v25 = vadd.f32 %v5247_v44, %v15494_v8 }
 0x549   : > { %v5249_v2 = vpop.f32.mrf.mxu1  ;;  %v15820_v21 = vpop.f32.mrf.mxu0 }
 0x54a   : > { %v15823_v17 = vpack.c.bf16 %v5505_v11, %v5501_v38  ;;  %v5250_v32 = vadd.f32 %v5249_v2, %v15503_v26  ;;  %v5508_v56 = vmax.f32 %v5248_v25, 0.0  ;;  %v5714_v26 = vld [vmem:[%s16784_s4] sm:$0x3] }
 0x54b   : > { %v5251_v43 = vpop.f32.mrf.mxu1  ;;  %v15825_v47 = vpop.f32.mrf.mxu0 }
 0x54c   : > { %v5252_v45 = vadd.f32 %v5251_v43, %v15510_v15  ;;  %v5509_v8 = vmax.f32 %v5250_v32, 0.0  ;;  %v18447_v32 = vld [vmem:[#allocation161_spill] sm:$0xff] }
 0x54d   : > { %v5253_v46 = vpop.f32.mrf.mxu1  ;;  %v15829_v4 = vpop.f32.mrf.mxu0 }
 0x54e   : > { %v5512_v31 = vmax.f32 %v5252_v45, 0.0  ;;  %v5254_v14 = vadd.f32 %v5253_v46, %v15514_v16 }
 0x54f   : > { %v5257_v7 = vpop.f32.mrf.mxu1  ;;  %v15832_v52 = vpop.f32.mrf.mxu0  ;;  %6662 = vmatmul.mubr.bf16.gmra.mxu1 %v15706_v6  ;;  %v10246_v6 = vld [vmem:[%s16787_s7 + $0x30] sm:$0xff]  }
 0x550   : > { %18445 = vst [vmem:[#allocation263_spill] sm:$0xff] %v15832_v52  ;;  %v15835_v44 = vpack.c.bf16 %v5512_v31, %v5508_v56  ;;  %v5513_v38 = vmax.f32 %v5254_v14, 0.0  ;;  %6671 = vmatprep.mubr.bf16.mxu1 %v15730_v42  ;;  %v5258_v16 = vadd.f32 %v5257_v7, %v15522_v9  ;;  %v18448_v42 = vsub.s32 0, %v18447_v32  ;;  %9547 = vmatprep.subr.bf16.mxu1 %v10246_v6 }
 0x551   : > { %v5259_v15 = vpop.f32.mrf.mxu1  ;;  %v15841_v11 = vpop.f32.mrf.mxu0  ;;  %9548 = vmatpush3.bf16.msra.mxu1 %v10246_v6  ;;  %v18449_v14 = vsub.s32 1, %v18447_v32 }
 0x552   : > { %v15844_v2 = vpack.c.bf16 %v5513_v38, %v5509_v8  ;;  %v15853_v45 = vrot.slane %v5714_v26, %v18448_v42  ;;  %v5260_v46 = vadd.f32 %v5259_v15, %v15528_v29  ;;  %v5516_v8 = vmax.f32 %v5258_v16, 0.0 }
 0x553   : > { %v5261_v25 = vpop.f32.mrf.mxu1  ;;  %v15849_v43 = vpop.f32.mrf.mxu0  ;;  %v15861_v7 = vrot.slane %v5714_v26, %v18449_v14 }
 0x554   : > { %18446 = vst [vmem:[#allocation70_spill] sm:$0xff] %v15849_v43  ;;  %v5262_v56 = vadd.f32 %v5261_v25, %v15534_v27  ;;  %v6081_v29 = vadd.f32 %v15541_v63, %v15853_v45  ;;  %v5517_v27 = vmax.f32 %v5260_v46, 0.0  ;;  %v6085_v25 = vadd.f32 %v15557_v60, %v15853_v45 }
 0x555   : > { %v5263_v31 = vpop.f32.mrf.mxu1  ;;  %v15857_v9 = vpop.f32.mrf.mxu0 }
 0x556   : > { %v5520_v38 = vmax.f32 %v5262_v56, 0.0  ;;  %v5264_v52 = vadd.f32 %v5263_v31, %v15538_v59  ;;  %v6083_v59 = vadd.f32 %v15552_v54, %v15861_v7 }
 0x557   : > { %v15864_v43 = vpop.f32.mrf.mxu0  ;;  %v6433_v42 = vpop.f32.mrf.mxu1  ;;  %6672 = vmatmul.mubr.bf16.gmra.mxu1 %v15724_v62 }
 0x558   : > { %18450 = vst [vmem:[#allocation208_spill] sm:$0xff] %v15864_v43  ;;  %v15869_v15 = vpack.c.bf16 %v5520_v38, %v5516_v8  ;;  %v5521_v6 = vmax.f32 %v5264_v52, 0.0  ;;  %6681 = vmatprep.mubr.bf16.mxu1 %v15748_v19  ;;  %v6434_v32 = vadd.f32 %v6433_v42, %v6081_v29  ;;  %v6087_v52 = vadd.f32 %v15561_v33, %v15861_v7 }
 0x559   : > { %v15872_v26 = vpop.f32.mrf.mxu0  ;;  %v6435_v16 = vpop.f32.mrf.mxu1  ;;  %v6091_v42 = vadd.f32 %v15564_v24, %v15853_v45  ;;  %v18452_v24 = vld [vmem:[#allocation283_spill] sm:$0xff] }
 0x55a   : > { %v15878_v62 = vpack.c.bf16 %v5521_v6, %v5517_v27  ;;  %v6436_v46 = vadd.f32 %v6435_v16, %v6083_v59  ;;  %v6752_v8 = vmax.f32 %v6434_v32, 0.0  ;;  %v6093_v59 = vadd.f32 %v15572_v57, %v15861_v7 }
 0x55b   : > { %v15880_v56 = vpop.f32.mrf.mxu0  ;;  %v6437_v63 = vpop.f32.mrf.mxu1 }
 0x55c   : > { %v6438_v19 = vadd.f32 %v6437_v63, %v6085_v25  ;;  %v6753_v29 = vmax.f32 %v6436_v46, 0.0  ;;  %v6095_v25 = vadd.f32 %v15577_v58, %v15853_v45  ;;  %v6097_v46 = vadd.f32 %v18452_v24, %v15861_v7 }
 0x55d   : > { %v15884_v31 = vpop.f32.mrf.mxu0  ;;  %v6439_v14 = vpop.f32.mrf.mxu1 }
 0x55e   : > { %v6754_v38 = vmax.f32 %v6438_v19, 0.0  ;;  %v6440_v54 = vadd.f32 %v6439_v14, %v6087_v52 }
 0x55f   : > { %v15886_v43 = vpop.f32.mrf.mxu0  ;;  %v6443_v60 = vpop.f32.mrf.mxu1  ;;  %6682 = vmatmul.mubr.bf16.gmra.mxu1 %v15742_v18 }
 0x560   : > { %18451 = vst [vmem:[#allocation300_spill] sm:$0xff] %v15886_v43  ;;  %v6880_v27 = vpack.c.bf16 %v6754_v38, %v6752_v8  ;;  %v6755_v6 = vmax.f32 %v6440_v54, 0.0  ;;  %6691 = vmatprep.mubr.bf16.mxu1 %v15766_v48  ;;  %v6444_v32 = vadd.f32 %v6443_v60, %v6091_v42  ;;  %v18453_v60 = vld [vmem:[#allocation284_spill] sm:$0xff] }
 0x561   : > { %v15892_v33 = vpop.f32.mrf.mxu0  ;;  %v6445_v16 = vpop.f32.mrf.mxu1  ;;  %v6101_v42 = vadd.f32 %v18453_v60, %v15853_v45 }
 0x562   : > { %v6881_v63 = vpack.c.bf16 %v6755_v6, %v6753_v29  ;;  %v6446_v19 = vadd.f32 %v6445_v16, %v6093_v59  ;;  %v6756_v38 = vmax.f32 %v6444_v32, 0.0 }
 0x563   : > { %v15898_v18 = vpop.f32.mrf.mxu0  ;;  %v6447_v52 = vpop.f32.mrf.mxu1 }
 0x564   : > { %v6448_v14 = vadd.f32 %v6447_v52, %v6095_v25  ;;  %7111 = vmatprep.mubr.bf16.mxu0 %v6881_v63  ;;  %v6757_v29 = vmax.f32 %v6446_v19, 0.0  ;;  %v6105_v63 = vadd.f32 %v15597_v55, %v15853_v45  ;;  %v6107_v19 = vadd.f32 %v15601_v23, %v15861_v7 }
 0x565   : > { %v15902_v48 = vpop.f32.mrf.mxu0  ;;  %v6449_v8 = vpop.f32.mrf.mxu1  ;;  %7112 = vmatmul.mubr.bf16.vlgmr.msra.gmra.mxu0 %v6880_v27  ;;  %v18454_v27 = vld [vmem:[#allocation285_spill] sm:$0xff] }
 0x566   : > { %v6758_v57 = vmax.f32 %v6448_v14, 0.0  ;;  %v6450_v54 = vadd.f32 %v6449_v8, %v6097_v46  ;;  %v6103_v32 = vadd.f32 %v18454_v27, %v15861_v7 }
 0x567   : > { %v15904_v43 = vpop.f32.mrf.mxu0  ;;  %v6453_v58 = vpop.f32.mrf.mxu1  ;;  %6692 = vmatmul.mubr.bf16.gmra.mxu1 %v15760_v35 }
 0x568   : > { %v6882_v6 = vpack.c.bf16 %v6758_v57, %v6756_v38  ;;  %v6759_v16 = vmax.f32 %v6450_v54, 0.0  ;;  %6701 = vmatprep.mubr.bf16.mxu1 %v15787_v13  ;;  %v6454_v52 = vadd.f32 %v6453_v58, %v6101_v42  ;;  %v6111_v58 = vadd.f32 %v15604_v3, %v15853_v45  ;;  %v10247_v3 = vld [vmem:[%s16787_s7 + $0x28] sm:$0xff]  }
 0x569   : > { %v15910_v59 = vpop.f32.mrf.mxu0  ;;  %v6455_v25 = vpop.f32.mrf.mxu1  ;;  %9549 = vmatprep.subr.bf16.mxu1 %v10247_v3 }
 0x56a   : > { %v6883_v24 = vpack.c.bf16 %v6759_v16, %v6757_v29  ;;  %v6456_v14 = vadd.f32 %v6455_v25, %v6103_v32  ;;  %v6760_v57 = vmax.f32 %v6454_v52, 0.0  ;;  %9550 = vmatpush3.bf16.msra.mxu1 %v10247_v3 }
 0x56b   : > { %v15916_v35 = vpop.f32.mrf.mxu0  ;;  %v6457_v46 = vpop.f32.mrf.mxu1 }
 0x56c   : > { %v6458_v8 = vadd.f32 %v6457_v46, %v6105_v63  ;;  %7119 = vmatprep.mubr.bf16.mxu0 %v6883_v24  ;;  %v6761_v42 = vmax.f32 %v6456_v14, 0.0  ;;  %v6115_v63 = vadd.f32 %v15617_v12, %v15853_v45 }
 0x56d   : > { %v15920_v13 = vpop.f32.mrf.mxu0  ;;  %v6459_v38 = vpop.f32.mrf.mxu1  ;;  %7120 = vmatmul.mubr.bf16.gmra.mxu0 %v6882_v6  ;;  %v18455_v6 = vld [vmem:[#allocation95_spill] sm:$0xff] }
 0x56e   : > { %v6762_v54 = vmax.f32 %v6458_v8, 0.0  ;;  %v6460_v60 = vadd.f32 %v6459_v38, %v6107_v19  ;;  %v6113_v32 = vadd.f32 %v18455_v6, %v15861_v7  ;;  %v18456_v6 = vld [vmem:[#allocation64_spill] sm:$0xff] }
 0x56f   : > { %v15922_v27 = vpop.f32.mrf.mxu0  ;;  %v6463_v55 = vpop.f32.mrf.mxu1  ;;  %6702 = vmatmul.mubr.bf16.gmra.mxu1 %v15781_v30 }
 0x570   : > { %v6884_v23 = vpack.c.bf16 %v6762_v54, %v6760_v57  ;;  %v6763_v29 = vmax.f32 %v6460_v60, 0.0  ;;  %6711 = vmatprep.mubr.bf16.mxu1 %v15805_v41  ;;  %v6464_v52 = vadd.f32 %v6463_v55, %v6111_v58  ;;  %v6117_v41 = vadd.f32 %v15621_v5, %v15861_v7 }
 0x571   : > { %v15928_v16 = vpop.f32.mrf.mxu0  ;;  %v6465_v25 = vpop.f32.mrf.mxu1 }
 0x572   : > { %v6885_v24 = vpack.c.bf16 %v6763_v29, %v6761_v42  ;;  %v6466_v19 = vadd.f32 %v6465_v25, %v6113_v32  ;;  %v6764_v12 = vmax.f32 %v6464_v52, 0.0  ;;  %v18457_v32 = vld [vmem:[#allocation286_spill] sm:$0xff] }
 0x573   : > { %v15937_v30 = vpop.f32.mrf.mxu0  ;;  %v6467_v46 = vpop.f32.mrf.mxu1 }
 0x574   : > { %v6468_v14 = vadd.f32 %v6467_v46, %v6115_v63  ;;  %7127 = vmatprep.mubr.bf16.mxu0 %v6885_v24  ;;  %v6765_v58 = vmax.f32 %v6466_v19, 0.0  ;;  %v6125_v63 = vadd.f32 %v18457_v32, %v15853_v45  ;;  %v18458_v24 = vld [vmem:[#allocation145_spill] sm:$0xff] }
 0x575   : > { %v15941_v8 = vpop.f32.mrf.mxu0  ;;  %v6469_v38 = vpop.f32.mrf.mxu1  ;;  %7128 = vmatmul.mubr.bf16.gmra.mxu0 %v6884_v23  ;;  %v6123_v23 = vadd.f32 %v18456_v6, %v15861_v7  ;;  %v6121_v3 = vadd.f32 %v18458_v24, %v15853_v45 }
 0x576   : > { %v6766_v57 = vmax.f32 %v6468_v14, 0.0  ;;  %v6470_v54 = vadd.f32 %v6469_v38, %v6117_v41  ;;  %v18459_v41 = vld [vmem:[#allocation287_spill] sm:$0xff] }
 0x577   : > { %v15943_v60 = vpop.f32.mrf.mxu0  ;;  %v6473_v55 = vpop.f32.mrf.mxu1  ;;  %6712 = vmatmul.mubr.bf16.gmra.mxu1 %v15799_v37  ;;  %v6127_v19 = vadd.f32 %v18459_v41, %v15861_v7 }
 0x578   : > { %v6886_v42 = vpack.c.bf16 %v6766_v57, %v6764_v12  ;;  %v6767_v5 = vmax.f32 %v6470_v54, 0.0  ;;  %6721 = vmatprep.mubr.bf16.mxu1 %v15823_v17  ;;  %v6474_v38 = vadd.f32 %v6473_v55, %v6121_v3  ;;  %v18462_v55 = vld [vmem:[#allocation97_spill] sm:$0xff] }
 0x579   : > { %v15947_v29 = vpop.f32.mrf.mxu0  ;;  %v6475_v25 = vpop.f32.mrf.mxu1 }
 0x57a   : > { %v6887_v52 = vpack.c.bf16 %v6767_v5, %v6765_v58  ;;  %v6476_v17 = vadd.f32 %v6475_v25, %v6123_v23  ;;  %v6768_v41 = vmax.f32 %v6474_v38, 0.0 }
 0x57b   : > { %v15955_v46 = vpop.f32.mrf.mxu0  ;;  %v6477_v37 = vpop.f32.mrf.mxu1 }
 0x57c   : > { %v6478_v14 = vadd.f32 %v6477_v37, %v6125_v63  ;;  %7135 = vmatprep.mubr.bf16.mxu0 %v6887_v52  ;;  %v6769_v32 = vmax.f32 %v6476_v17, 0.0  ;;  %v6133_v63 = vadd.f32 %v18462_v55, %v15861_v7  ;;  %v18464_v37 = vld [vmem:[#allocation288_spill] sm:$0xff] }
 0x57d   : > { %v15959_v12 = vpop.f32.mrf.mxu0  ;;  %v6479_v57 = vpop.f32.mrf.mxu1  ;;  %7136 = vmatmul.mubr.bf16.gmra.mxu0 %v6886_v42  ;;  %v18463_v42 = vld [vmem:[#allocation150_spill] sm:$0xff] }
 0x57e   : > { %v6480_v54 = vadd.f32 %v6479_v57, %v6127_v19  ;;  %v6770_v6 = vmax.f32 %v6478_v14, 0.0  ;;  %v6135_v52 = vadd.f32 %v18463_v42, %v15853_v45  ;;  %v6131_v19 = vadd.f32 %v18464_v37, %v15853_v45 }
 0x57f   : > { %v15961_v58 = vpop.f32.mrf.mxu0  ;;  %v6483_v5 = vpop.f32.mrf.mxu1  ;;  %6722 = vmatmul.mubr.bf16.gmra.mxu1 %v15817_v39 }
 0x580   : > { %18460 = vst [vmem:[#allocation266_spill] sm:$0xff] %v15961_v58  ;;  %v6771_v24 = vmax.f32 %v6480_v54, 0.0  ;;  %6731 = vmatprep.mubr.bf16.mxu1 %v15844_v2  ;;  %v6888_v14 = vpack.c.bf16 %v6770_v6, %v6768_v41  ;;  %v18465_v2 = vld [vmem:[#allocation290_spill] sm:$0xff]  ;;  %v6484_v58 = vadd.f32 %v6483_v5, %v6131_v19  ;;  %v18468_v19 = vld [vmem:[#allocation291_spill] sm:$0xff] }
 0x581   : > { %v15965_v25 = vpop.f32.mrf.mxu0  ;;  %v6485_v23 = vpop.f32.mrf.mxu1  ;;  %v6137_v38 = vadd.f32 %v18465_v2, %v15861_v7 }
 0x582   : > { %18461 = vst [vmem:[#allocation211_spill] sm:$0xff] %v15965_v25  ;;  %v6889_v3 = vpack.c.bf16 %v6771_v24, %v6769_v32  ;;  %v6486_v57 = vadd.f32 %v6485_v23, %v6133_v63  ;;  %v6772_v2 = vmax.f32 %v6484_v58, 0.0  ;;  %v18467_v63 = vld [vmem:[#allocation66_spill] sm:$0xff] }
 0x583   : > { %v15973_v39 = vpop.f32.mrf.mxu0  ;;  %v6487_v17 = vpop.f32.mrf.mxu1  ;;  %v6143_v5 = vadd.f32 %v18467_v63, %v15861_v7 }
 0x584   : > { %v6488_v54 = vadd.f32 %v6487_v17, %v6135_v52  ;;  %7143 = vmatprep.mubr.bf16.mxu0 %v6889_v3  ;;  %v6773_v6 = vmax.f32 %v6486_v57, 0.0  ;;  %v6145_v52 = vadd.f32 %v15677_v40, %v15853_v45  ;;  %v18470_v57 = vld [vmem:[#allocation187_spill] sm:$0xff] }
 0x585   : > { %v15977_v25 = vpop.f32.mrf.mxu0  ;;  %v6489_v55 = vpop.f32.mrf.mxu1  ;;  %7144 = vmatmul.mubr.bf16.gmra.mxu0 %v6888_v14  ;;  %v6141_v14 = vadd.f32 %v18468_v19, %v15853_v45 }
 0x586   : > { %v6490_v42 = vadd.f32 %v6489_v55, %v6137_v38  ;;  %v6774_v32 = vmax.f32 %v6488_v54, 0.0  ;;  %v6147_v54 = vadd.f32 %v18470_v57, %v15861_v7 }
 0x587   : > { %v15979_v24 = vpop.f32.mrf.mxu0  ;;  %v6493_v37 = vpop.f32.mrf.mxu1  ;;  %6732 = vmatmul.mubr.bf16.gmra.mxu1 %v15835_v44 }
 0x588   : > { %18466 = vst [vmem:[#allocation103_spill] sm:$0xff] %v15979_v24  ;;  %v6775_v41 = vmax.f32 %v6490_v42, 0.0  ;;  %6741 = vmatprep.mubr.bf16.mxu1 %v15878_v62  ;;  %v6890_v17 = vpack.c.bf16 %v6774_v32, %v6772_v2  ;;  %v6494_v55 = vadd.f32 %v6493_v37, %v6141_v14 }
 0x589   : > { %v6495_v23 = vpop.f32.mrf.mxu1  ;;  %v15989_v38 = vpop.f32.mrf.mxu0 }
 0x58a   : > { %v6891_v3 = vpack.c.bf16 %v6775_v41, %v6773_v6  ;;  %18469 = vst [vmem:[#allocation159_spill] sm:$0xff] %v15989_v38  ;;  %v6496_v62 = vadd.f32 %v6495_v23, %v6143_v5  ;;  %v6776_v2 = vmax.f32 %v6494_v55, 0.0  ;;  %v18472_v38 = vld [vmem:[#allocation31_spill] sm:$0xff] }
 0x58b   : > { %v6497_v44 = vpop.f32.mrf.mxu1  ;;  %v15993_v24 = vpop.f32.mrf.mxu0  ;;  %v6153_v57 = vadd.f32 %v18472_v38, %v15861_v7  ;;  %v18473_v23 = vld [vmem:[#allocation151_spill] sm:$0xff] }
 0x58c   : > { %v6498_v58 = vadd.f32 %v6497_v44, %v6145_v52  ;;  %7151 = vmatprep.mubr.bf16.mxu0 %v6891_v3  ;;  %18471 = vst [vmem:[#allocation72_spill] sm:$0xff] %v15993_v24  ;;  %v6777_v32 = vmax.f32 %v6496_v62, 0.0  ;;  %v6155_v5 = vadd.f32 %v18473_v23, %v15853_v45  ;;  %v10248_v52 = vld [vmem:[%s16787_s7 + $0x20] sm:$0xff]   ;;  %v18474_v3 = vld [vmem:[#allocation259_spill] sm:$0xff]  ;;  %v18477_v24 = vld [vmem:[#allocation192_spill] sm:$0xff] }
 0x58d   : > { %v6499_v42 = vpop.f32.mrf.mxu1  ;;  %7152 = vmatmul.mubr.bf16.gmra.mxu0 %v6890_v17  ;;  %v6151_v14 = vadd.f32 %v18474_v3, %v15853_v45  ;;  %9551 = vmatprep.subr.bf16.mxu1 %v10248_v52 }
 0x58e   : > { %v6500_v63 = vadd.f32 %v6499_v42, %v6147_v54  ;;  %v6778_v40 = vmax.f32 %v6498_v58, 0.0  ;;  %v18476_v54 = vld [vmem:[#allocation262_spill] sm:$0xff]  ;;  %9552 = vmatpush3.bf16.msra.mxu1 %v10248_v52 }
 0x58f   : > { %v6503_v6 = vpop.f32.mrf.mxu1  ;;  %6742 = vmatmul.mubr.bf16.gmra.mxu1 %v15869_v15  ;;  %v16005_v15 = vpop.f32.mrf.mxu0  ;;  %v6157_v62 = vadd.f32 %v18476_v54, %v15861_v7  ;;  %v6163_v54 = vadd.f32 %v18477_v24, %v15861_v7 }
 0x590   : > { %v6779_v41 = vmax.f32 %v6500_v63, 0.0  ;;  %v6892_v17 = vpack.c.bf16 %v6778_v40, %v6776_v2  ;;  %18475 = vst [vmem:[#allocation215_spill] sm:$0xff] %v16005_v15  ;;  %v6504_v55 = vadd.f32 %v6503_v6, %v6151_v14  ;;  %v18478_v6 = vld [vmem:[#allocation152_spill] sm:$0xff] }
 0x591   : > { %v6505_v19 = vpop.f32.mrf.mxu1 }
 0x592   : > { %v6893_v37 = vpack.c.bf16 %v6779_v41, %v6777_v32  ;;  %v6506_v58 = vadd.f32 %v6505_v19, %v6153_v57  ;;  %v16009_v32 = vpop.f32.mrf.mxu0  ;;  %v6780_v3 = vmax.f32 %v6504_v55, 0.0  ;;  %v6165_v19 = vadd.f32 %v15714_v36, %v15853_v45 }
 0x593   : > { %v6507_v44 = vpop.f32.mrf.mxu1 }
 0x594   : > { %v6508_v38 = vadd.f32 %v6507_v44, %v6155_v5  ;;  %7159 = vmatprep.mubr.bf16.mxu0 %v6893_v37  ;;  %v6781_v40 = vmax.f32 %v6506_v58, 0.0  ;;  %v6161_v5 = vadd.f32 %v18478_v6, %v15853_v45  ;;  %v16017_v37 = vpop.f32.mrf.mxu0 }
 0x595   : > { %v6509_v42 = vpop.f32.mrf.mxu1  ;;  %7160 = vmatmul.mubr.bf16.gmra.mxu0 %v6892_v17  ;;  %v6167_v17 = vadd.f32 %v15718_v50, %v15861_v7  ;;  %v6175_v50 = vadd.f32 %v15732_v51, %v15853_v45  ;;  %v10249_v51 = vld [vmem:[%s16787_s7 + $0x18] sm:$0xff]  }
 0x596   : > { %v6510_v63 = vadd.f32 %v6509_v42, %v6157_v62  ;;  %v6782_v41 = vmax.f32 %v6508_v38, 0.0  ;;  %v16021_v55 = vpop.f32.mrf.mxu0  ;;  %9553 = vmatprep.subr.bf16.mxu1 %v10249_v51 }
 0x597   : > { %v6513_v23 = vpop.f32.mrf.mxu1  ;;  %9554 = vmatpush3.bf16.msra.mxu1 %v10249_v51  ;;  %v10251_v51 = vld [vmem:[%s16787_s7 + $0x8] sm:$0xff]  }
 0x598   : > { %v6783_v2 = vmax.f32 %v6510_v63, 0.0  ;;  %v6894_v52 = vpack.c.bf16 %v6782_v41, %v6780_v3  ;;  %v6514_v58 = vadd.f32 %v6513_v23, %v6161_v5  ;;  %v18479_v41 = vld [vmem:[#allocation195_spill] sm:$0xff]  ;;  %v18480_v23 = vld [vmem:[#allocation294_spill] sm:$0xff] }
 0x599   : > { %v6515_v15 = vpop.f32.mrf.mxu1  ;;  %v6173_v3 = vadd.f32 %v18479_v41, %v15861_v7 }
 0x59a   : > { %v6895_v57 = vpack.c.bf16 %v6783_v2, %v6781_v40  ;;  %v6516_v44 = vadd.f32 %v6515_v15, %v6163_v54  ;;  %v6784_v2 = vmax.f32 %v6514_v58, 0.0  ;;  %v6171_v54 = vadd.f32 %v18480_v23, %v15853_v45 }
 0x59b   : > { %v6517_v14 = vpop.f32.mrf.mxu1 }
 0x59c   : > { %v6518_v62 = vadd.f32 %v6517_v14, %v6165_v19  ;;  %7167 = vmatprep.mubr.bf16.mxu0 %v6895_v57  ;;  %v6785_v63 = vmax.f32 %v6516_v44, 0.0  ;;  %v16029_v19 = vpop.f32.mrf.mxu0 }
 0x59d   : > { %v6519_v38 = vpop.f32.mrf.mxu1  ;;  %7168 = vmatmul.mubr.bf16.gmra.mxu0 %v6894_v52  ;;  %v18481_v52 = vld [vmem:[#allocation99_spill] sm:$0xff] }
 0x59e   : > { %v6520_v24 = vadd.f32 %v6519_v38, %v6167_v17  ;;  %v6786_v36 = vmax.f32 %v6518_v62, 0.0  ;;  %v6177_v14 = vadd.f32 %v18481_v52, %v15861_v7 }
 0x59f   : > { %v6523_v42 = vpop.f32.mrf.mxu1 }
 0x5a0   : > { %v6787_v40 = vmax.f32 %v6520_v24, 0.0  ;;  %v6896_v57 = vpack.c.bf16 %v6786_v36, %v6784_v2  ;;  %v6524_v62 = vadd.f32 %v6523_v42, %v6171_v54  ;;  %v16036_v24 = vpop.f32.mrf.mxu0  ;;  %v18483_v54 = vld [vmem:[#allocation33_spill] sm:$0xff] }
 0x5a1   : > { %v6525_v6 = vpop.f32.mrf.mxu1 }
 0x5a2   : > { %v6897_v15 = vpack.c.bf16 %v6787_v40, %v6785_v63  ;;  %v6526_v17 = vadd.f32 %v6525_v6, %v6173_v3  ;;  %v6788_v41 = vmax.f32 %v6524_v62, 0.0  ;;  %v18482_v6 = vld [vmem:[#allocation68_spill] sm:$0xff]  ;;  %v6185_v3 = vadd.f32 %v15750_v10, %v15853_v45 }
 0x5a3   : > { %v6527_v5 = vpop.f32.mrf.mxu1  ;;  %v6183_v42 = vadd.f32 %v18482_v6, %v15861_v7 }
 0x5a4   : > { %v6528_v44 = vadd.f32 %v6527_v5, %v6175_v50  ;;  %7175 = vmatprep.mubr.bf16.mxu0 %v6897_v15  ;;  %v6789_v36 = vmax.f32 %v6526_v17, 0.0  ;;  %v10250_v15 = vld [vmem:[%s16787_s7 + $0x10] sm:$0xff]   ;;  %v16047_v5 = vpop.f32.mrf.mxu0  ;;  %v6187_v17 = vadd.f32 %v15754_v0, %v15861_v7 }
 0x5a5   : > { %v6529_v58 = vpop.f32.mrf.mxu1  ;;  %7176 = vmatmul.mubr.bf16.gmra.mxu0 %v6896_v57  ;;  %v6181_v57 = vadd.f32 %v18483_v54, %v15853_v45  ;;  %9555 = vmatprep.subr.bf16.mxu1 %v10250_v15 }
 0x5a6   : > { %v6530_v38 = vadd.f32 %v6529_v58, %v6177_v14  ;;  %v6790_v63 = vmax.f32 %v6528_v44, 0.0  ;;  %9556 = vmatpush3.bf16.msra.mxu1 %v10250_v15  ;;  %v18484_v15 = vld [vmem:[#allocation296_spill] sm:$0xff] }
 0x5a7   : > { %v6533_v40 = vpop.f32.mrf.mxu1  ;;  %9557 = vmatprep.subr.bf16.mxu1 %v10251_v51  ;;  %v6191_v54 = vadd.f32 %v18484_v15, %v15853_v45 }
 0x5a8   : > { %v6791_v2 = vmax.f32 %v6530_v38, 0.0  ;;  %v6898_v52 = vpack.c.bf16 %v6790_v63, %v6788_v41  ;;  %v6534_v10 = vadd.f32 %v6533_v40, %v6181_v57  ;;  %v6193_v40 = vadd.f32 %v15763_v28, %v15861_v7 }
 0x5a9   : > { %v6535_v23 = vpop.f32.mrf.mxu1 }
 0x5aa   : > { %v6899_v50 = vpack.c.bf16 %v6791_v2, %v6789_v36  ;;  %v6536_v44 = vadd.f32 %v6535_v23, %v6183_v42  ;;  %v16054_v36 = vpop.f32.mrf.mxu0  ;;  %v6792_v0 = vmax.f32 %v6534_v10, 0.0  ;;  %9558 = vmatpush3.bf16.msra.mxu1 %v10251_v51  ;;  %v6195_v42 = vadd.f32 %v15771_v49, %v15853_v45 }
 0x5ab   : > { %v6537_v14 = vpop.f32.mrf.mxu1 }
 0x5ac   : > { %v6538_v62 = vadd.f32 %v6537_v14, %v6185_v3  ;;  %7183 = vmatprep.mubr.bf16.mxu0 %v6899_v50  ;;  %v6793_v41 = vmax.f32 %v6536_v44, 0.0  ;;  %v10252_v50 = vld [vmem:[%s16787_s7] sm:$0xff]   ;;  %v16065_v57 = vpop.f32.mrf.mxu0 }
 0x5ad   : > { %v6539_v58 = vpop.f32.mrf.mxu1  ;;  %7184 = vmatmul.mubr.bf16.gmra.mxu0 %v6898_v52  ;;  %18485 = vst [vmem:[#allocation216_spill] sm:$0xff] %v16065_v57  ;;  %9559 = vmatprep.subr.bf16.mxu1 %v10252_v50  ;;  %v18487_v57 = vld [vmem:[#allocation203_spill] sm:$0xff] }
 0x5ae   : > { %v6540_v38 = vadd.f32 %v6539_v58, %v6187_v17  ;;  %v6794_v63 = vmax.f32 %v6538_v62, 0.0  ;;  %v18486_v17 = vld [vmem:[#allocation297_spill] sm:$0xff]  ;;  %9560 = vmatpush3.bf16.msra.mxu1 %v10252_v50 }
 0x5af   : > { %v6543_v2 = vpop.f32.mrf.mxu1  ;;  %v6197_v44 = vadd.f32 %v18486_v17, %v15861_v7  ;;  %v6203_v17 = vadd.f32 %v18487_v57, %v15861_v7 }
 0x5b0   : > { %v6795_v6 = vmax.f32 %v6540_v38, 0.0  ;;  %v6900_v52 = vpack.c.bf16 %v6794_v63, %v6792_v0  ;;  %v6544_v49 = vadd.f32 %v6543_v2, %v6191_v54  ;;  %v16069_v38 = vpop.f32.mrf.mxu0  ;;  %v18488_v2 = vld [vmem:[#allocation153_spill] sm:$0xff] }
 0x5b1   : > { %v6545_v23 = vpop.f32.mrf.mxu1 }
 0x5b2   : > { %v6901_v3 = vpack.c.bf16 %v6795_v6, %v6793_v41  ;;  %v6546_v62 = vadd.f32 %v6545_v23, %v6193_v40  ;;  %v6796_v63 = vmax.f32 %v6544_v49, 0.0  ;;  %v6205_v23 = vadd.f32 %v15789_v53, %v15853_v45 }
 0x5b3   : > { %v6547_v14 = vpop.f32.mrf.mxu1 }
 0x5b4   : > { %v6548_v28 = vadd.f32 %v6547_v14, %v6195_v42  ;;  %7191 = vmatprep.mubr.bf16.mxu0 %v6901_v3  ;;  %v6797_v6 = vmax.f32 %v6546_v62, 0.0  ;;  %v6201_v42 = vadd.f32 %v18488_v2, %v15853_v45  ;;  %v16077_v3 = vpop.f32.mrf.mxu0 }
 0x5b5   : > { %v6549_v10 = vpop.f32.mrf.mxu1  ;;  %7192 = vmatmul.mubr.bf16.gmra.mxu0 %v6900_v52  ;;  %v6207_v52 = vadd.f32 %v15793_v22, %v15861_v7  ;;  %v6215_v22 = vadd.f32 %v15807_v34, %v15853_v45 }
 0x5b6   : > { %v6550_v58 = vadd.f32 %v6549_v10, %v6197_v44  ;;  %v6798_v51 = vmax.f32 %v6548_v28, 0.0  ;;  %v16081_v49 = vpop.f32.mrf.mxu0 }
 0x5b7   : > { %v6553_v41 = vpop.f32.mrf.mxu1 }
 0x5b8   : > { %v6799_v15 = vmax.f32 %v6550_v58, 0.0  ;;  %v6902_v50 = vpack.c.bf16 %v6798_v51, %v6796_v63  ;;  %v6554_v62 = vadd.f32 %v6553_v41, %v6201_v42  ;;  %v6213_v51 = vadd.f32 %v15802_v20, %v15861_v7  ;;  %v18489_v41 = vld [vmem:[#allocation101_spill] sm:$0xff] }
 0x5b9   : > { %v6555_v0 = vpop.f32.mrf.mxu1  ;;  %v6217_v42 = vadd.f32 %v15811_v61, %v15861_v7  ;;  %v6225_v61 = vadd.f32 %v15825_v47, %v15853_v45 }
 0x5ba   : > { %v6903_v40 = vpack.c.bf16 %v6799_v15, %v6797_v6  ;;  %v6556_v14 = vadd.f32 %v6555_v0, %v6203_v17  ;;  %v6800_v15 = vmax.f32 %v6554_v62, 0.0  ;;  %v6211_v0 = vadd.f32 %v18489_v41, %v15853_v45  ;;  %v16089_v17 = vpop.f32.mrf.mxu0 }
 0x5bb   : > { %v6557_v54 = vpop.f32.mrf.mxu1 }
 0x5bc   : > { %v6558_v44 = vadd.f32 %v6557_v54, %v6205_v23  ;;  %7199 = vmatprep.mubr.bf16.mxu0 %v6903_v40  ;;  %v6801_v58 = vmax.f32 %v6556_v14, 0.0 }
 0x5bd   : > { %v6559_v28 = vpop.f32.mrf.mxu1  ;;  %7200 = vmatmul.mubr.bf16.gmra.mxu0 %v6902_v50 }
 0x5be   : > { %v6560_v57 = vadd.f32 %v6559_v28, %v6207_v52  ;;  %v6802_v53 = vmax.f32 %v6558_v44, 0.0  ;;  %v16093_v44 = vpop.f32.mrf.mxu0 }
 0x5bf   : > { %v6563_v10 = vpop.f32.mrf.mxu1 }
 0x5c0   : > { %v6803_v6 = vmax.f32 %v6560_v57, 0.0  ;;  %v6904_v23 = vpack.c.bf16 %v6802_v53, %v6800_v15  ;;  %v6564_v52 = vadd.f32 %v6563_v10, %v6211_v0  ;;  %v6223_v53 = vadd.f32 %v15820_v21, %v15861_v7 }
 0x5c1   : > { %v6565_v2 = vpop.f32.mrf.mxu1  ;;  %v6221_v10 = vadd.f32 %v15814_v1, %v15853_v45 }
 0x5c2   : > { %v6905_v63 = vpack.c.bf16 %v6803_v6, %v6801_v58  ;;  %v6566_v50 = vadd.f32 %v6565_v2, %v6213_v51  ;;  %v6804_v58 = vmax.f32 %v6564_v52, 0.0  ;;  %v16101_v2 = vpop.f32.mrf.mxu0 }
 0x5c3   : > { %v6567_v40 = vpop.f32.mrf.mxu1 }
 0x5c4   : > { %v6568_v54 = vadd.f32 %v6567_v40, %v6215_v22  ;;  %7207 = vmatprep.mubr.bf16.mxu0 %v6905_v63  ;;  %v6805_v28 = vmax.f32 %v6566_v50, 0.0  ;;  %v6227_v63 = vadd.f32 %v15829_v4, %v15861_v7  ;;  %v18490_v4 = vld [vmem:[#allocation70_spill] sm:$0xff] }
 0x5c5   : > { %v6569_v14 = vpop.f32.mrf.mxu1  ;;  %7208 = vmatmul.mubr.bf16.gmra.mxu0 %v6904_v23 }
 0x5c6   : > { %v6570_v20 = vadd.f32 %v6569_v14, %v6217_v42  ;;  %v6806_v34 = vmax.f32 %v6568_v54, 0.0  ;;  %v16105_v42 = vpop.f32.mrf.mxu0 }
 0x5c7   : > { %v6573_v62 = vpop.f32.mrf.mxu1 }
 0x5c8   : > { %v6807_v57 = vmax.f32 %v6570_v20, 0.0  ;;  %v6906_v51 = vpack.c.bf16 %v6806_v34, %v6804_v58  ;;  %v6574_v23 = vadd.f32 %v6573_v62, %v6221_v10  ;;  %v6233_v20 = vadd.f32 %v15841_v11, %v15861_v7  ;;  %v18491_v62 = vld [vmem:[#allocation263_spill] sm:$0xff]  ;;  %v16113_v58 = vpop.f32.mrf.mxu0 }
 0x5c9   : > { %v6575_v6 = vpop.f32.mrf.mxu1  ;;  %v6235_v34 = vadd.f32 %v18490_v4, %v15853_v45 }
 0x5ca   : > { %v6907_v15 = vpack.c.bf16 %v6807_v57, %v6805_v28  ;;  %v6576_v41 = vadd.f32 %v6575_v6, %v6223_v53  ;;  %v6808_v52 = vmax.f32 %v6574_v23, 0.0  ;;  %v6231_v57 = vadd.f32 %v18491_v62, %v15853_v45 }
 0x5cb   : > { %v6577_v22 = vpop.f32.mrf.mxu1 }
 0x5cc   : > { %v6578_v0 = vadd.f32 %v6577_v22, %v6225_v61  ;;  %7215 = vmatprep.mubr.bf16.mxu0 %v6907_v15  ;;  %v6809_v54 = vmax.f32 %v6576_v41, 0.0  ;;  %v6237_v61 = vadd.f32 %v15857_v9, %v15861_v7  ;;  %v6245_v9 = vadd.f32 %v15880_v56, %v15853_v45 }
 0x5cd   : > { %v6579_v40 = vpop.f32.mrf.mxu1  ;;  %7216 = vmatmul.mubr.bf16.gmra.mxu0 %v6906_v51 }
 0x5ce   : > { %v6580_v21 = vadd.f32 %v6579_v40, %v6227_v63  ;;  %v6810_v47 = vmax.f32 %v6578_v0, 0.0  ;;  %v16117_v63 = vpop.f32.mrf.mxu0 }
 0x5cf   : > { %v6583_v50 = vpop.f32.mrf.mxu1 }
 0x5d0   : > { %v6811_v1 = vmax.f32 %v6580_v21, 0.0  ;;  %v6908_v6 = vpack.c.bf16 %v6810_v47, %v6808_v52  ;;  %v6584_v51 = vadd.f32 %v6583_v50, %v6231_v57  ;;  %v6243_v47 = vadd.f32 %v15872_v26, %v15861_v7  ;;  %v18492_v50 = vld [vmem:[#allocation208_spill] sm:$0xff] }
 0x5d1   : > { %v6585_v14 = vpop.f32.mrf.mxu1  ;;  %v6241_v52 = vadd.f32 %v18492_v50, %v15853_v45 }
 0x5d2   : > { %v6909_v28 = vpack.c.bf16 %v6811_v1, %v6809_v54  ;;  %v6586_v15 = vadd.f32 %v6585_v14, %v6233_v20  ;;  %v6812_v21 = vmax.f32 %v6584_v51, 0.0  ;;  %v16125_v14 = vpop.f32.mrf.mxu0 }
 0x5d3   : > { %v6587_v53 = vpop.f32.mrf.mxu1 }
 0x5d4   : > { %v6588_v10 = vadd.f32 %v6587_v53, %v6235_v34  ;;  %7223 = vmatprep.mubr.bf16.mxu0 %v6909_v28  ;;  %v6813_v23 = vmax.f32 %v6586_v15, 0.0  ;;  %v6247_v34 = vadd.f32 %v15884_v31, %v15861_v7  ;;  %v16129_v53 = vpop.f32.mrf.mxu0  ;;  %v6255_v31 = vadd.f32 %v15898_v18, %v15853_v45 }
 0x5d5   : > { %v6589_v22 = vpop.f32.mrf.mxu1  ;;  %7224 = vmatmul.mubr.bf16.gmra.mxu0 %v6908_v6 }
 0x5d6   : > { %v6590_v11 = vadd.f32 %v6589_v22, %v6237_v61  ;;  %v6814_v41 = vmax.f32 %v6588_v10, 0.0 }
 0x5d7   : > { %v6593_v0 = vpop.f32.mrf.mxu1 }
 0x5d8   : > { %v6815_v40 = vmax.f32 %v6590_v11, 0.0  ;;  %v6910_v20 = vpack.c.bf16 %v6814_v41, %v6812_v21  ;;  %v6594_v57 = vadd.f32 %v6593_v0, %v6241_v52  ;;  %v6253_v11 = vadd.f32 %v15892_v33, %v15861_v7  ;;  %v18493_v0 = vld [vmem:[#allocation300_spill] sm:$0xff] }
 0x5d9   : > { %v6595_v54 = vpop.f32.mrf.mxu1 }
 0x5da   : > { %v6911_v1 = vpack.c.bf16 %v6815_v40, %v6813_v23  ;;  %v6596_v28 = vadd.f32 %v6595_v54, %v6243_v47  ;;  %v6816_v51 = vmax.f32 %v6594_v57, 0.0  ;;  %v6251_v23 = vadd.f32 %v18493_v0, %v15853_v45  ;;  %v16137_v40 = vpop.f32.mrf.mxu0 }
 0x5db   : > { %v6597_v4 = vpop.f32.mrf.mxu1  ;;  %v6257_v47 = vadd.f32 %v15902_v48, %v15861_v7  ;;  %v6265_v48 = vadd.f32 %v15916_v35, %v15853_v45 }
 0x5dc   : > { %v6598_v62 = vadd.f32 %v6597_v4, %v6245_v9  ;;  %7231 = vmatprep.mubr.bf16.mxu0 %v6911_v1  ;;  %v6817_v15 = vmax.f32 %v6596_v28, 0.0 }
 0x5dd   : > { %v6599_v6 = vpop.f32.mrf.mxu1  ;;  %7232 = vmatmul.mubr.bf16.gmra.mxu0 %v6910_v20  ;;  %v16141_v20 = vpop.f32.mrf.mxu0 }
 0x5de   : > { %v6600_v26 = vadd.f32 %v6599_v6, %v6247_v34  ;;  %v6818_v56 = vmax.f32 %v6598_v62, 0.0  ;;  %v6263_v6 = vadd.f32 %v15910_v59, %v15861_v7 }
 0x5df   : > { %v6603_v61 = vpop.f32.mrf.mxu1 }
 0x5e0   : > { %v6819_v10 = vmax.f32 %v6600_v26, 0.0  ;;  %v6912_v21 = vpack.c.bf16 %v6818_v56, %v6816_v51  ;;  %v6604_v50 = vadd.f32 %v6603_v61, %v6251_v23  ;;  %v6261_v56 = vadd.f32 %v15904_v43, %v15853_v45  ;;  %v16149_v61 = vpop.f32.mrf.mxu0 }
 0x5e1   : > { %v6605_v22 = vpop.f32.mrf.mxu1  ;;  %v6267_v51 = vadd.f32 %v15920_v13, %v15861_v7  ;;  %v6275_v13 = vadd.f32 %v15937_v30, %v15853_v45 }
 0x5e2   : > { %v6913_v41 = vpack.c.bf16 %v6819_v10, %v6817_v15  ;;  %v6606_v9 = vadd.f32 %v6605_v22, %v6253_v11  ;;  %v6820_v62 = vmax.f32 %v6604_v50, 0.0  ;;  %v16153_v0 = vpop.f32.mrf.mxu0  ;;  %v6271_v50 = vadd.f32 %v15922_v27, %v15853_v45 }
 0x5e3   : > { %v6607_v54 = vpop.f32.mrf.mxu1 }
 0x5e4   : > { %v6608_v1 = vadd.f32 %v6607_v54, %v6255_v31  ;;  %7239 = vmatprep.mubr.bf16.mxu0 %v6913_v41  ;;  %v6821_v34 = vmax.f32 %v6606_v9, 0.0  ;;  %v6273_v9 = vadd.f32 %v15928_v16, %v15861_v7 }
 0x5e5   : > { %v6609_v52 = vpop.f32.mrf.mxu1  ;;  %7240 = vmatmul.mubr.bf16.gmra.mxu0 %v6912_v21 }
 0x5e6   : > { %v6610_v33 = vadd.f32 %v6609_v52, %v6257_v47  ;;  %v6822_v18 = vmax.f32 %v6608_v1, 0.0  ;;  %v16161_v52 = vpop.f32.mrf.mxu0 }
 0x5e7   : > { %v6613_v4 = vpop.f32.mrf.mxu1 }
 0x5e8   : > { %v6823_v28 = vmax.f32 %v6610_v33, 0.0  ;;  %v6914_v15 = vpack.c.bf16 %v6822_v18, %v6820_v62  ;;  %v6614_v31 = vadd.f32 %v6613_v4, %v6261_v56  ;;  %v6277_v4 = vadd.f32 %v15941_v8, %v15861_v7 }
 0x5e9   : > { %v6615_v57 = vpop.f32.mrf.mxu1  ;;  %v6285_v8 = vadd.f32 %v15955_v46, %v15853_v45 }
 0x5ea   : > { %v6915_v26 = vpack.c.bf16 %v6823_v28, %v6821_v34  ;;  %v6616_v22 = vadd.f32 %v6615_v57, %v6263_v6  ;;  %v6824_v54 = vmax.f32 %v6614_v31, 0.0  ;;  %v16165_v6 = vpop.f32.mrf.mxu0 }
 0x5eb   : > { %v6617_v10 = vpop.f32.mrf.mxu1 }
 0x5ec   : > { %v6618_v11 = vadd.f32 %v6617_v10, %v6265_v48  ;;  %7247 = vmatprep.mubr.bf16.mxu0 %v6915_v26  ;;  %v6825_v21 = vmax.f32 %v6616_v22, 0.0  ;;  %v6283_v10 = vadd.f32 %v15947_v29, %v15861_v7  ;;  %v6281_v22 = vadd.f32 %v15943_v60, %v15853_v45 }
 0x5ed   : > { %v6619_v41 = vpop.f32.mrf.mxu1  ;;  %7248 = vmatmul.mubr.bf16.gmra.mxu0 %v6914_v15 }
 0x5ee   : > { %v6620_v59 = vadd.f32 %v6619_v41, %v6267_v51  ;;  %v6826_v35 = vmax.f32 %v6618_v11, 0.0  ;;  %v16173_v11 = vpop.f32.mrf.mxu0 }
 0x5ef   : > { %v6623_v23 = vpop.f32.mrf.mxu1 }
 0x5f0   : > { %v6827_v43 = vmax.f32 %v6620_v59, 0.0  ;;  %v6916_v33 = vpack.c.bf16 %v6826_v35, %v6824_v54  ;;  %v6624_v62 = vadd.f32 %v6623_v23, %v6271_v50  ;;  %v6287_v59 = vadd.f32 %v15959_v12, %v15861_v7  ;;  %v16177_v54 = vpop.f32.mrf.mxu0  ;;  %v18494_v50 = vld [vmem:[#allocation211_spill] sm:$0xff] }
 0x5f1   : > { %v6625_v47 = vpop.f32.mrf.mxu1  ;;  %v6295_v12 = vadd.f32 %v15973_v39, %v15853_v45 }
 0x5f2   : > { %v6917_v1 = vpack.c.bf16 %v6827_v43, %v6825_v21  ;;  %v6626_v34 = vadd.f32 %v6625_v47, %v6273_v9  ;;  %v6828_v56 = vmax.f32 %v6624_v62, 0.0 }
 0x5f3   : > { %v6627_v18 = vpop.f32.mrf.mxu1 }
 0x5f4   : > { %v6628_v28 = vadd.f32 %v6627_v18, %v6275_v13  ;;  %7255 = vmatprep.mubr.bf16.mxu0 %v6917_v1  ;;  %v6829_v26 = vmax.f32 %v6626_v34, 0.0 }
 0x5f5   : > { %v6629_v57 = vpop.f32.mrf.mxu1  ;;  %7256 = vmatmul.mubr.bf16.gmra.mxu0 %v6916_v33  ;;  %v6293_v33 = vadd.f32 %v18494_v50, %v15861_v7 }
 0x5f6   : > { %v6630_v16 = vadd.f32 %v6629_v57, %v6277_v4  ;;  %v6830_v30 = vmax.f32 %v6628_v28, 0.0  ;;  %v18495_v4 = vld [vmem:[#allocation266_spill] sm:$0xff]  ;;  %v16185_v28 = vpop.f32.mrf.mxu0 }
 0x5f7   : > { %v6633_v48 = vpop.f32.mrf.mxu1  ;;  %v6291_v34 = vadd.f32 %v18495_v4, %v15853_v45 }
 0x5f8   : > { %v6831_v27 = vmax.f32 %v6630_v16, 0.0  ;;  %v6918_v31 = vpack.c.bf16 %v6830_v30, %v6828_v56  ;;  %v6634_v21 = vadd.f32 %v6633_v48, %v6281_v22  ;;  %v6297_v16 = vadd.f32 %v15977_v25, %v15861_v7  ;;  %v18497_v25 = vld [vmem:[#allocation72_spill] sm:$0xff] }
 0x5f9   : > { %v6635_v15 = vpop.f32.mrf.mxu1 }
 0x5fa   : > { %v6919_v51 = vpack.c.bf16 %v6831_v27, %v6829_v26  ;;  %v6636_v35 = vadd.f32 %v6635_v15, %v6283_v10  ;;  %v6832_v13 = vmax.f32 %v6634_v21, 0.0  ;;  %v16189_v15 = vpop.f32.mrf.mxu0  ;;  %v18498_v21 = vld [vmem:[#allocation103_spill] sm:$0xff] }
 0x5fb   : > { %v6637_v41 = vpop.f32.mrf.mxu1 }
 0x5fc   : > { %v6638_v23 = vadd.f32 %v6637_v41, %v6285_v8  ;;  %7263 = vmatprep.mubr.bf16.mxu0 %v6919_v51  ;;  %v6833_v9 = vmax.f32 %v6636_v35, 0.0  ;;  %v18496_v41 = vld [vmem:[#allocation159_spill] sm:$0xff]  ;;  %v6305_v35 = vadd.f32 %v18497_v25, %v15853_v45 }
 0x5fd   : > { %v6639_v43 = vpop.f32.mrf.mxu1  ;;  %7264 = vmatmul.mubr.bf16.gmra.mxu0 %v6918_v31 }
 0x5fe   : > { %v6640_v29 = vadd.f32 %v6639_v43, %v6287_v59  ;;  %v6834_v46 = vmax.f32 %v6638_v23, 0.0  ;;  %v6303_v59 = vadd.f32 %v18496_v41, %v15861_v7  ;;  %v6301_v43 = vadd.f32 %v18498_v21, %v15853_v45 }
 0x5ff   : > { %v6643_v47 = vpop.f32.mrf.mxu1 }
 0x600   : > { %v6835_v60 = vmax.f32 %v6640_v29, 0.0  ;;  %v6920_v62 = vpack.c.bf16 %v6834_v46, %v6832_v13  ;;  %v6644_v26 = vadd.f32 %v6643_v47, %v6291_v34  ;;  %v16197_v29 = vpop.f32.mrf.mxu0 }
 0x601   : > { %v6645_v1 = vpop.f32.mrf.mxu1 }
 0x602   : > { %v6921_v18 = vpack.c.bf16 %v6835_v60, %v6833_v9  ;;  %v6646_v30 = vadd.f32 %v6645_v1, %v6293_v33  ;;  %v6836_v22 = vmax.f32 %v6644_v26, 0.0  ;;  %v18499_v9 = vld [vmem:[#allocation215_spill] sm:$0xff]  ;;  %v6315_v26 = vadd.f32 %v16021_v55, %v15853_v45 }
 0x603   : > { %v6647_v57 = vpop.f32.mrf.mxu1  ;;  %v6307_v60 = vadd.f32 %v18499_v9, %v15861_v7  ;;  %v6321_v9 = vadd.f32 %v16036_v24, %v15853_v45 }
 0x604   : > { %v6648_v48 = vadd.f32 %v6647_v57, %v6295_v12  ;;  %7271 = vmatprep.mubr.bf16.mxu0 %v6921_v18  ;;  %v6837_v8 = vmax.f32 %v6646_v30, 0.0  ;;  %v16201_v18 = vpop.f32.mrf.mxu0 }
 0x605   : > { %v6649_v27 = vpop.f32.mrf.mxu1  ;;  %7272 = vmatmul.mubr.bf16.gmra.mxu0 %v6920_v62 }
 0x606   : > { %v6650_v56 = vadd.f32 %v6649_v27, %v6297_v16  ;;  %v6838_v39 = vmax.f32 %v6648_v48, 0.0  ;;  %v6313_v48 = vadd.f32 %v16017_v37, %v15861_v7 }
 0x607   : > { %v6653_v10 = vpop.f32.mrf.mxu1 }
 0x608   : > { %v6839_v51 = vmax.f32 %v6650_v56, 0.0  ;;  %v6922_v46 = vpack.c.bf16 %v6838_v39, %v6836_v22  ;;  %v6654_v50 = vadd.f32 %v6653_v10, %v6301_v43  ;;  %v6311_v56 = vadd.f32 %v16009_v32, %v15853_v45  ;;  %v16209_v39 = vpop.f32.mrf.mxu0 }
 0x609   : > { %v6655_v31 = vpop.f32.mrf.mxu1 }
 0x60a   : > { %v6923_v23 = vpack.c.bf16 %v6839_v51, %v6837_v8  ;;  %v6656_v13 = vadd.f32 %v6655_v31, %v6303_v59  ;;  %v6840_v16 = vmax.f32 %v6654_v50, 0.0  ;;  %v6317_v51 = vadd.f32 %v16029_v19, %v15861_v7  ;;  %v16213_v25 = vpop.f32.mrf.mxu0  ;;  %v18500_v50 = vld [vmem:[#allocation216_spill] sm:$0xff] }
 0x60b   : > { %v6657_v47 = vpop.f32.mrf.mxu1  ;;  %v6325_v19 = vadd.f32 %v16054_v36, %v15853_v45 }
 0x60c   : > { %v6658_v1 = vadd.f32 %v6657_v47, %v6305_v35  ;;  %7279 = vmatprep.mubr.bf16.mxu0 %v6923_v23  ;;  %v6841_v62 = vmax.f32 %v6656_v13, 0.0 }
 0x60d   : > { %v6659_v33 = vpop.f32.mrf.mxu1  ;;  %7280 = vmatmul.mubr.bf16.gmra.mxu0 %v6922_v46  ;;  %v6323_v46 = vadd.f32 %v16047_v5, %v15861_v7 }
 0x60e   : > { %v6660_v12 = vadd.f32 %v6659_v33, %v6307_v60  ;;  %v6842_v4 = vmax.f32 %v6658_v1, 0.0  ;;  %v16221_v60 = vpop.f32.mrf.mxu0  ;;  %v6327_v33 = vadd.f32 %v18500_v50, %v15861_v7 }
 0x60f   : > { %v6663_v34 = vpop.f32.mrf.mxu1 }
 0x610   : > { %v6843_v57 = vmax.f32 %v6660_v12, 0.0  ;;  %v6924_v10 = vpack.c.bf16 %v6842_v4, %v6840_v16  ;;  %v6664_v41 = vadd.f32 %v6663_v34, %v6311_v56  ;;  %v6335_v56 = vadd.f32 %v16081_v49, %v15853_v45 }
 0x611   : > { %v6665_v30 = vpop.f32.mrf.mxu1 }
 0x612   : > { %v6925_v27 = vpack.c.bf16 %v6843_v57, %v6841_v62  ;;  %v6666_v22 = vadd.f32 %v6665_v30, %v6313_v48  ;;  %v6844_v21 = vmax.f32 %v6664_v41, 0.0  ;;  %v16225_v57 = vpop.f32.mrf.mxu0  ;;  %v6337_v41 = vadd.f32 %v16089_v17, %v15861_v7 }
 0x613   : > { %v6667_v8 = vpop.f32.mrf.mxu1 }
 0x614   : > { %v6668_v31 = vadd.f32 %v6667_v8, %v6315_v26  ;;  %7287 = vmatprep.mubr.bf16.mxu0 %v6925_v27  ;;  %v6845_v23 = vmax.f32 %v6666_v22, 0.0  ;;  %v6333_v27 = vadd.f32 %v16077_v3, %v15861_v7  ;;  %v6331_v8 = vadd.f32 %v16069_v38, %v15853_v45  ;;  %v16240_v3 = vld [vmem:[%s16786_s6] ss:$0 sm:$0xff] }
 0x615   : > { %v6669_v59 = vpop.f32.mrf.mxu1  ;;  %7288 = vmatmul.mubr.bf16.gmra.mxu0 %v6924_v10 }
 0x616   : > { %v6670_v37 = vadd.f32 %v6669_v59, %v6317_v51  ;;  %v6846_v55 = vmax.f32 %v6668_v31, 0.0  ;;  %v16233_v51 = vpop.f32.mrf.mxu0 }
 0x617   : > { %v6673_v35 = vpop.f32.mrf.mxu1 }
 0x618   : > { %v6847_v32 = vmax.f32 %v6670_v37, 0.0  ;;  %v6926_v13 = vpack.c.bf16 %v6846_v55, %v6844_v21  ;;  %v6674_v34 = vadd.f32 %v6673_v35, %v6321_v9 }
 0x619   : > { %v6675_v43 = vpop.f32.mrf.mxu1 }
 0x61a   : > { %v6927_v47 = vpack.c.bf16 %v6847_v32, %v6845_v23  ;;  %v6676_v12 = vadd.f32 %v6675_v43, %v6323_v46  ;;  %v6848_v48 = vmax.f32 %v6674_v34, 0.0 }
 0x61b   : > { %v6677_v1 = vpop.f32.mrf.mxu1 }
 0x61c   : > { %v6678_v4 = vadd.f32 %v6677_v1, %v6325_v19  ;;  %7295 = vmatprep.mubr.bf16.mxu0 %v6927_v47  ;;  %v6849_v30 = vmax.f32 %v6676_v12, 0.0  ;;  %v6345_v1 = vadd.f32 %v16105_v42, %v15853_v45  ;;  %v6341_v12 = vadd.f32 %v16093_v44, %v15853_v45 }
 0x61d   : > { %v6679_v62 = vpop.f32.mrf.mxu1  ;;  %7296 = vmatmul.mubr.bf16.gmra.mxu0 %v6926_v13  ;;  %v6343_v13 = vadd.f32 %v16101_v2, %v15861_v7 }
 0x61e   : > { %v6680_v5 = vadd.f32 %v6679_v62, %v6327_v33  ;;  %v6850_v36 = vmax.f32 %v6678_v4, 0.0  ;;  %v6347_v4 = vadd.f32 %v16113_v58, %v15861_v7 }
 0x61f   : > { %v6683_v16 = vpop.f32.mrf.mxu1 }
 0x620   : > { %v6851_v24 = vmax.f32 %v6680_v5, 0.0  ;;  %v6928_v22 = vpack.c.bf16 %v6850_v36, %v6848_v48  ;;  %v6684_v55 = vadd.f32 %v6683_v16, %v6331_v8 }
 0x621   : > { %v6685_v26 = vpop.f32.mrf.mxu1 }
 0x622   : > { %v6929_v10 = vpack.c.bf16 %v6851_v24, %v6849_v30  ;;  %v6686_v59 = vadd.f32 %v6685_v26, %v6333_v27  ;;  %v6852_v19 = vmax.f32 %v6684_v55, 0.0  ;;  %v6355_v55 = vadd.f32 %v16129_v53, %v15853_v45 }
 0x623   : > { %v6687_v31 = vpop.f32.mrf.mxu1 }
 0x624   : > { %v6688_v37 = vadd.f32 %v6687_v31, %v6335_v56  ;;  %7303 = vmatprep.mubr.bf16.mxu0 %v6929_v10  ;;  %v6853_v43 = vmax.f32 %v6686_v59, 0.0 }
 0x625   : > { %v6689_v35 = vpop.f32.mrf.mxu1  ;;  %v7113_v49 = vpop.f32.mrf.mxu0  ;;  %7304 = vmatmul.mubr.bf16.gmra.mxu0 %v6928_v22 }
 0x626   : > { %v6690_v38 = vadd.f32 %v6689_v35, %v6337_v41  ;;  %v6854_v23 = vmax.f32 %v6688_v37, 0.0  ;;  %v7114_v17 = vadd.f32 %v16240_v3, %v7113_v49  ;;  %v6353_v37 = vadd.f32 %v16125_v14, %v15861_v7 }
 0x627   : > { %v6693_v32 = vpop.f32.mrf.mxu1  ;;  %v7115_v21 = vpop.f32.mrf.mxu0 }
 0x628   : > { %v6855_v46 = vmax.f32 %v6690_v38, 0.0  ;;  %v6930_v34 = vpack.c.bf16 %v6854_v23, %v6852_v19  ;;  %v7368_v36 = vmax.f32 %v7114_v17, 0.0  ;;  %v6694_v2 = vadd.f32 %v6693_v32, %v6341_v12 }
 0x629   : > { %v6695_v47 = vpop.f32.mrf.mxu1  ;;  %v7116_v9 = vpop.f32.mrf.mxu0  ;;  %v6351_v38 = vadd.f32 %v16117_v63, %v15853_v45  ;;  %v6357_v23 = vadd.f32 %v16137_v40, %v15861_v7 }
 0x62a   : > { %v7117_v50 = vadd.f32 %v16240_v3, %v7116_v9  ;;  %v6931_v33 = vpack.c.bf16 %v6855_v46, %v6853_v43  ;;  %v6696_v16 = vadd.f32 %v6695_v47, %v6343_v13  ;;  %v6856_v31 = vmax.f32 %v6694_v2, 0.0 }
 0x62b   : > { %v6697_v62 = vpop.f32.mrf.mxu1  ;;  %v7118_v5 = vpop.f32.mrf.mxu0  ;;  %v6361_v2 = vadd.f32 %v16141_v20, %v15853_v45 }
 0x62c   : > { %v7369_v30 = vmax.f32 %v7117_v50, 0.0  ;;  %v6698_v24 = vadd.f32 %v6697_v62, %v6345_v1  ;;  %7311 = vmatprep.mubr.bf16.mxu0 %v6931_v33  ;;  %v6857_v8 = vmax.f32 %v6696_v16, 0.0  ;;  %v6365_v16 = vadd.f32 %v16153_v0, %v15853_v45 }
 0x62d   : > { %v6699_v48 = vpop.f32.mrf.mxu1  ;;  %v7121_v42 = vpop.f32.mrf.mxu0  ;;  %7312 = vmatmul.mubr.bf16.gmra.mxu0 %v6930_v34 }
 0x62e   : > { %v7432_v26 = vpack.c.bf16 %v7369_v30, %v7368_v36  ;;  %v6700_v27 = vadd.f32 %v6699_v48, %v6347_v4  ;;  %v6858_v56 = vmax.f32 %v6698_v24, 0.0  ;;  %v7122_v58 = vadd.f32 %v16240_v3, %v7121_v42 }
 0x62f   : > { %v6703_v10 = vpop.f32.mrf.mxu1  ;;  %v7123_v44 = vpop.f32.mrf.mxu0  ;;  %v6363_v36 = vadd.f32 %v16149_v61, %v15861_v7  ;;  %v6367_v48 = vadd.f32 %v16161_v52, %v15861_v7 }
 0x630   : > { %v6859_v22 = vmax.f32 %v6700_v27, 0.0  ;;  %9561 = vmatprep.mubr.bf16.mxu1 %v7432_v26  ;;  %v6932_v32 = vpack.c.bf16 %v6858_v56, %v6856_v31  ;;  %v7370_v46 = vmax.f32 %v7122_v58, 0.0  ;;  %v6704_v14 = vadd.f32 %v6703_v10, %v6351_v38 }
 0x631   : > { %v6705_v41 = vpop.f32.mrf.mxu1  ;;  %v7124_v59 = vpop.f32.mrf.mxu0 }
 0x632   : > { %v7125_v35 = vadd.f32 %v16240_v3, %v7124_v59  ;;  %v6933_v49 = vpack.c.bf16 %v6859_v22, %v6857_v8  ;;  %v6706_v17 = vadd.f32 %v6705_v41, %v6353_v37  ;;  %v6860_v34 = vmax.f32 %v6704_v14, 0.0 }
 0x633   : > { %v6707_v21 = vpop.f32.mrf.mxu1  ;;  %v7126_v43 = vpop.f32.mrf.mxu0 }
 0x634   : > { %v7371_v19 = vmax.f32 %v7125_v35, 0.0  ;;  %v6708_v47 = vadd.f32 %v6707_v21, %v6355_v55  ;;  %7319 = vmatprep.mubr.bf16.mxu0 %v6933_v49  ;;  %v6861_v12 = vmax.f32 %v6706_v17, 0.0  ;;  %v6377_v17 = vadd.f32 %v16185_v28, %v15861_v7 }
 0x635   : > { %v6709_v9 = vpop.f32.mrf.mxu1  ;;  %v7129_v53 = vpop.f32.mrf.mxu0  ;;  %7320 = vmatmul.mubr.bf16.gmra.mxu0 %v6932_v32  ;;  %v6375_v32 = vadd.f32 %v16177_v54, %v15853_v45 }
 0x636   : > { %v7433_v13 = vpack.c.bf16 %v7371_v19, %v7370_v46  ;;  %v6710_v1 = vadd.f32 %v6709_v9, %v6357_v23  ;;  %v6862_v50 = vmax.f32 %v6708_v47, 0.0  ;;  %v7130_v40 = vadd.f32 %v16240_v3, %v7129_v53 }
 0x637   : > { %v6713_v33 = vpop.f32.mrf.mxu1  ;;  %v7131_v63 = vpop.f32.mrf.mxu0  ;;  %v6373_v23 = vadd.f32 %v16173_v11, %v15861_v7  ;;  %v6371_v46 = vadd.f32 %v16165_v6, %v15853_v45 }
 0x638   : > { %v6863_v4 = vmax.f32 %v6710_v1, 0.0  ;;  %9562 = vmatmul.mubr.bf16.vlgmr.msra.gmra.mxu1 %v7433_v13  ;;  %v6934_v42 = vpack.c.bf16 %v6862_v50, %v6860_v34  ;;  %v7372_v56 = vmax.f32 %v7130_v40, 0.0  ;;  %v6714_v61 = vadd.f32 %v6713_v33, %v6361_v2 }
 0x639   : > { %v6715_v62 = vpop.f32.mrf.mxu1  ;;  %v7132_v5 = vpop.f32.mrf.mxu0 }
 0x63a   : > { %v7133_v30 = vadd.f32 %v16240_v3, %v7132_v5  ;;  %v6935_v24 = vpack.c.bf16 %v6863_v4, %v6861_v12  ;;  %v6716_v10 = vadd.f32 %v6715_v62, %v6363_v36  ;;  %v6864_v35 = vmax.f32 %v6714_v61, 0.0 }
 0x63b   : > { %v6717_v26 = vpop.f32.mrf.mxu1  ;;  %v7134_v27 = vpop.f32.mrf.mxu0 }
 0x63c   : > { %v7373_v44 = vmax.f32 %v7133_v30, 0.0  ;;  %v6718_v8 = vadd.f32 %v6717_v26, %v6365_v16  ;;  %7327 = vmatprep.mubr.bf16.mxu0 %v6935_v24  ;;  %v6865_v37 = vmax.f32 %v6716_v10, 0.0  ;;  %v6383_v16 = vadd.f32 %v16197_v29, %v15861_v7 }
 0x63d   : > { %v6719_v22 = vpop.f32.mrf.mxu1  ;;  %v7137_v0 = vpop.f32.mrf.mxu0  ;;  %7328 = vmatmul.mubr.bf16.gmra.mxu0 %v6934_v42  ;;  %v6385_v30 = vadd.f32 %v16201_v18, %v15853_v45  ;;  %v6387_v42 = vadd.f32 %v16209_v39, %v15861_v7 }
 0x63e   : > { %v7434_v58 = vpack.c.bf16 %v7373_v44, %v7372_v56  ;;  %v6720_v31 = vadd.f32 %v6719_v22, %v6367_v48  ;;  %v6866_v41 = vmax.f32 %v6718_v8, 0.0  ;;  %v7138_v52 = vadd.f32 %v16240_v3, %v7137_v0 }
 0x63f   : > { %v6723_v59 = vpop.f32.mrf.mxu1  ;;  %v7139_v20 = vpop.f32.mrf.mxu0  ;;  %v6381_v48 = vadd.f32 %v16189_v15, %v15853_v45 }
 0x640   : > { %v6867_v55 = vmax.f32 %v6720_v31, 0.0  ;;  %9565 = vmatprep.mubr.bf16.mxu1 %v7434_v58  ;;  %v6936_v19 = vpack.c.bf16 %v6866_v41, %v6864_v35  ;;  %v7374_v9 = vmax.f32 %v7138_v52, 0.0  ;;  %v6724_v11 = vadd.f32 %v6723_v59, %v6371_v46 }
 0x641   : > { %v6725_v49 = vpop.f32.mrf.mxu1  ;;  %v7140_v38 = vpop.f32.mrf.mxu0  ;;  %v6393_v35 = vadd.f32 %v16221_v60, %v15861_v7 }
 0x642   : > { %v7141_v21 = vadd.f32 %v16240_v3, %v7140_v38  ;;  %v6937_v43 = vpack.c.bf16 %v6867_v55, %v6865_v37  ;;  %v6726_v53 = vadd.f32 %v6725_v49, %v6373_v23  ;;  %v6868_v62 = vmax.f32 %v6724_v11, 0.0 }
 0x643   : > { %v6727_v47 = vpop.f32.mrf.mxu1  ;;  %v7142_v14 = vpop.f32.mrf.mxu0  ;;  %v6395_v49 = vadd.f32 %v16225_v57, %v15853_v45 }
 0x644   : > { %v7375_v13 = vmax.f32 %v7141_v21, 0.0  ;;  %v6728_v1 = vadd.f32 %v6727_v47, %v6375_v32  ;;  %7335 = vmatprep.mubr.bf16.mxu0 %v6937_v43  ;;  %v6869_v40 = vmax.f32 %v6726_v53, 0.0  ;;  %v6391_v32 = vadd.f32 %v16213_v25, %v15853_v45 }
 0x645   : > { %v6729_v50 = vpop.f32.mrf.mxu1  ;;  %v7145_v54 = vpop.f32.mrf.mxu0  ;;  %7336 = vmatmul.mubr.bf16.gmra.mxu0 %v6936_v19  ;;  %v6397_v21 = vadd.f32 %v16233_v51, %v15861_v7 }
 0x646   : > { %v7435_v33 = vpack.c.bf16 %v7375_v13, %v7374_v9  ;;  %v6730_v63 = vadd.f32 %v6729_v50, %v6377_v17  ;;  %v6870_v12 = vmax.f32 %v6728_v1, 0.0  ;;  %v7146_v28 = vadd.f32 %v16240_v3, %v7145_v54 }
 0x647   : > { %v6733_v4 = vpop.f32.mrf.mxu1  ;;  %v7147_v6 = vpop.f32.mrf.mxu0 }
 0x648   : > { %v6871_v34 = vmax.f32 %v6730_v63, 0.0  ;;  %9566 = vmatmul.mubr.bf16.gmra.mxu1 %v7435_v33  ;;  %v6938_v26 = vpack.c.bf16 %v6870_v12, %v6868_v62  ;;  %v7376_v10 = vmax.f32 %v7146_v28, 0.0  ;;  %v6734_v29 = vadd.f32 %v6733_v4, %v6381_v48 }
 0x649   : > { %v6735_v5 = vpop.f32.mrf.mxu1  ;;  %v7148_v36 = vpop.f32.mrf.mxu0 }
 0x64a   : > { %v7149_v24 = vadd.f32 %v16240_v3, %v7148_v36  ;;  %v6939_v2 = vpack.c.bf16 %v6871_v34, %v6869_v40  ;;  %v6736_v44 = vadd.f32 %v6735_v5, %v6383_v16  ;;  %v6872_v37 = vmax.f32 %v6734_v29, 0.0 }
 0x64b   : > { %v6737_v27 = vpop.f32.mrf.mxu1  ;;  %v7150_v56 = vpop.f32.mrf.mxu0 }
 0x64c   : > { %v7377_v8 = vmax.f32 %v7149_v24, 0.0  ;;  %v6738_v61 = vadd.f32 %v6737_v27, %v6385_v30  ;;  %7343 = vmatprep.mubr.bf16.mxu0 %v6939_v2  ;;  %v6873_v59 = vmax.f32 %v6736_v44, 0.0 }
 0x64d   : > { %v6739_v22 = vpop.f32.mrf.mxu1  ;;  %v7153_v18 = vpop.f32.mrf.mxu0  ;;  %7344 = vmatmul.mubr.bf16.gmra.mxu0 %v6938_v26 }
 0x64e   : > { %v7436_v0 = vpack.c.bf16 %v7377_v8, %v7376_v10  ;;  %v6740_v58 = vadd.f32 %v6739_v22, %v6387_v42  ;;  %v6874_v31 = vmax.f32 %v6738_v61, 0.0  ;;  %v7154_v39 = vadd.f32 %v16240_v3, %v7153_v18 }
 0x64f   : > { %v6743_v41 = vpop.f32.mrf.mxu1  ;;  %v7155_v15 = vpop.f32.mrf.mxu0 }
 0x650   : > { %v6875_v20 = vmax.f32 %v6740_v58, 0.0  ;;  %9569 = vmatprep.mubr.bf16.mxu1 %v7436_v0  ;;  %v6940_v43 = vpack.c.bf16 %v6874_v31, %v6872_v37  ;;  %v7378_v19 = vmax.f32 %v7154_v39, 0.0  ;;  %v6744_v60 = vadd.f32 %v6743_v41, %v6391_v32 }
 0x651   : > { %v6745_v55 = vpop.f32.mrf.mxu1  ;;  %v7156_v52 = vpop.f32.mrf.mxu0 }
 0x652   : > { %v7157_v38 = vadd.f32 %v16240_v3, %v7156_v52  ;;  %v6941_v23 = vpack.c.bf16 %v6875_v20, %v6873_v59  ;;  %v6746_v47 = vadd.f32 %v6745_v55, %v6393_v35  ;;  %v6876_v51 = vmax.f32 %v6744_v60, 0.0 }
 0x653   : > { %v6747_v46 = vpop.f32.mrf.mxu1  ;;  %v7158_v17 = vpop.f32.mrf.mxu0 }
 0x654   : > { %v7379_v14 = vmax.f32 %v7157_v38, 0.0  ;;  %v6748_v9 = vadd.f32 %v6747_v46, %v6395_v49  ;;  %7351 = vmatprep.mubr.bf16.mxu0 %v6941_v23  ;;  %v6877_v45 = vmax.f32 %v6746_v47, 0.0 }
 0x655   : > { %v6749_v53 = vpop.f32.mrf.mxu1  ;;  %v7161_v57 = vpop.f32.mrf.mxu0  ;;  %7352 = vmatmul.mubr.bf16.gmra.mxu0 %v6940_v43 }
 0x656   : > { %v7437_v13 = vpack.c.bf16 %v7379_v14, %v7378_v19  ;;  %v6750_v1 = vadd.f32 %v6749_v53, %v6397_v21  ;;  %v6878_v11 = vmax.f32 %v6748_v9, 0.0  ;;  %v7162_v7 = vadd.f32 %v16240_v3, %v7161_v57  ;;  %v10253_v14 = vld [vmem:[%s16789_s9 + $0x18] sm:$0xff]  }
 0x657   : > { %v7163_v50 = vpop.f32.mrf.mxu0  ;;  %9625 = vmatprep.subr.bf16.mxu1 %v10253_v14 }
 0x658   : > { %v6879_v25 = vmax.f32 %v6750_v1, 0.0  ;;  %9570 = vmatmul.mubr.bf16.gmra.mxu1 %v7437_v13  ;;  %v6942_v12 = vpack.c.bf16 %v6878_v11, %v6876_v51  ;;  %v7380_v6 = vmax.f32 %v7162_v7, 0.0 }
 0x659   : > { %v7164_v54 = vpop.f32.mrf.mxu0  ;;  %9626 = vmatpush3.bf16.msra.mxu1 %v10253_v14 }
 0x65a   : > { %v7165_v33 = vadd.f32 %v16240_v3, %v7164_v54  ;;  %v6943_v63 = vpack.c.bf16 %v6879_v25, %v6877_v45 }
 0x65b   : > { %v7166_v4 = vpop.f32.mrf.mxu0 }
 0x65c   : > { %v7381_v40 = vmax.f32 %v7165_v33, 0.0  ;;  %7359 = vmatprep.mubr.bf16.mxu0 %v6943_v63 }
 0x65d   : > { %v7169_v34 = vpop.f32.mrf.mxu0  ;;  %7360 = vmatmul.mubr.bf16.gmra.mxu0 %v6942_v12 }
 0x65e   : > { %v7438_v28 = vpack.c.bf16 %v7381_v40, %v7380_v6  ;;  %v7170_v5 = vadd.f32 %v16240_v3, %v7169_v34 }
 0x65f   : > { %v7171_v62 = vpop.f32.mrf.mxu0 }
 0x660   : > { %9573 = vmatprep.mubr.bf16.mxu1 %v7438_v28  ;;  %v7382_v24 = vmax.f32 %v7170_v5, 0.0 }
 0x661   : > { %v7172_v36 = vpop.f32.mrf.mxu0 }
 0x662   : > { %v7173_v16 = vadd.f32 %v16240_v3, %v7172_v36 }
 0x663   : > { %v7174_v30 = vpop.f32.mrf.mxu0 }
 0x664   : > { %v7383_v2 = vmax.f32 %v7173_v16, 0.0 }
 0x665   : > { %v7177_v48 = vpop.f32.mrf.mxu0 }
 0x666   : > { %v7439_v42 = vpack.c.bf16 %v7383_v2, %v7382_v24  ;;  %v7178_v27 = vadd.f32 %v16240_v3, %v7177_v48 }
 0x667   : > { %v7179_v26 = vpop.f32.mrf.mxu0 }
 0x668   : > { %9574 = vmatmul.mubr.bf16.gmra.mxu1 %v7439_v42  ;;  %v7384_v8 = vmax.f32 %v7178_v27, 0.0 }
 0x669   : > { %v7180_v56 = vpop.f32.mrf.mxu0 }
 0x66a   : > { %v7181_v10 = vadd.f32 %v16240_v3, %v7180_v56 }
 0x66b   : > { %v7182_v44 = vpop.f32.mrf.mxu0 }
 0x66c   : > { %v7385_v61 = vmax.f32 %v7181_v10, 0.0 }
 0x66d   : > { %v7185_v29 = vpop.f32.mrf.mxu0 }
 0x66e   : > { %v7440_v22 = vpack.c.bf16 %v7385_v61, %v7384_v8  ;;  %v7186_v0 = vadd.f32 %v16240_v3, %v7185_v29  ;;  %v10254_v8 = vld [vmem:[%s16789_s9 + $0x10] sm:$0xff]  }
 0x66f   : > { %v7187_v18 = vpop.f32.mrf.mxu0  ;;  %9627 = vmatprep.subr.bf16.mxu1 %v10254_v8 }
 0x670   : > { %9577 = vmatprep.mubr.bf16.mxu1 %v7440_v22  ;;  %v7386_v15 = vmax.f32 %v7186_v0, 0.0  ;;  %9628 = vmatpush3.bf16.msra.mxu1 %v10254_v8 }
 0x671   : > { %v7188_v58 = vpop.f32.mrf.mxu0 }
 0x672   : > { %v7189_v31 = vadd.f32 %v16240_v3, %v7188_v58  ;;  %v10255_v58 = vld [vmem:[%s16789_s9 + $0x8] sm:$0xff]  }
 0x673   : > { %v7190_v41 = vpop.f32.mrf.mxu0  ;;  %9629 = vmatprep.subr.bf16.mxu1 %v10255_v58 }
 0x674   : > { %v7387_v59 = vmax.f32 %v7189_v31, 0.0  ;;  %9630 = vmatpush3.bf16.msra.mxu1 %v10255_v58 }
 0x675   : > { %v7193_v20 = vpop.f32.mrf.mxu0 }
 0x676   : > { %v7441_v39 = vpack.c.bf16 %v7387_v59, %v7386_v15  ;;  %v7194_v55 = vadd.f32 %v16240_v3, %v7193_v20  ;;  %v10256_v20 = vld [vmem:[%s16789_s9] sm:$0xff]  }
 0x677   : > { %v7195_v37 = vpop.f32.mrf.mxu0  ;;  %9631 = vmatprep.subr.bf16.mxu1 %v10256_v20 }
 0x678   : > { %9578 = vmatmul.mubr.bf16.gmra.mxu1 %v7441_v39  ;;  %v7388_v38 = vmax.f32 %v7194_v55, 0.0 }
 0x679   : > { %v7196_v52 = vpop.f32.mrf.mxu0  ;;  %9632 = vmatpush3.bf16.msra.mxu1 %v10256_v20 }
 0x67a   : > { %v7197_v35 = vadd.f32 %v16240_v3, %v7196_v52 }
 0x67b   : > { %v7198_v49 = vpop.f32.mrf.mxu0 }
 0x67c   : > { %v7389_v23 = vmax.f32 %v7197_v35, 0.0 }
 0x67d   : > { %v7201_v32 = vpop.f32.mrf.mxu0 }
 0x67e   : > { %v7442_v21 = vpack.c.bf16 %v7389_v23, %v7388_v38  ;;  %v7202_v46 = vadd.f32 %v16240_v3, %v7201_v32 }
 0x67f   : > { %v7203_v43 = vpop.f32.mrf.mxu0 }
 0x680   : > { %9581 = vmatprep.mubr.bf16.mxu1 %v7442_v21  ;;  %v7390_v9 = vmax.f32 %v7202_v46, 0.0 }
 0x681   : > { %v7204_v17 = vpop.f32.mrf.mxu0 }
 0x682   : > { %v7205_v19 = vadd.f32 %v16240_v3, %v7204_v17 }
 0x683   : > { %v7206_v47 = vpop.f32.mrf.mxu0 }
 0x684   : > { %v7391_v60 = vmax.f32 %v7205_v19, 0.0 }
 0x685   : > { %v7209_v53 = vpop.f32.mrf.mxu0 }
 0x686   : > { %v7443_v57 = vpack.c.bf16 %v7391_v60, %v7390_v9  ;;  %v7210_v1 = vadd.f32 %v16240_v3, %v7209_v53 }
 0x687   : > { %v7211_v13 = vpop.f32.mrf.mxu0 }
 0x688   : > { %9582 = vmatmul.mubr.bf16.gmra.mxu1 %v7443_v57  ;;  %v7392_v25 = vmax.f32 %v7210_v1, 0.0 }
 0x689   : > { %v7212_v11 = vpop.f32.mrf.mxu0 }
 0x68a   : > { %v7213_v50 = vadd.f32 %v16240_v3, %v7212_v11 }
 0x68b   : > { %v7214_v45 = vpop.f32.mrf.mxu0 }
 0x68c   : > { %v7393_v7 = vmax.f32 %v7213_v50, 0.0 }
 0x68d   : > { %v7217_v51 = vpop.f32.mrf.mxu0 }
 0x68e   : > { %v7444_v54 = vpack.c.bf16 %v7393_v7, %v7392_v25  ;;  %v7218_v63 = vadd.f32 %v16240_v3, %v7217_v51 }
 0x68f   : > { %v7219_v33 = vpop.f32.mrf.mxu0 }
 0x690   : > { %9585 = vmatprep.mubr.bf16.mxu1 %v7444_v54  ;;  %v7394_v40 = vmax.f32 %v7218_v63, 0.0 }
 0x691   : > { %v7220_v12 = vpop.f32.mrf.mxu0 }
 0x692   : > { %v7221_v4 = vadd.f32 %v16240_v3, %v7220_v12 }
 0x693   : > { %v7222_v6 = vpop.f32.mrf.mxu0 }
 0x694   : > { %v7395_v34 = vmax.f32 %v7221_v4, 0.0 }
 0x695   : > { %v7225_v28 = vpop.f32.mrf.mxu0 }
 0x696   : > { %v7445_v62 = vpack.c.bf16 %v7395_v34, %v7394_v40  ;;  %v7226_v36 = vadd.f32 %v16240_v3, %v7225_v28 }
 0x697   : > { %v7227_v5 = vpop.f32.mrf.mxu0 }
 0x698   : > { %9586 = vmatmul.mubr.bf16.gmra.mxu1 %v7445_v62  ;;  %v7396_v2 = vmax.f32 %v7226_v36, 0.0 }
 0x699   : > { %v7228_v16 = vpop.f32.mrf.mxu0 }
 0x69a   : > { %v7229_v30 = vadd.f32 %v16240_v3, %v7228_v16 }
 0x69b   : > { %v7230_v24 = vpop.f32.mrf.mxu0 }
 0x69c   : > { %v7397_v48 = vmax.f32 %v7229_v30, 0.0 }
 0x69d   : > { %v7233_v42 = vpop.f32.mrf.mxu0 }
 0x69e   : > { %v7446_v26 = vpack.c.bf16 %v7397_v48, %v7396_v2  ;;  %v7234_v56 = vadd.f32 %v16240_v3, %v7233_v42  ;;  %v10257_v48 = vld [vmem:[%s16791_s11 + $0x8] sm:$0xff]  }
 0x69f   : > { %v7235_v27 = vpop.f32.mrf.mxu0  ;;  %9697 = vmatprep.subr.bf16.mxu0 %v10257_v48 }
 0x6a0   : > { %9589 = vmatprep.mubr.bf16.mxu1 %v7446_v26  ;;  %v7398_v29 = vmax.f32 %v7234_v56, 0.0  ;;  %9698 = vmatpush3.bf16.msra.mxu0 %v10257_v48 }
 0x6a1   : > { %v7236_v10 = vpop.f32.mrf.mxu0 }
 0x6a2   : > { %v7237_v44 = vadd.f32 %v16240_v3, %v7236_v10 }
 0x6a3   : > { %v7238_v61 = vpop.f32.mrf.mxu0 }
 0x6a4   : > { %v7399_v22 = vmax.f32 %v7237_v44, 0.0 }
 0x6a5   : > { %v7241_v18 = vpop.f32.mrf.mxu0 }
 0x6a6   : > { %v7447_v0 = vpack.c.bf16 %v7399_v22, %v7398_v29  ;;  %v7242_v41 = vadd.f32 %v16240_v3, %v7241_v18 }
 0x6a7   : > { %v7243_v31 = vpop.f32.mrf.mxu0 }
 0x6a8   : > { %9590 = vmatmul.mubr.bf16.gmra.mxu1 %v7447_v0  ;;  %v7400_v37 = vmax.f32 %v7242_v41, 0.0 }
 0x6a9   : > { %v7244_v15 = vpop.f32.mrf.mxu0 }
 0x6aa   : > { %v7245_v59 = vadd.f32 %v16240_v3, %v7244_v15 }
 0x6ab   : > { %v7246_v39 = vpop.f32.mrf.mxu0 }
 0x6ac   : > { %v7401_v55 = vmax.f32 %v7245_v59, 0.0 }
 0x6ad   : > { %v7249_v52 = vpop.f32.mrf.mxu0 }
 0x6ae   : > { %v7448_v35 = vpack.c.bf16 %v7401_v55, %v7400_v37  ;;  %v7250_v38 = vadd.f32 %v16240_v3, %v7249_v52 }
 0x6af   : > { %v7251_v49 = vpop.f32.mrf.mxu0 }
 0x6b0   : > { %9593 = vmatprep.mubr.bf16.mxu1 %v7448_v35  ;;  %v7402_v43 = vmax.f32 %v7250_v38, 0.0 }
 0x6b1   : > { %v7252_v23 = vpop.f32.mrf.mxu0 }
 0x6b2   : > { %v7253_v32 = vadd.f32 %v16240_v3, %v7252_v23 }
 0x6b3   : > { %v7254_v21 = vpop.f32.mrf.mxu0 }
 0x6b4   : > { %v7403_v46 = vmax.f32 %v7253_v32, 0.0 }
 0x6b5   : > { %v7257_v17 = vpop.f32.mrf.mxu0 }
 0x6b6   : > { %v7449_v19 = vpack.c.bf16 %v7403_v46, %v7402_v43  ;;  %v7258_v14 = vadd.f32 %v16240_v3, %v7257_v17 }
 0x6b7   : > { %v7259_v47 = vpop.f32.mrf.mxu0 }
 0x6b8   : > { %9594 = vmatmul.mubr.bf16.gmra.mxu1 %v7449_v19  ;;  %v7404_v57 = vmax.f32 %v7258_v14, 0.0 }
 0x6b9   : > { %v7260_v9 = vpop.f32.mrf.mxu0 }
 0x6ba   : > { %v7261_v60 = vadd.f32 %v16240_v3, %v7260_v9 }
 0x6bb   : > { %v7262_v53 = vpop.f32.mrf.mxu0 }
 0x6bc   : > { %v7405_v13 = vmax.f32 %v7261_v60, 0.0 }
 0x6bd   : > { %v7265_v1 = vpop.f32.mrf.mxu0 }
 0x6be   : > { %v7450_v11 = vpack.c.bf16 %v7405_v13, %v7404_v57  ;;  %v7266_v45 = vadd.f32 %v16240_v3, %v7265_v1 }
 0x6bf   : > { %v7267_v50 = vpop.f32.mrf.mxu0 }
 0x6c0   : > { %9597 = vmatprep.mubr.bf16.mxu1 %v7450_v11  ;;  %v7406_v54 = vmax.f32 %v7266_v45, 0.0 }
 0x6c1   : > { %v7268_v25 = vpop.f32.mrf.mxu0 }
 0x6c2   : > { %v7269_v7 = vadd.f32 %v16240_v3, %v7268_v25 }
 0x6c3   : > { %v7270_v51 = vpop.f32.mrf.mxu0 }
 0x6c4   : > { %v7407_v33 = vmax.f32 %v7269_v7, 0.0 }
 0x6c5   : > { %v7273_v63 = vpop.f32.mrf.mxu0 }
 0x6c6   : > { %v7451_v12 = vpack.c.bf16 %v7407_v33, %v7406_v54  ;;  %v7274_v6 = vadd.f32 %v16240_v3, %v7273_v63 }
 0x6c7   : > { %v7275_v4 = vpop.f32.mrf.mxu0 }
 0x6c8   : > { %9598 = vmatmul.mubr.bf16.gmra.mxu1 %v7451_v12  ;;  %v7408_v62 = vmax.f32 %v7274_v6, 0.0 }
 0x6c9   : > { %v7276_v40 = vpop.f32.mrf.mxu0 }
 0x6ca   : > { %v7277_v34 = vadd.f32 %v16240_v3, %v7276_v40 }
 0x6cb   : > { %v7278_v28 = vpop.f32.mrf.mxu0 }
 0x6cc   : > { %v7409_v5 = vmax.f32 %v7277_v34, 0.0 }
 0x6cd   : > { %v7281_v36 = vpop.f32.mrf.mxu0 }
 0x6ce   : > { %v7452_v16 = vpack.c.bf16 %v7409_v5, %v7408_v62  ;;  %v7282_v24 = vadd.f32 %v16240_v3, %v7281_v36 }
 0x6cf   : > { %v7283_v30 = vpop.f32.mrf.mxu0 }
 0x6d0   : > { %9601 = vmatprep.mubr.bf16.mxu1 %v7452_v16  ;;  %v7410_v27 = vmax.f32 %v7282_v24, 0.0 }
 0x6d1   : > { %v7284_v2 = vpop.f32.mrf.mxu0 }
 0x6d2   : > { %v7285_v42 = vadd.f32 %v16240_v3, %v7284_v2 }
 0x6d3   : > { %v7286_v26 = vpop.f32.mrf.mxu0 }
 0x6d4   : > { %v7411_v56 = vmax.f32 %v7285_v42, 0.0 }
 0x6d5   : > { %v7289_v10 = vpop.f32.mrf.mxu0 }
 0x6d6   : > { %v7453_v44 = vpack.c.bf16 %v7411_v56, %v7410_v27  ;;  %v7290_v61 = vadd.f32 %v16240_v3, %v7289_v10 }
 0x6d7   : > { %v7291_v8 = vpop.f32.mrf.mxu0 }
 0x6d8   : > { %9602 = vmatmul.mubr.bf16.gmra.mxu1 %v7453_v44  ;;  %v7412_v0 = vmax.f32 %v7290_v61, 0.0 }
 0x6d9   : > { %v7292_v29 = vpop.f32.mrf.mxu0 }
 0x6da   : > { %v7293_v22 = vadd.f32 %v16240_v3, %v7292_v29 }
 0x6db   : > { %v7294_v18 = vpop.f32.mrf.mxu0 }
 0x6dc   : > { %v7413_v58 = vmax.f32 %v7293_v22, 0.0 }
 0x6dd   : > { %v7297_v31 = vpop.f32.mrf.mxu0 }
 0x6de   : > { %v7454_v41 = vpack.c.bf16 %v7413_v58, %v7412_v0  ;;  %v7298_v59 = vadd.f32 %v16240_v3, %v7297_v31 }
 0x6df   : > { %v7299_v15 = vpop.f32.mrf.mxu0 }
 0x6e0   : > { %9605 = vmatprep.mubr.bf16.mxu1 %v7454_v41  ;;  %v7414_v55 = vmax.f32 %v7298_v59, 0.0 }
 0x6e1   : > { %v7300_v20 = vpop.f32.mrf.mxu0 }
 0x6e2   : > { %v7301_v39 = vadd.f32 %v16240_v3, %v7300_v20 }
 0x6e3   : > { %v7302_v37 = vpop.f32.mrf.mxu0 }
 0x6e4   : > { %v7415_v52 = vmax.f32 %v7301_v39, 0.0 }
 0x6e5   : > { %v7305_v35 = vpop.f32.mrf.mxu0 }
 0x6e6   : > { %v7455_v49 = vpack.c.bf16 %v7415_v52, %v7414_v55  ;;  %v7306_v23 = vadd.f32 %v16240_v3, %v7305_v35 }
 0x6e7   : > { %v7307_v38 = vpop.f32.mrf.mxu0 }
 0x6e8   : > { %9606 = vmatmul.mubr.bf16.gmra.mxu1 %v7455_v49  ;;  %v7416_v46 = vmax.f32 %v7306_v23, 0.0 }
 0x6e9   : > { %v7308_v32 = vpop.f32.mrf.mxu0 }
 0x6ea   : > { %v7309_v21 = vadd.f32 %v16240_v3, %v7308_v32 }
 0x6eb   : > { %v7310_v43 = vpop.f32.mrf.mxu0 }
 0x6ec   : > { %v7417_v17 = vmax.f32 %v7309_v21, 0.0 }
 0x6ed   : > { %v7313_v19 = vpop.f32.mrf.mxu0 }
 0x6ee   : > { %v7456_v47 = vpack.c.bf16 %v7417_v17, %v7416_v46  ;;  %v7314_v9 = vadd.f32 %v16240_v3, %v7313_v19 }
 0x6ef   : > { %v7315_v14 = vpop.f32.mrf.mxu0 }
 0x6f0   : > { %9609 = vmatprep.mubr.bf16.mxu1 %v7456_v47  ;;  %v7418_v13 = vmax.f32 %v7314_v9, 0.0  ;;  %v16374_v47 = vld [vmem:[%s16788_s8] ss:$0 sm:$0xff] }
 0x6f1   : > { %v7316_v60 = vpop.f32.mrf.mxu0 }
 0x6f2   : > { %v7317_v53 = vadd.f32 %v16240_v3, %v7316_v60 }
 0x6f3   : > { %v7318_v57 = vpop.f32.mrf.mxu0 }
 0x6f4   : > { %v7419_v1 = vmax.f32 %v7317_v53, 0.0 }
 0x6f5   : > { %v7321_v11 = vpop.f32.mrf.mxu0 }
 0x6f6   : > { %v7457_v50 = vpack.c.bf16 %v7419_v1, %v7418_v13  ;;  %v7322_v25 = vadd.f32 %v16240_v3, %v7321_v11 }
 0x6f7   : > { %v7323_v45 = vpop.f32.mrf.mxu0 }
 0x6f8   : > { %9610 = vmatmul.mubr.bf16.gmra.mxu1 %v7457_v50  ;;  %v7420_v33 = vmax.f32 %v7322_v25, 0.0  ;;  %v16359_v4 = vpop.f32.mrf.mxu1 }
 0x6f9   : > { %v7324_v7 = vpop.f32.mrf.mxu0 }
 0x6fa   : > { %v7325_v51 = vadd.f32 %v16240_v3, %v7324_v7  ;;  %v7569_v62 = vpop.f32.mrf.mxu1 }
 0x6fb   : > { %v7326_v54 = vpop.f32.mrf.mxu0  ;;  %v7570_v13 = vadd.f32 %v16374_v47, %v7569_v62 }
 0x6fc   : > { %v7421_v63 = vmax.f32 %v7325_v51, 0.0  ;;  %v9564_v2 = vpop.f32.mrf.mxu1 }
 0x6fd   : > { %v7329_v12 = vpop.f32.mrf.mxu0  ;;  %v7824_v54 = vmax.f32 %v7570_v13, 0.0 }
 0x6fe   : > { %v7458_v6 = vpack.c.bf16 %v7421_v63, %v7420_v33  ;;  %v7330_v34 = vadd.f32 %v16240_v3, %v7329_v12  ;;  %v7572_v56 = vpop.f32.mrf.mxu1  ;;  %v7581_v33 = vadd.f32 %v9564_v2, %v16374_v47 }
 0x6ff   : > { %v7331_v40 = vpop.f32.mrf.mxu0  ;;  %v7573_v60 = vadd.f32 %v16374_v47, %v7572_v56 }
 0x700   : > { %9613 = vmatprep.mubr.bf16.mxu1 %v7458_v6  ;;  %v7422_v16 = vmax.f32 %v7330_v34, 0.0  ;;  %v7578_v34 = vadd.f32 %v16359_v4, %v16374_v47  ;;  %v7827_v62 = vmax.f32 %v7581_v33, 0.0 }
 0x701   : > { %v7332_v28 = vpop.f32.mrf.mxu0  ;;  %v7825_v45 = vmax.f32 %v7573_v60, 0.0 }
 0x702   : > { %v7333_v5 = vadd.f32 %v16240_v3, %v7332_v28 }
 0x703   : > { %v7334_v36 = vpop.f32.mrf.mxu0  ;;  %v7888_v6 = vpack.c.bf16 %v7825_v45, %v7824_v54 }
 0x704   : > { %v7423_v30 = vmax.f32 %v7333_v5, 0.0  ;;  %v7826_v36 = vmax.f32 %v7578_v34, 0.0 }
 0x705   : > { %v7337_v24 = vpop.f32.mrf.mxu0 }
 0x706   : > { %v7459_v48 = vpack.c.bf16 %v7423_v30, %v7422_v16  ;;  %v7338_v26 = vadd.f32 %v16240_v3, %v7337_v24  ;;  %v7889_v24 = vpack.c.bf16 %v7827_v62, %v7826_v36 }
 0x707   : > { %v7339_v42 = vpop.f32.mrf.mxu0 }
 0x708   : > { %9614 = vmatmul.mubr.bf16.gmra.mxu1 %v7459_v48  ;;  %v7424_v8 = vmax.f32 %v7338_v26, 0.0  ;;  %v16365_v61 = vpop.f32.mrf.mxu1 }
 0x709   : > { %v7340_v27 = vpop.f32.mrf.mxu0  ;;  %v7594_v4 = vadd.f32 %v16365_v61, %v16374_v47 }
 0x70a   : > { %v7341_v10 = vadd.f32 %v16240_v3, %v7340_v27  ;;  %v7585_v58 = vpop.f32.mrf.mxu1 }
 0x70b   : > { %v7342_v44 = vpop.f32.mrf.mxu0 }
 0x70c   : > { %v7425_v29 = vmax.f32 %v7341_v10, 0.0  ;;  %v9568_v20 = vpop.f32.mrf.mxu1  ;;  %v7830_v44 = vmax.f32 %v7594_v4, 0.0 }
 0x70d   : > { %v7345_v22 = vpop.f32.mrf.mxu0  ;;  %v7597_v2 = vadd.f32 %v9568_v20, %v16374_v47 }
 0x70e   : > { %v7460_v18 = vpack.c.bf16 %v7425_v29, %v7424_v8  ;;  %v7346_v31 = vadd.f32 %v16240_v3, %v7345_v22  ;;  %v7588_v49 = vpop.f32.mrf.mxu1 }
 0x70f   : > { %v7347_v0 = vpop.f32.mrf.mxu0  ;;  %v7589_v40 = vadd.f32 %v16374_v47, %v7588_v49  ;;  %v7831_v56 = vmax.f32 %v7597_v2, 0.0 }
 0x710   : > { %9617 = vmatprep.mubr.bf16.mxu1 %v7460_v18  ;;  %v7426_v39 = vmax.f32 %v7346_v31, 0.0 }
 0x711   : > { %v7348_v41 = vpop.f32.mrf.mxu0  ;;  %v7829_v5 = vmax.f32 %v7589_v40, 0.0  ;;  %v7891_v22 = vpack.c.bf16 %v7831_v56, %v7830_v44 }
 0x712   : > { %v7349_v15 = vadd.f32 %v16240_v3, %v7348_v41 }
 0x713   : > { %v7350_v59 = vpop.f32.mrf.mxu0 }
 0x714   : > { %v7427_v37 = vmax.f32 %v7349_v15, 0.0 }
 0x715   : > { %v7353_v55 = vpop.f32.mrf.mxu0 }
 0x716   : > { %v7461_v52 = vpack.c.bf16 %v7427_v37, %v7426_v39  ;;  %v7354_v38 = vadd.f32 %v16240_v3, %v7353_v55 }
 0x717   : > { %v7355_v35 = vpop.f32.mrf.mxu0 }
 0x718   : > { %9618 = vmatmul.mubr.bf16.gmra.mxu1 %v7461_v52  ;;  %v9571_v32 = vpop.f32.mrf.mxu1  ;;  %v7428_v46 = vmax.f32 %v7354_v38, 0.0 }
 0x719   : > { %v7356_v23 = vpop.f32.mrf.mxu0  ;;  %v7610_v61 = vadd.f32 %v9571_v32, %v16374_v47 }
 0x71a   : > { %v7357_v21 = vadd.f32 %v16240_v3, %v7356_v23  ;;  %v7601_v9 = vpop.f32.mrf.mxu1 }
 0x71b   : > { %v7358_v43 = vpop.f32.mrf.mxu0  ;;  %v7602_v27 = vadd.f32 %v16374_v47, %v7601_v9  ;;  %v7834_v39 = vmax.f32 %v7610_v61, 0.0 }
 0x71c   : > { %v7429_v17 = vmax.f32 %v7357_v21, 0.0  ;;  %v9572_v11 = vpop.f32.mrf.mxu1 }
 0x71d   : > { %v7361_v19 = vpop.f32.mrf.mxu0  ;;  %v7832_v29 = vmax.f32 %v7602_v27, 0.0  ;;  %v7613_v18 = vadd.f32 %v9572_v11, %v16374_v47 }
 0x71e   : > { %v7462_v14 = vpack.c.bf16 %v7429_v17, %v7428_v46  ;;  %v7362_v57 = vadd.f32 %v16240_v3, %v7361_v19  ;;  %v7604_v63 = vpop.f32.mrf.mxu1 }
 0x71f   : > { %v7363_v53 = vpop.f32.mrf.mxu0  ;;  %v7605_v42 = vadd.f32 %v16374_v47, %v7604_v63  ;;  %v7835_v15 = vmax.f32 %v7613_v18, 0.0 }
 0x720   : > { %9621 = vmatprep.mubr.bf16.mxu1 %v7462_v14  ;;  %v7430_v7 = vmax.f32 %v7362_v57, 0.0 }
 0x721   : > { %v7364_v1 = vpop.f32.mrf.mxu0  ;;  %v7833_v10 = vmax.f32 %v7605_v42, 0.0  ;;  %v7893_v52 = vpack.c.bf16 %v7835_v15, %v7834_v39 }
 0x722   : > { %v7365_v50 = vadd.f32 %v16240_v3, %v7364_v1  ;;  %v7586_v3 = vadd.f32 %v16374_v47, %v7585_v58 }
 0x723   : > { %v7366_v25 = vpop.f32.mrf.mxu0  ;;  %v7892_v0 = vpack.c.bf16 %v7833_v10, %v7832_v29 }
 0x724   : > { %v7431_v51 = vmax.f32 %v7365_v50, 0.0  ;;  %v7828_v30 = vmax.f32 %v7586_v3, 0.0 }
 0x726   : > { %v7463_v12 = vpack.c.bf16 %v7431_v51, %v7430_v7  ;;  %v7890_v48 = vpack.c.bf16 %v7829_v5, %v7828_v30 }
 0x728   : > { %v9575_v28 = vpop.f32.mrf.mxu1  ;;  %9622 = vmatmul.mubr.bf16.gmra.mxu1 %v7463_v12 }
 0x729   : > { %9633 = vmatprep.mubr.msk.bf16.mxu1 %vm7959_vm1, %v7888_v6  ;;  %v7626_v32 = vadd.f32 %v9575_v28, %v16374_v47  ;;  %v10258_v6 = vld [vmem:[%s16791_s11] sm:$0xff]  }
 0x72a   : > { %v7617_v16 = vpop.f32.mrf.mxu1  ;;  %9699 = vmatprep.subr.bf16.mxu0 %v10258_v6 }
 0x72b   : > { %v7618_v41 = vadd.f32 %v16374_v47, %v7617_v16  ;;  %v7838_v17 = vmax.f32 %v7626_v32, 0.0  ;;  %9700 = vmatpush3.bf16.msra.mxu0 %v10258_v6 }
 0x72c   : > { %v9576_v26 = vpop.f32.mrf.mxu1 }
 0x72d   : > { %v7836_v55 = vmax.f32 %v7618_v41, 0.0  ;;  %v7629_v35 = vadd.f32 %v9576_v26, %v16374_v47 }
 0x72e   : > { %v7620_v8 = vpop.f32.mrf.mxu1 }
 0x72f   : > { %v7621_v58 = vadd.f32 %v16374_v47, %v7620_v8  ;;  %v7839_v43 = vmax.f32 %v7629_v35, 0.0 }
 0x730   : > { %9634 = vmatmul.mubr.msk.bf16.vlgmr.msra.gmra.mxu1 %vm7959_vm1, %v7889_v24 }
 0x731   : > { %9637 = vmatprep.mubr.msk.bf16.mxu1 %vm7959_vm1, %v7890_v48  ;;  %v7837_v20 = vmax.f32 %v7621_v58, 0.0  ;;  %v7895_v14 = vpack.c.bf16 %v7839_v43, %v7838_v17 }
 0x733   : > { %v7894_v38 = vpack.c.bf16 %v7837_v20, %v7836_v55 }
 0x738   : > { %v9579_v31 = vpop.f32.mrf.mxu1  ;;  %9638 = vmatmul.mubr.msk.bf16.gmra.mxu1 %vm7959_vm1, %v7891_v22 }
 0x739   : > { %9641 = vmatprep.mubr.msk.bf16.mxu1 %vm7959_vm1, %v7892_v0  ;;  %v7642_v53 = vadd.f32 %v9579_v31, %v16374_v47 }
 0x73a   : > { %v7633_v59 = vpop.f32.mrf.mxu1 }
 0x73b   : > { %v7634_v21 = vadd.f32 %v16374_v47, %v7633_v59  ;;  %v7842_v11 = vmax.f32 %v7642_v53, 0.0 }
 0x73c   : > { %v9580_v37 = vpop.f32.mrf.mxu1 }
 0x73d   : > { %v7840_v19 = vmax.f32 %v7634_v21, 0.0  ;;  %v7645_v9 = vadd.f32 %v9580_v37, %v16374_v47 }
 0x73e   : > { %v7636_v49 = vpop.f32.mrf.mxu1 }
 0x73f   : > { %v7637_v23 = vadd.f32 %v16374_v47, %v7636_v49  ;;  %v7843_v13 = vmax.f32 %v7645_v9, 0.0 }
 0x740   : > { %9642 = vmatmul.mubr.msk.bf16.gmra.mxu1 %vm7959_vm1, %v7893_v52 }
 0x741   : > { %9645 = vmatprep.mubr.msk.bf16.mxu1 %vm7959_vm1, %v7894_v38  ;;  %v7841_v46 = vmax.f32 %v7637_v23, 0.0  ;;  %v7897_v25 = vpack.c.bf16 %v7843_v13, %v7842_v11 }
 0x743   : > { %v7896_v60 = vpack.c.bf16 %v7841_v46, %v7840_v19 }
 0x748   : > { %v9583_v57 = vpop.f32.mrf.mxu1  ;;  %9646 = vmatmul.mubr.msk.bf16.gmra.mxu1 %vm7959_vm1, %v7895_v14 }
 0x749   : > { %9649 = vmatprep.mubr.msk.bf16.mxu1 %vm7959_vm1, %v7896_v60  ;;  %v7658_v33 = vadd.f32 %v9583_v57, %v16374_v47 }
 0x74a   : > { %v7649_v1 = vpop.f32.mrf.mxu1 }
 0x74b   : > { %v7650_v45 = vadd.f32 %v16374_v47, %v7649_v1  ;;  %v7846_v28 = vmax.f32 %v7658_v33, 0.0 }
 0x74c   : > { %v9584_v50 = vpop.f32.mrf.mxu1 }
 0x74d   : > { %v7661_v7 = vadd.f32 %v9584_v50, %v16374_v47  ;;  %v7844_v63 = vmax.f32 %v7650_v45, 0.0 }
 0x74e   : > { %v7652_v51 = vpop.f32.mrf.mxu1 }
 0x74f   : > { %v7653_v54 = vadd.f32 %v16374_v47, %v7652_v51  ;;  %v7847_v40 = vmax.f32 %v7661_v7, 0.0 }
 0x750   : > { %9650 = vmatmul.mubr.msk.bf16.gmra.mxu1 %vm7959_vm1, %v7897_v25 }
 0x751   : > { %v7845_v12 = vmax.f32 %v7653_v54, 0.0  ;;  %v7899_v3 = vpack.c.bf16 %v7847_v40, %v7846_v28 }
 0x753   : > { %v7898_v34 = vpack.c.bf16 %v7845_v12, %v7844_v63 }
 0x755   : > { %9653 = vmatprep.mubr.msk.bf16.mxu1 %vm7959_vm1, %v7898_v34 }
 0x758   : > { %v9587_v62 = vpop.f32.mrf.mxu1  ;;  %9654 = vmatmul.mubr.msk.bf16.gmra.mxu1 %vm7959_vm1, %v7899_v3 }
 0x759   : > { %v7674_v24 = vadd.f32 %v9587_v62, %v16374_v47 }
 0x75a   : > { %v7665_v5 = vpop.f32.mrf.mxu1 }
 0x75b   : > { %v7666_v16 = vadd.f32 %v16374_v47, %v7665_v5  ;;  %v7850_v27 = vmax.f32 %v7674_v24, 0.0 }
 0x75c   : > { %v9588_v36 = vpop.f32.mrf.mxu1 }
 0x75d   : > { %v7677_v30 = vadd.f32 %v9588_v36, %v16374_v47  ;;  %v7848_v4 = vmax.f32 %v7666_v16, 0.0 }
 0x75e   : > { %v7668_v2 = vpop.f32.mrf.mxu1 }
 0x75f   : > { %v7669_v48 = vadd.f32 %v16374_v47, %v7668_v2  ;;  %v7851_v42 = vmax.f32 %v7677_v30, 0.0 }
 0x761   : > { %v7849_v26 = vmax.f32 %v7669_v48, 0.0  ;;  %v7901_v10 = vpack.c.bf16 %v7851_v42, %v7850_v27 }
 0x763   : > { %v7900_v56 = vpack.c.bf16 %v7849_v26, %v7848_v4 }
 0x765   : > { %9657 = vmatprep.mubr.msk.bf16.mxu1 %vm7959_vm1, %v7900_v56 }
 0x766   : > { %9658 = vmatmul.mubr.msk.bf16.gmra.mxu1 %vm7959_vm1, %v7901_v10 }
 0x768   : > { %v9591_v44 = vpop.f32.mrf.mxu1 }
 0x769   : > { %v7690_v0 = vadd.f32 %v9591_v44, %v16374_v47 }
 0x76a   : > { %v7681_v8 = vpop.f32.mrf.mxu1 }
 0x76b   : > { %v7682_v22 = vadd.f32 %v16374_v47, %v7681_v8  ;;  %v7854_v59 = vmax.f32 %v7690_v0, 0.0 }
 0x76c   : > { %v9592_v29 = vpop.f32.mrf.mxu1 }
 0x76d   : > { %v7693_v18 = vadd.f32 %v9592_v29, %v16374_v47  ;;  %v7852_v41 = vmax.f32 %v7682_v22, 0.0 }
 0x76e   : > { %v7684_v58 = vpop.f32.mrf.mxu1 }
 0x76f   : > { %v7685_v61 = vadd.f32 %v16374_v47, %v7684_v58  ;;  %v7855_v31 = vmax.f32 %v7693_v18, 0.0 }
 0x771   : > { %v7853_v15 = vmax.f32 %v7685_v61, 0.0  ;;  %v7903_v39 = vpack.c.bf16 %v7855_v31, %v7854_v59 }
 0x773   : > { %v7902_v20 = vpack.c.bf16 %v7853_v15, %v7852_v41 }
 0x775   : > { %9661 = vmatprep.mubr.msk.bf16.mxu1 %vm7959_vm1, %v7902_v20 }
 0x776   : > { %9662 = vmatmul.mubr.msk.bf16.gmra.mxu1 %vm7959_vm1, %v7903_v39 }
 0x778   : > { %v9595_v37 = vpop.f32.mrf.mxu1 }
 0x779   : > { %v7706_v38 = vadd.f32 %v9595_v37, %v16374_v47 }
 0x77a   : > { %v7697_v55 = vpop.f32.mrf.mxu1 }
 0x77b   : > { %v7698_v35 = vadd.f32 %v16374_v47, %v7697_v55  ;;  %v7858_v17 = vmax.f32 %v7706_v38, 0.0 }
 0x77c   : > { %v9596_v52 = vpop.f32.mrf.mxu1 }
 0x77d   : > { %v7709_v49 = vadd.f32 %v9596_v52, %v16374_v47  ;;  %v7856_v43 = vmax.f32 %v7698_v35, 0.0 }
 0x77e   : > { %v7700_v23 = vpop.f32.mrf.mxu1 }
 0x77f   : > { %v7701_v32 = vadd.f32 %v16374_v47, %v7700_v23  ;;  %v7859_v21 = vmax.f32 %v7709_v49, 0.0 }
 0x781   : > { %v7857_v46 = vmax.f32 %v7701_v32, 0.0  ;;  %v7905_v14 = vpack.c.bf16 %v7859_v21, %v7858_v17 }
 0x783   : > { %v7904_v19 = vpack.c.bf16 %v7857_v46, %v7856_v43 }
 0x785   : > { %9665 = vmatprep.mubr.msk.bf16.mxu1 %vm7959_vm1, %v7904_v19 }
 0x786   : > { %9666 = vmatmul.mubr.msk.bf16.gmra.mxu1 %vm7959_vm1, %v7905_v14 }
 0x788   : > { %v9599_v9 = vpop.f32.mrf.mxu1 }
 0x789   : > { %v7722_v1 = vadd.f32 %v9599_v9, %v16374_v47 }
 0x78a   : > { %v7713_v60 = vpop.f32.mrf.mxu1 }
 0x78b   : > { %v7714_v57 = vadd.f32 %v16374_v47, %v7713_v60  ;;  %v7862_v51 = vmax.f32 %v7722_v1, 0.0 }
 0x78c   : > { %v9600_v53 = vpop.f32.mrf.mxu1 }
 0x78d   : > { %v7725_v13 = vadd.f32 %v9600_v53, %v16374_v47  ;;  %v7860_v25 = vmax.f32 %v7714_v57, 0.0 }
 0x78e   : > { %v7716_v11 = vpop.f32.mrf.mxu1 }
 0x78f   : > { %v7717_v50 = vadd.f32 %v16374_v47, %v7716_v11  ;;  %v7863_v45 = vmax.f32 %v7725_v13, 0.0 }
 0x791   : > { %v7861_v7 = vmax.f32 %v7717_v50, 0.0  ;;  %v7907_v33 = vpack.c.bf16 %v7863_v45, %v7862_v51 }
 0x793   : > { %v7906_v54 = vpack.c.bf16 %v7861_v7, %v7860_v25 }
 0x795   : > { %9669 = vmatprep.mubr.msk.bf16.mxu1 %vm7959_vm1, %v7906_v54 }
 0x796   : > { %9670 = vmatmul.mubr.msk.bf16.gmra.mxu1 %vm7959_vm1, %v7907_v33 }
 0x798   : > { %v9603_v63 = vpop.f32.mrf.mxu1 }
 0x799   : > { %v7738_v28 = vadd.f32 %v9603_v63, %v16374_v47 }
 0x79a   : > { %v7729_v12 = vpop.f32.mrf.mxu1 }
 0x79b   : > { %v7730_v40 = vadd.f32 %v16374_v47, %v7729_v12  ;;  %v7866_v30 = vmax.f32 %v7738_v28, 0.0 }
 0x79c   : > { %v9604_v6 = vpop.f32.mrf.mxu1 }
 0x79d   : > { %v7741_v34 = vadd.f32 %v9604_v6, %v16374_v47  ;;  %v7864_v36 = vmax.f32 %v7730_v40, 0.0 }
 0x79e   : > { %v7732_v3 = vpop.f32.mrf.mxu1 }
 0x79f   : > { %v7733_v62 = vadd.f32 %v16374_v47, %v7732_v3  ;;  %v7867_v5 = vmax.f32 %v7741_v34, 0.0 }
 0x7a1   : > { %v7865_v16 = vmax.f32 %v7733_v62, 0.0  ;;  %v7909_v2 = vpack.c.bf16 %v7867_v5, %v7866_v30 }
 0x7a3   : > { %v7908_v24 = vpack.c.bf16 %v7865_v16, %v7864_v36 }
 0x7a5   : > { %9673 = vmatprep.mubr.msk.bf16.mxu1 %vm7959_vm1, %v7908_v24 }
 0x7a6   : > { %9674 = vmatmul.mubr.msk.bf16.gmra.mxu1 %vm7959_vm1, %v7909_v2 }
 0x7a8   : > { %v9607_v48 = vpop.f32.mrf.mxu1 }
 0x7a9   : > { %v7754_v56 = vadd.f32 %v9607_v48, %v16374_v47 }
 0x7aa   : > { %v7745_v42 = vpop.f32.mrf.mxu1 }
 0x7ab   : > { %v7746_v26 = vadd.f32 %v16374_v47, %v7745_v42  ;;  %v7870_v18 = vmax.f32 %v7754_v56, 0.0 }
 0x7ac   : > { %v9608_v4 = vpop.f32.mrf.mxu1 }
 0x7ad   : > { %v7757_v27 = vadd.f32 %v9608_v4, %v16374_v47  ;;  %v7868_v29 = vmax.f32 %v7746_v26, 0.0 }
 0x7ae   : > { %v7748_v10 = vpop.f32.mrf.mxu1 }
 0x7af   : > { %v7749_v44 = vadd.f32 %v16374_v47, %v7748_v10  ;;  %v7871_v8 = vmax.f32 %v7757_v27, 0.0 }
 0x7b1   : > { %v7869_v22 = vmax.f32 %v7749_v44, 0.0  ;;  %v7911_v58 = vpack.c.bf16 %v7871_v8, %v7870_v18  ;;  %v16480_v8 = vld [vmem:[%s16790_s10] ss:$0 sm:$0xff] }
 0x7b3   : > { %v7910_v0 = vpack.c.bf16 %v7869_v22, %v7868_v29 }
 0x7b5   : > { %9677 = vmatprep.mubr.msk.bf16.mxu1 %vm7959_vm1, %v7910_v0 }
 0x7b6   : > { %9678 = vmatmul.mubr.msk.bf16.gmra.mxu1 %vm7959_vm1, %v7911_v58 }
 0x7b8   : > { %v9611_v61 = vpop.f32.mrf.mxu1 }
 0x7b9   : > { %v7770_v20 = vadd.f32 %v9611_v61, %v16374_v47 }
 0x7ba   : > { %v7761_v31 = vpop.f32.mrf.mxu1 }
 0x7bb   : > { %v7762_v15 = vadd.f32 %v16374_v47, %v7761_v31  ;;  %v7874_v49 = vmax.f32 %v7770_v20, 0.0 }
 0x7bc   : > { %v9612_v41 = vpop.f32.mrf.mxu1 }
 0x7bd   : > { %v7773_v59 = vadd.f32 %v9612_v41, %v16374_v47  ;;  %v7872_v52 = vmax.f32 %v7762_v15, 0.0 }
 0x7be   : > { %v7764_v39 = vpop.f32.mrf.mxu1 }
 0x7bf   : > { %v7765_v37 = vadd.f32 %v16374_v47, %v7764_v39  ;;  %v7875_v55 = vmax.f32 %v7773_v59, 0.0 }
 0x7c1   : > { %v7873_v35 = vmax.f32 %v7765_v37, 0.0  ;;  %v7913_v23 = vpack.c.bf16 %v7875_v55, %v7874_v49 }
 0x7c3   : > { %v7912_v38 = vpack.c.bf16 %v7873_v35, %v7872_v52 }
 0x7c5   : > { %9681 = vmatprep.mubr.msk.bf16.mxu1 %vm7959_vm1, %v7912_v38 }
 0x7c6   : > { %9682 = vmatmul.mubr.msk.bf16.gmra.mxu1 %vm7959_vm1, %v7913_v23 }
 0x7c8   : > { %v9615_v32 = vpop.f32.mrf.mxu1 }
 0x7c9   : > { %v7786_v19 = vadd.f32 %v9615_v32, %v16374_v47 }
 0x7ca   : > { %v7777_v21 = vpop.f32.mrf.mxu1 }
 0x7cb   : > { %v7778_v46 = vadd.f32 %v16374_v47, %v7777_v21  ;;  %v7878_v13 = vmax.f32 %v7786_v19, 0.0 }
 0x7cc   : > { %v9616_v43 = vpop.f32.mrf.mxu1 }
 0x7cd   : > { %v7789_v17 = vadd.f32 %v9616_v43, %v16374_v47  ;;  %v7876_v53 = vmax.f32 %v7778_v46, 0.0 }
 0x7ce   : > { %v7780_v14 = vpop.f32.mrf.mxu1 }
 0x7cf   : > { %v7781_v9 = vadd.f32 %v16374_v47, %v7780_v14  ;;  %v7879_v60 = vmax.f32 %v7789_v17, 0.0 }
 0x7d1   : > { %v7877_v57 = vmax.f32 %v7781_v9, 0.0  ;;  %v7915_v11 = vpack.c.bf16 %v7879_v60, %v7878_v13 }
 0x7d3   : > { %v7914_v1 = vpack.c.bf16 %v7877_v57, %v7876_v53 }
 0x7d5   : > { %9685 = vmatprep.mubr.msk.bf16.mxu1 %vm7959_vm1, %v7914_v1 }
 0x7d6   : > { %9686 = vmatmul.mubr.msk.bf16.gmra.mxu1 %vm7959_vm1, %v7915_v11 }
 0x7d8   : > { %v9619_v50 = vpop.f32.mrf.mxu1 }
 0x7d9   : > { %v7802_v54 = vadd.f32 %v9619_v50, %v16374_v47 }
 0x7da   : > { %v7793_v45 = vpop.f32.mrf.mxu1 }
 0x7db   : > { %v7794_v7 = vadd.f32 %v16374_v47, %v7793_v45  ;;  %v7882_v34 = vmax.f32 %v7802_v54, 0.0 }
 0x7dc   : > { %v9620_v25 = vpop.f32.mrf.mxu1 }
 0x7dd   : > { %v7805_v51 = vadd.f32 %v9620_v25, %v16374_v47  ;;  %v7880_v6 = vmax.f32 %v7794_v7, 0.0 }
 0x7de   : > { %v7796_v33 = vpop.f32.mrf.mxu1 }
 0x7df   : > { %v7797_v63 = vadd.f32 %v16374_v47, %v7796_v33  ;;  %v7883_v12 = vmax.f32 %v7805_v51, 0.0 }
 0x7e1   : > { %v7881_v40 = vmax.f32 %v7797_v63, 0.0  ;;  %v7917_v3 = vpack.c.bf16 %v7883_v12, %v7882_v34 }
 0x7e3   : > { %v7916_v28 = vpack.c.bf16 %v7881_v40, %v7880_v6 }
 0x7e5   : > { %9689 = vmatprep.mubr.msk.bf16.mxu1 %vm7959_vm1, %v7916_v28 }
 0x7e6   : > { %9690 = vmatmul.mubr.msk.bf16.gmra.mxu1 %vm7959_vm1, %v7917_v3 }
 0x7e8   : > { %v9623_v62 = vpop.f32.mrf.mxu1 }
 0x7e9   : > { %v7818_v24 = vadd.f32 %v9623_v62, %v16374_v47 }
 0x7ea   : > { %v7809_v5 = vpop.f32.mrf.mxu1 }
 0x7eb   : > { %v7810_v16 = vadd.f32 %v16374_v47, %v7809_v5  ;;  %v7886_v56 = vmax.f32 %v7818_v24, 0.0 }
 0x7ec   : > { %v9624_v36 = vpop.f32.mrf.mxu1 }
 0x7ed   : > { %v7821_v30 = vadd.f32 %v9624_v36, %v16374_v47  ;;  %v7884_v26 = vmax.f32 %v7810_v16, 0.0 }
 0x7ee   : > { %v7812_v2 = vpop.f32.mrf.mxu1 }
 0x7ef   : > { %v7813_v48 = vadd.f32 %v16374_v47, %v7812_v2  ;;  %v7887_v42 = vmax.f32 %v7821_v30, 0.0 }
 0x7f0   : > { %v9635_v4 = vpop.f32.mrf.mxu1 }
 0x7f1   : > { %v7885_v27 = vmax.f32 %v7813_v48, 0.0  ;;  %v7919_v29 = vpack.c.bf16 %v7887_v42, %v7886_v56  ;;  %v8099_v47 = vadd.f32 %v9635_v4, %v16480_v8 }
 0x7f2   : > { %v8090_v10 = vpop.f32.mrf.mxu1 }
 0x7f3   : > { %v7918_v44 = vpack.c.bf16 %v7885_v27, %v7884_v26  ;;  %v8091_v18 = vadd.f32 %v16480_v8, %v8090_v10  ;;  %v8347_v20 = vmax.f32 %v8099_v47, 0.0 }
 0x7f4   : > { %v9636_v22 = vpop.f32.mrf.mxu1 }
 0x7f5   : > { %v8102_v0 = vadd.f32 %v9636_v22, %v16480_v8  ;;  %9693 = vmatprep.mubr.msk.bf16.mxu1 %vm7959_vm1, %v7918_v44  ;;  %v8345_v15 = vmax.f32 %v8091_v18, 0.0 }
 0x7f6   : > { %v8093_v58 = vpop.f32.mrf.mxu1  ;;  %9694 = vmatmul.mubr.msk.bf16.gmra.mxu1 %vm7959_vm1, %v7919_v29 }
 0x7f7   : > { %v8094_v61 = vadd.f32 %v16480_v8, %v8093_v58  ;;  %v8348_v31 = vmax.f32 %v8102_v0, 0.0 }
 0x7f8   : > { %v9639_v41 = vpop.f32.mrf.mxu1 }
 0x7f9   : > { %v8346_v59 = vmax.f32 %v8094_v61, 0.0  ;;  %v8410_v55 = vpack.c.bf16 %v8348_v31, %v8347_v20  ;;  %v8115_v38 = vadd.f32 %v9639_v41, %v16480_v8 }
 0x7fa   : > { %v8106_v39 = vpop.f32.mrf.mxu1 }
 0x7fb   : > { %v8409_v37 = vpack.c.bf16 %v8346_v59, %v8345_v15  ;;  %v8107_v35 = vadd.f32 %v16480_v8, %v8106_v39  ;;  %v8351_v19 = vmax.f32 %v8115_v38, 0.0 }
 0x7fc   : > { %v9640_v52 = vpop.f32.mrf.mxu1 }
 0x7fd   : > { %v8118_v49 = vadd.f32 %v9640_v52, %v16480_v8  ;;  %9701 = vmatprep.mubr.msk.bf16.mxu0 %vm8464_vm2, %v8409_v37  ;;  %v8349_v46 = vmax.f32 %v8107_v35, 0.0 }
 0x7fe   : > { %v8109_v23 = vpop.f32.mrf.mxu1  ;;  %9702 = vmatmul.mubr.msk.bf16.vlgmr.msra.gmra.mxu0 %vm8464_vm2, %v8410_v55 }
 0x7ff   : > { %v8110_v32 = vadd.f32 %v16480_v8, %v8109_v23  ;;  %v8352_v21 = vmax.f32 %v8118_v49, 0.0 }
 0x800   : > { %v9643_v43 = vpop.f32.mrf.mxu1 }
 0x801   : > { %v8350_v17 = vmax.f32 %v8110_v32, 0.0  ;;  %v8412_v60 = vpack.c.bf16 %v8352_v21, %v8351_v19  ;;  %v8131_v1 = vadd.f32 %v9643_v43, %v16480_v8 }
 0x802   : > { %v8122_v14 = vpop.f32.mrf.mxu1 }
 0x803   : > { %v8411_v9 = vpack.c.bf16 %v8350_v17, %v8349_v46  ;;  %v8123_v57 = vadd.f32 %v16480_v8, %v8122_v14  ;;  %v8355_v54 = vmax.f32 %v8131_v1, 0.0 }
 0x804   : > { %v9644_v53 = vpop.f32.mrf.mxu1 }
 0x805   : > { %v8134_v13 = vadd.f32 %v9644_v53, %v16480_v8  ;;  %9705 = vmatprep.mubr.msk.bf16.mxu0 %vm8464_vm2, %v8411_v9  ;;  %v8353_v7 = vmax.f32 %v8123_v57, 0.0 }
 0x806   : > { %v8125_v11 = vpop.f32.mrf.mxu1  ;;  %9706 = vmatmul.mubr.msk.bf16.gmra.mxu0 %vm8464_vm2, %v8412_v60 }
 0x807   : > { %v8126_v50 = vadd.f32 %v16480_v8, %v8125_v11  ;;  %v8356_v45 = vmax.f32 %v8134_v13, 0.0 }
 0x808   : > { %v9647_v25 = vpop.f32.mrf.mxu1 }
 0x809   : > { %v8354_v51 = vmax.f32 %v8126_v50, 0.0  ;;  %v8414_v12 = vpack.c.bf16 %v8356_v45, %v8355_v54  ;;  %v8147_v28 = vadd.f32 %v9647_v25, %v16480_v8 }
 0x80a   : > { %v8138_v33 = vpop.f32.mrf.mxu1 }
 0x80b   : > { %v8413_v63 = vpack.c.bf16 %v8354_v51, %v8353_v7  ;;  %v8139_v40 = vadd.f32 %v16480_v8, %v8138_v33  ;;  %v8359_v24 = vmax.f32 %v8147_v28, 0.0 }
 0x80c   : > { %v9648_v6 = vpop.f32.mrf.mxu1 }
 0x80d   : > { %v8150_v34 = vadd.f32 %v9648_v6, %v16480_v8  ;;  %9709 = vmatprep.mubr.msk.bf16.mxu0 %vm8464_vm2, %v8413_v63  ;;  %v8357_v16 = vmax.f32 %v8139_v40, 0.0 }
 0x80e   : > { %v8141_v3 = vpop.f32.mrf.mxu1  ;;  %9710 = vmatmul.mubr.msk.bf16.gmra.mxu0 %vm8464_vm2, %v8414_v12 }
 0x80f   : > { %v8142_v62 = vadd.f32 %v16480_v8, %v8141_v3  ;;  %v8360_v5 = vmax.f32 %v8150_v34, 0.0 }
 0x810   : > { %v9651_v36 = vpop.f32.mrf.mxu1 }
 0x811   : > { %v8358_v30 = vmax.f32 %v8142_v62, 0.0  ;;  %v8416_v42 = vpack.c.bf16 %v8360_v5, %v8359_v24  ;;  %v8163_v56 = vadd.f32 %v9651_v36, %v16480_v8 }
 0x812   : > { %v8154_v2 = vpop.f32.mrf.mxu1 }
 0x813   : > { %v8415_v48 = vpack.c.bf16 %v8358_v30, %v8357_v16  ;;  %v8155_v26 = vadd.f32 %v16480_v8, %v8154_v2  ;;  %v8363_v47 = vmax.f32 %v8163_v56, 0.0 }
 0x814   : > { %v9652_v4 = vpop.f32.mrf.mxu1 }
 0x815   : > { %v8166_v27 = vadd.f32 %v9652_v4, %v16480_v8  ;;  %9713 = vmatprep.mubr.msk.bf16.mxu0 %vm8464_vm2, %v8415_v48  ;;  %v8361_v18 = vmax.f32 %v8155_v26, 0.0 }
 0x816   : > { %v8157_v10 = vpop.f32.mrf.mxu1  ;;  %9714 = vmatmul.mubr.msk.bf16.gmra.mxu0 %vm8464_vm2, %v8416_v42 }
 0x817   : > { %v8158_v44 = vadd.f32 %v16480_v8, %v8157_v10  ;;  %v8364_v29 = vmax.f32 %v8166_v27, 0.0 }
 0x818   : > { %v9655_v22 = vpop.f32.mrf.mxu1 }
 0x819   : > { %v8362_v0 = vmax.f32 %v8158_v44, 0.0  ;;  %v8418_v31 = vpack.c.bf16 %v8364_v29, %v8363_v47  ;;  %v8179_v20 = vadd.f32 %v9655_v22, %v16480_v8 }
 0x81a   : > { %v8170_v58 = vpop.f32.mrf.mxu1 }
 0x81b   : > { %v8417_v61 = vpack.c.bf16 %v8362_v0, %v8361_v18  ;;  %v8171_v15 = vadd.f32 %v16480_v8, %v8170_v58  ;;  %v8367_v49 = vmax.f32 %v8179_v20, 0.0 }
 0x81c   : > { %v9656_v41 = vpop.f32.mrf.mxu1 }
 0x81d   : > { %v8182_v59 = vadd.f32 %v9656_v41, %v16480_v8  ;;  %9717 = vmatprep.mubr.msk.bf16.mxu0 %vm8464_vm2, %v8417_v61  ;;  %v8365_v52 = vmax.f32 %v8171_v15, 0.0 }
 0x81e   : > { %v8173_v39 = vpop.f32.mrf.mxu1  ;;  %9718 = vmatmul.mubr.msk.bf16.gmra.mxu0 %vm8464_vm2, %v8418_v31 }
 0x81f   : > { %v8174_v37 = vadd.f32 %v16480_v8, %v8173_v39  ;;  %v8368_v55 = vmax.f32 %v8182_v59, 0.0 }
 0x821   : > { %v8366_v35 = vmax.f32 %v8174_v37, 0.0  ;;  %v8420_v23 = vpack.c.bf16 %v8368_v55, %v8367_v49 }
 0x823   : > { %v8419_v38 = vpack.c.bf16 %v8366_v35, %v8365_v52 }
 0x825   : > { %9721 = vmatprep.mubr.msk.bf16.mxu0 %vm8464_vm2, %v8419_v38 }
 0x826   : > { %v9659_v32 = vpop.f32.mrf.mxu1  ;;  %9722 = vmatmul.mubr.msk.bf16.gmra.mxu0 %vm8464_vm2, %v8420_v23 }
 0x827   : > { %v8195_v19 = vadd.f32 %v9659_v32, %v16480_v8 }
 0x828   : > { %v8186_v21 = vpop.f32.mrf.mxu1 }
 0x829   : > { %v8187_v46 = vadd.f32 %v16480_v8, %v8186_v21  ;;  %v8371_v13 = vmax.f32 %v8195_v19, 0.0 }
 0x82a   : > { %v9660_v43 = vpop.f32.mrf.mxu1 }
 0x82b   : > { %v8198_v17 = vadd.f32 %v9660_v43, %v16480_v8  ;;  %v8369_v53 = vmax.f32 %v8187_v46, 0.0 }
 0x82c   : > { %v8189_v14 = vpop.f32.mrf.mxu1 }
 0x82d   : > { %v8190_v9 = vadd.f32 %v16480_v8, %v8189_v14  ;;  %v8372_v60 = vmax.f32 %v8198_v17, 0.0 }
 0x82f   : > { %v8370_v57 = vmax.f32 %v8190_v9, 0.0  ;;  %v8422_v11 = vpack.c.bf16 %v8372_v60, %v8371_v13 }
 0x831   : > { %v8421_v1 = vpack.c.bf16 %v8370_v57, %v8369_v53 }
 0x833   : > { %9725 = vmatprep.mubr.msk.bf16.mxu0 %vm8464_vm2, %v8421_v1 }
 0x834   : > { %9726 = vmatmul.mubr.msk.bf16.gmra.mxu0 %vm8464_vm2, %v8422_v11 }
 0x836   : > { %v9663_v50 = vpop.f32.mrf.mxu1 }
 0x837   : > { %v8211_v54 = vadd.f32 %v9663_v50, %v16480_v8 }
 0x838   : > { %v8202_v45 = vpop.f32.mrf.mxu1 }
 0x839   : > { %v8203_v7 = vadd.f32 %v16480_v8, %v8202_v45  ;;  %v8375_v34 = vmax.f32 %v8211_v54, 0.0 }
 0x83a   : > { %v9664_v25 = vpop.f32.mrf.mxu1 }
 0x83b   : > { %v8214_v51 = vadd.f32 %v9664_v25, %v16480_v8  ;;  %v8373_v6 = vmax.f32 %v8203_v7, 0.0 }
 0x83c   : > { %v8205_v33 = vpop.f32.mrf.mxu1 }
 0x83d   : > { %v8206_v63 = vadd.f32 %v16480_v8, %v8205_v33  ;;  %v8376_v12 = vmax.f32 %v8214_v51, 0.0 }
 0x83f   : > { %v8374_v40 = vmax.f32 %v8206_v63, 0.0  ;;  %v8424_v3 = vpack.c.bf16 %v8376_v12, %v8375_v34 }
 0x841   : > { %v8423_v28 = vpack.c.bf16 %v8374_v40, %v8373_v6 }
 0x843   : > { %9729 = vmatprep.mubr.msk.bf16.mxu0 %vm8464_vm2, %v8423_v28 }
 0x844   : > { %9730 = vmatmul.mubr.msk.bf16.gmra.mxu0 %vm8464_vm2, %v8424_v3 }
 0x846   : > { %v9667_v62 = vpop.f32.mrf.mxu1 }
 0x847   : > { %v8227_v24 = vadd.f32 %v9667_v62, %v16480_v8 }
 0x848   : > { %v8218_v5 = vpop.f32.mrf.mxu1 }
 0x849   : > { %v8219_v16 = vadd.f32 %v16480_v8, %v8218_v5  ;;  %v8379_v27 = vmax.f32 %v8227_v24, 0.0 }
 0x84a   : > { %v9668_v36 = vpop.f32.mrf.mxu1 }
 0x84b   : > { %v8230_v30 = vadd.f32 %v9668_v36, %v16480_v8  ;;  %v8377_v4 = vmax.f32 %v8219_v16, 0.0 }
 0x84c   : > { %v8221_v2 = vpop.f32.mrf.mxu1 }
 0x84d   : > { %v8222_v48 = vadd.f32 %v16480_v8, %v8221_v2  ;;  %v8380_v42 = vmax.f32 %v8230_v30, 0.0 }
 0x84f   : > { %v8378_v26 = vmax.f32 %v8222_v48, 0.0  ;;  %v8426_v10 = vpack.c.bf16 %v8380_v42, %v8379_v27 }
 0x851   : > { %v8425_v56 = vpack.c.bf16 %v8378_v26, %v8377_v4 }
 0x853   : > { %9733 = vmatprep.mubr.msk.bf16.mxu0 %vm8464_vm2, %v8425_v56 }
 0x854   : > { %9734 = vmatmul.mubr.msk.bf16.gmra.mxu0 %vm8464_vm2, %v8426_v10 }
 0x856   : > { %v9671_v44 = vpop.f32.mrf.mxu1 }
 0x857   : > { %v8243_v47 = vadd.f32 %v9671_v44, %v16480_v8 }
 0x858   : > { %v8234_v29 = vpop.f32.mrf.mxu1 }
 0x859   : > { %v8235_v18 = vadd.f32 %v16480_v8, %v8234_v29  ;;  %v8383_v59 = vmax.f32 %v8243_v47, 0.0 }
 0x85a   : > { %v9672_v22 = vpop.f32.mrf.mxu1 }
 0x85b   : > { %v8246_v0 = vadd.f32 %v9672_v22, %v16480_v8  ;;  %v8381_v41 = vmax.f32 %v8235_v18, 0.0 }
 0x85c   : > { %v8237_v58 = vpop.f32.mrf.mxu1 }
 0x85d   : > { %v8238_v61 = vadd.f32 %v16480_v8, %v8237_v58  ;;  %v8384_v31 = vmax.f32 %v8246_v0, 0.0 }
 0x85f   : > { %v8382_v15 = vmax.f32 %v8238_v61, 0.0  ;;  %v8428_v39 = vpack.c.bf16 %v8384_v31, %v8383_v59 }
 0x861   : > { %v8427_v20 = vpack.c.bf16 %v8382_v15, %v8381_v41 }
 0x863   : > { %9737 = vmatprep.mubr.msk.bf16.mxu0 %vm8464_vm2, %v8427_v20 }
 0x864   : > { %9738 = vmatmul.mubr.msk.bf16.gmra.mxu0 %vm8464_vm2, %v8428_v39 }
 0x866   : > { %v9675_v37 = vpop.f32.mrf.mxu1 }
 0x867   : > { %v8259_v38 = vadd.f32 %v9675_v37, %v16480_v8 }
 0x868   : > { %v8250_v55 = vpop.f32.mrf.mxu1 }
 0x869   : > { %v8251_v35 = vadd.f32 %v16480_v8, %v8250_v55  ;;  %v8387_v17 = vmax.f32 %v8259_v38, 0.0 }
 0x86a   : > { %v9676_v52 = vpop.f32.mrf.mxu1 }
 0x86b   : > { %v8262_v49 = vadd.f32 %v9676_v52, %v16480_v8  ;;  %v8385_v43 = vmax.f32 %v8251_v35, 0.0 }
 0x86c   : > { %v8253_v23 = vpop.f32.mrf.mxu1 }
 0x86d   : > { %v8254_v32 = vadd.f32 %v16480_v8, %v8253_v23  ;;  %v8388_v21 = vmax.f32 %v8262_v49, 0.0 }
 0x86f   : > { %v8386_v46 = vmax.f32 %v8254_v32, 0.0  ;;  %v8430_v14 = vpack.c.bf16 %v8388_v21, %v8387_v17 }
 0x871   : > { %v8429_v19 = vpack.c.bf16 %v8386_v46, %v8385_v43 }
 0x873   : > { %9741 = vmatprep.mubr.msk.bf16.mxu0 %vm8464_vm2, %v8429_v19 }
 0x874   : > { %9742 = vmatmul.mubr.msk.bf16.gmra.mxu0 %vm8464_vm2, %v8430_v14 }
 0x876   : > { %v9679_v9 = vpop.f32.mrf.mxu1 }
 0x877   : > { %v8275_v1 = vadd.f32 %v9679_v9, %v16480_v8  ;;  %v16583_v9 = vld [vmem:[%s16792_s12] ss:$0 sm:$0xff] }
 0x878   : > { %v8266_v60 = vpop.f32.mrf.mxu1 }
 0x879   : > { %v8267_v57 = vadd.f32 %v16480_v8, %v8266_v60  ;;  %v8391_v51 = vmax.f32 %v8275_v1, 0.0 }
 0x87a   : > { %v9680_v53 = vpop.f32.mrf.mxu1 }
 0x87b   : > { %v8278_v13 = vadd.f32 %v9680_v53, %v16480_v8  ;;  %v8389_v25 = vmax.f32 %v8267_v57, 0.0 }
 0x87c   : > { %v8269_v11 = vpop.f32.mrf.mxu1 }
 0x87d   : > { %v8270_v50 = vadd.f32 %v16480_v8, %v8269_v11  ;;  %v8392_v45 = vmax.f32 %v8278_v13, 0.0 }
 0x87f   : > { %v8390_v7 = vmax.f32 %v8270_v50, 0.0  ;;  %v8432_v33 = vpack.c.bf16 %v8392_v45, %v8391_v51 }
 0x881   : > { %v8431_v54 = vpack.c.bf16 %v8390_v7, %v8389_v25 }
 0x883   : > { %9745 = vmatprep.mubr.msk.bf16.mxu0 %vm8464_vm2, %v8431_v54 }
 0x884   : > { %9746 = vmatmul.mubr.msk.bf16.gmra.mxu0 %vm8464_vm2, %v8432_v33 }
 0x886   : > { %v9683_v63 = vpop.f32.mrf.mxu1 }
 0x887   : > { %v8291_v28 = vadd.f32 %v9683_v63, %v16480_v8 }
 0x888   : > { %v8282_v12 = vpop.f32.mrf.mxu1 }
 0x889   : > { %v8283_v40 = vadd.f32 %v16480_v8, %v8282_v12  ;;  %v8395_v30 = vmax.f32 %v8291_v28, 0.0 }
 0x88a   : > { %v9684_v6 = vpop.f32.mrf.mxu1 }
 0x88b   : > { %v8294_v34 = vadd.f32 %v9684_v6, %v16480_v8  ;;  %v8393_v36 = vmax.f32 %v8283_v40, 0.0 }
 0x88c   : > { %v8285_v3 = vpop.f32.mrf.mxu1 }
 0x88d   : > { %v8286_v62 = vadd.f32 %v16480_v8, %v8285_v3  ;;  %v8396_v5 = vmax.f32 %v8294_v34, 0.0 }
 0x88f   : > { %v8394_v16 = vmax.f32 %v8286_v62, 0.0  ;;  %v8434_v2 = vpack.c.bf16 %v8396_v5, %v8395_v30 }
 0x891   : > { %v8433_v24 = vpack.c.bf16 %v8394_v16, %v8393_v36 }
 0x893   : > { %9749 = vmatprep.mubr.msk.bf16.mxu0 %vm8464_vm2, %v8433_v24 }
 0x894   : > { %9750 = vmatmul.mubr.msk.bf16.gmra.mxu0 %vm8464_vm2, %v8434_v2 }
 0x896   : > { %v9687_v48 = vpop.f32.mrf.mxu1 }
 0x897   : > { %v8307_v56 = vadd.f32 %v9687_v48, %v16480_v8 }
 0x898   : > { %v8298_v42 = vpop.f32.mrf.mxu1 }
 0x899   : > { %v8299_v26 = vadd.f32 %v16480_v8, %v8298_v42  ;;  %v8399_v0 = vmax.f32 %v8307_v56, 0.0 }
 0x89a   : > { %v9688_v4 = vpop.f32.mrf.mxu1 }
 0x89b   : > { %v8310_v27 = vadd.f32 %v9688_v4, %v16480_v8  ;;  %v8397_v22 = vmax.f32 %v8299_v26, 0.0 }
 0x89c   : > { %v8301_v10 = vpop.f32.mrf.mxu1 }
 0x89d   : > { %v8302_v44 = vadd.f32 %v16480_v8, %v8301_v10  ;;  %v8400_v29 = vmax.f32 %v8310_v27, 0.0 }
 0x89f   : > { %v8398_v18 = vmax.f32 %v8302_v44, 0.0  ;;  %v8436_v58 = vpack.c.bf16 %v8400_v29, %v8399_v0 }
 0x8a1   : > { %v8435_v47 = vpack.c.bf16 %v8398_v18, %v8397_v22 }
 0x8a3   : > { %9753 = vmatprep.mubr.msk.bf16.mxu0 %vm8464_vm2, %v8435_v47 }
 0x8a4   : > { %9754 = vmatmul.mubr.msk.bf16.gmra.mxu0 %vm8464_vm2, %v8436_v58 }
 0x8a6   : > { %v9691_v61 = vpop.f32.mrf.mxu1 }
 0x8a7   : > { %v8323_v20 = vadd.f32 %v9691_v61, %v16480_v8 }
 0x8a8   : > { %v8314_v31 = vpop.f32.mrf.mxu1 }
 0x8a9   : > { %v8315_v15 = vadd.f32 %v16480_v8, %v8314_v31  ;;  %v8403_v49 = vmax.f32 %v8323_v20, 0.0 }
 0x8aa   : > { %v9692_v41 = vpop.f32.mrf.mxu1 }
 0x8ab   : > { %v8326_v59 = vadd.f32 %v9692_v41, %v16480_v8  ;;  %v8401_v52 = vmax.f32 %v8315_v15, 0.0 }
 0x8ac   : > { %v8317_v39 = vpop.f32.mrf.mxu1 }
 0x8ad   : > { %v8318_v37 = vadd.f32 %v16480_v8, %v8317_v39  ;;  %v8404_v55 = vmax.f32 %v8326_v59, 0.0 }
 0x8af   : > { %v8402_v35 = vmax.f32 %v8318_v37, 0.0  ;;  %v8438_v23 = vpack.c.bf16 %v8404_v55, %v8403_v49 }
 0x8b1   : > { %v8437_v38 = vpack.c.bf16 %v8402_v35, %v8401_v52 }
 0x8b3   : > { %9757 = vmatprep.mubr.msk.bf16.mxu0 %vm8464_vm2, %v8437_v38 }
 0x8b4   : > { %9758 = vmatmul.mubr.msk.bf16.gmra.mxu0 %vm8464_vm2, %v8438_v23 }
 0x8b6   : > { %v9695_v32 = vpop.f32.mrf.mxu1 }
 0x8b7   : > { %v8339_v19 = vadd.f32 %v9695_v32, %v16480_v8 }
 0x8b8   : > { %v8330_v21 = vpop.f32.mrf.mxu1 }
 0x8b9   : > { %v8331_v46 = vadd.f32 %v16480_v8, %v8330_v21  ;;  %v8407_v50 = vmax.f32 %v8339_v19, 0.0 }
 0x8ba   : > { %v9696_v43 = vpop.f32.mrf.mxu1 }
 0x8bb   : > { %v8342_v17 = vadd.f32 %v9696_v43, %v16480_v8  ;;  %v8405_v13 = vmax.f32 %v8331_v46, 0.0 }
 0x8bc   : > { %v8333_v14 = vpop.f32.mrf.mxu1 }
 0x8bd   : > { %v8334_v60 = vadd.f32 %v16480_v8, %v8333_v14  ;;  %v8408_v53 = vmax.f32 %v8342_v17, 0.0 }
 0x8be   : > { %v9703_v57 = vpop.f32.mrf.mxu0 }
 0x8bf   : > { %v8406_v1 = vmax.f32 %v8334_v60, 0.0  ;;  %v8604_v11 = vadd.f32 %v9703_v57, %v16583_v9  ;;  %v8440_v8 = vpack.c.bf16 %v8408_v53, %v8407_v50 }
 0x8c0   : > { %v8595_v45 = vpop.f32.mrf.mxu0 }
 0x8c1   : > { %v8439_v25 = vpack.c.bf16 %v8406_v1, %v8405_v13  ;;  %8852 = vst [vmem:[%s16587_s22 + $0x10] sm:$0xff] %v8604_v11  ;;  %v8596_v7 = vadd.f32 %v16583_v9, %v8595_v45 }
 0x8c2   : > { %v9704_v51 = vpop.f32.mrf.mxu0 }
 0x8c3   : > { %8850 = vst [vmem:[%s16587_s22] sm:$0xff] %v8596_v7  ;;  %v8607_v54 = vadd.f32 %v9704_v51, %v16583_v9  ;;  %9761 = vmatprep.mubr.msk.bf16.mxu0 %vm8464_vm2, %v8439_v25 }
 0x8c4   : > { %v8598_v33 = vpop.f32.mrf.mxu0  ;;  %9762 = vmatmul.mubr.msk.bf16.gmra.mxu0 %vm8464_vm2, %v8440_v8 }
 0x8c5   : > { %8853 = vst [vmem:[%s16587_s22 + $0x18] sm:$0xff] %v8607_v54  ;;  %v8599_v63 = vadd.f32 %v16583_v9, %v8598_v33 }
 0x8c6   : > { %v9707_v12 = vpop.f32.mrf.mxu0 }
 0x8c7   : > { %8851 = vst [vmem:[%s16587_s22 + $0x8] sm:$0xff] %v8599_v63  ;;  %v8620_v6 = vadd.f32 %v9707_v12, %v16583_v9 }
 0x8c8   : > { %v8611_v40 = vpop.f32.mrf.mxu0 }
 0x8c9   : > { %8856 = vst [vmem:[%s16587_s22 + $0x30] sm:$0xff] %v8620_v6  ;;  %v8612_v34 = vadd.f32 %v16583_v9, %v8611_v40 }
 0x8ca   : > { %v9708_v28 = vpop.f32.mrf.mxu0 }
 0x8cb   : > { %8854 = vst [vmem:[%s16587_s22 + $0x20] sm:$0xff] %v8612_v34  ;;  %v8623_v3 = vadd.f32 %v9708_v28, %v16583_v9 }
 0x8cc   : > { %v8614_v62 = vpop.f32.mrf.mxu0 }
 0x8cd   : > { %8857 = vst [vmem:[%s16587_s22 + $0x38] sm:$0xff] %v8623_v3  ;;  %v8615_v5 = vadd.f32 %v16583_v9, %v8614_v62 }
 0x8ce   : > { %v9711_v36 = vpop.f32.mrf.mxu0 }
 0x8cf   : > { %8855 = vst [vmem:[%s16587_s22 + $0x28] sm:$0xff] %v8615_v5  ;;  %v8636_v16 = vadd.f32 %v9711_v36, %v16583_v9 }
 0x8d0   : > { %v8627_v30 = vpop.f32.mrf.mxu0 }
 0x8d1   : > { %8860 = vst [vmem:[%s16587_s22 + $0x50] sm:$0xff] %v8636_v16  ;;  %v8628_v24 = vadd.f32 %v16583_v9, %v8627_v30 }
 0x8d2   : > { %v9712_v2 = vpop.f32.mrf.mxu0 }
 0x8d3   : > { %8858 = vst [vmem:[%s16587_s22 + $0x40] sm:$0xff] %v8628_v24  ;;  %v8639_v48 = vadd.f32 %v9712_v2, %v16583_v9 }
 0x8d4   : > { %v8630_v42 = vpop.f32.mrf.mxu0 }
 0x8d5   : > { %8861 = vst [vmem:[%s16587_s22 + $0x58] sm:$0xff] %v8639_v48  ;;  %v8631_v4 = vadd.f32 %v16583_v9, %v8630_v42 }
 0x8d6   : > { %v9715_v26 = vpop.f32.mrf.mxu0 }
 0x8d7   : > { %8859 = vst [vmem:[%s16587_s22 + $0x48] sm:$0xff] %v8631_v4  ;;  %v8652_v27 = vadd.f32 %v9715_v26, %v16583_v9 }
 0x8d8   : > { %v8643_v56 = vpop.f32.mrf.mxu0 }
 0x8d9   : > { %8864 = vst [vmem:[%s16587_s22 + $0x70] sm:$0xff] %v8652_v27  ;;  %v8644_v10 = vadd.f32 %v16583_v9, %v8643_v56 }
 0x8da   : > { %v9716_v44 = vpop.f32.mrf.mxu0 }
 0x8db   : > { %8862 = vst [vmem:[%s16587_s22 + $0x60] sm:$0xff] %v8644_v10  ;;  %v8655_v29 = vadd.f32 %v9716_v44, %v16583_v9 }
 0x8dc   : > { %v8646_v22 = vpop.f32.mrf.mxu0 }
 0x8dd   : > { %8865 = vst [vmem:[%s16587_s22 + $0x78] sm:$0xff] %v8655_v29  ;;  %v8647_v18 = vadd.f32 %v16583_v9, %v8646_v22 }
 0x8de   : > { %v9719_v0 = vpop.f32.mrf.mxu0 }
 0x8df   : > { %8863 = vst [vmem:[%s16587_s22 + $0x68] sm:$0xff] %v8647_v18  ;;  %v8668_v47 = vadd.f32 %v9719_v0, %v16583_v9 }
 0x8e0   : > { %v8659_v58 = vpop.f32.mrf.mxu0 }
 0x8e1   : > { %8868 = vst [vmem:[%s16587_s22 + $0x90] sm:$0xff] %v8668_v47  ;;  %v8660_v61 = vadd.f32 %v16583_v9, %v8659_v58 }
 0x8e2   : > { %v9720_v31 = vpop.f32.mrf.mxu0 }
 0x8e3   : > { %8866 = vst [vmem:[%s16587_s22 + $0x80] sm:$0xff] %v8660_v61  ;;  %v8671_v41 = vadd.f32 %v9720_v31, %v16583_v9 }
 0x8e4   : > { %v8662_v15 = vpop.f32.mrf.mxu0 }
 0x8e5   : > { %8869 = vst [vmem:[%s16587_s22 + $0x98] sm:$0xff] %v8671_v41  ;;  %v8663_v59 = vadd.f32 %v16583_v9, %v8662_v15 }
 0x8e6   : > { %v9723_v20 = vpop.f32.mrf.mxu0 }
 0x8e7   : > { %8867 = vst [vmem:[%s16587_s22 + $0x88] sm:$0xff] %v8663_v59  ;;  %v8684_v39 = vadd.f32 %v9723_v20, %v16583_v9 }
 0x8e8   : > { %v8675_v37 = vpop.f32.mrf.mxu0 }
 0x8e9   : > { %8872 = vst [vmem:[%s16587_s22 + $0xb0] sm:$0xff] %v8684_v39  ;;  %v8676_v55 = vadd.f32 %v16583_v9, %v8675_v37 }
 0x8ea   : > { %v9724_v52 = vpop.f32.mrf.mxu0 }
 0x8eb   : > { %8870 = vst [vmem:[%s16587_s22 + $0xa0] sm:$0xff] %v8676_v55  ;;  %v8687_v35 = vadd.f32 %v9724_v52, %v16583_v9 }
 0x8ec   : > { %v8678_v49 = vpop.f32.mrf.mxu0 }
 0x8ed   : > { %8873 = vst [vmem:[%s16587_s22 + $0xb8] sm:$0xff] %v8687_v35  ;;  %v8679_v38 = vadd.f32 %v16583_v9, %v8678_v49 }
 0x8ef   : > { %8871 = vst [vmem:[%s16587_s22 + $0xa8] sm:$0xff] %v8679_v38 }
 0x8f4   : > { %v9727_v23 = vpop.f32.mrf.mxu0 }
 0x8f5   : > { %v8700_v32 = vadd.f32 %v9727_v23, %v16583_v9 }
 0x8f6   : > { %v8691_v21 = vpop.f32.mrf.mxu0 }
 0x8f7   : > { %8876 = vst [vmem:[%s16587_s22 + $0xd0] sm:$0xff] %v8700_v32  ;;  %v8692_v43 = vadd.f32 %v16583_v9, %v8691_v21 }
 0x8f8   : > { %v9728_v46 = vpop.f32.mrf.mxu0 }
 0x8f9   : > { %8874 = vst [vmem:[%s16587_s22 + $0xc0] sm:$0xff] %v8692_v43  ;;  %v8703_v17 = vadd.f32 %v9728_v46, %v16583_v9 }
 0x8fa   : > { %v8694_v19 = vpop.f32.mrf.mxu0 }
 0x8fb   : > { %8877 = vst [vmem:[%s16587_s22 + $0xd8] sm:$0xff] %v8703_v17  ;;  %v8695_v14 = vadd.f32 %v16583_v9, %v8694_v19 }
 0x8fd   : > { %8875 = vst [vmem:[%s16587_s22 + $0xc8] sm:$0xff] %v8695_v14 }
 0x904   : > { %v9731_v60 = vpop.f32.mrf.mxu0 }
 0x905   : > { %v8716_v53 = vadd.f32 %v9731_v60, %v16583_v9 }
 0x906   : > { %v8707_v57 = vpop.f32.mrf.mxu0 }
 0x907   : > { %8880 = vst [vmem:[%s16587_s22 + $0xf0] sm:$0xff] %v8716_v53  ;;  %v8708_v13 = vadd.f32 %v16583_v9, %v8707_v57 }
 0x908   : > { %v9732_v1 = vpop.f32.mrf.mxu0 }
 0x909   : > { %8878 = vst [vmem:[%s16587_s22 + $0xe0] sm:$0xff] %v8708_v13  ;;  %v8719_v11 = vadd.f32 %v9732_v1, %v16583_v9 }
 0x90a   : > { %v8710_v50 = vpop.f32.mrf.mxu0 }
 0x90b   : > { %8881 = vst [vmem:[%s16587_s22 + $0xf8] sm:$0xff] %v8719_v11  ;;  %v8711_v45 = vadd.f32 %v16583_v9, %v8710_v50 }
 0x90d   : > { %8879 = vst [vmem:[%s16587_s22 + $0xe8] sm:$0xff] %v8711_v45 }
 0x914   : > { %v9735_v25 = vpop.f32.mrf.mxu0 }
 0x915   : > { %v8732_v7 = vadd.f32 %v9735_v25, %v16583_v9 }
 0x916   : > { %v8723_v8 = vpop.f32.mrf.mxu0 }
 0x917   : > { %8884 = vst [vmem:[%s16587_s22 + $0x110] sm:$0xff] %v8732_v7  ;;  %v8724_v51 = vadd.f32 %v16583_v9, %v8723_v8 }
 0x918   : > { %v9736_v54 = vpop.f32.mrf.mxu0 }
 0x919   : > { %8882 = vst [vmem:[%s16587_s22 + $0x100] sm:$0xff] %v8724_v51  ;;  %v8735_v33 = vadd.f32 %v9736_v54, %v16583_v9 }
 0x91a   : > { %v8726_v63 = vpop.f32.mrf.mxu0 }
 0x91b   : > { %8885 = vst [vmem:[%s16587_s22 + $0x118] sm:$0xff] %v8735_v33  ;;  %v8727_v12 = vadd.f32 %v16583_v9, %v8726_v63 }
 0x91d   : > { %8883 = vst [vmem:[%s16587_s22 + $0x108] sm:$0xff] %v8727_v12 }
 0x924   : > { %v9739_v6 = vpop.f32.mrf.mxu0 }
 0x925   : > { %v8748_v40 = vadd.f32 %v9739_v6, %v16583_v9 }
 0x926   : > { %v8739_v34 = vpop.f32.mrf.mxu0 }
 0x927   : > { %8888 = vst [vmem:[%s16587_s22 + $0x130] sm:$0xff] %v8748_v40  ;;  %v8740_v28 = vadd.f32 %v16583_v9, %v8739_v34 }
 0x928   : > { %v9740_v3 = vpop.f32.mrf.mxu0 }
 0x929   : > { %8886 = vst [vmem:[%s16587_s22 + $0x120] sm:$0xff] %v8740_v28  ;;  %v8751_v62 = vadd.f32 %v9740_v3, %v16583_v9 }
 0x92a   : > { %v8742_v5 = vpop.f32.mrf.mxu0 }
 0x92b   : > { %8889 = vst [vmem:[%s16587_s22 + $0x138] sm:$0xff] %v8751_v62  ;;  %v8743_v36 = vadd.f32 %v16583_v9, %v8742_v5 }
 0x92d   : > { %8887 = vst [vmem:[%s16587_s22 + $0x128] sm:$0xff] %v8743_v36 }
 0x934   : > { %v9743_v16 = vpop.f32.mrf.mxu0 }
 0x935   : > { %v8764_v30 = vadd.f32 %v9743_v16, %v16583_v9 }
 0x936   : > { %v8755_v24 = vpop.f32.mrf.mxu0 }
 0x937   : > { %8892 = vst [vmem:[%s16587_s22 + $0x150] sm:$0xff] %v8764_v30  ;;  %v8756_v2 = vadd.f32 %v16583_v9, %v8755_v24 }
 0x938   : > { %v9744_v48 = vpop.f32.mrf.mxu0 }
 0x939   : > { %8890 = vst [vmem:[%s16587_s22 + $0x140] sm:$0xff] %v8756_v2  ;;  %v8767_v42 = vadd.f32 %v9744_v48, %v16583_v9 }
 0x93a   : > { %v8758_v4 = vpop.f32.mrf.mxu0 }
 0x93b   : > { %8893 = vst [vmem:[%s16587_s22 + $0x158] sm:$0xff] %v8767_v42  ;;  %v8759_v26 = vadd.f32 %v16583_v9, %v8758_v4 }
 0x93d   : > { %8891 = vst [vmem:[%s16587_s22 + $0x148] sm:$0xff] %v8759_v26 }
 0x944   : > { %v9747_v27 = vpop.f32.mrf.mxu0 }
 0x945   : > { %v8780_v56 = vadd.f32 %v9747_v27, %v16583_v9 }
 0x946   : > { %v8771_v10 = vpop.f32.mrf.mxu0 }
 0x947   : > { %8896 = vst [vmem:[%s16587_s22 + $0x170] sm:$0xff] %v8780_v56  ;;  %v8772_v44 = vadd.f32 %v16583_v9, %v8771_v10 }
 0x948   : > { %v9748_v29 = vpop.f32.mrf.mxu0 }
 0x949   : > { %8894 = vst [vmem:[%s16587_s22 + $0x160] sm:$0xff] %v8772_v44  ;;  %v8783_v22 = vadd.f32 %v9748_v29, %v16583_v9 }
 0x94a   : > { %v8774_v18 = vpop.f32.mrf.mxu0 }
 0x94b   : > { %8897 = vst [vmem:[%s16587_s22 + $0x178] sm:$0xff] %v8783_v22  ;;  %v8775_v0 = vadd.f32 %v16583_v9, %v8774_v18 }
 0x94d   : > { %8895 = vst [vmem:[%s16587_s22 + $0x168] sm:$0xff] %v8775_v0 }
 0x954   : > { %v9751_v47 = vpop.f32.mrf.mxu0 }
 0x955   : > { %v8796_v58 = vadd.f32 %v9751_v47, %v16583_v9 }
 0x956   : > { %v8787_v61 = vpop.f32.mrf.mxu0 }
 0x957   : > { %8900 = vst [vmem:[%s16587_s22 + $0x190] sm:$0xff] %v8796_v58  ;;  %v8788_v31 = vadd.f32 %v16583_v9, %v8787_v61 }
 0x958   : > { %v9752_v41 = vpop.f32.mrf.mxu0 }
 0x959   : > { %8898 = vst [vmem:[%s16587_s22 + $0x180] sm:$0xff] %v8788_v31  ;;  %v8799_v15 = vadd.f32 %v9752_v41, %v16583_v9 }
 0x95a   : > { %v8790_v59 = vpop.f32.mrf.mxu0 }
 0x95b   : > { %8901 = vst [vmem:[%s16587_s22 + $0x198] sm:$0xff] %v8799_v15  ;;  %v8791_v20 = vadd.f32 %v16583_v9, %v8790_v59 }
 0x95d   : > { %8899 = vst [vmem:[%s16587_s22 + $0x188] sm:$0xff] %v8791_v20 }
 0x964   : > { %v9755_v39 = vpop.f32.mrf.mxu0 }
 0x965   : > { %v8812_v37 = vadd.f32 %v9755_v39, %v16583_v9 }
 0x966   : > { %v8803_v55 = vpop.f32.mrf.mxu0 }
 0x967   : > { %8904 = vst [vmem:[%s16587_s22 + $0x1b0] sm:$0xff] %v8812_v37  ;;  %v8804_v52 = vadd.f32 %v16583_v9, %v8803_v55 }
 0x968   : > { %v9756_v35 = vpop.f32.mrf.mxu0 }
 0x969   : > { %8902 = vst [vmem:[%s16587_s22 + $0x1a0] sm:$0xff] %v8804_v52  ;;  %v8815_v49 = vadd.f32 %v9756_v35, %v16583_v9 }
 0x96a   : > { %v8806_v38 = vpop.f32.mrf.mxu0 }
 0x96b   : > { %8905 = vst [vmem:[%s16587_s22 + $0x1b8] sm:$0xff] %v8815_v49  ;;  %v8807_v23 = vadd.f32 %v16583_v9, %v8806_v38 }
 0x96d   : > { %8903 = vst [vmem:[%s16587_s22 + $0x1a8] sm:$0xff] %v8807_v23 }
 0x974   : > { %v9759_v32 = vpop.f32.mrf.mxu0 }
 0x975   : > { %v8828_v21 = vadd.f32 %v9759_v32, %v16583_v9 }
 0x976   : > { %v8819_v43 = vpop.f32.mrf.mxu0 }
 0x977   : > { %8908 = vst [vmem:[%s16587_s22 + $0x1d0] sm:$0xff] %v8828_v21  ;;  %v8820_v46 = vadd.f32 %v16583_v9, %v8819_v43 }
 0x978   : > { %v9760_v17 = vpop.f32.mrf.mxu0 }
 0x979   : > { %8906 = vst [vmem:[%s16587_s22 + $0x1c0] sm:$0xff] %v8820_v46  ;;  %v8831_v19 = vadd.f32 %v9760_v17, %v16583_v9 }
 0x97a   : > { %v8822_v14 = vpop.f32.mrf.mxu0 }
 0x97b   : > { %8909 = vst [vmem:[%s16587_s22 + $0x1d8] sm:$0xff] %v8831_v19  ;;  %v8823_v60 = vadd.f32 %v16583_v9, %v8822_v14 }
 0x97d   : > { %8907 = vst [vmem:[%s16587_s22 + $0x1c8] sm:$0xff] %v8823_v60 }
 0x984   : > { %v9763_v53 = vpop.f32.mrf.mxu0 }
 0x985   : > { %v8844_v57 = vadd.f32 %v9763_v53, %v16583_v9 }
 0x986   : > { %v8835_v13 = vpop.f32.mrf.mxu0 }
 0x987   : > { %8912 = vst [vmem:[%s16587_s22 + $0x1f0] sm:$0xff] %v8844_v57  ;;  %v8836_v1 = vadd.f32 %v16583_v9, %v8835_v13 }
 0x988   : > { %v9764_v11 = vpop.f32.mrf.mxu0 }
 0x989   : > { %8910 = vst [vmem:[%s16587_s22 + $0x1e0] sm:$0xff] %v8836_v1  ;;  %v8847_v50 = vadd.f32 %v9764_v11, %v16583_v9  ;;  %8921 = sbr.rel (!%p10434_p5) target bundleno = 2473 (0x9a9), region = 76 }
 0x98a   : > { %v8838_v45 = vpop.f32.mrf.mxu0 }
 0x98b   : > { %8913 = vst [vmem:[%s16587_s22 + $0x1f8] sm:$0xff] %v8847_v50  ;;  %v8839_v25 = vadd.f32 %v16583_v9, %v8838_v45 }
 0x98d   : > { %8911 = vst [vmem:[%s16587_s22 + $0x1e8] sm:$0xff] %v8839_v25 }
 0x98e   : > { %s18508_s24 = smov (!%p8924_p11, %s8923_s24), 64 }
 0x98f   : > { %s16725_s30 = sshll.u32 %s18508_s24, 7 }
 0x990   : > { %s8928_s27 = ssub.s32 8192, %s16725_s30 }
 0x991   : > { %8929 = vsyncadd %s16720_s23, %s8928_s27  ;;  %p9428_p12 = scmp.ne.s32.totalorder %s16725_s30, 0  ;;  %s9434_s16 = sshll.u32 %s10417_s29, 13 }
 0x992   : > { %s16734_s14 = scalar_lea.hbm %s16793_s13, %s9434_s16  ;;  %s8934_s17 = sshll.u32 %s16587_s22, 4  ;;  %s16737_s17 = int_to_ptr.vmem [resolvable:$true] %s8934_s17 }
 0x993   : > { %s10260_s19 = scalar_lea.vmem %s16737_s17, %s16725_s30  ;;  %s10323_s20 = smov [#allocation2]  }
 0x994   : > { %p10261_p13 = scmp.ne.s32.totalorder %s16737_s17, %s10260_s19  ;;  %s10264_s21 = sshll.u32 %s10323_s20, 4  ;;  %s10265_s21 = int_to_ptr.vmem [resolvable:$false] %s10264_s21 }
 0x995   : > { %s10266_s29 = scalar_lea.vmem %s10265_s21, 16384  ;;  %p10267_p2 = scmp.lt.s32.totalorder %s16737_s17, %s10265_s21 }
 0x996   : > { %p10262_p0 = pnand %p10261_p13, %p9428_p12  ;;  %p10268_p3 = scmp.lt.s32.totalorder %s10266_s29, %s10260_s19 }
 0x998   : > { %p10263_p1 = pneg %p10262_p0  ;;  %p10269_p4 = por %p10268_p3, %p10267_p2 }
 0x99a   : > { %p10270_p5 = pnand %p10269_p4, %p10263_p1 }
 0x99c   : > { %10273 = shalt.err (!%p10270_p5)
}
 0x99d   : > { %s10274_s22 = scalar_lea.hbm %s16734_s14, %s16725_s30  ;;  %s10278_s16 = scalar_lea.hbm %s16793_s13, 9600 }
 0x99e   : > { %p10275_p7 = scmp.ne.s32.totalorder %s16734_s14, %s10274_s22  ;;  %p10279_p10 = scmp.lt.s32.totalorder %s16734_s14, %s16793_s13 }
 0x99f   : > { %p10280_p11 = scmp.lt.s32.totalorder %s10278_s16, %s10274_s22 }
 0x9a0   : > { %p10276_p8 = pnand %p10275_p7, %p9428_p12 }
 0x9a1   : > { %p10281_p13 = por %p10280_p11, %p10279_p10 }
 0x9a2   : > { %p10277_p9 = pneg %p10276_p8 }
 0x9a4   : > { %p10282_p0 = pnand %p10281_p13, %p10277_p9 }
 0x9a6   : > { %10285 = shalt.err (!%p10282_p0)
}
 0x9a7   : > { %s10324_s19 = smov 128   ;;  %s10325_s20 = smov 8  }
 0x9a8   : > { %8940 = dma.vmem_to_hbm [thread:$0]  (%p9428_p12), %s16737_s17, %s16725_s30, %s16734_s14, %s16720_s23, %s10324_s19, %s10324_s19, %s10325_s20  }
 0x9a9 PF: > { %p9803_p1 = scmp.ge.s32.totalorder %s10320_s28, 2  ;;  %s8949_s29 = sand.u32 1, %s10308_s25  }
 0x9aa   : > { %s8950_s22 = scalar_lea.sflag [#allocation3], %s8949_s29 }
 0x9ab   : > { %p9800_p2 = pnand %p9803_p1, %p10438_p6 }
 0x9ad   : > { %p9801_p3 = pneg %p9800_p2 }
 0x9af   : > { %10303 = dma.done.wait (%p9801_p3), %s8950_s22, 8192  }
 0x9b0   : > { %10305 = vsyncadd (%p9801_p3), %s8950_s22, 4294959104  ;;  %s18502_s28 = sld [smem:[#allocation6_spill]]  ;;  %s18505_s25 = smov %s10312_s26 }
 0x9b1   : > { %s18503_s24 = sld [smem:[#allocation5_spill]] }
 0x9b2   : > { %s18504_s27 = sld [smem:[#allocation7_spill]] }
 0x9b6   : > { %p23_p4 = scmp.ge.s32.totalorder %s18502_s28, 4  }
 0x9b7   : > { %s18506_s26 = smov %s18503_s24 }
 0x9b8   :  { %25 = sbr.rel (!%p23_p4) target bundleno = 3 (0x3), region = 107 }
 0x9bd   :  { %8955 = vsyncpa [#allocation3], 1 }
 0x9be   :  { %8957 = vsyncpa [#allocation3 + $0x1], 1 }

</bundles_post_ra>
